<compile_context>
chip_gen: v6e
topology: v6e:2x2x1
jax: 0.10.0
libtpu: 0.0.40
codegen_flags: <defaults>
</compile_context>

<pallas_src>
import functools

import jax
import jax.numpy as jnp
from jax.experimental import pallas as pl
from jax.experimental.pallas import tpu as pltpu


def _num_tensorcores() -> int:
    """2 on v7x (2 TensorCores/chip visible to a 'parallel' grid axis), else 1."""
    try:
        kind = jax.devices()[0].device_kind.lower()
    except Exception:  # pragma: no cover
        return 1
    return 2 if ("v7" in kind or "7x" in kind) else 1


def _default_tile_n(n_rows: int) -> int:
    n_tc = _num_tensorcores()
    tile = n_rows
    if n_tc > 1 and n_rows % (8 * n_tc) == 0:
        tile = n_rows // n_tc          # one even step per TensorCore (v7x)
    else:
        tile = n_rows                  # single grid step on 1-TC v5e / v6e
    # Keep very large batches pipelined HBM<->VMEM.
    while tile > 512 and tile % 2 == 0:
        tile //= 2
    return tile


def prepare_moe_adaptor_weights(w_gate, w_exp, b_exp, *, compute_dtype=jnp.bfloat16):
    """One-time weight preparation (hoisted out of the per-call hot path).

    Returns:
      w_slab    [D_in, E*D_out + GPAD]  compute_dtype — fused expert weights with
                                        the zero-padded gate columns appended.
      bias_proj [E, D_out]              f32           — bias_proj[e] = b_e @ W_e.
    """
    E, D_in, D_out = w_exp.shape
    assert w_gate.shape == (D_in, E)
    # Fuse expert weights: [E, D_in, D_out] -> [D_in, E*D_out].
    w_fused = jnp.transpose(w_exp, (1, 0, 2)).reshape(D_in, E * D_out)
    # Append gate columns, zero-padded to a full 128-lane tile.
    gpad = -(-E // 128) * 128
    wg_pad = jnp.pad(w_gate, ((0, 0), (0, gpad - E)))
    w_slab = jnp.concatenate([w_fused, wg_pad], axis=1).astype(compute_dtype)
    # Bias projection in f32: bias_proj[e] = b_e @ W_e.
    b_flat = b_exp.reshape(E, D_in).astype(jnp.float32)
    bias_proj = jnp.einsum("ed,edo->eo", b_flat, w_exp.astype(jnp.float32))
    return w_slab, bias_proj


def moe_adaptor_kernel(x_ref, slab_ref, bproj_ref, o_ref, *, n_exps, d_out, row_chunk):
    x = x_ref[...]                                            # [tn, D_in] compute dtype

    # One MXU push: all expert projections + gate logits (tail lane tile).
    fused = jnp.dot(x, slab_ref[...], preferred_element_type=jnp.float32)

    gcol = n_exps * d_out
    logits = fused[:, gcol:gcol + n_exps]                     # [tn, E] f32
    m = jnp.max(logits, axis=-1, keepdims=True)
    p = jnp.exp(logits - m)
    gates = p * pl.reciprocal(jnp.sum(p, axis=-1, keepdims=True), approx=True)

    bproj = bproj_ref[...]                                    # [E, d_out] f32
    tn = x.shape[0]
    # Chunked combine: keep the f32 accumulator vreg-resident across all E
    # experts + bias correction; store each output chunk exactly once.
    # Chunk boundaries are (8,128)-tile aligned (row_chunk % 8 == 0, d_out % 128 == 0).
    for r in range(0, tn, row_chunk):                         # static unroll
        g = gates[r:r + row_chunk]                            # [rc, E]
        acc = g[:, 0:1] * fused[r:r + row_chunk, 0:d_out]
        for e in range(1, n_exps):
            acc = acc + g[:, e:e + 1] * fused[r:r + row_chunk, e * d_out:(e + 1) * d_out]
        # bias correction: sum_e g_e * (b_e @ W_e) as one tiny [rc,E]@[E,d_out] matmul
        acc = acc - jnp.dot(g, bproj, preferred_element_type=jnp.float32)
        o_ref[r:r + row_chunk, :] = acc.astype(o_ref.dtype)


def moe_adaptor_forward(x, w_slab, bias_proj, *, n_exps, d_out, tile_n=None,
                        out_dtype=jnp.float32, single_buffer_weights=False):
    """x: [N, D_in]; w_slab/bias_proj from prepare_moe_adaptor_weights()."""
    N, D_in = x.shape
    E = n_exps
    slab_cols = w_slab.shape[1]
    gpad = slab_cols - E * d_out
    assert gpad >= E and gpad % 128 == 0, "gate columns must be 128-lane padded"
    assert d_out % 128 == 0, "D_out must be a multiple of 128 for lane-aligned slices"
    assert bias_proj.shape == (E, d_out)

    if tile_n is None:
        tile_n = _default_tile_n(N)
    tile_n = min(tile_n, N)
    assert N % tile_n == 0, "N must be a multiple of tile_n"
    assert tile_n % 8 == 0 or tile_n == N
    row_chunk = 64 if tile_n % 64 == 0 else tile_n

    x_c = x.astype(w_slab.dtype)

    weight_spec_kwargs = {}
    if single_buffer_weights:
        # Grid-invariant weights gain nothing from double buffering; halving
        # their VMEM footprint matters at production shapes on v7x (64 MiB VMEM).
        weight_spec_kwargs = dict(pipeline_mode=pl.Buffered(1))

    itm = jnp.dtype(w_slab.dtype).itemsize
    out_itm = jnp.dtype(out_dtype).itemsize
    cost = pl.CostEstimate(
        flops=2 * N * D_in * slab_cols + 4 * N * E * d_out,
        transcendentals=N * E + N,
        bytes_accessed=(N * D_in * itm + D_in * slab_cols * itm
                        + E * d_out * 4 + N * d_out * out_itm),
    )

    kernel = functools.partial(moe_adaptor_kernel, n_exps=E, d_out=d_out,
                               row_chunk=row_chunk)
    return pl.pallas_call(
        kernel,
        out_shape=jax.ShapeDtypeStruct((N, d_out), out_dtype),
        grid_spec=pltpu.PrefetchScalarGridSpec(
            num_scalar_prefetch=0,
            grid=(N // tile_n,),
            in_specs=[
                pl.BlockSpec((tile_n, D_in), lambda i: (i, 0)),              # x tile
                pl.BlockSpec((D_in, slab_cols), lambda i: (0, 0),            # fused weights + gate
                             **weight_spec_kwargs),
                pl.BlockSpec((E, d_out), lambda i: (0, 0),                   # bias_proj (f32)
                             **weight_spec_kwargs),
            ],
            out_specs=pl.BlockSpec((tile_n, d_out), lambda i: (i, 0)),
        ),
        compiler_params=pltpu.CompilerParams(
            dimension_semantics=("parallel",),
            vmem_limit_bytes=32 * 1024 * 1024,
        ),
        cost_estimate=cost,
    )(x_c, w_slab, bias_proj)


def moe_adaptor_reference(x, w_gate, w_exp, b_exp):
    gates = jax.nn.softmax(x @ w_gate, axis=-1)                 # [N, E]
    E = w_exp.shape[0]
    outs = [(x - b_exp[e].reshape(1, -1)) @ w_exp[e] for e in range(E)]
    expert_outputs = jnp.stack(outs, axis=-2)                   # [N, E, D_out]
    return jnp.sum(gates[..., None] * expert_outputs, axis=-2)


if __name__ == "__main__":
    # Shapes consistent with MoEAdaptorLayer(n_exps=4, layers=[D_in, D_out]).
    N, D_IN, D_OUT, E = 512, 128, 256, 4

    key = jax.random.PRNGKey(0)
    kx, kw, kg, kb = jax.random.split(key, 4)

    x = jax.random.normal(kx, (N, D_IN), dtype=jnp.float32)
    # lin.weight ~ N(0, 0.02), stored transposed as [E, D_in, D_out].
    w_exp = 0.02 * jax.random.normal(kw, (E, D_IN, D_OUT), dtype=jnp.float32)
    # Module inits w_gate / bias to zeros; random values here so gating and the
    # bias path are actually exercised by the correctness check.
    w_gate = 0.1 * jax.random.normal(kg, (D_IN, E), dtype=jnp.float32)
    b_exp = 0.05 * jax.random.normal(kb, (E, 1, D_IN), dtype=jnp.float32)

    y_ref = moe_adaptor_reference(x, w_gate, w_exp, b_exp)

    # --- f32 compute path: tight check of the fused-slab + bias_proj algebra.
    slab32, bproj = prepare_moe_adaptor_weights(w_gate, w_exp, b_exp,
                                                compute_dtype=jnp.float32)
    y_f32 = jax.block_until_ready(
        moe_adaptor_forward(x, slab32, bproj, n_exps=E, d_out=D_OUT))
    assert y_f32.shape == (N, D_OUT)
    assert jnp.allclose(y_f32, y_ref, atol=2e-3, rtol=2e-3)

    # --- default bf16-MXU path (f32 accumulation), weights prepped once.
    slab16, bproj16 = prepare_moe_adaptor_weights(w_gate, w_exp, b_exp)
    y_bf16 = jax.block_until_ready(
        moe_adaptor_forward(x, slab16, bproj16, n_exps=E, d_out=D_OUT))
    assert y_bf16.shape == (N, D_OUT)
    assert jnp.allclose(y_bf16, y_ref, atol=3e-2, rtol=3e-2)

    # --- bf16 output variant (halves the HBM writeback; biggest mem lever on v5e).
    y_bf16_out = jax.block_until_ready(
        moe_adaptor_forward(x, slab16, bproj16, n_exps=E, d_out=D_OUT,
                            out_dtype=jnp.bfloat16))
    assert y_bf16_out.dtype == jnp.bfloat16
    assert jnp.allclose(y_bf16_out.astype(jnp.float32), y_ref, atol=3e-2, rtol=3e-2)

    print("KERNEL_OK")
</pallas_src>

<mosaic_0001>
module attributes {stable_mosaic.version = 11 : i64} {
  func.func @moe_adaptor_kernel(%arg0: i32, %arg1: memref<512x128xf32, #tpu.memory_space<vmem>>, %arg2: memref<128x1152xf32, #tpu.memory_space<vmem>>, %arg3: memref<4x256xf32, #tpu.memory_space<vmem>>, %arg4: memref<512x256xf32, #tpu.memory_space<vmem>>) attributes {dimension_semantics = [#tpu.dimension_semantics<parallel>], iteration_bounds = array<i64: 1>, scalar_prefetch = 0 : i64, scratch_operands = 0 : i64, tpu.core_type = #tpu.core_type<tc>, window_params = [{transform_indices = @transform_0, window_bounds = array<i64: 512, 128>}, {pipeline_mode = #tpu.pipeline_mode<synchronous>, transform_indices = @transform_1, window_bounds = array<i64: 128, 1152>}, {pipeline_mode = #tpu.pipeline_mode<synchronous>, transform_indices = @transform_2, window_bounds = array<i64: 4, 256>}, {transform_indices = @transform_3, window_bounds = array<i64: 512, 256>}]} {
    %c0 = arith.constant 0 : index
    %c0_0 = arith.constant 0 : index
    %0 = vector.load %arg1[%c0, %c0_0] : memref<512x128xf32, #tpu.memory_space<vmem>>, vector<512x128xf32>
    %c0_1 = arith.constant 0 : index
    %c0_2 = arith.constant 0 : index
    %1 = vector.load %arg2[%c0_1, %c0_2] : memref<128x1152xf32, #tpu.memory_space<vmem>>, vector<128x1152xf32>
    %cst = arith.constant dense<0.000000e+00> : vector<512x1152xf32>
    %2 = tpu.matmul %0, %1, %cst {dimension_numbers = #tpu.dot_dimension_numbers<[1], [0], [0], [1], [0, 0, 1, 1], [], []>} : vector<512x128xf32>, vector<128x1152xf32>, vector<512x1152xf32> -> vector<512x1152xf32>
    %3 = vector.extract_strided_slice %2 {offsets = [0, 1024], sizes = [512, 4], strides = [1, 1]} : vector<512x1152xf32> to vector<512x4xf32>
    %cst_3 = arith.constant dense<0xFF800000> : vector<512xf32>
    %4 = vector.multi_reduction <maximumf>, %3, %cst_3 [1] : vector<512x4xf32> to vector<512xf32>
    %5 = vector.shape_cast %4 : vector<512xf32> to vector<512x1xf32>
    %6 = vector.broadcast %5 : vector<512x1xf32> to vector<512x4xf32>
    %7 = arith.subf %3, %6 : vector<512x4xf32>
    %8 = math.exp %7 : vector<512x4xf32>
    %cst_4 = arith.constant dense<0.000000e+00> : vector<512xf32>
    %9 = vector.multi_reduction <add>, %8, %cst_4 [1] : vector<512x4xf32> to vector<512xf32>
    %10 = vector.shape_cast %9 : vector<512xf32> to vector<512x1xf32>
    %11 = tpu.reciprocal %10 {approx = true} : vector<512x1xf32> -> vector<512x1xf32>
    %12 = vector.broadcast %11 : vector<512x1xf32> to vector<512x4xf32>
    %13 = arith.mulf %8, %12 : vector<512x4xf32>
    %c0_5 = arith.constant 0 : index
    %c0_6 = arith.constant 0 : index
    %14 = vector.load %arg3[%c0_5, %c0_6] : memref<4x256xf32, #tpu.memory_space<vmem>>, vector<4x256xf32>
    %15 = vector.extract_strided_slice %13 {offsets = [0, 0], sizes = [64, 4], strides = [1, 1]} : vector<512x4xf32> to vector<64x4xf32>
    %16 = vector.extract_strided_slice %15 {offsets = [0, 0], sizes = [64, 1], strides = [1, 1]} : vector<64x4xf32> to vector<64x1xf32>
    %17 = vector.extract_strided_slice %2 {offsets = [0, 0], sizes = [64, 256], strides = [1, 1]} : vector<512x1152xf32> to vector<64x256xf32>
    %18 = vector.broadcast %16 : vector<64x1xf32> to vector<64x256xf32>
    %19 = arith.mulf %18, %17 : vector<64x256xf32>
    %20 = vector.extract_strided_slice %15 {offsets = [0, 1], sizes = [64, 1], strides = [1, 1]} : vector<64x4xf32> to vector<64x1xf32>
    %21 = vector.extract_strided_slice %2 {offsets = [0, 256], sizes = [64, 256], strides = [1, 1]} : vector<512x1152xf32> to vector<64x256xf32>
    %22 = vector.broadcast %20 : vector<64x1xf32> to vector<64x256xf32>
    %23 = arith.mulf %22, %21 : vector<64x256xf32>
    %24 = arith.addf %19, %23 : vector<64x256xf32>
    %25 = vector.extract_strided_slice %15 {offsets = [0, 2], sizes = [64, 1], strides = [1, 1]} : vector<64x4xf32> to vector<64x1xf32>
    %26 = vector.extract_strided_slice %2 {offsets = [0, 512], sizes = [64, 256], strides = [1, 1]} : vector<512x1152xf32> to vector<64x256xf32>
    %27 = vector.broadcast %25 : vector<64x1xf32> to vector<64x256xf32>
    %28 = arith.mulf %27, %26 : vector<64x256xf32>
    %29 = arith.addf %24, %28 : vector<64x256xf32>
    %30 = vector.extract_strided_slice %15 {offsets = [0, 3], sizes = [64, 1], strides = [1, 1]} : vector<64x4xf32> to vector<64x1xf32>
    %31 = vector.extract_strided_slice %2 {offsets = [0, 768], sizes = [64, 256], strides = [1, 1]} : vector<512x1152xf32> to vector<64x256xf32>
    %32 = vector.broadcast %30 : vector<64x1xf32> to vector<64x256xf32>
    %33 = arith.mulf %32, %31 : vector<64x256xf32>
    %34 = arith.addf %29, %33 : vector<64x256xf32>
    %cst_7 = arith.constant dense<0.000000e+00> : vector<64x256xf32>
    %35 = tpu.matmul %15, %14, %cst_7 {dimension_numbers = #tpu.dot_dimension_numbers<[1], [0], [0], [1], [0, 0, 1, 1], [], []>} : vector<64x4xf32>, vector<4x256xf32>, vector<64x256xf32> -> vector<64x256xf32>
    %36 = arith.subf %34, %35 : vector<64x256xf32>
    %c0_8 = arith.constant 0 : index
    %c0_9 = arith.constant 0 : index
    %37 = vector.load %arg4[%c0_8, %c0_9] : memref<512x256xf32, #tpu.memory_space<vmem>>, vector<64x256xf32>
    tpu.vector_store %arg4[%c0_8, %c0_9], %36 {strides = array<i32>} : memref<512x256xf32, #tpu.memory_space<vmem>>, vector<64x256xf32>,
    %38 = vector.extract_strided_slice %13 {offsets = [64, 0], sizes = [64, 4], strides = [1, 1]} : vector<512x4xf32> to vector<64x4xf32>
    %39 = vector.extract_strided_slice %38 {offsets = [0, 0], sizes = [64, 1], strides = [1, 1]} : vector<64x4xf32> to vector<64x1xf32>
    %40 = vector.extract_strided_slice %2 {offsets = [64, 0], sizes = [64, 256], strides = [1, 1]} : vector<512x1152xf32> to vector<64x256xf32>
    %41 = vector.broadcast %39 : vector<64x1xf32> to vector<64x256xf32>
    %42 = arith.mulf %41, %40 : vector<64x256xf32>
    %43 = vector.extract_strided_slice %38 {offsets = [0, 1], sizes = [64, 1], strides = [1, 1]} : vector<64x4xf32> to vector<64x1xf32>
    %44 = vector.extract_strided_slice %2 {offsets = [64, 256], sizes = [64, 256], strides = [1, 1]} : vector<512x1152xf32> to vector<64x256xf32>
    %45 = vector.broadcast %43 : vector<64x1xf32> to vector<64x256xf32>
    %46 = arith.mulf %45, %44 : vector<64x256xf32>
    %47 = arith.addf %42, %46 : vector<64x256xf32>
    %48 = vector.extract_strided_slice %38 {offsets = [0, 2], sizes = [64, 1], strides = [1, 1]} : vector<64x4xf32> to vector<64x1xf32>
    %49 = vector.extract_strided_slice %2 {offsets = [64, 512], sizes = [64, 256], strides = [1, 1]} : vector<512x1152xf32> to vector<64x256xf32>
    %50 = vector.broadcast %48 : vector<64x1xf32> to vector<64x256xf32>
    %51 = arith.mulf %50, %49 : vector<64x256xf32>
    %52 = arith.addf %47, %51 : vector<64x256xf32>
    %53 = vector.extract_strided_slice %38 {offsets = [0, 3], sizes = [64, 1], strides = [1, 1]} : vector<64x4xf32> to vector<64x1xf32>
    %54 = vector.extract_strided_slice %2 {offsets = [64, 768], sizes = [64, 256], strides = [1, 1]} : vector<512x1152xf32> to vector<64x256xf32>
    %55 = vector.broadcast %53 : vector<64x1xf32> to vector<64x256xf32>
    %56 = arith.mulf %55, %54 : vector<64x256xf32>
    %57 = arith.addf %52, %56 : vector<64x256xf32>
    %cst_10 = arith.constant dense<0.000000e+00> : vector<64x256xf32>
    %58 = tpu.matmul %38, %14, %cst_10 {dimension_numbers = #tpu.dot_dimension_numbers<[1], [0], [0], [1], [0, 0, 1, 1], [], []>} : vector<64x4xf32>, vector<4x256xf32>, vector<64x256xf32> -> vector<64x256xf32>
    %59 = arith.subf %57, %58 : vector<64x256xf32>
    %c64 = arith.constant 64 : index
    %c0_11 = arith.constant 0 : index
    %60 = vector.load %arg4[%c64, %c0_11] : memref<512x256xf32, #tpu.memory_space<vmem>>, vector<64x256xf32>
    tpu.vector_store %arg4[%c64, %c0_11], %59 {strides = array<i32>} : memref<512x256xf32, #tpu.memory_space<vmem>>, vector<64x256xf32>,
    %61 = vector.extract_strided_slice %13 {offsets = [128, 0], sizes = [64, 4], strides = [1, 1]} : vector<512x4xf32> to vector<64x4xf32>
    %62 = vector.extract_strided_slice %61 {offsets = [0, 0], sizes = [64, 1], strides = [1, 1]} : vector<64x4xf32> to vector<64x1xf32>
    %63 = vector.extract_strided_slice %2 {offsets = [128, 0], sizes = [64, 256], strides = [1, 1]} : vector<512x1152xf32> to vector<64x256xf32>
    %64 = vector.broadcast %62 : vector<64x1xf32> to vector<64x256xf32>
    %65 = arith.mulf %64, %63 : vector<64x256xf32>
    %66 = vector.extract_strided_slice %61 {offsets = [0, 1], sizes = [64, 1], strides = [1, 1]} : vector<64x4xf32> to vector<64x1xf32>
    %67 = vector.extract_strided_slice %2 {offsets = [128, 256], sizes = [64, 256], strides = [1, 1]} : vector<512x1152xf32> to vector<64x256xf32>
    %68 = vector.broadcast %66 : vector<64x1xf32> to vector<64x256xf32>
    %69 = arith.mulf %68, %67 : vector<64x256xf32>
    %70 = arith.addf %65, %69 : vector<64x256xf32>
    %71 = vector.extract_strided_slice %61 {offsets = [0, 2], sizes = [64, 1], strides = [1, 1]} : vector<64x4xf32> to vector<64x1xf32>
    %72 = vector.extract_strided_slice %2 {offsets = [128, 512], sizes = [64, 256], strides = [1, 1]} : vector<512x1152xf32> to vector<64x256xf32>
    %73 = vector.broadcast %71 : vector<64x1xf32> to vector<64x256xf32>
    %74 = arith.mulf %73, %72 : vector<64x256xf32>
    %75 = arith.addf %70, %74 : vector<64x256xf32>
    %76 = vector.extract_strided_slice %61 {offsets = [0, 3], sizes = [64, 1], strides = [1, 1]} : vector<64x4xf32> to vector<64x1xf32>
    %77 = vector.extract_strided_slice %2 {offsets = [128, 768], sizes = [64, 256], strides = [1, 1]} : vector<512x1152xf32> to vector<64x256xf32>
    %78 = vector.broadcast %76 : vector<64x1xf32> to vector<64x256xf32>
    %79 = arith.mulf %78, %77 : vector<64x256xf32>
    %80 = arith.addf %75, %79 : vector<64x256xf32>
    %cst_12 = arith.constant dense<0.000000e+00> : vector<64x256xf32>
    %81 = tpu.matmul %61, %14, %cst_12 {dimension_numbers = #tpu.dot_dimension_numbers<[1], [0], [0], [1], [0, 0, 1, 1], [], []>} : vector<64x4xf32>, vector<4x256xf32>, vector<64x256xf32> -> vector<64x256xf32>
    %82 = arith.subf %80, %81 : vector<64x256xf32>
    %c128 = arith.constant 128 : index
    %c0_13 = arith.constant 0 : index
    %83 = vector.load %arg4[%c128, %c0_13] : memref<512x256xf32, #tpu.memory_space<vmem>>, vector<64x256xf32>
    tpu.vector_store %arg4[%c128, %c0_13], %82 {strides = array<i32>} : memref<512x256xf32, #tpu.memory_space<vmem>>, vector<64x256xf32>,
    %84 = vector.extract_strided_slice %13 {offsets = [192, 0], sizes = [64, 4], strides = [1, 1]} : vector<512x4xf32> to vector<64x4xf32>
    %85 = vector.extract_strided_slice %84 {offsets = [0, 0], sizes = [64, 1], strides = [1, 1]} : vector<64x4xf32> to vector<64x1xf32>
    %86 = vector.extract_strided_slice %2 {offsets = [192, 0], sizes = [64, 256], strides = [1, 1]} : vector<512x1152xf32> to vector<64x256xf32>
    %87 = vector.broadcast %85 : vector<64x1xf32> to vector<64x256xf32>
    %88 = arith.mulf %87, %86 : vector<64x256xf32>
    %89 = vector.extract_strided_slice %84 {offsets = [0, 1], sizes = [64, 1], strides = [1, 1]} : vector<64x4xf32> to vector<64x1xf32>
    %90 = vector.extract_strided_slice %2 {offsets = [192, 256], sizes = [64, 256], strides = [1, 1]} : vector<512x1152xf32> to vector<64x256xf32>
    %91 = vector.broadcast %89 : vector<64x1xf32> to vector<64x256xf32>
    %92 = arith.mulf %91, %90 : vector<64x256xf32>
    %93 = arith.addf %88, %92 : vector<64x256xf32>
    %94 = vector.extract_strided_slice %84 {offsets = [0, 2], sizes = [64, 1], strides = [1, 1]} : vector<64x4xf32> to vector<64x1xf32>
    %95 = vector.extract_strided_slice %2 {offsets = [192, 512], sizes = [64, 256], strides = [1, 1]} : vector<512x1152xf32> to vector<64x256xf32>
    %96 = vector.broadcast %94 : vector<64x1xf32> to vector<64x256xf32>
    %97 = arith.mulf %96, %95 : vector<64x256xf32>
    %98 = arith.addf %93, %97 : vector<64x256xf32>
    %99 = vector.extract_strided_slice %84 {offsets = [0, 3], sizes = [64, 1], strides = [1, 1]} : vector<64x4xf32> to vector<64x1xf32>
    %100 = vector.extract_strided_slice %2 {offsets = [192, 768], sizes = [64, 256], strides = [1, 1]} : vector<512x1152xf32> to vector<64x256xf32>
    %101 = vector.broadcast %99 : vector<64x1xf32> to vector<64x256xf32>
    %102 = arith.mulf %101, %100 : vector<64x256xf32>
    %103 = arith.addf %98, %102 : vector<64x256xf32>
    %cst_14 = arith.constant dense<0.000000e+00> : vector<64x256xf32>
    %104 = tpu.matmul %84, %14, %cst_14 {dimension_numbers = #tpu.dot_dimension_numbers<[1], [0], [0], [1], [0, 0, 1, 1], [], []>} : vector<64x4xf32>, vector<4x256xf32>, vector<64x256xf32> -> vector<64x256xf32>
    %105 = arith.subf %103, %104 : vector<64x256xf32>
    %c192 = arith.constant 192 : index
    %c0_15 = arith.constant 0 : index
    %106 = vector.load %arg4[%c192, %c0_15] : memref<512x256xf32, #tpu.memory_space<vmem>>, vector<64x256xf32>
    tpu.vector_store %arg4[%c192, %c0_15], %105 {strides = array<i32>} : memref<512x256xf32, #tpu.memory_space<vmem>>, vector<64x256xf32>,
    %107 = vector.extract_strided_slice %13 {offsets = [256, 0], sizes = [64, 4], strides = [1, 1]} : vector<512x4xf32> to vector<64x4xf32>
    %108 = vector.extract_strided_slice %107 {offsets = [0, 0], sizes = [64, 1], strides = [1, 1]} : vector<64x4xf32> to vector<64x1xf32>
    %109 = vector.extract_strided_slice %2 {offsets = [256, 0], sizes = [64, 256], strides = [1, 1]} : vector<512x1152xf32> to vector<64x256xf32>
    %110 = vector.broadcast %108 : vector<64x1xf32> to vector<64x256xf32>
    %111 = arith.mulf %110, %109 : vector<64x256xf32>
    %112 = vector.extract_strided_slice %107 {offsets = [0, 1], sizes = [64, 1], strides = [1, 1]} : vector<64x4xf32> to vector<64x1xf32>
    %113 = vector.extract_strided_slice %2 {offsets = [256, 256], sizes = [64, 256], strides = [1, 1]} : vector<512x1152xf32> to vector<64x256xf32>
    %114 = vector.broadcast %112 : vector<64x1xf32> to vector<64x256xf32>
    %115 = arith.mulf %114, %113 : vector<64x256xf32>
    %116 = arith.addf %111, %115 : vector<64x256xf32>
    %117 = vector.extract_strided_slice %107 {offsets = [0, 2], sizes = [64, 1], strides = [1, 1]} : vector<64x4xf32> to vector<64x1xf32>
    %118 = vector.extract_strided_slice %2 {offsets = [256, 512], sizes = [64, 256], strides = [1, 1]} : vector<512x1152xf32> to vector<64x256xf32>
    %119 = vector.broadcast %117 : vector<64x1xf32> to vector<64x256xf32>
    %120 = arith.mulf %119, %118 : vector<64x256xf32>
    %121 = arith.addf %116, %120 : vector<64x256xf32>
    %122 = vector.extract_strided_slice %107 {offsets = [0, 3], sizes = [64, 1], strides = [1, 1]} : vector<64x4xf32> to vector<64x1xf32>
    %123 = vector.extract_strided_slice %2 {offsets = [256, 768], sizes = [64, 256], strides = [1, 1]} : vector<512x1152xf32> to vector<64x256xf32>
    %124 = vector.broadcast %122 : vector<64x1xf32> to vector<64x256xf32>
    %125 = arith.mulf %124, %123 : vector<64x256xf32>
    %126 = arith.addf %121, %125 : vector<64x256xf32>
    %cst_16 = arith.constant dense<0.000000e+00> : vector<64x256xf32>
    %127 = tpu.matmul %107, %14, %cst_16 {dimension_numbers = #tpu.dot_dimension_numbers<[1], [0], [0], [1], [0, 0, 1, 1], [], []>} : vector<64x4xf32>, vector<4x256xf32>, vector<64x256xf32> -> vector<64x256xf32>
    %128 = arith.subf %126, %127 : vector<64x256xf32>
    %c256 = arith.constant 256 : index
    %c0_17 = arith.constant 0 : index
    %129 = vector.load %arg4[%c256, %c0_17] : memref<512x256xf32, #tpu.memory_space<vmem>>, vector<64x256xf32>
    tpu.vector_store %arg4[%c256, %c0_17], %128 {strides = array<i32>} : memref<512x256xf32, #tpu.memory_space<vmem>>, vector<64x256xf32>,
    %130 = vector.extract_strided_slice %13 {offsets = [320, 0], sizes = [64, 4], strides = [1, 1]} : vector<512x4xf32> to vector<64x4xf32>
    %131 = vector.extract_strided_slice %130 {offsets = [0, 0], sizes = [64, 1], strides = [1, 1]} : vector<64x4xf32> to vector<64x1xf32>
    %132 = vector.extract_strided_slice %2 {offsets = [320, 0], sizes = [64, 256], strides = [1, 1]} : vector<512x1152xf32> to vector<64x256xf32>
    %133 = vector.broadcast %131 : vector<64x1xf32> to vector<64x256xf32>
    %134 = arith.mulf %133, %132 : vector<64x256xf32>
    %135 = vector.extract_strided_slice %130 {offsets = [0, 1], sizes = [64, 1], strides = [1, 1]} : vector<64x4xf32> to vector<64x1xf32>
    %136 = vector.extract_strided_slice %2 {offsets = [320, 256], sizes = [64, 256], strides = [1, 1]} : vector<512x1152xf32> to vector<64x256xf32>
    %137 = vector.broadcast %135 : vector<64x1xf32> to vector<64x256xf32>
    %138 = arith.mulf %137, %136 : vector<64x256xf32>
    %139 = arith.addf %134, %138 : vector<64x256xf32>
    %140 = vector.extract_strided_slice %130 {offsets = [0, 2], sizes = [64, 1], strides = [1, 1]} : vector<64x4xf32> to vector<64x1xf32>
    %141 = vector.extract_strided_slice %2 {offsets = [320, 512], sizes = [64, 256], strides = [1, 1]} : vector<512x1152xf32> to vector<64x256xf32>
    %142 = vector.broadcast %140 : vector<64x1xf32> to vector<64x256xf32>
    %143 = arith.mulf %142, %141 : vector<64x256xf32>
    %144 = arith.addf %139, %143 : vector<64x256xf32>
    %145 = vector.extract_strided_slice %130 {offsets = [0, 3], sizes = [64, 1], strides = [1, 1]} : vector<64x4xf32> to vector<64x1xf32>
    %146 = vector.extract_strided_slice %2 {offsets = [320, 768], sizes = [64, 256], strides = [1, 1]} : vector<512x1152xf32> to vector<64x256xf32>
    %147 = vector.broadcast %145 : vector<64x1xf32> to vector<64x256xf32>
    %148 = arith.mulf %147, %146 : vector<64x256xf32>
    %149 = arith.addf %144, %148 : vector<64x256xf32>
    %cst_18 = arith.constant dense<0.000000e+00> : vector<64x256xf32>
    %150 = tpu.matmul %130, %14, %cst_18 {dimension_numbers = #tpu.dot_dimension_numbers<[1], [0], [0], [1], [0, 0, 1, 1], [], []>} : vector<64x4xf32>, vector<4x256xf32>, vector<64x256xf32> -> vector<64x256xf32>
    %151 = arith.subf %149, %150 : vector<64x256xf32>
    %c320 = arith.constant 320 : index
    %c0_19 = arith.constant 0 : index
    %152 = vector.load %arg4[%c320, %c0_19] : memref<512x256xf32, #tpu.memory_space<vmem>>, vector<64x256xf32>
    tpu.vector_store %arg4[%c320, %c0_19], %151 {strides = array<i32>} : memref<512x256xf32, #tpu.memory_space<vmem>>, vector<64x256xf32>,
    %153 = vector.extract_strided_slice %13 {offsets = [384, 0], sizes = [64, 4], strides = [1, 1]} : vector<512x4xf32> to vector<64x4xf32>
    %154 = vector.extract_strided_slice %153 {offsets = [0, 0], sizes = [64, 1], strides = [1, 1]} : vector<64x4xf32> to vector<64x1xf32>
    %155 = vector.extract_strided_slice %2 {offsets = [384, 0], sizes = [64, 256], strides = [1, 1]} : vector<512x1152xf32> to vector<64x256xf32>
    %156 = vector.broadcast %154 : vector<64x1xf32> to vector<64x256xf32>
    %157 = arith.mulf %156, %155 : vector<64x256xf32>
    %158 = vector.extract_strided_slice %153 {offsets = [0, 1], sizes = [64, 1], strides = [1, 1]} : vector<64x4xf32> to vector<64x1xf32>
    %159 = vector.extract_strided_slice %2 {offsets = [384, 256], sizes = [64, 256], strides = [1, 1]} : vector<512x1152xf32> to vector<64x256xf32>
    %160 = vector.broadcast %158 : vector<64x1xf32> to vector<64x256xf32>
    %161 = arith.mulf %160, %159 : vector<64x256xf32>
    %162 = arith.addf %157, %161 : vector<64x256xf32>
    %163 = vector.extract_strided_slice %153 {offsets = [0, 2], sizes = [64, 1], strides = [1, 1]} : vector<64x4xf32> to vector<64x1xf32>
    %164 = vector.extract_strided_slice %2 {offsets = [384, 512], sizes = [64, 256], strides = [1, 1]} : vector<512x1152xf32> to vector<64x256xf32>
    %165 = vector.broadcast %163 : vector<64x1xf32> to vector<64x256xf32>
    %166 = arith.mulf %165, %164 : vector<64x256xf32>
    %167 = arith.addf %162, %166 : vector<64x256xf32>
    %168 = vector.extract_strided_slice %153 {offsets = [0, 3], sizes = [64, 1], strides = [1, 1]} : vector<64x4xf32> to vector<64x1xf32>
    %169 = vector.extract_strided_slice %2 {offsets = [384, 768], sizes = [64, 256], strides = [1, 1]} : vector<512x1152xf32> to vector<64x256xf32>
    %170 = vector.broadcast %168 : vector<64x1xf32> to vector<64x256xf32>
    %171 = arith.mulf %170, %169 : vector<64x256xf32>
    %172 = arith.addf %167, %171 : vector<64x256xf32>
    %cst_20 = arith.constant dense<0.000000e+00> : vector<64x256xf32>
    %173 = tpu.matmul %153, %14, %cst_20 {dimension_numbers = #tpu.dot_dimension_numbers<[1], [0], [0], [1], [0, 0, 1, 1], [], []>} : vector<64x4xf32>, vector<4x256xf32>, vector<64x256xf32> -> vector<64x256xf32>
    %174 = arith.subf %172, %173 : vector<64x256xf32>
    %c384 = arith.constant 384 : index
    %c0_21 = arith.constant 0 : index
    %175 = vector.load %arg4[%c384, %c0_21] : memref<512x256xf32, #tpu.memory_space<vmem>>, vector<64x256xf32>
    tpu.vector_store %arg4[%c384, %c0_21], %174 {strides = array<i32>} : memref<512x256xf32, #tpu.memory_space<vmem>>, vector<64x256xf32>,
    %176 = vector.extract_strided_slice %13 {offsets = [448, 0], sizes = [64, 4], strides = [1, 1]} : vector<512x4xf32> to vector<64x4xf32>
    %177 = vector.extract_strided_slice %176 {offsets = [0, 0], sizes = [64, 1], strides = [1, 1]} : vector<64x4xf32> to vector<64x1xf32>
    %178 = vector.extract_strided_slice %2 {offsets = [448, 0], sizes = [64, 256], strides = [1, 1]} : vector<512x1152xf32> to vector<64x256xf32>
    %179 = vector.broadcast %177 : vector<64x1xf32> to vector<64x256xf32>
    %180 = arith.mulf %179, %178 : vector<64x256xf32>
    %181 = vector.extract_strided_slice %176 {offsets = [0, 1], sizes = [64, 1], strides = [1, 1]} : vector<64x4xf32> to vector<64x1xf32>
    %182 = vector.extract_strided_slice %2 {offsets = [448, 256], sizes = [64, 256], strides = [1, 1]} : vector<512x1152xf32> to vector<64x256xf32>
    %183 = vector.broadcast %181 : vector<64x1xf32> to vector<64x256xf32>
    %184 = arith.mulf %183, %182 : vector<64x256xf32>
    %185 = arith.addf %180, %184 : vector<64x256xf32>
    %186 = vector.extract_strided_slice %176 {offsets = [0, 2], sizes = [64, 1], strides = [1, 1]} : vector<64x4xf32> to vector<64x1xf32>
    %187 = vector.extract_strided_slice %2 {offsets = [448, 512], sizes = [64, 256], strides = [1, 1]} : vector<512x1152xf32> to vector<64x256xf32>
    %188 = vector.broadcast %186 : vector<64x1xf32> to vector<64x256xf32>
    %189 = arith.mulf %188, %187 : vector<64x256xf32>
    %190 = arith.addf %185, %189 : vector<64x256xf32>
    %191 = vector.extract_strided_slice %176 {offsets = [0, 3], sizes = [64, 1], strides = [1, 1]} : vector<64x4xf32> to vector<64x1xf32>
    %192 = vector.extract_strided_slice %2 {offsets = [448, 768], sizes = [64, 256], strides = [1, 1]} : vector<512x1152xf32> to vector<64x256xf32>
    %193 = vector.broadcast %191 : vector<64x1xf32> to vector<64x256xf32>
    %194 = arith.mulf %193, %192 : vector<64x256xf32>
    %195 = arith.addf %190, %194 : vector<64x256xf32>
    %cst_22 = arith.constant dense<0.000000e+00> : vector<64x256xf32>
    %196 = tpu.matmul %176, %14, %cst_22 {dimension_numbers = #tpu.dot_dimension_numbers<[1], [0], [0], [1], [0, 0, 1, 1], [], []>} : vector<64x4xf32>, vector<4x256xf32>, vector<64x256xf32> -> vector<64x256xf32>
    %197 = arith.subf %195, %196 : vector<64x256xf32>
    %c448 = arith.constant 448 : index
    %c0_23 = arith.constant 0 : index
    %198 = vector.load %arg4[%c448, %c0_23] : memref<512x256xf32, #tpu.memory_space<vmem>>, vector<64x256xf32>
    tpu.vector_store %arg4[%c448, %c0_23], %197 {strides = array<i32>} : memref<512x256xf32, #tpu.memory_space<vmem>>, vector<64x256xf32>,
    return
  }
  func.func @transform_0(%arg0: i32) -> (i32, i32) {
    %c0_i32 = arith.constant 0 : i32
    %c0_i32_0 = arith.constant 0 : i32
    return %arg0, %c0_i32 : i32, i32
  }
  func.func @transform_1(%arg0: i32) -> (i32, i32) {
    %c0_i32 = arith.constant 0 : i32
    %c0_i32_0 = arith.constant 0 : i32
    %c0_i32_1 = arith.constant 0 : i32
    return %c0_i32, %c0_i32_0 : i32, i32
  }
  func.func @transform_2(%arg0: i32) -> (i32, i32) {
    %c0_i32 = arith.constant 0 : i32
    %c0_i32_0 = arith.constant 0 : i32
    %c0_i32_1 = arith.constant 0 : i32
    return %c0_i32, %c0_i32_0 : i32, i32
  }
  func.func @transform_3(%arg0: i32) -> (i32, i32) {
    %c0_i32 = arith.constant 0 : i32
    %c0_i32_0 = arith.constant 0 : i32
    return %arg0, %c0_i32 : i32, i32
  }
}

</mosaic_0001>

<bundles_post_ra>
// kernel: tpu_custom_call.1
= control target key start
LH: loop header
LB: loop body
LE: loop exit
PB: predicated region body
PF: predicated region fallthrough
CT: control target
= control target key end

     0   :  { %8 = vsyncpa [#allocation3], 0  ;;  %s11620_s0 = inlined_call_operand.hbm [shape: f32[512,128], index: 0, kind: input, shape index: {}]   ;;  %s11621_s1 = inlined_call_operand.hbm [shape: f32[128,1152], index: 1, kind: input, shape index: {}]   ;;  %s11622_s2 = inlined_call_operand.hbm [shape: f32[4,256], index: 2, kind: input, shape index: {}]   ;;  %s11623_s3 = inlined_call_operand.hbm [shape: f32[512,256], index: 3, kind: output, shape index: {}]  }
   0x1   :  { %9 = vsyncpa [#allocation6], 0 }
   0x2   :  { %10 = vsyncpa [#allocation4], 0  ;;  %s7451_s12 = smov [#allocation5]  }
   0x3   :  { %s28_s13 = sshll.u32 %s7451_s12, 4  ;;  %s29_s13 = int_to_ptr.vmem [resolvable:$true] %s28_s13 }
   0x4   :  { %s7373_s14 = scalar_lea.vmem %s29_s13, 18432  ;;  %p7378_p1 = scmp.lt.s32.totalorder %s29_s13, %s29_s13 }
   0x5   :  { %p7374_p0 = scmp.ne.s32.totalorder %s29_s13, %s7373_s14  ;;  %p7379_p2 = scmp.lt.s32.totalorder %s7373_s14, %s7373_s14 }
   0x7   :  { %p7380_p3 = por %p7379_p2, %p7378_p1 }
   0x9   :  { %p7381_p4 = pnand %p7380_p3, %p7374_p0 }
   0xb   :  { %7384 = shalt.err (!%p7381_p4)
}
   0xc   :  { %s7452_s15 = smov 1152   ;;  %s7453_s16 = smov 72  }
   0xd   :  { %34 = dma.hbm_to_vmem [thread:$0]  %s11621_s1, 18432, %s29_s13, [#allocation6], %s7452_s15, %s7452_s15, %s7453_s16  }
   0xe   :  { %s7454_s19 = smov [#allocation2]  }
   0xf   :  { %s16_s20 = sshll.u32 %s7454_s19, 4  ;;  %s17_s20 = int_to_ptr.vmem [resolvable:$true] %s16_s20 }
  0x10   :  { %s7393_s21 = scalar_lea.vmem %s17_s20, 8192  ;;  %p7398_p6 = scmp.lt.s32.totalorder %s17_s20, %s17_s20 }
  0x11   :  { %p7394_p5 = scmp.ne.s32.totalorder %s17_s20, %s7393_s21  ;;  %p7399_p7 = scmp.lt.s32.totalorder %s7393_s21, %s7393_s21 }
  0x13   :  { %p7400_p8 = por %p7399_p7, %p7398_p6 }
  0x15   :  { %p7401_p9 = pnand %p7400_p8, %p7394_p5 }
  0x17   :  { %7404 = shalt.err (!%p7401_p9)
}
  0x18   :  { %s7455_s22 = smov 128   ;;  %s7456_s23 = smov 8  }
  0x19   :  { %22 = dma.hbm_to_vmem [thread:$0]  %s11620_s0, 8192, %s17_s20, [#allocation3], %s7455_s22, %s7455_s22, %s7456_s23  }
  0x1a   :  { %s7457_s26 = smov [#allocation7]  }
  0x1b   :  { %s41_s27 = sshll.u32 %s7457_s26, 4  ;;  %s42_s27 = int_to_ptr.vmem [resolvable:$true] %s41_s27 }
  0x1c   :  { %s7413_s1 = scalar_lea.vmem %s42_s27, 128  ;;  %p7418_p11 = scmp.lt.s32.totalorder %s42_s27, %s42_s27 }
  0x1d   :  { %p7414_p10 = scmp.ne.s32.totalorder %s42_s27, %s7413_s1  ;;  %p7419_p12 = scmp.lt.s32.totalorder %s7413_s1, %s7413_s1 }
  0x1f   :  { %p7420_p13 = por %p7419_p12, %p7418_p11 }
  0x21   :  { %p7421_p0 = pnand %p7420_p13, %p7414_p10 }
  0x23   :  { %7424 = shalt.err (!%p7421_p0)
}
  0x24   :  { %44 = dma.hbm_to_vmem [thread:$0]  %s11622_s2, 128, %s42_s27, [#allocation6]  }
  0x25   :  { %7445 = dma.done.wait [#allocation3], 8192  }
  0x26   :  { %7446 = vsyncadd [#allocation3], 4294959104 }
  0x27   :  { %7447 = dma.done.wait [#allocation6], 18560  }
  0x28   :  { %7448 = vsyncadd [#allocation6], 4294948736  ;;  %v11633_v0 = vmov 0.0   ;;  %v254_v1 = vld [vmem:[#allocation5 + $0x440] sm:$0xff]  ;;  %v253_v2 = vld [vmem:[#allocation5 + $0x438] sm:$0xff]  ;;  %vm2443_vm0 = vcmask 31744  }
  0x29   :  { %326 = vmatprep.mubr.f32.mxu0 %v11633_v0  ;;  %775 = vmatprep.mubr.f32.mxu1 %v11633_v0  ;;  %v245_v3 = vld [vmem:[#allocation5 + $0x3f8] sm:$0xff]  ;;  %v244_v4 = vld [vmem:[#allocation5 + $0x3f0] sm:$0xff]  ;;  %v235_v6 = vld [vmem:[#allocation5 + $0x3a8] sm:$0xff]  ;;  %vm3415_vm1 = vcmask 1043456   ;;  %s7463_s0 = smov [#allocation8]  }
  0x2a   :  { %262 = vmatprep.subr.mxu0 %v254_v1  ;;  %v236_v5 = vld [vmem:[#allocation5 + $0x3b0] sm:$0xff]  ;;  %v227_v7 = vld [vmem:[#allocation5 + $0x368] sm:$0xff]  ;;  %v226_v8 = vld [vmem:[#allocation5 + $0x360] sm:$0xff]  ;;  %s6433_s2 = sshll.u32 %s7463_s0, 4  ;;  %s6434_s2 = int_to_ptr.vmem [resolvable:$true] %s6433_s2 }
  0x2b   :  { %263 = vmatpush1.msra.mxu0 %v253_v2  ;;  %v218_v9 = vld [vmem:[#allocation5 + $0x320] sm:$0xff]  ;;  %v217_v10 = vld [vmem:[#allocation5 + $0x318] sm:$0xff]  ;;  %v208_v12 = vld [vmem:[#allocation5 + $0x2d0] sm:$0xff]  ;;  %s7425_s30 = scalar_lea.vmem %s6434_s2, 16384  ;;  %p7430_p2 = scmp.lt.s32.totalorder %s6434_s2, %s6434_s2 }
  0x2c   :  { %264 = vmatprep.subr.mxu0 %v245_v3  ;;  %v209_v11 = vld [vmem:[#allocation5 + $0x2d8] sm:$0xff]  ;;  %v200_v13 = vld [vmem:[#allocation5 + $0x290] sm:$0xff]  ;;  %v199_v14 = vld [vmem:[#allocation5 + $0x288] sm:$0xff]  ;;  %p7426_p1 = scmp.ne.s32.totalorder %s6434_s2, %s7425_s30  ;;  %p7431_p3 = scmp.lt.s32.totalorder %s7425_s30, %s7425_s30 }
  0x2d   :  { %265 = vmatpush1.msra.mxu0 %v244_v4  ;;  %v191_v15 = vld [vmem:[#allocation5 + $0x248] sm:$0xff]  ;;  %v190_v16 = vld [vmem:[#allocation5 + $0x240] sm:$0xff]  ;;  %v181_v18 = vld [vmem:[#allocation5 + $0x1f8] sm:$0xff] }
  0x2e   :  { %266 = vmatprep.subr.mxu0 %v236_v5  ;;  %v182_v17 = vld [vmem:[#allocation5 + $0x200] sm:$0xff]  ;;  %v173_v19 = vld [vmem:[#allocation5 + $0x1b8] sm:$0xff]  ;;  %v172_v20 = vld [vmem:[#allocation5 + $0x1b0] sm:$0xff]  ;;  %p7432_p4 = por %p7431_p3, %p7430_p2 }
  0x2f   :  { %267 = vmatpush1.msra.mxu0 %v235_v6  ;;  %v164_v21 = vld [vmem:[#allocation5 + $0x170] sm:$0xff]  ;;  %v163_v22 = vld [vmem:[#allocation5 + $0x168] sm:$0xff]  ;;  %v154_v24 = vld [vmem:[#allocation5 + $0x120] sm:$0xff] }
  0x30   :  { %268 = vmatprep.subr.mxu0 %v227_v7  ;;  %v155_v23 = vld [vmem:[#allocation5 + $0x128] sm:$0xff]  ;;  %v146_v25 = vld [vmem:[#allocation5 + $0xe0] sm:$0xff]  ;;  %v145_v26 = vld [vmem:[#allocation5 + $0xd8] sm:$0xff]  ;;  %p7433_p5 = pnand %p7432_p4, %p7426_p1 }
  0x31   :  { %269 = vmatpush1.msra.mxu0 %v226_v8  ;;  %v137_v27 = vld [vmem:[#allocation5 + $0x98] sm:$0xff]  ;;  %v136_v28 = vld [vmem:[#allocation5 + $0x90] sm:$0xff]  ;;  %v127_v30 = vld [vmem:[#allocation5 + $0x48] sm:$0xff] }
  0x32   :  { %270 = vmatprep.subr.mxu0 %v218_v9  ;;  %v128_v29 = vld [vmem:[#allocation5 + $0x50] sm:$0xff]  ;;  %v119_v31 = vld [vmem:[#allocation5 + $0x8] sm:$0xff]  ;;  %v118_v32 = vld [vmem:[#allocation5] sm:$0xff] }
  0x33   :  { %271 = vmatpush1.msra.mxu0 %v217_v10  ;;  %v7497_v33 = vld [vmem:[#allocation2] sm:$0xff]  ;;  %v257_v35 = vld [vmem:[#allocation5 + $0x458] sm:$0xff]  ;;  %v248_v37 = vld [vmem:[#allocation5 + $0x410] sm:$0xff] }
  0x34   :  { %272 = vmatprep.subr.mxu0 %v209_v11  ;;  %v258_v34 = vld [vmem:[#allocation5 + $0x460] sm:$0xff]  ;;  %v249_v36 = vld [vmem:[#allocation5 + $0x418] sm:$0xff]  ;;  %v7501_v38 = vld [vmem:[#allocation2 + $0x8] sm:$0xff] }
  0x35   :  { %273 = vmatpush1.msra.mxu0 %v208_v12  ;;  %v240_v39 = vld [vmem:[#allocation5 + $0x3d0] sm:$0xff]  ;;  %v239_v40 = vld [vmem:[#allocation5 + $0x3c8] sm:$0xff]  ;;  %v230_v42 = vld [vmem:[#allocation5 + $0x380] sm:$0xff] }
  0x36   :  { %274 = vmatprep.subr.mxu0 %v200_v13  ;;  %v231_v41 = vld [vmem:[#allocation5 + $0x388] sm:$0xff]  ;;  %v7505_v43 = vld [vmem:[#allocation2 + $0x10] sm:$0xff]  ;;  %v222_v44 = vld [vmem:[#allocation5 + $0x340] sm:$0xff] }
  0x37   :  { %275 = vmatpush1.msra.mxu0 %v199_v14  ;;  %v221_v45 = vld [vmem:[#allocation5 + $0x338] sm:$0xff]  ;;  %v212_v47 = vld [vmem:[#allocation5 + $0x2f0] sm:$0xff]  ;;  %v203_v50 = vld [vmem:[#allocation5 + $0x2a8] sm:$0xff] }
  0x38   :  { %276 = vmatprep.subr.mxu0 %v191_v15  ;;  %v213_v46 = vld [vmem:[#allocation5 + $0x2f8] sm:$0xff]  ;;  %v204_v49 = vld [vmem:[#allocation5 + $0x2b0] sm:$0xff]  ;;  %v195_v51 = vld [vmem:[#allocation5 + $0x268] sm:$0xff] }
  0x39   :  { %277 = vmatpush1.msra.mxu0 %v190_v16  ;;  %v7509_v48 = vld [vmem:[#allocation2 + $0x18] sm:$0xff]  ;;  %v194_v52 = vld [vmem:[#allocation5 + $0x260] sm:$0xff]  ;;  %v176_v57 = vld [vmem:[#allocation5 + $0x1d0] sm:$0xff] }
  0x3a   :  { %278 = vmatprep.subr.mxu0 %v182_v17  ;;  %v7513_v53 = vld [vmem:[#allocation2 + $0x20] sm:$0xff]  ;;  %v185_v55 = vld [vmem:[#allocation5 + $0x218] sm:$0xff]  ;;  %v7517_v58 = vld [vmem:[#allocation2 + $0x28] sm:$0xff] }
  0x3b   :  { %279 = vmatpush1.msra.mxu0 %v181_v18  ;;  %v186_v54 = vld [vmem:[#allocation5 + $0x220] sm:$0xff]  ;;  %v177_v56 = vld [vmem:[#allocation5 + $0x1d8] sm:$0xff]  ;;  %v7521_v59 = vld [vmem:[#allocation2 + $0x30] sm:$0xff] }
  0x3c   :  { %280 = vmatprep.subr.mxu0 %v173_v19  ;;  %v7525_v60 = vld [vmem:[#allocation2 + $0x38] sm:$0xff]  ;;  %v7529_v61 = vld [vmem:[#allocation2 + $0x40] sm:$0xff]  ;;  %v168_v62 = vld [vmem:[#allocation5 + $0x190] sm:$0xff] }
  0x3d   :  { %281 = vmatpush1.msra.mxu0 %v172_v20  ;;  %v167_v63 = vld [vmem:[#allocation5 + $0x188] sm:$0xff]  ;;  %v7537_v2 = vld [vmem:[#allocation2 + $0x50] sm:$0xff]  ;;  %v7541_v3 = vld [vmem:[#allocation2 + $0x58] sm:$0xff] }
  0x3e   :  { %282 = vmatprep.subr.mxu0 %v164_v21  ;;  %v7533_v1 = vld [vmem:[#allocation2 + $0x48] sm:$0xff]  ;;  %v7545_v4 = vld [vmem:[#allocation2 + $0x60] sm:$0xff]  ;;  %v7553_v8 = vld [vmem:[#allocation2 + $0x70] sm:$0xff] }
  0x3f   :  { %283 = vmatpush1.msra.mxu0 %v163_v22  ;;  %v159_v5 = vld [vmem:[#allocation5 + $0x148] sm:$0xff]  ;;  %v158_v6 = vld [vmem:[#allocation5 + $0x140] sm:$0xff]  ;;  %v7557_v9 = vld [vmem:[#allocation2 + $0x78] sm:$0xff] }
  0x40   :  { %284 = vmatprep.subr.mxu0 %v155_v23  ;;  %v7549_v7 = vld [vmem:[#allocation2 + $0x68] sm:$0xff]  ;;  %v7561_v10 = vld [vmem:[#allocation2 + $0x80] sm:$0xff]  ;;  %v149_v12 = vld [vmem:[#allocation5 + $0xf8] sm:$0xff] }
  0x41   :  { %285 = vmatpush1.msra.mxu0 %v154_v24  ;;  %v150_v11 = vld [vmem:[#allocation5 + $0x100] sm:$0xff]  ;;  %v7565_v13 = vld [vmem:[#allocation2 + $0x88] sm:$0xff]  ;;  %v7569_v14 = vld [vmem:[#allocation2 + $0x90] sm:$0xff] }
  0x42   :  { %286 = vmatprep.subr.mxu0 %v146_v25  ;;  %v7573_v15 = vld [vmem:[#allocation2 + $0x98] sm:$0xff]  ;;  %v7577_v16 = vld [vmem:[#allocation2 + $0xa0] sm:$0xff]  ;;  %v140_v18 = vld [vmem:[#allocation5 + $0xb0] sm:$0xff] }
  0x43   :  { %287 = vmatpush1.msra.mxu0 %v145_v26  ;;  %v141_v17 = vld [vmem:[#allocation5 + $0xb8] sm:$0xff]  ;;  %v7581_v19 = vld [vmem:[#allocation2 + $0xa8] sm:$0xff]  ;;  %v7585_v20 = vld [vmem:[#allocation2 + $0xb0] sm:$0xff] }
  0x44   :  { %288 = vmatprep.subr.mxu0 %v137_v27  ;;  %v7589_v21 = vld [vmem:[#allocation2 + $0xb8] sm:$0xff]  ;;  %v7593_v22 = vld [vmem:[#allocation2 + $0xc0] sm:$0xff]  ;;  %v132_v23 = vld [vmem:[#allocation5 + $0x70] sm:$0xff] }
  0x45   :  { %289 = vmatpush1.msra.mxu0 %v136_v28  ;;  %v131_v24 = vld [vmem:[#allocation5 + $0x68] sm:$0xff]  ;;  %v7601_v26 = vld [vmem:[#allocation2 + $0xd0] sm:$0xff]  ;;  %v7605_v27 = vld [vmem:[#allocation2 + $0xd8] sm:$0xff] }
  0x46   :  { %290 = vmatprep.subr.mxu0 %v128_v29  ;;  %v7597_v25 = vld [vmem:[#allocation2 + $0xc8] sm:$0xff]  ;;  %v7609_v28 = vld [vmem:[#allocation2 + $0xe0] sm:$0xff] }
  0x47   :  { %291 = vmatpush1.msra.mxu0 %v127_v30  ;;  %v123_v29 = vld [vmem:[#allocation5 + $0x28] sm:$0xff]  ;;  %v122_v30 = vld [vmem:[#allocation5 + $0x20] sm:$0xff] }
  0x48   :  { %292 = vmatprep.subr.mxu0 %v119_v31  ;;  %v7613_v31 = vld [vmem:[#allocation2 + $0xe8] sm:$0xff] }
  0x49   :  { %293 = vmatpush1.msra.mxu0 %v118_v32  ;;  %v7617_v32 = vld [vmem:[#allocation2 + $0xf0] sm:$0xff] }
  0x4a   :  { %327 = vmatmul.mubr.f32.vlgmr.msra.gmra.mxu0 %v7497_v33  ;;  %1160 = vmatprep.subr.mxu0 %v258_v34  ;;  %v7621_v34 = vld [vmem:[#allocation2 + $0xf8] sm:$0xff] }
  0x4b   :  { %1161 = vmatpush1.msra.mxu0 %v257_v35  ;;  %332 = vmatprep.mubr.f32.mxu0 %v11633_v0  ;;  %v7625_v35 = vld [vmem:[#allocation2 + $0x100] sm:$0xff] }
  0x4c   :  { %1162 = vmatprep.subr.mxu0 %v249_v36  ;;  %v7628_v36 = vld [vmem:[#allocation5 + $0x478] sm:$0xff] }
  0x4d   :  { %1163 = vmatpush1.msra.mxu0 %v248_v37  ;;  %v7631_v37 = vld [vmem:[#allocation2 + $0x108] sm:$0xff] }
  0x4e   :  { %333 = vmatmul.mubr.f32.gmra.mxu0 %v7501_v38  ;;  %1164 = vmatprep.subr.mxu0 %v240_v39  ;;  %v7636_v39 = vld [vmem:[#allocation2 + $0x110] sm:$0xff] }
  0x4f   :  { %338 = vmatprep.mubr.f32.mxu0 %v11633_v0  ;;  %1165 = vmatpush1.msra.mxu0 %v239_v40  ;;  %v7640_v40 = vld [vmem:[#allocation2 + $0x118] sm:$0xff] }
  0x50   :  { %1166 = vmatprep.subr.mxu0 %v231_v41  ;;  %v7644_v41 = vld [vmem:[#allocation2 + $0x120] sm:$0xff] }
  0x51   :  { %1167 = vmatpush1.msra.mxu0 %v230_v42  ;;  %v7648_v42 = vld [vmem:[#allocation2 + $0x128] sm:$0xff] }
  0x52   :  { %339 = vmatmul.mubr.f32.gmra.mxu0 %v7505_v43  ;;  %1168 = vmatprep.subr.mxu0 %v222_v44  ;;  %v7652_v44 = vld [vmem:[#allocation2 + $0x130] sm:$0xff] }
  0x53   :  { %344 = vmatprep.mubr.f32.mxu0 %v11633_v0  ;;  %1169 = vmatpush1.msra.mxu0 %v221_v45  ;;  %v7656_v45 = vld [vmem:[#allocation2 + $0x138] sm:$0xff] }
  0x54   :  { %1170 = vmatprep.subr.mxu0 %v213_v46  ;;  %v7660_v46 = vld [vmem:[#allocation2 + $0x140] sm:$0xff] }
  0x55   :  { %1171 = vmatpush1.msra.mxu0 %v212_v47  ;;  %v7664_v47 = vld [vmem:[#allocation2 + $0x148] sm:$0xff] }
  0x56   :  { %345 = vmatmul.mubr.f32.gmra.mxu0 %v7509_v48  ;;  %1172 = vmatprep.subr.mxu0 %v204_v49  ;;  %v7668_v49 = vld [vmem:[#allocation2 + $0x150] sm:$0xff] }
  0x57   :  { %350 = vmatprep.mubr.f32.mxu0 %v11633_v0  ;;  %1173 = vmatpush1.msra.mxu0 %v203_v50  ;;  %v7672_v50 = vld [vmem:[#allocation2 + $0x158] sm:$0xff] }
  0x58   :  { %1174 = vmatprep.subr.mxu0 %v195_v51  ;;  %v7676_v51 = vld [vmem:[#allocation2 + $0x160] sm:$0xff] }
  0x59   :  { %1175 = vmatpush1.msra.mxu0 %v194_v52  ;;  %v7680_v52 = vld [vmem:[#allocation2 + $0x168] sm:$0xff] }
  0x5a   :  { %351 = vmatmul.mubr.f32.gmra.mxu0 %v7513_v53  ;;  %1176 = vmatprep.subr.mxu0 %v186_v54  ;;  %v7684_v54 = vld [vmem:[#allocation2 + $0x170] sm:$0xff] }
  0x5b   :  { %356 = vmatprep.mubr.f32.mxu0 %v11633_v0  ;;  %1177 = vmatpush1.msra.mxu0 %v185_v55  ;;  %v7688_v55 = vld [vmem:[#allocation2 + $0x178] sm:$0xff] }
  0x5c   :  { %1178 = vmatprep.subr.mxu0 %v177_v56  ;;  %v7692_v56 = vld [vmem:[#allocation2 + $0x180] sm:$0xff] }
  0x5d   :  { %1179 = vmatpush1.msra.mxu0 %v176_v57 }
  0x5e   :  { %357 = vmatmul.mubr.f32.gmra.mxu0 %v7517_v58  ;;  %1180 = vmatprep.subr.mxu0 %v168_v62  ;;  %v7698_v62 = vld [vmem:[#allocation2 + $0x188] sm:$0xff] }
  0x5f   :  { %362 = vmatprep.mubr.f32.mxu0 %v11633_v0  ;;  %1181 = vmatpush1.msra.mxu0 %v167_v63 }
  0x60   :  { %1182 = vmatprep.subr.mxu0 %v159_v5 }
  0x61   :  { %1183 = vmatpush1.msra.mxu0 %v158_v6  ;;  %v7706_v6 = vld [vmem:[#allocation2 + $0x190] sm:$0xff] }
  0x62   :  { %363 = vmatmul.mubr.f32.gmra.mxu0 %v7521_v59  ;;  %1184 = vmatprep.subr.mxu0 %v150_v11 }
  0x63   :  { %368 = vmatprep.mubr.f32.mxu0 %v11633_v0  ;;  %1185 = vmatpush1.msra.mxu0 %v149_v12 }
  0x64   :  { %1186 = vmatprep.subr.mxu0 %v141_v17  ;;  %v7714_v17 = vld [vmem:[#allocation2 + $0x198] sm:$0xff] }
  0x65   :  { %1187 = vmatpush1.msra.mxu0 %v140_v18 }
  0x66   :  { %369 = vmatmul.mubr.f32.gmra.mxu0 %v7525_v60  ;;  %1188 = vmatprep.subr.mxu0 %v132_v23 }
  0x67   :  { %374 = vmatprep.mubr.f32.mxu0 %v11633_v0  ;;  %1189 = vmatpush1.msra.mxu0 %v131_v24  ;;  %v7722_v24 = vld [vmem:[#allocation2 + $0x1a0] sm:$0xff] }
  0x68   :  { %1190 = vmatprep.subr.mxu0 %v123_v29 }
  0x69   :  { %1191 = vmatpush1.msra.mxu0 %v122_v30 }
  0x6a   :  { %375 = vmatmul.mubr.f32.gmra.mxu0 %v7529_v61  ;;  %6606 = vmatprep.subr.mxu0 %v7628_v36 }
  0x6b   :  { %380 = vmatprep.mubr.f32.mxu0 %v11633_v0 }
  0x6e   :  { %381 = vmatmul.mubr.f32.gmra.mxu0 %v7533_v1 }
  0x6f   :  { %386 = vmatprep.mubr.f32.mxu0 %v11633_v0 }
  0x72   :  { %387 = vmatmul.mubr.f32.gmra.mxu0 %v7537_v2 }
  0x73   :  { %392 = vmatprep.mubr.f32.mxu0 %v11633_v0 }
  0x76   :  { %393 = vmatmul.mubr.f32.gmra.mxu0 %v7541_v3 }
  0x77   :  { %398 = vmatprep.mubr.f32.mxu0 %v11633_v0 }
  0x7a   :  { %399 = vmatmul.mubr.f32.gmra.mxu0 %v7545_v4 }
  0x7b   :  { %404 = vmatprep.mubr.f32.mxu0 %v11633_v0 }
  0x7e   :  { %405 = vmatmul.mubr.f32.gmra.mxu0 %v7549_v7 }
  0x7f   :  { %410 = vmatprep.mubr.f32.mxu0 %v11633_v0 }
  0x82   :  { %411 = vmatmul.mubr.f32.gmra.mxu0 %v7553_v8 }
  0x83   :  { %416 = vmatprep.mubr.f32.mxu0 %v11633_v0 }
  0x86   :  { %417 = vmatmul.mubr.f32.gmra.mxu0 %v7557_v9 }
  0x87   :  { %422 = vmatprep.mubr.f32.mxu0 %v11633_v0 }
  0x8a   :  { %423 = vmatmul.mubr.f32.gmra.mxu0 %v7561_v10 }
  0x8b   :  { %428 = vmatprep.mubr.f32.mxu0 %v11633_v0 }
  0x8e   :  { %429 = vmatmul.mubr.f32.gmra.mxu0 %v7565_v13 }
  0x8f   :  { %434 = vmatprep.mubr.f32.mxu0 %v11633_v0 }
  0x92   :  { %435 = vmatmul.mubr.f32.gmra.mxu0 %v7569_v14 }
  0x93   :  { %440 = vmatprep.mubr.f32.mxu0 %v11633_v0 }
  0x96   :  { %441 = vmatmul.mubr.f32.gmra.mxu0 %v7573_v15 }
  0x97   :  { %446 = vmatprep.mubr.f32.mxu0 %v11633_v0 }
  0x9a   :  { %447 = vmatmul.mubr.f32.gmra.mxu0 %v7577_v16 }
  0x9b   :  { %452 = vmatprep.mubr.f32.mxu0 %v11633_v0 }
  0x9e   :  { %453 = vmatmul.mubr.f32.gmra.mxu0 %v7581_v19 }
  0x9f   :  { %458 = vmatprep.mubr.f32.mxu0 %v11633_v0 }
  0xa2   :  { %459 = vmatmul.mubr.f32.gmra.mxu0 %v7585_v20 }
  0xa3   :  { %464 = vmatprep.mubr.f32.mxu0 %v11633_v0 }
  0xa6   :  { %465 = vmatmul.mubr.f32.gmra.mxu0 %v7589_v21 }
  0xa7   :  { %470 = vmatprep.mubr.f32.mxu0 %v11633_v0 }
  0xaa   :  { %471 = vmatmul.mubr.f32.gmra.mxu0 %v7593_v22 }
  0xab   :  { %476 = vmatprep.mubr.f32.mxu0 %v11633_v0 }
  0xae   :  { %477 = vmatmul.mubr.f32.gmra.mxu0 %v7597_v25 }
  0xaf   :  { %482 = vmatprep.mubr.f32.mxu0 %v11633_v0 }
  0xb2   :  { %483 = vmatmul.mubr.f32.gmra.mxu0 %v7601_v26 }
  0xb3   :  { %488 = vmatprep.mubr.f32.mxu0 %v11633_v0 }
  0xb6   :  { %489 = vmatmul.mubr.f32.gmra.mxu0 %v7605_v27 }
  0xb7   :  { %494 = vmatprep.mubr.f32.mxu0 %v11633_v0 }
  0xba   :  { %495 = vmatmul.mubr.f32.gmra.mxu0 %v7609_v28 }
  0xbb   :  { %500 = vmatprep.mubr.f32.mxu0 %v11633_v0 }
  0xbe   :  { %501 = vmatmul.mubr.f32.gmra.mxu0 %v7613_v31 }
  0xbf   :  { %506 = vmatprep.mubr.f32.mxu0 %v11633_v0 }
  0xc2   :  { %507 = vmatmul.mubr.f32.gmra.mxu0 %v7617_v32 }
  0xc3   :  { %512 = vmatprep.mubr.f32.mxu0 %v11633_v0 }
  0xc6   :  { %513 = vmatmul.mubr.f32.gmra.mxu0 %v7621_v34 }
  0xc7   :  { %518 = vmatprep.mubr.f32.mxu0 %v11633_v0 }
  0xca   :  { %519 = vmatmul.mubr.f32.gmra.mxu0 %v7625_v35 }
  0xcb   :  { %524 = vmatprep.mubr.f32.mxu0 %v11633_v0 }
  0xce   :  { %525 = vmatmul.mubr.f32.gmra.mxu0 %v7631_v37 }
  0xcf   :  { %530 = vmatprep.mubr.f32.mxu0 %v11633_v0 }
  0xd2   :  { %531 = vmatmul.mubr.f32.gmra.mxu0 %v7636_v39 }
  0xd3   :  { %536 = vmatprep.mubr.f32.mxu0 %v11633_v0 }
  0xd6   :  { %537 = vmatmul.mubr.f32.gmra.mxu0 %v7640_v40 }
  0xd7   :  { %542 = vmatprep.mubr.f32.mxu0 %v11633_v0 }
  0xda   :  { %543 = vmatmul.mubr.f32.gmra.mxu0 %v7644_v41 }
  0xdb   :  { %548 = vmatprep.mubr.f32.mxu0 %v11633_v0 }
  0xde   :  { %549 = vmatmul.mubr.f32.gmra.mxu0 %v7648_v42 }
  0xdf   :  { %554 = vmatprep.mubr.f32.mxu0 %v11633_v0 }
  0xe2   :  { %555 = vmatmul.mubr.f32.gmra.mxu0 %v7652_v44 }
  0xe3   :  { %560 = vmatprep.mubr.f32.mxu0 %v11633_v0 }
  0xe6   :  { %561 = vmatmul.mubr.f32.gmra.mxu0 %v7656_v45 }
  0xe7   :  { %566 = vmatprep.mubr.f32.mxu0 %v11633_v0 }
  0xea   :  { %567 = vmatmul.mubr.f32.gmra.mxu0 %v7660_v46 }
  0xeb   :  { %572 = vmatprep.mubr.f32.mxu0 %v11633_v0 }
  0xee   :  { %573 = vmatmul.mubr.f32.gmra.mxu0 %v7664_v47 }
  0xef   :  { %578 = vmatprep.mubr.f32.mxu0 %v11633_v0 }
  0xf2   :  { %579 = vmatmul.mubr.f32.gmra.mxu0 %v7668_v49 }
  0xf3   :  { %584 = vmatprep.mubr.f32.mxu0 %v11633_v0 }
  0xf6   :  { %585 = vmatmul.mubr.f32.gmra.mxu0 %v7672_v50 }
  0xf7   :  { %590 = vmatprep.mubr.f32.mxu0 %v11633_v0 }
  0xfa   :  { %591 = vmatmul.mubr.f32.gmra.mxu0 %v7676_v51 }
  0xfb   :  { %596 = vmatprep.mubr.f32.mxu0 %v11633_v0 }
  0xfe   :  { %597 = vmatmul.mubr.f32.gmra.mxu0 %v7680_v52 }
  0xff   :  { %602 = vmatprep.mubr.f32.mxu0 %v11633_v0 }
 0x102   :  { %603 = vmatmul.mubr.f32.gmra.mxu0 %v7684_v54 }
 0x103   :  { %608 = vmatprep.mubr.f32.mxu0 %v11633_v0 }
 0x106   :  { %609 = vmatmul.mubr.f32.gmra.mxu0 %v7688_v55 }
 0x107   :  { %614 = vmatprep.mubr.f32.mxu0 %v11633_v0 }
 0x10a   :  { %v7694_v57 = vpop.f32.mrf.mxu0  ;;  %615 = vmatmul.mubr.f32.gmra.mxu0 %v7692_v56 }
 0x10b   :  { %11740 = vst [vmem:[#allocation12_spill] sm:$0xff] %v7694_v57  ;;  %620 = vmatprep.mubr.f32.mxu0 %v11633_v0 }
 0x10c   :  { %v7700_v63 = vpop.f32.mrf.mxu0 }
 0x10d   :  { %11741 = vst [vmem:[#allocation13_spill] sm:$0xff] %v7700_v63 }
 0x10e   :  { %v7702_v5 = vpop.f32.mrf.mxu0  ;;  %621 = vmatmul.mubr.f32.gmra.mxu0 %v7698_v62 }
 0x10f   :  { %11742 = vst [vmem:[#allocation14_spill] sm:$0xff] %v7702_v5  ;;  %626 = vmatprep.mubr.f32.mxu0 %v11633_v0 }
 0x110   :  { %v7708_v11 = vpop.f32.mrf.mxu0 }
 0x111   :  { %11743 = vst [vmem:[#allocation15_spill] sm:$0xff] %v7708_v11 }
 0x112   :  { %v7710_v12 = vpop.f32.mrf.mxu0  ;;  %627 = vmatmul.mubr.f32.gmra.mxu0 %v7706_v6 }
 0x113   :  { %11744 = vst [vmem:[#allocation16_spill] sm:$0xff] %v7710_v12  ;;  %632 = vmatprep.mubr.f32.mxu0 %v11633_v0  ;;  %v7730_v12 = vld [vmem:[#allocation2 + $0x1a8] sm:$0xff] }
 0x114   :  { %v7716_v18 = vpop.f32.mrf.mxu0 }
 0x115   :  { %11745 = vst [vmem:[#allocation17_spill] sm:$0xff] %v7716_v18 }
 0x116   :  { %v7718_v23 = vpop.f32.mrf.mxu0  ;;  %633 = vmatmul.mubr.f32.gmra.mxu0 %v7714_v17 }
 0x117   :  { %11746 = vst [vmem:[#allocation18_spill] sm:$0xff] %v7718_v23  ;;  %638 = vmatprep.mubr.f32.mxu0 %v11633_v0  ;;  %v7738_v23 = vld [vmem:[#allocation2 + $0x1b0] sm:$0xff] }
 0x118   :  { %v7724_v29 = vpop.f32.mrf.mxu0  ;;  %11751 = vst [vmem:[#allocation23_spill] sm:$0xff] %v7738_v23 }
 0x119   :  { %11747 = vst [vmem:[#allocation19_spill] sm:$0xff] %v7724_v29 }
 0x11a   :  { %v7726_v30 = vpop.f32.mrf.mxu0  ;;  %639 = vmatmul.mubr.f32.gmra.mxu0 %v7722_v24 }
 0x11b   :  { %11748 = vst [vmem:[#allocation20_spill] sm:$0xff] %v7726_v30  ;;  %644 = vmatprep.mubr.f32.mxu0 %v11633_v0  ;;  %v7746_v30 = vld [vmem:[#allocation2 + $0x1b8] sm:$0xff] }
 0x11c   :  { %v7732_v63 = vpop.f32.mrf.mxu0  ;;  %11754 = vst [vmem:[#allocation26_spill] sm:$0xff] %v7746_v30 }
 0x11d   :  { %11749 = vst [vmem:[#allocation21_spill] sm:$0xff] %v7732_v63 }
 0x11e   :  { %v7734_v18 = vpop.f32.mrf.mxu0  ;;  %645 = vmatmul.mubr.f32.gmra.mxu0 %v7730_v12 }
 0x11f   :  { %11750 = vst [vmem:[#allocation22_spill] sm:$0xff] %v7734_v18  ;;  %650 = vmatprep.mubr.f32.mxu0 %v11633_v0  ;;  %v7754_v18 = vld [vmem:[#allocation2 + $0x1c0] sm:$0xff] }
 0x120   :  { %v7740_v57 = vpop.f32.mrf.mxu0  ;;  %11757 = vst [vmem:[#allocation29_spill] sm:$0xff] %v7754_v18 }
 0x121   :  { %11752 = vst [vmem:[#allocation24_spill] sm:$0xff] %v7740_v57 }
 0x122   :  { %v7742_v29 = vpop.f32.mrf.mxu0  ;;  %651 = vmatmul.mubr.f32.gmra.mxu0 %v7738_v23 }
 0x123   :  { %11753 = vst [vmem:[#allocation25_spill] sm:$0xff] %v7742_v29  ;;  %656 = vmatprep.mubr.f32.mxu0 %v11633_v0  ;;  %v7762_v29 = vld [vmem:[#allocation2 + $0x1c8] sm:$0xff] }
 0x124   :  { %v7748_v11 = vpop.f32.mrf.mxu0  ;;  %11760 = vst [vmem:[#allocation32_spill] sm:$0xff] %v7762_v29 }
 0x125   :  { %11755 = vst [vmem:[#allocation27_spill] sm:$0xff] %v7748_v11 }
 0x126   :  { %v7750_v63 = vpop.f32.mrf.mxu0  ;;  %657 = vmatmul.mubr.f32.gmra.mxu0 %v7746_v30 }
 0x127   :  { %11756 = vst [vmem:[#allocation28_spill] sm:$0xff] %v7750_v63  ;;  %662 = vmatprep.mubr.f32.mxu0 %v11633_v0  ;;  %v7770_v63 = vld [vmem:[#allocation2 + $0x1d0] sm:$0xff] }
 0x128   :  { %v7756_v5 = vpop.f32.mrf.mxu0  ;;  %11763 = vst [vmem:[#allocation35_spill] sm:$0xff] %v7770_v63 }
 0x129   :  { %11758 = vst [vmem:[#allocation30_spill] sm:$0xff] %v7756_v5 }
 0x12a   :  { %v7758_v57 = vpop.f32.mrf.mxu0  ;;  %663 = vmatmul.mubr.f32.gmra.mxu0 %v7754_v18 }
 0x12b   :  { %11759 = vst [vmem:[#allocation31_spill] sm:$0xff] %v7758_v57  ;;  %668 = vmatprep.mubr.f32.mxu0 %v11633_v0  ;;  %v7778_v57 = vld [vmem:[#allocation2 + $0x1d8] sm:$0xff] }
 0x12c   :  { %v7764_v23 = vpop.f32.mrf.mxu0  ;;  %11766 = vst [vmem:[#allocation38_spill] sm:$0xff] %v7778_v57 }
 0x12d   :  { %11761 = vst [vmem:[#allocation33_spill] sm:$0xff] %v7764_v23 }
 0x12e   :  { %v7766_v11 = vpop.f32.mrf.mxu0  ;;  %669 = vmatmul.mubr.f32.gmra.mxu0 %v7762_v29 }
 0x12f   :  { %11762 = vst [vmem:[#allocation34_spill] sm:$0xff] %v7766_v11  ;;  %674 = vmatprep.mubr.f32.mxu0 %v11633_v0  ;;  %v7786_v11 = vld [vmem:[#allocation2 + $0x1e0] sm:$0xff] }
 0x130   :  { %v7772_v30 = vpop.f32.mrf.mxu0  ;;  %11769 = vst [vmem:[#allocation41_spill] sm:$0xff] %v7786_v11 }
 0x131   :  { %11764 = vst [vmem:[#allocation36_spill] sm:$0xff] %v7772_v30 }
 0x132   :  { %v7774_v5 = vpop.f32.mrf.mxu0  ;;  %675 = vmatmul.mubr.f32.gmra.mxu0 %v7770_v63 }
 0x133   :  { %11765 = vst [vmem:[#allocation37_spill] sm:$0xff] %v7774_v5  ;;  %680 = vmatprep.mubr.f32.mxu0 %v11633_v0  ;;  %v7794_v5 = vld [vmem:[#allocation2 + $0x1e8] sm:$0xff] }
 0x134   :  { %v7780_v18 = vpop.f32.mrf.mxu0  ;;  %11772 = vst [vmem:[#allocation44_spill] sm:$0xff] %v7794_v5 }
 0x135   :  { %11767 = vst [vmem:[#allocation39_spill] sm:$0xff] %v7780_v18 }
 0x136   :  { %v7782_v23 = vpop.f32.mrf.mxu0  ;;  %681 = vmatmul.mubr.f32.gmra.mxu0 %v7778_v57 }
 0x137   :  { %11768 = vst [vmem:[#allocation40_spill] sm:$0xff] %v7782_v23  ;;  %686 = vmatprep.mubr.f32.mxu0 %v11633_v0  ;;  %v7802_v23 = vld [vmem:[#allocation2 + $0x1f0] sm:$0xff] }
 0x138   :  { %v7788_v29 = vpop.f32.mrf.mxu0  ;;  %11775 = vst [vmem:[#allocation47_spill] sm:$0xff] %v7802_v23 }
 0x139   :  { %11770 = vst [vmem:[#allocation42_spill] sm:$0xff] %v7788_v29 }
 0x13a   :  { %v7790_v30 = vpop.f32.mrf.mxu0  ;;  %687 = vmatmul.mubr.f32.gmra.mxu0 %v7786_v11 }
 0x13b   :  { %11771 = vst [vmem:[#allocation43_spill] sm:$0xff] %v7790_v30  ;;  %692 = vmatprep.mubr.f32.mxu0 %v11633_v0  ;;  %v7810_v30 = vld [vmem:[#allocation2 + $0x1f8] sm:$0xff] }
 0x13c   :  { %v7796_v63 = vpop.f32.mrf.mxu0 }
 0x13d   :  { %11773 = vst [vmem:[#allocation45_spill] sm:$0xff] %v7796_v63 }
 0x13e   :  { %v7798_v18 = vpop.f32.mrf.mxu0  ;;  %693 = vmatmul.mubr.f32.gmra.mxu0 %v7794_v5  ;;  %v252_v5 = vld [vmem:[#allocation5 + $0x430] sm:$0xff] }
 0x13f   :  { %11774 = vst [vmem:[#allocation46_spill] sm:$0xff] %v7798_v18  ;;  %698 = vmatprep.mubr.f32.mxu0 %v11633_v0 }
 0x140   :  { %v7804_v57 = vpop.f32.mrf.mxu0 }
 0x141   :  { %11776 = vst [vmem:[#allocation48_spill] sm:$0xff] %v7804_v57 }
 0x142   :  { %v7806_v29 = vpop.f32.mrf.mxu0  ;;  %699 = vmatmul.mubr.f32.gmra.mxu0 %v7802_v23 }
 0x143   :  { %11777 = vst [vmem:[#allocation49_spill] sm:$0xff] %v7806_v29  ;;  %704 = vmatprep.mubr.f32.mxu0 %v11633_v0  ;;  %v243_v29 = vld [vmem:[#allocation5 + $0x3e8] sm:$0xff] }
 0x144   :  { %v7812_v11 = vpop.f32.mrf.mxu0 }
 0x145   :  { %11778 = vst [vmem:[#allocation50_spill] sm:$0xff] %v7812_v11  ;;  %v234_v11 = vld [vmem:[#allocation5 + $0x3a0] sm:$0xff] }
 0x146   :  { %v7814_v63 = vpop.f32.mrf.mxu0  ;;  %705 = vmatmul.mubr.f32.gmra.mxu0 %v7810_v30 }
 0x147   :  { %11779 = vst [vmem:[#allocation51_spill] sm:$0xff] %v7814_v63  ;;  %1224 = vmatprep.mubr.f32.mxu0 %v11633_v0 }
 0x148   :  { %v7818_v18 = vpop.f32.mrf.mxu0 }
 0x149   :  { %11780 = vst [vmem:[#allocation52_spill] sm:$0xff] %v7818_v18 }
 0x14a   :  { %v7820_v57 = vpop.f32.mrf.mxu0  ;;  %1225 = vmatmul.mubr.f32.vlgmr.msra.gmra.mxu0 %v7497_v33 }
 0x14b   :  { %11781 = vst [vmem:[#allocation53_spill] sm:$0xff] %v7820_v57  ;;  %6607 = vmatpush3.msra.mxu0 %v7628_v36  ;;  %1230 = vmatprep.mubr.f32.mxu0 %v11633_v0  ;;  %v225_v57 = vld [vmem:[#allocation5 + $0x358] sm:$0xff]  ;;  %v216_v36 = vld [vmem:[#allocation5 + $0x310] sm:$0xff] }
 0x14c   :  { %v7825_v23 = vpop.f32.mrf.mxu0  ;;  %6608 = vmatprep.subr.mxu0 %v252_v5 }
 0x14d   :  { %11782 = vst [vmem:[#allocation54_spill] sm:$0xff] %v7825_v23  ;;  %6609 = vmatpush3.msra.mxu0 %v252_v5  ;;  %v207_v5 = vld [vmem:[#allocation5 + $0x2c8] sm:$0xff] }
 0x14e   :  { %v7827_v63 = vpop.f32.mrf.mxu0  ;;  %1231 = vmatmul.mubr.f32.gmra.mxu0 %v7501_v38  ;;  %6610 = vmatprep.subr.mxu0 %v243_v29 }
 0x14f   :  { %11783 = vst [vmem:[#allocation55_spill] sm:$0xff] %v7827_v63  ;;  %1236 = vmatprep.mubr.f32.mxu0 %v11633_v0  ;;  %6611 = vmatpush3.msra.mxu0 %v243_v29  ;;  %v198_v29 = vld [vmem:[#allocation5 + $0x280] sm:$0xff] }
 0x150   :  { %v7831_v33 = vpop.f32.mrf.mxu0  ;;  %6612 = vmatprep.subr.mxu0 %v234_v11  ;;  %v8325_v63 = vld [vmem:[#allocation2 + $0x100] sm:$0xff] }
 0x151   :  { %11784 = vst [vmem:[#allocation56_spill] sm:$0xff] %v7831_v33  ;;  %6613 = vmatpush3.msra.mxu0 %v234_v11  ;;  %v189_v11 = vld [vmem:[#allocation5 + $0x238] sm:$0xff] }
 0x152   :  { %v7833_v18 = vpop.f32.mrf.mxu0  ;;  %1237 = vmatmul.mubr.f32.gmra.mxu0 %v7505_v43  ;;  %6614 = vmatprep.subr.mxu0 %v225_v57 }
 0x153   :  { %11785 = vst [vmem:[#allocation57_spill] sm:$0xff] %v7833_v18  ;;  %1242 = vmatprep.mubr.f32.mxu0 %v11633_v0  ;;  %6615 = vmatpush3.msra.mxu0 %v225_v57  ;;  %v11914_v18 = vld [vmem:[#allocation47_spill] sm:$0xff] }
 0x154   :  { %v7837_v38 = vpop.f32.mrf.mxu0  ;;  %6616 = vmatprep.subr.mxu0 %v216_v36 }
 0x155   :  { %11786 = vst [vmem:[#allocation58_spill] sm:$0xff] %v7837_v38  ;;  %6617 = vmatpush3.msra.mxu0 %v216_v36  ;;  %v180_v36 = vld [vmem:[#allocation5 + $0x1f0] sm:$0xff] }
 0x156   :  { %v7839_v23 = vpop.f32.mrf.mxu0  ;;  %1243 = vmatmul.mubr.f32.gmra.mxu0 %v7509_v48  ;;  %6618 = vmatprep.subr.mxu0 %v207_v5 }
 0x157   :  { %11787 = vst [vmem:[#allocation59_spill] sm:$0xff] %v7839_v23  ;;  %1248 = vmatprep.mubr.f32.mxu0 %v11633_v0  ;;  %6619 = vmatpush3.msra.mxu0 %v207_v5  ;;  %v8315_v23 = vld [vmem:[#allocation2 + $0xf8] sm:$0xff] }
 0x158   :  { %v7843_v43 = vpop.f32.mrf.mxu0  ;;  %6620 = vmatprep.subr.mxu0 %v198_v29 }
 0x159   :  { %11788 = vst [vmem:[#allocation60_spill] sm:$0xff] %v7843_v43  ;;  %6621 = vmatpush3.msra.mxu0 %v198_v29 }
 0x15a   :  { %v7845_v57 = vpop.f32.mrf.mxu0  ;;  %1249 = vmatmul.mubr.f32.gmra.mxu0 %v7513_v53  ;;  %6622 = vmatprep.subr.mxu0 %v189_v11 }
 0x15b   :  { %11789 = vst [vmem:[#allocation61_spill] sm:$0xff] %v7845_v57  ;;  %1254 = vmatprep.mubr.f32.mxu0 %v11633_v0  ;;  %6623 = vmatpush3.msra.mxu0 %v189_v11 }
 0x15c   :  { %v7849_v38 = vpop.f32.mrf.mxu0  ;;  %6624 = vmatprep.subr.mxu0 %v180_v36 }
 0x15d   :  { %11790 = vst [vmem:[#allocation62_spill] sm:$0xff] %v7849_v38  ;;  %6625 = vmatpush3.msra.mxu0 %v180_v36 }
 0x15e   :  { %v7851_v48 = vpop.f32.mrf.mxu0  ;;  %1255 = vmatmul.mubr.f32.gmra.mxu0 %v7517_v58 }
 0x15f   :  { %11791 = vst [vmem:[#allocation63_spill] sm:$0xff] %v7851_v48  ;;  %1260 = vmatprep.mubr.f32.mxu0 %v11633_v0  ;;  %v8305_v48 = vld [vmem:[#allocation2 + $0xf0] sm:$0xff] }
 0x160   :  { %v7855_v5 = vpop.f32.mrf.mxu0 }
 0x161   :  { %11792 = vst [vmem:[#allocation64_spill] sm:$0xff] %v7855_v5  ;;  %v171_v5 = vld [vmem:[#allocation5 + $0x1a8] sm:$0xff] }
 0x162   :  { %v7857_v29 = vpop.f32.mrf.mxu0  ;;  %1261 = vmatmul.mubr.f32.gmra.mxu0 %v7521_v59  ;;  %6626 = vmatprep.subr.mxu0 %v171_v5 }
 0x163   :  { %11793 = vst [vmem:[#allocation65_spill] sm:$0xff] %v7857_v29  ;;  %1266 = vmatprep.mubr.f32.mxu0 %v11633_v0  ;;  %6627 = vmatpush3.msra.mxu0 %v171_v5 }
 0x164   :  { %v7861_v57 = vpop.f32.mrf.mxu0 }
 0x165   :  { %11794 = vst [vmem:[#allocation66_spill] sm:$0xff] %v7861_v57 }
 0x166   :  { %v7863_v11 = vpop.f32.mrf.mxu0  ;;  %1267 = vmatmul.mubr.f32.gmra.mxu0 %v7525_v60 }
 0x167   :  { %11795 = vst [vmem:[#allocation67_spill] sm:$0xff] %v7863_v11  ;;  %1272 = vmatprep.mubr.f32.mxu0 %v11633_v0 }
 0x168   :  { %v7867_v36 = vpop.f32.mrf.mxu0 }
 0x169   :  { %11796 = vst [vmem:[#allocation68_spill] sm:$0xff] %v7867_v36 }
 0x16a   :  { %v7869_v38 = vpop.f32.mrf.mxu0  ;;  %1273 = vmatmul.mubr.f32.gmra.mxu0 %v7529_v61 }
 0x16b   :  { %11797 = vst [vmem:[#allocation69_spill] sm:$0xff] %v7869_v38  ;;  %1278 = vmatprep.mubr.f32.mxu0 %v11633_v0 }
 0x16c   :  { %v7873_v29 = vpop.f32.mrf.mxu0 }
 0x16d   :  { %11798 = vst [vmem:[#allocation70_spill] sm:$0xff] %v7873_v29  ;;  %v162_v29 = vld [vmem:[#allocation5 + $0x160] sm:$0xff] }
 0x16e   :  { %v7875_v57 = vpop.f32.mrf.mxu0  ;;  %1279 = vmatmul.mubr.f32.gmra.mxu0 %v7533_v1  ;;  %6628 = vmatprep.subr.mxu0 %v162_v29 }
 0x16f   :  { %11799 = vst [vmem:[#allocation71_spill] sm:$0xff] %v7875_v57  ;;  %1284 = vmatprep.mubr.f32.mxu0 %v11633_v0  ;;  %6629 = vmatpush3.msra.mxu0 %v162_v29 }
 0x170   :  { %v7879_v11 = vpop.f32.mrf.mxu0 }
 0x171   :  { %11800 = vst [vmem:[#allocation72_spill] sm:$0xff] %v7879_v11  ;;  %v11911_v11 = vld [vmem:[#allocation44_spill] sm:$0xff] }
 0x172   :  { %v7881_v36 = vpop.f32.mrf.mxu0  ;;  %1285 = vmatmul.mubr.f32.gmra.mxu0 %v7537_v2 }
 0x173   :  { %11801 = vst [vmem:[#allocation73_spill] sm:$0xff] %v7881_v36  ;;  %1290 = vmatprep.mubr.f32.mxu0 %v11633_v0 }
 0x174   :  { %v7885_v61 = vpop.f32.mrf.mxu0 }
 0x175   :  { %11802 = vst [vmem:[#allocation74_spill] sm:$0xff] %v7885_v61 }
 0x176   :  { %v7887_v38 = vpop.f32.mrf.mxu0  ;;  %1291 = vmatmul.mubr.f32.gmra.mxu0 %v7541_v3 }
 0x177   :  { %11803 = vst [vmem:[#allocation75_spill] sm:$0xff] %v7887_v38  ;;  %1296 = vmatprep.mubr.f32.mxu0 %v11633_v0  ;;  %v8295_v38 = vld [vmem:[#allocation2 + $0xe8] sm:$0xff] }
 0x178   :  { %v7891_v5 = vpop.f32.mrf.mxu0 }
 0x179   :  { %11804 = vst [vmem:[#allocation76_spill] sm:$0xff] %v7891_v5 }
 0x17a   :  { %v7893_v1 = vpop.f32.mrf.mxu0  ;;  %1297 = vmatmul.mubr.f32.gmra.mxu0 %v7545_v4 }
 0x17b   :  { %11805 = vst [vmem:[#allocation77_spill] sm:$0xff] %v7893_v1  ;;  %1302 = vmatprep.mubr.f32.mxu0 %v11633_v0 }
 0x17c   :  { %v7897_v2 = vpop.f32.mrf.mxu0 }
 0x17d   :  { %11806 = vst [vmem:[#allocation78_spill] sm:$0xff] %v7897_v2  ;;  %v153_v2 = vld [vmem:[#allocation5 + $0x118] sm:$0xff] }
 0x17e   :  { %v7899_v61 = vpop.f32.mrf.mxu0  ;;  %1303 = vmatmul.mubr.f32.gmra.mxu0 %v7549_v7  ;;  %6630 = vmatprep.subr.mxu0 %v153_v2 }
 0x17f   :  { %11807 = vst [vmem:[#allocation79_spill] sm:$0xff] %v7899_v61  ;;  %1308 = vmatprep.mubr.f32.mxu0 %v11633_v0  ;;  %6631 = vmatpush3.msra.mxu0 %v153_v2  ;;  %v11908_v61 = vld [vmem:[#allocation41_spill] sm:$0xff] }
 0x180   :  { %v7903_v3 = vpop.f32.mrf.mxu0 }
 0x181   :  { %11808 = vst [vmem:[#allocation80_spill] sm:$0xff] %v7903_v3  ;;  %v8285_v3 = vld [vmem:[#allocation2 + $0xe0] sm:$0xff] }
 0x182   :  { %v7905_v36 = vpop.f32.mrf.mxu0  ;;  %1309 = vmatmul.mubr.f32.gmra.mxu0 %v7553_v8 }
 0x183   :  { %11809 = vst [vmem:[#allocation81_spill] sm:$0xff] %v7905_v36  ;;  %1314 = vmatprep.mubr.f32.mxu0 %v11633_v0 }
 0x184   :  { %v7909_v4 = vpop.f32.mrf.mxu0 }
 0x185   :  { %11810 = vst [vmem:[#allocation82_spill] sm:$0xff] %v7909_v4 }
 0x186   :  { %v7911_v1 = vpop.f32.mrf.mxu0  ;;  %1315 = vmatmul.mubr.f32.gmra.mxu0 %v7557_v9 }
 0x187   :  { %11811 = vst [vmem:[#allocation83_spill] sm:$0xff] %v7911_v1  ;;  %1320 = vmatprep.mubr.f32.mxu0 %v11633_v0 }
 0x188   :  { %v7915_v29 = vpop.f32.mrf.mxu0 }
 0x189   :  { %11812 = vst [vmem:[#allocation84_spill] sm:$0xff] %v7915_v29  ;;  %v11905_v29 = vld [vmem:[#allocation38_spill] sm:$0xff] }
 0x18a   :  { %v7917_v7 = vpop.f32.mrf.mxu0  ;;  %1321 = vmatmul.mubr.f32.gmra.mxu0 %v7561_v10 }
 0x18b   :  { %11813 = vst [vmem:[#allocation85_spill] sm:$0xff] %v7917_v7  ;;  %1326 = vmatprep.mubr.f32.mxu0 %v11633_v0 }
 0x18c   :  { %v7921_v8 = vpop.f32.mrf.mxu0 }
 0x18d   :  { %11814 = vst [vmem:[#allocation86_spill] sm:$0xff] %v7921_v8  ;;  %v144_v8 = vld [vmem:[#allocation5 + $0xd0] sm:$0xff] }
 0x18e   :  { %v7923_v4 = vpop.f32.mrf.mxu0  ;;  %1327 = vmatmul.mubr.f32.gmra.mxu0 %v7565_v13  ;;  %6632 = vmatprep.subr.mxu0 %v144_v8 }
 0x18f   :  { %11815 = vst [vmem:[#allocation87_spill] sm:$0xff] %v7923_v4  ;;  %1332 = vmatprep.mubr.f32.mxu0 %v11633_v0  ;;  %6633 = vmatpush3.msra.mxu0 %v144_v8  ;;  %v256_v8 = vld [vmem:[#allocation5 + $0x450] sm:$0xff]  ;;  %v8275_v4 = vld [vmem:[#allocation2 + $0xd8] sm:$0xff] }
 0x190   :  { %v7927_v9 = vpop.f32.mrf.mxu0  ;;  %711 = vmatprep.subr.mxu1 %v256_v8  ;;  %v229_v8 = vld [vmem:[#allocation5 + $0x378] sm:$0xff] }
 0x191   :  { %11816 = vst [vmem:[#allocation88_spill] sm:$0xff] %v7927_v9 }
 0x192   :  { %v7929_v36 = vpop.f32.mrf.mxu0  ;;  %1333 = vmatmul.mubr.f32.gmra.mxu0 %v7569_v14 }
 0x193   :  { %11817 = vst [vmem:[#allocation89_spill] sm:$0xff] %v7929_v36  ;;  %1338 = vmatprep.mubr.f32.mxu0 %v11633_v0 }
 0x194   :  { %v7933_v10 = vpop.f32.mrf.mxu0 }
 0x195   :  { %11818 = vst [vmem:[#allocation90_spill] sm:$0xff] %v7933_v10 }
 0x196   :  { %v7935_v7 = vpop.f32.mrf.mxu0  ;;  %1339 = vmatmul.mubr.f32.gmra.mxu0 %v7573_v15 }
 0x197   :  { %11819 = vst [vmem:[#allocation91_spill] sm:$0xff] %v7935_v7  ;;  %1344 = vmatprep.mubr.f32.mxu0 %v11633_v0  ;;  %v11902_v7 = vld [vmem:[#allocation35_spill] sm:$0xff] }
 0x198   :  { %v7939_v2 = vpop.f32.mrf.mxu0 }
 0x199   :  { %11820 = vst [vmem:[#allocation92_spill] sm:$0xff] %v7939_v2  ;;  %v8265_v2 = vld [vmem:[#allocation2 + $0xd0] sm:$0xff] }
 0x19a   :  { %v7941_v13 = vpop.f32.mrf.mxu0  ;;  %1345 = vmatmul.mubr.f32.gmra.mxu0 %v7577_v16 }
 0x19b   :  { %11821 = vst [vmem:[#allocation93_spill] sm:$0xff] %v7941_v13  ;;  %1350 = vmatprep.mubr.f32.mxu0 %v11633_v0 }
 0x19c   :  { %v7945_v14 = vpop.f32.mrf.mxu0 }
 0x19d   :  { %11822 = vst [vmem:[#allocation94_spill] sm:$0xff] %v7945_v14  ;;  %v255_v14 = vld [vmem:[#allocation5 + $0x448] sm:$0xff] }
 0x19e   :  { %v7947_v10 = vpop.f32.mrf.mxu0  ;;  %1351 = vmatmul.mubr.f32.gmra.mxu0 %v7581_v19  ;;  %712 = vmatpush1.msra.mxu1 %v255_v14  ;;  %v228_v14 = vld [vmem:[#allocation5 + $0x370] sm:$0xff] }
 0x19f   :  { %11823 = vst [vmem:[#allocation95_spill] sm:$0xff] %v7947_v10  ;;  %1356 = vmatprep.mubr.f32.mxu0 %v11633_v0  ;;  %v237_v10 = vld [vmem:[#allocation5 + $0x3b8] sm:$0xff] }
 0x1a0   :  { %v7951_v15 = vpop.f32.mrf.mxu0 }
 0x1a1   :  { %11824 = vst [vmem:[#allocation96_spill] sm:$0xff] %v7951_v15  ;;  %v247_v15 = vld [vmem:[#allocation5 + $0x408] sm:$0xff] }
 0x1a2   :  { %v7953_v36 = vpop.f32.mrf.mxu0  ;;  %1357 = vmatmul.mubr.f32.gmra.mxu0 %v7585_v20  ;;  %713 = vmatprep.subr.mxu1 %v247_v15 }
 0x1a3   :  { %11825 = vst [vmem:[#allocation97_spill] sm:$0xff] %v7953_v36  ;;  %1362 = vmatprep.mubr.f32.mxu0 %v11633_v0  ;;  %v246_v36 = vld [vmem:[#allocation5 + $0x400] sm:$0xff] }
 0x1a4   :  { %v7957_v16 = vpop.f32.mrf.mxu0  ;;  %714 = vmatpush1.msra.mxu1 %v246_v36  ;;  %v219_v36 = vld [vmem:[#allocation5 + $0x328] sm:$0xff] }
 0x1a5   :  { %11826 = vst [vmem:[#allocation98_spill] sm:$0xff] %v7957_v16  ;;  %v135_v16 = vld [vmem:[#allocation5 + $0x88] sm:$0xff] }
 0x1a6   :  { %v7959_v13 = vpop.f32.mrf.mxu0  ;;  %1363 = vmatmul.mubr.f32.gmra.mxu0 %v7589_v21  ;;  %6634 = vmatprep.subr.mxu0 %v135_v16 }
 0x1a7   :  { %11827 = vst [vmem:[#allocation99_spill] sm:$0xff] %v7959_v13  ;;  %1368 = vmatprep.mubr.f32.mxu0 %v11633_v0  ;;  %v238_v13 = vld [vmem:[#allocation5 + $0x3c0] sm:$0xff]  ;;  %6635 = vmatpush3.msra.mxu0 %v135_v16  ;;  %v201_v16 = vld [vmem:[#allocation5 + $0x298] sm:$0xff] }
 0x1a8   :  { %v7963_v19 = vpop.f32.mrf.mxu0  ;;  %715 = vmatprep.subr.mxu1 %v238_v13 }
 0x1a9   :  { %11828 = vst [vmem:[#allocation100_spill] sm:$0xff] %v7963_v19  ;;  %716 = vmatpush1.msra.mxu1 %v237_v10  ;;  %v202_v10 = vld [vmem:[#allocation5 + $0x2a0] sm:$0xff] }
 0x1aa   :  { %v7965_v20 = vpop.f32.mrf.mxu0  ;;  %1369 = vmatmul.mubr.f32.gmra.mxu0 %v7593_v22  ;;  %717 = vmatprep.subr.mxu1 %v229_v8  ;;  %v220_v22 = vld [vmem:[#allocation5 + $0x330] sm:$0xff]  ;;  %v193_v8 = vld [vmem:[#allocation5 + $0x258] sm:$0xff] }
 0x1ab   :  { %11829 = vst [vmem:[#allocation101_spill] sm:$0xff] %v7965_v20  ;;  %1374 = vmatprep.mubr.f32.mxu0 %v11633_v0  ;;  %718 = vmatpush1.msra.mxu1 %v228_v14  ;;  %v211_v20 = vld [vmem:[#allocation5 + $0x2e8] sm:$0xff]  ;;  %v192_v14 = vld [vmem:[#allocation5 + $0x250] sm:$0xff] }
 0x1ac   :  { %v7969_v21 = vpop.f32.mrf.mxu0  ;;  %719 = vmatprep.subr.mxu1 %v220_v22 }
 0x1ad   :  { %11830 = vst [vmem:[#allocation102_spill] sm:$0xff] %v7969_v21  ;;  %v210_v21 = vld [vmem:[#allocation5 + $0x2e0] sm:$0xff]  ;;  %720 = vmatpush1.msra.mxu1 %v219_v36  ;;  %v184_v36 = vld [vmem:[#allocation5 + $0x210] sm:$0xff] }
 0x1ae   :  { %v7971_v19 = vpop.f32.mrf.mxu0  ;;  %1375 = vmatmul.mubr.f32.gmra.mxu0 %v7597_v25  ;;  %721 = vmatprep.subr.mxu1 %v211_v20  ;;  %v175_v20 = vld [vmem:[#allocation5 + $0x1c8] sm:$0xff] }
 0x1af   :  { %11831 = vst [vmem:[#allocation103_spill] sm:$0xff] %v7971_v19  ;;  %1380 = vmatprep.mubr.f32.mxu0 %v11633_v0  ;;  %722 = vmatpush1.msra.mxu1 %v210_v21  ;;  %v174_v21 = vld [vmem:[#allocation5 + $0x1c0] sm:$0xff] }
 0x1b0   :  { %v7975_v15 = vpop.f32.mrf.mxu0  ;;  %723 = vmatprep.subr.mxu1 %v202_v10 }
 0x1b1   :  { %11832 = vst [vmem:[#allocation104_spill] sm:$0xff] %v7975_v15  ;;  %724 = vmatpush1.msra.mxu1 %v201_v16  ;;  %v126_v16 = vld [vmem:[#allocation5 + $0x40] sm:$0xff]  ;;  %v11899_v15 = vld [vmem:[#allocation32_spill] sm:$0xff] }
 0x1b2   :  { %v7977_v13 = vpop.f32.mrf.mxu0  ;;  %1381 = vmatmul.mubr.f32.gmra.mxu0 %v7601_v26  ;;  %725 = vmatprep.subr.mxu1 %v193_v8 }
 0x1b3   :  { %11833 = vst [vmem:[#allocation105_spill] sm:$0xff] %v7977_v13  ;;  %1386 = vmatprep.mubr.f32.mxu0 %v11633_v0  ;;  %v183_v13 = vld [vmem:[#allocation5 + $0x208] sm:$0xff]  ;;  %726 = vmatpush1.msra.mxu1 %v192_v14  ;;  %v157_v14 = vld [vmem:[#allocation5 + $0x138] sm:$0xff] }
 0x1b4   :  { %v7981_v25 = vpop.f32.mrf.mxu0  ;;  %727 = vmatprep.subr.mxu1 %v184_v36  ;;  %6636 = vmatprep.subr.mxu0 %v126_v16  ;;  %v156_v36 = vld [vmem:[#allocation5 + $0x130] sm:$0xff] }
 0x1b5   :  { %11834 = vst [vmem:[#allocation106_spill] sm:$0xff] %v7981_v25  ;;  %728 = vmatpush1.msra.mxu1 %v183_v13  ;;  %v166_v25 = vld [vmem:[#allocation5 + $0x180] sm:$0xff]  ;;  %6637 = vmatpush3.msra.mxu0 %v126_v16 }
 0x1b6   :  { %v7983_v22 = vpop.f32.mrf.mxu0  ;;  %1387 = vmatmul.mubr.f32.gmra.mxu0 %v7605_v27  ;;  %729 = vmatprep.subr.mxu1 %v175_v20  ;;  %v165_v27 = vld [vmem:[#allocation5 + $0x178] sm:$0xff]  ;;  %v147_v20 = vld [vmem:[#allocation5 + $0xe8] sm:$0xff]  ;;  %v130_v16 = vld [vmem:[#allocation5 + $0x60] sm:$0xff] }
 0x1b7   :  { %11835 = vst [vmem:[#allocation107_spill] sm:$0xff] %v7983_v22  ;;  %1392 = vmatprep.mubr.f32.mxu0 %v11633_v0  ;;  %730 = vmatpush1.msra.mxu1 %v174_v21  ;;  %v139_v21 = vld [vmem:[#allocation5 + $0xa8] sm:$0xff] }
 0x1b8   :  { %v7987_v26 = vpop.f32.mrf.mxu0  ;;  %731 = vmatprep.subr.mxu1 %v166_v25  ;;  %v8255_v22 = vld [vmem:[#allocation2 + $0xc8] sm:$0xff] }
 0x1b9   :  { %11836 = vst [vmem:[#allocation108_spill] sm:$0xff] %v7987_v26  ;;  %732 = vmatpush1.msra.mxu1 %v165_v27  ;;  %v129_v27 = vld [vmem:[#allocation5 + $0x58] sm:$0xff] }
 0x1ba   :  { %v7989_v10 = vpop.f32.mrf.mxu0  ;;  %1393 = vmatmul.mubr.f32.gmra.mxu0 %v7609_v28  ;;  %733 = vmatprep.subr.mxu1 %v157_v14  ;;  %v148_v28 = vld [vmem:[#allocation5 + $0xf0] sm:$0xff]  ;;  %v121_v14 = vld [vmem:[#allocation5 + $0x18] sm:$0xff] }
 0x1bb   :  { %11837 = vst [vmem:[#allocation109_spill] sm:$0xff] %v7989_v10  ;;  %1398 = vmatprep.mubr.f32.mxu0 %v11633_v0  ;;  %734 = vmatpush1.msra.mxu1 %v156_v36  ;;  %v120_v36 = vld [vmem:[#allocation5 + $0x10] sm:$0xff] }
 0x1bc   :  { %v7993_v8 = vpop.f32.mrf.mxu0  ;;  %735 = vmatprep.subr.mxu1 %v148_v28 }
 0x1bd   :  { %11838 = vst [vmem:[#allocation110_spill] sm:$0xff] %v7993_v8  ;;  %v138_v8 = vld [vmem:[#allocation5 + $0xa0] sm:$0xff]  ;;  %736 = vmatpush1.msra.mxu1 %v147_v20 }
 0x1be   :  { %v7995_v13 = vpop.f32.mrf.mxu0  ;;  %1399 = vmatmul.mubr.f32.gmra.mxu0 %v7613_v31  ;;  %737 = vmatprep.subr.mxu1 %v139_v21  ;;  %v8013_v20 = vld [vmem:[#allocation2] sm:$0xff] }
 0x1bf   :  { %11839 = vst [vmem:[#allocation111_spill] sm:$0xff] %v7995_v13  ;;  %1404 = vmatprep.mubr.f32.mxu0 %v11633_v0  ;;  %738 = vmatpush1.msra.mxu1 %v138_v8  ;;  %v11896_v13 = vld [vmem:[#allocation29_spill] sm:$0xff] }
 0x1c0   :  { %v7999_v10 = vpop.f32.mrf.mxu0  ;;  %739 = vmatprep.subr.mxu1 %v130_v16 }
 0x1c1   :  { %11840 = vst [vmem:[#allocation112_spill] sm:$0xff] %v7999_v10  ;;  %740 = vmatpush1.msra.mxu1 %v129_v27  ;;  %v8245_v10 = vld [vmem:[#allocation2 + $0xc0] sm:$0xff] }
 0x1c2   :  { %v8001_v25 = vpop.f32.mrf.mxu0  ;;  %1405 = vmatmul.mubr.f32.gmra.mxu0 %v7617_v32  ;;  %741 = vmatprep.subr.mxu1 %v121_v14  ;;  %v8033_v14 = vld [vmem:[#allocation2 + $0x10] sm:$0xff] }
 0x1c3   :  { %11841 = vst [vmem:[#allocation113_spill] sm:$0xff] %v8001_v25  ;;  %1410 = vmatprep.mubr.f32.mxu0 %v11633_v0  ;;  %742 = vmatpush1.msra.mxu1 %v120_v36  ;;  %v8235_v25 = vld [vmem:[#allocation2 + $0xb8] sm:$0xff] }
 0x1c4   :  { %v8005_v31 = vpop.f32.mrf.mxu0  ;;  %776 = vmatmul.mubr.f32.vlgmr.msra.gmra.mxu1 %v8013_v20 }
 0x1c5   :  { %11842 = vst [vmem:[#allocation114_spill] sm:$0xff] %v8005_v31  ;;  %781 = vmatprep.mubr.f32.mxu1 %v11633_v0 }
 0x1c6   :  { %v8007_v28 = vpop.f32.mrf.mxu0  ;;  %1411 = vmatmul.mubr.f32.gmra.mxu0 %v7621_v34  ;;  %v8023_v34 = vld [vmem:[#allocation2 + $0x8] sm:$0xff] }
 0x1c7   :  { %11843 = vst [vmem:[#allocation115_spill] sm:$0xff] %v8007_v28  ;;  %1416 = vmatprep.mubr.f32.mxu0 %v11633_v0 }
 0x1c8   :  { %v8011_v32 = vpop.f32.mrf.mxu0  ;;  %782 = vmatmul.mubr.f32.gmra.mxu1 %v8023_v34 }
 0x1c9   :  { %11844 = vst [vmem:[#allocation116_spill] sm:$0xff] %v8011_v32  ;;  %787 = vmatprep.mubr.f32.mxu1 %v11633_v0  ;;  %v11893_v32 = vld [vmem:[#allocation26_spill] sm:$0xff] }
 0x1ca   :  { %v8017_v8 = vpop.f32.mrf.mxu0  ;;  %1417 = vmatmul.mubr.f32.gmra.mxu0 %v7625_v35 }
 0x1cb   :  { %11845 = vst [vmem:[#allocation117_spill] sm:$0xff] %v8017_v8  ;;  %1422 = vmatprep.mubr.f32.mxu0 %v11633_v0 }
 0x1cc   :  { %v8021_v21 = vpop.f32.mrf.mxu0  ;;  %788 = vmatmul.mubr.f32.gmra.mxu1 %v8033_v14 }
 0x1cd   :  { %11846 = vst [vmem:[#allocation118_spill] sm:$0xff] %v8021_v21  ;;  %793 = vmatprep.mubr.f32.mxu1 %v11633_v0  ;;  %v8043_v21 = vld [vmem:[#allocation2 + $0x18] sm:$0xff] }
 0x1ce   :  { %v8027_v16 = vpop.f32.mrf.mxu0  ;;  %1423 = vmatmul.mubr.f32.gmra.mxu0 %v7631_v37 }
 0x1cf   :  { %11847 = vst [vmem:[#allocation119_spill] sm:$0xff] %v8027_v16  ;;  %1428 = vmatprep.mubr.f32.mxu0 %v11633_v0  ;;  %v11890_v16 = vld [vmem:[#allocation23_spill] sm:$0xff] }
 0x1d0   :  { %v8031_v27 = vpop.f32.mrf.mxu0  ;;  %794 = vmatmul.mubr.f32.gmra.mxu1 %v8043_v21 }
 0x1d1   :  { %11848 = vst [vmem:[#allocation120_spill] sm:$0xff] %v8031_v27  ;;  %799 = vmatprep.mubr.f32.mxu1 %v11633_v0  ;;  %v8225_v27 = vld [vmem:[#allocation2 + $0xb0] sm:$0xff] }
 0x1d2   :  { %v8037_v35 = vpop.f32.mrf.mxu0  ;;  %1429 = vmatmul.mubr.f32.gmra.mxu0 %v7636_v39 }
 0x1d3   :  { %11849 = vst [vmem:[#allocation121_spill] sm:$0xff] %v8037_v35  ;;  %1434 = vmatprep.mubr.f32.mxu0 %v11633_v0 }
 0x1d4   :  { %v8041_v36 = vpop.f32.mrf.mxu0  ;;  %800 = vmatmul.mubr.f32.gmra.mxu1 %v7513_v53 }
 0x1d5   :  { %11850 = vst [vmem:[#allocation122_spill] sm:$0xff] %v8041_v36  ;;  %805 = vmatprep.mubr.f32.mxu1 %v11633_v0 }
 0x1d6   :  { %v8047_v37 = vpop.f32.mrf.mxu0  ;;  %1435 = vmatmul.mubr.f32.gmra.mxu0 %v7640_v40 }
 0x1d7   :  { %11851 = vst [vmem:[#allocation123_spill] sm:$0xff] %v8047_v37  ;;  %1440 = vmatprep.mubr.f32.mxu0 %v11633_v0 }
 0x1d8   :  { %v8051_v8 = vpop.f32.mrf.mxu0  ;;  %806 = vmatmul.mubr.f32.gmra.mxu1 %v7517_v58 }
 0x1d9   :  { %11852 = vst [vmem:[#allocation124_spill] sm:$0xff] %v8051_v8  ;;  %811 = vmatprep.mubr.f32.mxu1 %v11633_v0  ;;  %v8215_v8 = vld [vmem:[#allocation2 + $0xa8] sm:$0xff] }
 0x1da   :  { %v8055_v39 = vpop.f32.mrf.mxu0  ;;  %1441 = vmatmul.mubr.f32.gmra.mxu0 %v7644_v41 }
 0x1db   :  { %11853 = vst [vmem:[#allocation125_spill] sm:$0xff] %v8055_v39  ;;  %1446 = vmatprep.mubr.f32.mxu0 %v11633_v0  ;;  %v8195_v39 = vld [vmem:[#allocation2 + $0x98] sm:$0xff] }
 0x1dc   :  { %v8059_v36 = vpop.f32.mrf.mxu0  ;;  %812 = vmatmul.mubr.f32.gmra.mxu1 %v7521_v59 }
 0x1dd   :  { %11854 = vst [vmem:[#allocation126_spill] sm:$0xff] %v8059_v36  ;;  %817 = vmatprep.mubr.f32.mxu1 %v11633_v0  ;;  %v8085_v36 = vld [vmem:[#allocation2 + $0x40] sm:$0xff] }
 0x1de   :  { %v8063_v40 = vpop.f32.mrf.mxu0  ;;  %1447 = vmatmul.mubr.f32.gmra.mxu0 %v7648_v42 }
 0x1df   :  { %11855 = vst [vmem:[#allocation127_spill] sm:$0xff] %v8063_v40  ;;  %1452 = vmatprep.mubr.f32.mxu0 %v11633_v0  ;;  %v8205_v40 = vld [vmem:[#allocation2 + $0xa0] sm:$0xff] }
 0x1e0   :  { %v8067_v53 = vpop.f32.mrf.mxu0  ;;  %818 = vmatmul.mubr.f32.gmra.mxu1 %v7525_v60 }
 0x1e1   :  { %11856 = vst [vmem:[#allocation128_spill] sm:$0xff] %v8067_v53  ;;  %823 = vmatprep.mubr.f32.mxu1 %v11633_v0 }
 0x1e2   :  { %v8071_v41 = vpop.f32.mrf.mxu0  ;;  %1453 = vmatmul.mubr.f32.gmra.mxu0 %v7652_v44 }
 0x1e3   :  { %11857 = vst [vmem:[#allocation129_spill] sm:$0xff] %v8071_v41  ;;  %1458 = vmatprep.mubr.f32.mxu0 %v11633_v0 }
 0x1e4   :  { %v8075_v58 = vpop.f32.mrf.mxu0  ;;  %824 = vmatmul.mubr.f32.gmra.mxu1 %v8085_v36 }
 0x1e5   :  { %11858 = vst [vmem:[#allocation130_spill] sm:$0xff] %v8075_v58  ;;  %829 = vmatprep.mubr.f32.mxu1 %v11633_v0  ;;  %v8095_v58 = vld [vmem:[#allocation2 + $0x48] sm:$0xff] }
 0x1e6   :  { %v8079_v42 = vpop.f32.mrf.mxu0  ;;  %1459 = vmatmul.mubr.f32.gmra.mxu0 %v7656_v45 }
 0x1e7   :  { %11859 = vst [vmem:[#allocation131_spill] sm:$0xff] %v8079_v42  ;;  %1464 = vmatprep.mubr.f32.mxu0 %v11633_v0 }
 0x1e8   :  { %v8083_v59 = vpop.f32.mrf.mxu0  ;;  %830 = vmatmul.mubr.f32.gmra.mxu1 %v8095_v58 }
 0x1e9   :  { %11860 = vst [vmem:[#allocation132_spill] sm:$0xff] %v8083_v59  ;;  %835 = vmatprep.mubr.f32.mxu1 %v11633_v0  ;;  %v8185_v59 = vld [vmem:[#allocation2 + $0x90] sm:$0xff] }
 0x1ea   :  { %v8089_v44 = vpop.f32.mrf.mxu0  ;;  %1465 = vmatmul.mubr.f32.gmra.mxu0 %v7660_v46 }
 0x1eb   :  { %11861 = vst [vmem:[#allocation133_spill] sm:$0xff] %v8089_v44  ;;  %1470 = vmatprep.mubr.f32.mxu0 %v11633_v0  ;;  %v8105_v44 = vld [vmem:[#allocation2 + $0x50] sm:$0xff] }
 0x1ec   :  { %v8093_v60 = vpop.f32.mrf.mxu0  ;;  %836 = vmatmul.mubr.f32.gmra.mxu1 %v8105_v44 }
 0x1ed   :  { %11862 = vst [vmem:[#allocation134_spill] sm:$0xff] %v8093_v60  ;;  %841 = vmatprep.mubr.f32.mxu1 %v11633_v0 }
 0x1ee   :  { %v8099_v45 = vpop.f32.mrf.mxu0  ;;  %1471 = vmatmul.mubr.f32.gmra.mxu0 %v7664_v47 }
 0x1ef   :  { %11863 = vst [vmem:[#allocation135_spill] sm:$0xff] %v8099_v45  ;;  %1476 = vmatprep.mubr.f32.mxu0 %v11633_v0  ;;  %v8115_v45 = vld [vmem:[#allocation2 + $0x58] sm:$0xff] }
 0x1f0   :  { %v8103_v41 = vpop.f32.mrf.mxu0  ;;  %842 = vmatmul.mubr.f32.gmra.mxu1 %v8115_v45 }
 0x1f1   :  { %11864 = vst [vmem:[#allocation136_spill] sm:$0xff] %v8103_v41  ;;  %847 = vmatprep.mubr.f32.mxu1 %v11633_v0 }
 0x1f2   :  { %v8109_v46 = vpop.f32.mrf.mxu0  ;;  %1477 = vmatmul.mubr.f32.gmra.mxu0 %v7668_v49 }
 0x1f3   :  { %11865 = vst [vmem:[#allocation137_spill] sm:$0xff] %v8109_v46  ;;  %1482 = vmatprep.mubr.f32.mxu0 %v11633_v0  ;;  %v8125_v46 = vld [vmem:[#allocation2 + $0x60] sm:$0xff] }
 0x1f4   :  { %v8113_v60 = vpop.f32.mrf.mxu0  ;;  %848 = vmatmul.mubr.f32.gmra.mxu1 %v8125_v46 }
 0x1f5   :  { %11866 = vst [vmem:[#allocation138_spill] sm:$0xff] %v8113_v60  ;;  %853 = vmatprep.mubr.f32.mxu1 %v11633_v0 }
 0x1f6   :  { %v8119_v47 = vpop.f32.mrf.mxu0  ;;  %1483 = vmatmul.mubr.f32.gmra.mxu0 %v7672_v50 }
 0x1f7   :  { %11867 = vst [vmem:[#allocation139_spill] sm:$0xff] %v8119_v47  ;;  %1488 = vmatprep.mubr.f32.mxu0 %v11633_v0  ;;  %v8135_v47 = vld [vmem:[#allocation2 + $0x68] sm:$0xff] }
 0x1f8   :  { %v8123_v41 = vpop.f32.mrf.mxu0  ;;  %854 = vmatmul.mubr.f32.gmra.mxu1 %v8135_v47 }
 0x1f9   :  { %11868 = vst [vmem:[#allocation140_spill] sm:$0xff] %v8123_v41  ;;  %859 = vmatprep.mubr.f32.mxu1 %v11633_v0 }
 0x1fa   :  { %v8129_v49 = vpop.f32.mrf.mxu0  ;;  %1489 = vmatmul.mubr.f32.gmra.mxu0 %v7676_v51 }
 0x1fb   :  { %11869 = vst [vmem:[#allocation141_spill] sm:$0xff] %v8129_v49  ;;  %1494 = vmatprep.mubr.f32.mxu0 %v11633_v0  ;;  %v8145_v49 = vld [vmem:[#allocation2 + $0x70] sm:$0xff] }
 0x1fc   :  { %v8133_v60 = vpop.f32.mrf.mxu0  ;;  %860 = vmatmul.mubr.f32.gmra.mxu1 %v8145_v49 }
 0x1fd   :  { %11870 = vst [vmem:[#allocation142_spill] sm:$0xff] %v8133_v60  ;;  %865 = vmatprep.mubr.f32.mxu1 %v11633_v0 }
 0x1fe   :  { %v8139_v50 = vpop.f32.mrf.mxu0  ;;  %1495 = vmatmul.mubr.f32.gmra.mxu0 %v7680_v52 }
 0x1ff   :  { %11871 = vst [vmem:[#allocation143_spill] sm:$0xff] %v8139_v50  ;;  %1500 = vmatprep.mubr.f32.mxu0 %v11633_v0  ;;  %v8155_v50 = vld [vmem:[#allocation2 + $0x78] sm:$0xff] }
 0x200   :  { %v8143_v41 = vpop.f32.mrf.mxu0  ;;  %866 = vmatmul.mubr.f32.gmra.mxu1 %v8155_v50 }
 0x201   :  { %11872 = vst [vmem:[#allocation144_spill] sm:$0xff] %v8143_v41  ;;  %871 = vmatprep.mubr.f32.mxu1 %v11633_v0 }
 0x202   :  { %v8149_v51 = vpop.f32.mrf.mxu0  ;;  %1501 = vmatmul.mubr.f32.gmra.mxu0 %v7684_v54 }
 0x203   :  { %11873 = vst [vmem:[#allocation145_spill] sm:$0xff] %v8149_v51  ;;  %1506 = vmatprep.mubr.f32.mxu0 %v11633_v0  ;;  %v8165_v51 = vld [vmem:[#allocation2 + $0x80] sm:$0xff] }
 0x204   :  { %v8153_v60 = vpop.f32.mrf.mxu0  ;;  %872 = vmatmul.mubr.f32.gmra.mxu1 %v8165_v51 }
 0x205   :  { %11874 = vst [vmem:[#allocation146_spill] sm:$0xff] %v8153_v60  ;;  %877 = vmatprep.mubr.f32.mxu1 %v11633_v0 }
 0x206   :  { %v8159_v52 = vpop.f32.mrf.mxu0  ;;  %1507 = vmatmul.mubr.f32.gmra.mxu0 %v7688_v55 }
 0x207   :  { %11875 = vst [vmem:[#allocation147_spill] sm:$0xff] %v8159_v52  ;;  %1512 = vmatprep.mubr.f32.mxu0 %v11633_v0  ;;  %v8175_v52 = vld [vmem:[#allocation2 + $0x88] sm:$0xff] }
 0x208   :  { %v8163_v41 = vpop.f32.mrf.mxu0  ;;  %878 = vmatmul.mubr.f32.gmra.mxu1 %v8175_v52 }
 0x209   :  { %11876 = vst [vmem:[#allocation148_spill] sm:$0xff] %v8163_v41  ;;  %883 = vmatprep.mubr.f32.mxu1 %v11633_v0 }
 0x20a   :  { %v8169_v54 = vpop.f32.mrf.mxu0  ;;  %1513 = vmatmul.mubr.f32.gmra.mxu0 %v7692_v56 }
 0x20b   :  { %11877 = vst [vmem:[#allocation149_spill] sm:$0xff] %v8169_v54  ;;  %1518 = vmatprep.mubr.f32.mxu0 %v11633_v0 }
 0x20c   :  { %v8173_v60 = vpop.f32.mrf.mxu0  ;;  %884 = vmatmul.mubr.f32.gmra.mxu1 %v8185_v59 }
 0x20d   :  { %11878 = vst [vmem:[#allocation150_spill] sm:$0xff] %v8173_v60  ;;  %889 = vmatprep.mubr.f32.mxu1 %v11633_v0  ;;  %v7340_v60 = vld [vmem:[#allocation2 + $0x140] sm:$0xff] }
 0x20e   :  { %v8179_v55 = vpop.f32.mrf.mxu0  ;;  %1519 = vmatmul.mubr.f32.gmra.mxu0 %v7698_v62 }
 0x20f   :  { %11879 = vst [vmem:[#allocation151_spill] sm:$0xff] %v8179_v55  ;;  %1524 = vmatprep.mubr.f32.mxu0 %v11633_v0  ;;  %v7342_v55 = vld [vmem:[#allocation2 + $0x150] sm:$0xff] }
 0x210   :  { %v8183_v41 = vpop.f32.mrf.mxu0  ;;  %890 = vmatmul.mubr.f32.gmra.mxu1 %v8195_v39 }
 0x211   :  { %11880 = vst [vmem:[#allocation152_spill] sm:$0xff] %v8183_v41  ;;  %895 = vmatprep.mubr.f32.mxu1 %v11633_v0 }
 0x212   :  { %v8189_v56 = vpop.f32.mrf.mxu0  ;;  %1525 = vmatmul.mubr.f32.gmra.mxu0 %v7706_v6 }
 0x213   :  { %11881 = vst [vmem:[#allocation153_spill] sm:$0xff] %v8189_v56  ;;  %1530 = vmatprep.mubr.f32.mxu0 %v11633_v0  ;;  %v7337_v56 = vld [vmem:[#allocation2 + $0x128] sm:$0xff] }
 0x214   :  { %v8193_v42 = vpop.f32.mrf.mxu0  ;;  %896 = vmatmul.mubr.f32.gmra.mxu1 %v8205_v40 }
 0x215   :  { %11882 = vst [vmem:[#allocation154_spill] sm:$0xff] %v8193_v42  ;;  %901 = vmatprep.mubr.f32.mxu1 %v11633_v0 }
 0x216   :  { %v8199_v62 = vpop.f32.mrf.mxu0  ;;  %1531 = vmatmul.mubr.f32.gmra.mxu0 %v7714_v17 }
 0x217   :  { %11883 = vst [vmem:[#allocation155_spill] sm:$0xff] %v8199_v62  ;;  %1536 = vmatprep.mubr.f32.mxu0 %v11633_v0 }
 0x218   :  { %v8203_v53 = vpop.f32.mrf.mxu0  ;;  %902 = vmatmul.mubr.f32.gmra.mxu1 %v8215_v8 }
 0x219   :  { %11884 = vst [vmem:[#allocation156_spill] sm:$0xff] %v8203_v53  ;;  %907 = vmatprep.mubr.f32.mxu1 %v11633_v0  ;;  %v7336_v53 = vld [vmem:[#allocation2 + $0x120] sm:$0xff] }
 0x21a   :  { %v8209_v6 = vpop.f32.mrf.mxu0  ;;  %1537 = vmatmul.mubr.f32.gmra.mxu0 %v7722_v24 }
 0x21b   :  { %11885 = vst [vmem:[#allocation157_spill] sm:$0xff] %v8209_v6  ;;  %1542 = vmatprep.mubr.f32.mxu0 %v11633_v0  ;;  %v7334_v6 = vld [vmem:[#allocation2 + $0x110] sm:$0xff] }
 0x21c   :  { %v8213_v35 = vpop.f32.mrf.mxu0  ;;  %908 = vmatmul.mubr.f32.gmra.mxu1 %v8225_v27 }
 0x21d   :  { %11886 = vst [vmem:[#allocation158_spill] sm:$0xff] %v8213_v35  ;;  %913 = vmatprep.mubr.f32.mxu1 %v11633_v0  ;;  %v250_v35 = vld [vmem:[#allocation5 + $0x420] sm:$0xff] }
 0x21e   :  { %v8219_v17 = vpop.f32.mrf.mxu0  ;;  %1543 = vmatmul.mubr.f32.gmra.mxu0 %v7730_v12 }
 0x21f   :  { %11887 = vst [vmem:[#allocation159_spill] sm:$0xff] %v8219_v17  ;;  %1548 = vmatprep.mubr.f32.mxu0 %v11633_v0  ;;  %v251_v17 = vld [vmem:[#allocation5 + $0x428] sm:$0xff] }
 0x220   :  { %v8223_v37 = vpop.f32.mrf.mxu0  ;;  %914 = vmatmul.mubr.f32.gmra.mxu1 %v8235_v25 }
 0x221   :  { %11888 = vst [vmem:[#allocation160_spill] sm:$0xff] %v8223_v37  ;;  %919 = vmatprep.mubr.f32.mxu1 %v11633_v0 }
 0x222   :  { %v8229_v24 = vpop.f32.mrf.mxu0  ;;  %1549 = vmatmul.mubr.f32.gmra.mxu0 %v11890_v16 }
 0x223   :  { %11889 = vst [vmem:[#allocation161_spill] sm:$0xff] %v8229_v24  ;;  %1554 = vmatprep.mubr.f32.mxu0 %v11633_v0 }
 0x224   :  { %v8233_v31 = vpop.f32.mrf.mxu0  ;;  %920 = vmatmul.mubr.f32.gmra.mxu1 %v8245_v10 }
 0x225   :  { %11891 = vst [vmem:[#allocation23_spill] sm:$0xff] %v8233_v31  ;;  %925 = vmatprep.mubr.f32.mxu1 %v11633_v0 }
 0x226   :  { %v8239_v12 = vpop.f32.mrf.mxu0  ;;  %1555 = vmatmul.mubr.f32.gmra.mxu0 %v11893_v32 }
 0x227   :  { %11892 = vst [vmem:[#allocation162_spill] sm:$0xff] %v8239_v12  ;;  %1560 = vmatprep.mubr.f32.mxu0 %v11633_v0 }
 0x228   :  { %v8243_v28 = vpop.f32.mrf.mxu0  ;;  %926 = vmatmul.mubr.f32.gmra.mxu1 %v8255_v22 }
 0x229   :  { %11894 = vst [vmem:[#allocation26_spill] sm:$0xff] %v8243_v28  ;;  %931 = vmatprep.mubr.f32.mxu1 %v11633_v0 }
 0x22a   :  { %v8249_v16 = vpop.f32.mrf.mxu0  ;;  %1561 = vmatmul.mubr.f32.gmra.mxu0 %v11896_v13 }
 0x22b   :  { %11895 = vst [vmem:[#allocation163_spill] sm:$0xff] %v8249_v16  ;;  %1566 = vmatprep.mubr.f32.mxu0 %v11633_v0 }
 0x22c   :  { %v8253_v26 = vpop.f32.mrf.mxu0  ;;  %932 = vmatmul.mubr.f32.gmra.mxu1 %v8265_v2 }
 0x22d   :  { %11897 = vst [vmem:[#allocation29_spill] sm:$0xff] %v8253_v26  ;;  %937 = vmatprep.mubr.f32.mxu1 %v11633_v0 }
 0x22e   :  { %v8259_v32 = vpop.f32.mrf.mxu0  ;;  %1567 = vmatmul.mubr.f32.gmra.mxu0 %v11899_v15 }
 0x22f   :  { %11898 = vst [vmem:[#allocation164_spill] sm:$0xff] %v8259_v32  ;;  %1572 = vmatprep.mubr.f32.mxu0 %v11633_v0 }
 0x230   :  { %v8263_v19 = vpop.f32.mrf.mxu0  ;;  %938 = vmatmul.mubr.f32.gmra.mxu1 %v8275_v4 }
 0x231   :  { %11900 = vst [vmem:[#allocation32_spill] sm:$0xff] %v8263_v19  ;;  %943 = vmatprep.mubr.f32.mxu1 %v11633_v0 }
 0x232   :  { %v8269_v13 = vpop.f32.mrf.mxu0  ;;  %1573 = vmatmul.mubr.f32.gmra.mxu0 %v11902_v7 }
 0x233   :  { %11901 = vst [vmem:[#allocation165_spill] sm:$0xff] %v8269_v13  ;;  %1578 = vmatprep.mubr.f32.mxu0 %v11633_v0  ;;  %v8383_v13 = vld [vmem:[#allocation2 + $0x128] sm:$0xff] }
 0x234   :  { %v8273_v9 = vpop.f32.mrf.mxu0  ;;  %944 = vmatmul.mubr.f32.gmra.mxu1 %v8285_v3 }
 0x235   :  { %11903 = vst [vmem:[#allocation35_spill] sm:$0xff] %v8273_v9  ;;  %949 = vmatprep.mubr.f32.mxu1 %v11633_v0  ;;  %v8373_v9 = vld [vmem:[#allocation2 + $0x120] sm:$0xff] }
 0x236   :  { %v8279_v15 = vpop.f32.mrf.mxu0  ;;  %1579 = vmatmul.mubr.f32.gmra.mxu0 %v11905_v29 }
 0x237   :  { %11904 = vst [vmem:[#allocation166_spill] sm:$0xff] %v8279_v15  ;;  %1584 = vmatprep.mubr.f32.mxu0 %v11633_v0 }
 0x238   :  { %v8283_v1 = vpop.f32.mrf.mxu0  ;;  %950 = vmatmul.mubr.f32.gmra.mxu1 %v8295_v38 }
 0x239   :  { %11906 = vst [vmem:[#allocation38_spill] sm:$0xff] %v8283_v1  ;;  %955 = vmatprep.mubr.f32.mxu1 %v11633_v0 }
 0x23a   :  { %v8289_v7 = vpop.f32.mrf.mxu0  ;;  %1585 = vmatmul.mubr.f32.gmra.mxu0 %v11908_v61 }
 0x23b   :  { %11907 = vst [vmem:[#allocation167_spill] sm:$0xff] %v8289_v7  ;;  %1590 = vmatprep.mubr.f32.mxu0 %v11633_v0 }
 0x23c   :  { %v8293_v5 = vpop.f32.mrf.mxu0  ;;  %956 = vmatmul.mubr.f32.gmra.mxu1 %v8305_v48 }
 0x23d   :  { %11909 = vst [vmem:[#allocation41_spill] sm:$0xff] %v8293_v5  ;;  %961 = vmatprep.mubr.f32.mxu1 %v11633_v0  ;;  %v8353_v5 = vld [vmem:[#allocation2 + $0x28] sm:$0xff] }
 0x23e   :  { %v8299_v29 = vpop.f32.mrf.mxu0  ;;  %1591 = vmatmul.mubr.f32.gmra.mxu0 %v11911_v11 }
 0x23f   :  { %11910 = vst [vmem:[#allocation168_spill] sm:$0xff] %v8299_v29  ;;  %1596 = vmatprep.mubr.f32.mxu0 %v11633_v0  ;;  %v8367_v29 = vld [vmem:[#allocation2 + $0x38] sm:$0xff] }
 0x240   :  { %v8303_v57 = vpop.f32.mrf.mxu0  ;;  %962 = vmatmul.mubr.f32.gmra.mxu1 %v8315_v23 }
 0x241   :  { %11912 = vst [vmem:[#allocation44_spill] sm:$0xff] %v8303_v57  ;;  %967 = vmatprep.mubr.f32.mxu1 %v11633_v0  ;;  %v8361_v57 = vld [vmem:[#allocation2 + $0x118] sm:$0xff] }
 0x242   :  { %v8309_v61 = vpop.f32.mrf.mxu0  ;;  %1597 = vmatmul.mubr.f32.gmra.mxu0 %v11914_v18 }
 0x243   :  { %11913 = vst [vmem:[#allocation169_spill] sm:$0xff] %v8309_v61  ;;  %1602 = vmatprep.mubr.f32.mxu0 %v11633_v0  ;;  %v8335_v61 = vld [vmem:[#allocation2 + $0x108] sm:$0xff] }
 0x244   :  { %v8313_v43 = vpop.f32.mrf.mxu0  ;;  %968 = vmatmul.mubr.f32.gmra.mxu1 %v8325_v63 }
 0x245   :  { %11915 = vst [vmem:[#allocation47_spill] sm:$0xff] %v8313_v43  ;;  %973 = vmatprep.mubr.f32.mxu1 %v11633_v0 }
 0x246   :  { %v8319_v11 = vpop.f32.mrf.mxu0  ;;  %1603 = vmatmul.mubr.f32.gmra.mxu0 %v7810_v30 }
 0x247   :  { %11916 = vst [vmem:[#allocation170_spill] sm:$0xff] %v8319_v11  ;;  %6638 = vmatprep.mubr.f32.mxu0 %v8013_v20  ;;  %v8347_v11 = vld [vmem:[#allocation2 + $0x110] sm:$0xff] }
 0x248   :  { %v8323_v33 = vpop.f32.mrf.mxu0  ;;  %974 = vmatmul.mubr.f32.gmra.mxu1 %v8335_v61 }
 0x249   :  { %11917 = vst [vmem:[#allocation171_spill] sm:$0xff] %v8323_v33  ;;  %979 = vmatprep.mubr.f32.mxu1 %v11633_v0  ;;  %v8342_v33 = vld [vmem:[#allocation2 + $0x20] sm:$0xff] }
 0x24a   :  { %v8329_v18 = vpop.f32.mrf.mxu0  ;;  %6639 = vmatmul.mubr.f32.vlgmr.msra.gmra.mxu0 %v8023_v34 }
 0x24b   :  { %11918 = vst [vmem:[#allocation172_spill] sm:$0xff] %v8329_v18  ;;  %6641 = vmatprep.mubr.f32.mxu0 %v8033_v14 }
 0x24c   :  { %v8333_v43 = vpop.f32.mrf.mxu0  ;;  %980 = vmatmul.mubr.f32.gmra.mxu1 %v8347_v11 }
 0x24d   :  { %11919 = vst [vmem:[#allocation173_spill] sm:$0xff] %v8333_v43  ;;  %985 = vmatprep.mubr.f32.mxu1 %v11633_v0 }
 0x24e   :  { %v8339_v30 = vpop.f32.mrf.mxu0  ;;  %6642 = vmatmul.mubr.f32.gmra.mxu0 %v8043_v21 }
 0x24f   :  { %11920 = vst [vmem:[#allocation174_spill] sm:$0xff] %v8339_v30  ;;  %6644 = vmatprep.mubr.f32.mxu0 %v8342_v33  ;;  %v8356_v30 = vld [vmem:[#allocation2 + $0x30] sm:$0xff] }
 0x250   :  { %v8345_v18 = vpop.f32.mrf.mxu0  ;;  %986 = vmatmul.mubr.f32.gmra.mxu1 %v8361_v57 }
 0x251   :  { %11921 = vst [vmem:[#allocation175_spill] sm:$0xff] %v8345_v18  ;;  %991 = vmatprep.mubr.f32.mxu1 %v11633_v0 }
 0x252   :  { %v8351_v43 = vpop.f32.mrf.mxu0  ;;  %6645 = vmatmul.mubr.f32.gmra.mxu0 %v8353_v5 }
 0x253   :  { %11922 = vst [vmem:[#allocation176_spill] sm:$0xff] %v8351_v43  ;;  %6647 = vmatprep.mubr.f32.mxu0 %v8356_v30 }
 0x254   :  { %v8359_v7 = vpop.f32.mrf.mxu0  ;;  %992 = vmatmul.mubr.f32.gmra.mxu1 %v8373_v9 }
 0x255   :  { %11923 = vst [vmem:[#allocation177_spill] sm:$0xff] %v8359_v7  ;;  %997 = vmatprep.mubr.f32.mxu1 %v11633_v0 }
 0x256   :  { %v8365_v18 = vpop.f32.mrf.mxu0  ;;  %6648 = vmatmul.mubr.f32.gmra.mxu0 %v8367_v29 }
 0x257   :  { %11924 = vst [vmem:[#allocation178_spill] sm:$0xff] %v8365_v18  ;;  %6650 = vmatprep.mubr.f32.mxu0 %v8085_v36 }
 0x258   :  { %v8371_v43 = vpop.f32.mrf.mxu0  ;;  %998 = vmatmul.mubr.f32.gmra.mxu1 %v8383_v13 }
 0x259   :  { %11925 = vst [vmem:[#allocation179_spill] sm:$0xff] %v8371_v43  ;;  %1003 = vmatprep.mubr.f32.mxu1 %v11633_v0 }
 0x25a   :  { %v8377_v7 = vpop.f32.mrf.mxu0  ;;  %6651 = vmatmul.mubr.f32.gmra.mxu0 %v8095_v58 }
 0x25b   :  { %11926 = vst [vmem:[#allocation180_spill] sm:$0xff] %v8377_v7  ;;  %6653 = vmatprep.mubr.f32.mxu0 %v8105_v44  ;;  %v8393_v7 = vld [vmem:[#allocation2 + $0x130] sm:$0xff] }
 0x25c   :  { %v8381_v18 = vpop.f32.mrf.mxu0  ;;  %1004 = vmatmul.mubr.f32.gmra.mxu1 %v8393_v7 }
 0x25d   :  { %11927 = vst [vmem:[#allocation181_spill] sm:$0xff] %v8381_v18  ;;  %1009 = vmatprep.mubr.f32.mxu1 %v11633_v0 }
 0x25e   :  { %v8387_v43 = vpop.f32.mrf.mxu0  ;;  %6654 = vmatmul.mubr.f32.gmra.mxu0 %v8115_v45 }
 0x25f   :  { %11928 = vst [vmem:[#allocation182_spill] sm:$0xff] %v8387_v43  ;;  %6656 = vmatprep.mubr.f32.mxu0 %v8125_v46  ;;  %v8403_v43 = vld [vmem:[#allocation2 + $0x138] sm:$0xff] }
 0x260   :  { %v8391_v1 = vpop.f32.mrf.mxu0  ;;  %1010 = vmatmul.mubr.f32.gmra.mxu1 %v8403_v43 }
 0x261   :  { %11929 = vst [vmem:[#allocation183_spill] sm:$0xff] %v8391_v1  ;;  %1015 = vmatprep.mubr.f32.mxu1 %v11633_v0 }
 0x262   :  { %v8397_v18 = vpop.f32.mrf.mxu0  ;;  %6657 = vmatmul.mubr.f32.gmra.mxu0 %v8135_v47 }
 0x263   :  { %11930 = vst [vmem:[#allocation184_spill] sm:$0xff] %v8397_v18  ;;  %6659 = vmatprep.mubr.f32.mxu0 %v8145_v49  ;;  %v8413_v18 = vld [vmem:[#allocation2 + $0x140] sm:$0xff] }
 0x264   :  { %v8401_v15 = vpop.f32.mrf.mxu0  ;;  %1016 = vmatmul.mubr.f32.gmra.mxu1 %v8413_v18 }
 0x265   :  { %11931 = vst [vmem:[#allocation185_spill] sm:$0xff] %v8401_v15  ;;  %1021 = vmatprep.mubr.f32.mxu1 %v11633_v0 }
 0x266   :  { %v8407_v1 = vpop.f32.mrf.mxu0  ;;  %6660 = vmatmul.mubr.f32.gmra.mxu0 %v8155_v50 }
 0x267   :  { %11932 = vst [vmem:[#allocation186_spill] sm:$0xff] %v8407_v1  ;;  %6662 = vmatprep.mubr.f32.mxu0 %v8165_v51  ;;  %v8423_v1 = vld [vmem:[#allocation2 + $0x148] sm:$0xff] }
 0x268   :  { %v8411_v26 = vpop.f32.mrf.mxu0  ;;  %1022 = vmatmul.mubr.f32.gmra.mxu1 %v8423_v1 }
 0x269   :  { %11933 = vst [vmem:[#allocation187_spill] sm:$0xff] %v8411_v26  ;;  %1027 = vmatprep.mubr.f32.mxu1 %v11633_v0 }
 0x26a   :  { %v8417_v15 = vpop.f32.mrf.mxu0  ;;  %6663 = vmatmul.mubr.f32.gmra.mxu0 %v8175_v52 }
 0x26b   :  { %11934 = vst [vmem:[#allocation188_spill] sm:$0xff] %v8417_v15  ;;  %6665 = vmatprep.mubr.f32.mxu0 %v8185_v59  ;;  %v8433_v15 = vld [vmem:[#allocation2 + $0x150] sm:$0xff] }
 0x26c   :  { %v8421_v16 = vpop.f32.mrf.mxu0  ;;  %1028 = vmatmul.mubr.f32.gmra.mxu1 %v8433_v15 }
 0x26d   :  { %11935 = vst [vmem:[#allocation189_spill] sm:$0xff] %v8421_v16  ;;  %1033 = vmatprep.mubr.f32.mxu1 %v11633_v0 }
 0x26e   :  { %v8427_v26 = vpop.f32.mrf.mxu0  ;;  %6666 = vmatmul.mubr.f32.gmra.mxu0 %v8195_v39 }
 0x26f   :  { %11936 = vst [vmem:[#allocation190_spill] sm:$0xff] %v8427_v26  ;;  %6668 = vmatprep.mubr.f32.mxu0 %v8205_v40  ;;  %v8443_v26 = vld [vmem:[#allocation2 + $0x158] sm:$0xff] }
 0x270   :  { %v8431_v19 = vpop.f32.mrf.mxu0  ;;  %1034 = vmatmul.mubr.f32.gmra.mxu1 %v8443_v26 }
 0x271   :  { %11937 = vst [vmem:[#allocation191_spill] sm:$0xff] %v8431_v19  ;;  %1039 = vmatprep.mubr.f32.mxu1 %v11633_v0 }
 0x272   :  { %v8437_v16 = vpop.f32.mrf.mxu0  ;;  %6669 = vmatmul.mubr.f32.gmra.mxu0 %v8215_v8 }
 0x273   :  { %11938 = vst [vmem:[#allocation192_spill] sm:$0xff] %v8437_v16  ;;  %6671 = vmatprep.mubr.f32.mxu0 %v8225_v27  ;;  %v8453_v16 = vld [vmem:[#allocation2 + $0x160] sm:$0xff] }
 0x274   :  { %v8441_v32 = vpop.f32.mrf.mxu0  ;;  %1040 = vmatmul.mubr.f32.gmra.mxu1 %v8453_v16 }
 0x275   :  { %11939 = vst [vmem:[#allocation193_spill] sm:$0xff] %v8441_v32  ;;  %1045 = vmatprep.mubr.f32.mxu1 %v11633_v0 }
 0x276   :  { %v8447_v19 = vpop.f32.mrf.mxu0  ;;  %6672 = vmatmul.mubr.f32.gmra.mxu0 %v8235_v25 }
 0x277   :  { %11940 = vst [vmem:[#allocation194_spill] sm:$0xff] %v8447_v19  ;;  %6674 = vmatprep.mubr.f32.mxu0 %v8245_v10  ;;  %v8463_v19 = vld [vmem:[#allocation2 + $0x168] sm:$0xff] }
 0x278   :  { %v8451_v31 = vpop.f32.mrf.mxu0  ;;  %1046 = vmatmul.mubr.f32.gmra.mxu1 %v8463_v19 }
 0x279   :  { %11941 = vst [vmem:[#allocation195_spill] sm:$0xff] %v8451_v31  ;;  %1051 = vmatprep.mubr.f32.mxu1 %v11633_v0 }
 0x27a   :  { %v8457_v32 = vpop.f32.mrf.mxu0  ;;  %6675 = vmatmul.mubr.f32.gmra.mxu0 %v8255_v22 }
 0x27b   :  { %11942 = vst [vmem:[#allocation196_spill] sm:$0xff] %v8457_v32  ;;  %6677 = vmatprep.mubr.f32.mxu0 %v8265_v2  ;;  %v8473_v32 = vld [vmem:[#allocation2 + $0x170] sm:$0xff] }
 0x27c   :  { %v8461_v24 = vpop.f32.mrf.mxu0  ;;  %1052 = vmatmul.mubr.f32.gmra.mxu1 %v8473_v32 }
 0x27d   :  { %11943 = vst [vmem:[#allocation197_spill] sm:$0xff] %v8461_v24  ;;  %1057 = vmatprep.mubr.f32.mxu1 %v11633_v0  ;;  %v8483_v24 = vld [vmem:[#allocation2 + $0x178] sm:$0xff] }
 0x27e   :  { %v8467_v10 = vpop.f32.mrf.mxu0  ;;  %6678 = vmatmul.mubr.f32.gmra.mxu0 %v8275_v4 }
 0x27f   :  { %11944 = vst [vmem:[#allocation198_spill] sm:$0xff] %v8467_v10  ;;  %6680 = vmatprep.mubr.f32.mxu0 %v8285_v3 }
 0x280   :  { %v8471_v31 = vpop.f32.mrf.mxu0  ;;  %1058 = vmatmul.mubr.f32.gmra.mxu1 %v8483_v24 }
 0x281   :  { %11945 = vst [vmem:[#allocation199_spill] sm:$0xff] %v8471_v31  ;;  %1063 = vmatprep.mubr.f32.mxu1 %v11633_v0 }
 0x282   :  { %v8477_v2 = vpop.f32.mrf.mxu0  ;;  %6681 = vmatmul.mubr.f32.gmra.mxu0 %v8295_v38  ;;  %v8495_v38 = vld [vmem:[#allocation2 + $0x180] sm:$0xff] }
 0x283   :  { %11946 = vst [vmem:[#allocation200_spill] sm:$0xff] %v8477_v2  ;;  %6683 = vmatprep.mubr.f32.mxu0 %v8305_v48 }
 0x284   :  { %v8481_v22 = vpop.f32.mrf.mxu0  ;;  %v8493_v2 = vpop.f32.mrf.mxu1  ;;  %1064 = vmatmul.mubr.f32.gmra.mxu1 %v8495_v38 }
 0x285   :  { %11947 = vst [vmem:[#allocation201_spill] sm:$0xff] %v8481_v22  ;;  %11950 = vst [vmem:[#allocation204_spill] sm:$0xff] %v8493_v2  ;;  %1069 = vmatprep.mubr.f32.mxu1 %v11633_v0 }
 0x286   :  { %v8487_v3 = vpop.f32.mrf.mxu0  ;;  %6684 = vmatmul.mubr.f32.gmra.mxu0 %v8315_v23  ;;  %v8502_v22 = vpop.f32.mrf.mxu1 }
 0x287   :  { %11948 = vst [vmem:[#allocation202_spill] sm:$0xff] %v8487_v3  ;;  %6686 = vmatprep.mubr.f32.mxu0 %v8325_v63  ;;  %11952 = vst [vmem:[#allocation206_spill] sm:$0xff] %v8502_v22  ;;  %v7341_v22 = vld [vmem:[#allocation2 + $0x148] sm:$0xff] }
 0x288   :  { %v8491_v4 = vpop.f32.mrf.mxu0  ;;  %v8507_v63 = vpop.f32.mrf.mxu1 }
 0x289   :  { %11949 = vst [vmem:[#allocation203_spill] sm:$0xff] %v8491_v4  ;;  %11954 = vst [vmem:[#allocation208_spill] sm:$0xff] %v8507_v63  ;;  %v8509_v4 = vld [vmem:[#allocation2 + $0x188] sm:$0xff] }
 0x28a   :  { %v8499_v48 = vpop.f32.mrf.mxu0  ;;  %6687 = vmatmul.mubr.f32.gmra.mxu0 %v8335_v61  ;;  %1070 = vmatmul.mubr.f32.gmra.mxu1 %v8509_v4 }
 0x28b   :  { %11951 = vst [vmem:[#allocation205_spill] sm:$0xff] %v8499_v48  ;;  %6689 = vmatprep.mubr.f32.mxu0 %v8347_v11  ;;  %1075 = vmatprep.mubr.f32.mxu1 %v11633_v0  ;;  %v8516_v48 = vpop.f32.mrf.mxu1 }
 0x28c   :  { %v8505_v23 = vpop.f32.mrf.mxu0  ;;  %11956 = vst [vmem:[#allocation210_spill] sm:$0xff] %v8516_v48  ;;  %v7343_v48 = vld [vmem:[#allocation2 + $0x158] sm:$0xff] }
 0x28d   :  { %11953 = vst [vmem:[#allocation207_spill] sm:$0xff] %v8505_v23  ;;  %v8521_v11 = vpop.f32.mrf.mxu1  ;;  %v8523_v23 = vld [vmem:[#allocation2 + $0x190] sm:$0xff] }
 0x28e   :  { %v8513_v3 = vpop.f32.mrf.mxu0  ;;  %6690 = vmatmul.mubr.f32.gmra.mxu0 %v8361_v57  ;;  %11958 = vst [vmem:[#allocation212_spill] sm:$0xff] %v8521_v11  ;;  %1076 = vmatmul.mubr.f32.gmra.mxu1 %v8523_v23  ;;  %v7339_v11 = vld [vmem:[#allocation2 + $0x138] sm:$0xff] }
 0x28f   :  { %11955 = vst [vmem:[#allocation209_spill] sm:$0xff] %v8513_v3  ;;  %6692 = vmatprep.mubr.f32.mxu0 %v8373_v9  ;;  %1081 = vmatprep.mubr.f32.mxu1 %v11633_v0  ;;  %v8530_v3 = vpop.f32.mrf.mxu1 }
 0x290   :  { %v8519_v61 = vpop.f32.mrf.mxu0  ;;  %11960 = vst [vmem:[#allocation214_spill] sm:$0xff] %v8530_v3 }
 0x291   :  { %11957 = vst [vmem:[#allocation211_spill] sm:$0xff] %v8519_v61  ;;  %v8535_v9 = vpop.f32.mrf.mxu1  ;;  %v8537_v61 = vld [vmem:[#allocation2 + $0x198] sm:$0xff] }
 0x292   :  { %v8527_v31 = vpop.f32.mrf.mxu0  ;;  %6693 = vmatmul.mubr.f32.gmra.mxu0 %v8383_v13  ;;  %11962 = vst [vmem:[#allocation216_spill] sm:$0xff] %v8535_v9  ;;  %1082 = vmatmul.mubr.f32.gmra.mxu1 %v8537_v61 }
 0x293   :  { %11959 = vst [vmem:[#allocation213_spill] sm:$0xff] %v8527_v31  ;;  %6695 = vmatprep.mubr.f32.mxu0 %v8393_v7  ;;  %1087 = vmatprep.mubr.f32.mxu1 %v11633_v0  ;;  %v8544_v31 = vpop.f32.mrf.mxu1 }
 0x294   :  { %v8533_v57 = vpop.f32.mrf.mxu0  ;;  %11964 = vst [vmem:[#allocation218_spill] sm:$0xff] %v8544_v31  ;;  %v7338_v31 = vld [vmem:[#allocation2 + $0x130] sm:$0xff] }
 0x295   :  { %11961 = vst [vmem:[#allocation215_spill] sm:$0xff] %v8533_v57  ;;  %v8549_v7 = vpop.f32.mrf.mxu1  ;;  %v8551_v57 = vld [vmem:[#allocation2 + $0x1a0] sm:$0xff] }
 0x296   :  { %v8541_v10 = vpop.f32.mrf.mxu0  ;;  %6696 = vmatmul.mubr.f32.gmra.mxu0 %v8403_v43  ;;  %11966 = vst [vmem:[#allocation220_spill] sm:$0xff] %v8549_v7  ;;  %1088 = vmatmul.mubr.f32.gmra.mxu1 %v8551_v57 }
 0x297   :  { %11963 = vst [vmem:[#allocation217_spill] sm:$0xff] %v8541_v10  ;;  %6698 = vmatprep.mubr.f32.mxu0 %v8413_v18  ;;  %1093 = vmatprep.mubr.f32.mxu1 %v11633_v0  ;;  %v8558_v10 = vpop.f32.mrf.mxu1 }
 0x298   :  { %v8547_v13 = vpop.f32.mrf.mxu0  ;;  %11968 = vst [vmem:[#allocation222_spill] sm:$0xff] %v8558_v10  ;;  %v7335_v10 = vld [vmem:[#allocation2 + $0x118] sm:$0xff] }
 0x299   :  { %11965 = vst [vmem:[#allocation219_spill] sm:$0xff] %v8547_v13  ;;  %v8563_v18 = vpop.f32.mrf.mxu1  ;;  %v8565_v13 = vld [vmem:[#allocation2 + $0x1a8] sm:$0xff] }
 0x29a   :  { %v8555_v28 = vpop.f32.mrf.mxu0  ;;  %6699 = vmatmul.mubr.f32.gmra.mxu0 %v8423_v1  ;;  %11970 = vst [vmem:[#allocation224_spill] sm:$0xff] %v8563_v18  ;;  %1094 = vmatmul.mubr.f32.gmra.mxu1 %v8565_v13 }
 0x29b   :  { %11967 = vst [vmem:[#allocation221_spill] sm:$0xff] %v8555_v28  ;;  %6701 = vmatprep.mubr.f32.mxu0 %v8433_v15  ;;  %1099 = vmatprep.mubr.f32.mxu1 %v11633_v0  ;;  %v8572_v28 = vpop.f32.mrf.mxu1 }
 0x29c   :  { %v8561_v43 = vpop.f32.mrf.mxu0  ;;  %11972 = vst [vmem:[#allocation226_spill] sm:$0xff] %v8572_v28 }
 0x29d   :  { %11969 = vst [vmem:[#allocation223_spill] sm:$0xff] %v8561_v43  ;;  %v8577_v15 = vpop.f32.mrf.mxu1  ;;  %v8579_v43 = vld [vmem:[#allocation2 + $0x1b0] sm:$0xff] }
 0x29e   :  { %v8569_v12 = vpop.f32.mrf.mxu0  ;;  %6702 = vmatmul.mubr.f32.gmra.mxu0 %v8443_v26  ;;  %11974 = vst [vmem:[#allocation228_spill] sm:$0xff] %v8577_v15  ;;  %1100 = vmatmul.mubr.f32.gmra.mxu1 %v8579_v43 }
 0x29f   :  { %11971 = vst [vmem:[#allocation225_spill] sm:$0xff] %v8569_v12  ;;  %6704 = vmatprep.mubr.f32.mxu0 %v8453_v16  ;;  %1105 = vmatprep.mubr.f32.mxu1 %v11633_v0  ;;  %v8586_v12 = vpop.f32.mrf.mxu1 }
 0x2a0   :  { %v8575_v1 = vpop.f32.mrf.mxu0  ;;  %11976 = vst [vmem:[#allocation230_spill] sm:$0xff] %v8586_v12  ;;  %v259_v12 = vld [vmem:[#allocation5 + $0x468] sm:$0xff] }
 0x2a1   :  { %11973 = vst [vmem:[#allocation227_spill] sm:$0xff] %v8575_v1  ;;  %v8591_v16 = vpop.f32.mrf.mxu1  ;;  %v8593_v1 = vld [vmem:[#allocation2 + $0x1b8] sm:$0xff] }
 0x2a2   :  { %v8583_v37 = vpop.f32.mrf.mxu0  ;;  %6705 = vmatmul.mubr.f32.gmra.mxu0 %v8463_v19  ;;  %11978 = vst [vmem:[#allocation232_spill] sm:$0xff] %v8591_v16  ;;  %1106 = vmatmul.mubr.f32.gmra.mxu1 %v8593_v1  ;;  %v260_v19 = vld [vmem:[#allocation5 + $0x470] sm:$0xff]  ;;  %v7316_v16 = vld [vmem:[#allocation2 + $0x1c0] sm:$0xff] }
 0x2a3   :  { %11975 = vst [vmem:[#allocation229_spill] sm:$0xff] %v8583_v37  ;;  %6707 = vmatprep.mubr.f32.mxu0 %v8473_v32  ;;  %1111 = vmatprep.mubr.f32.mxu1 %v11633_v0  ;;  %v8600_v37 = vpop.f32.mrf.mxu1 }
 0x2a4   :  { %v8589_v26 = vpop.f32.mrf.mxu0  ;;  %11980 = vst [vmem:[#allocation234_spill] sm:$0xff] %v8600_v37  ;;  %1609 = vmatprep.subr.mxu1 %v260_v19  ;;  %v241_v19 = vld [vmem:[#allocation5 + $0x3d8] sm:$0xff]  ;;  %v7317_v37 = vld [vmem:[#allocation2 + $0x1c8] sm:$0xff] }
 0x2a5   :  { %11977 = vst [vmem:[#allocation231_spill] sm:$0xff] %v8589_v26  ;;  %v8605_v26 = vpop.f32.mrf.mxu1  ;;  %1610 = vmatpush1.msra.mxu1 %v259_v12  ;;  %v233_v12 = vld [vmem:[#allocation5 + $0x398] sm:$0xff] }
 0x2a6   :  { %v8597_v15 = vpop.f32.mrf.mxu0  ;;  %6708 = vmatmul.mubr.f32.gmra.mxu0 %v8483_v24  ;;  %11982 = vst [vmem:[#allocation236_spill] sm:$0xff] %v8605_v26  ;;  %1112 = vmatmul.mubr.f32.gmra.mxu1 %v7316_v16 }
 0x2a7   :  { %11979 = vst [vmem:[#allocation233_spill] sm:$0xff] %v8597_v15  ;;  %6710 = vmatprep.mubr.f32.mxu0 %v8495_v38  ;;  %1117 = vmatprep.mubr.f32.mxu1 %v11633_v0  ;;  %v8611_v24 = vpop.f32.mrf.mxu1  ;;  %v242_v38 = vld [vmem:[#allocation5 + $0x3e0] sm:$0xff]  ;;  %v232_v0 = vld [vmem:[#allocation5 + $0x390] sm:$0xff] }
 0x2a8   :  { %v8603_v32 = vpop.f32.mrf.mxu0  ;;  %11984 = vst [vmem:[#allocation238_spill] sm:$0xff] %v8611_v24  ;;  %1611 = vmatprep.subr.mxu1 %v251_v17  ;;  %v7318_v24 = vld [vmem:[#allocation2 + $0x1d0] sm:$0xff] }
 0x2a9   :  { %11981 = vst [vmem:[#allocation235_spill] sm:$0xff] %v8603_v32  ;;  %1612 = vmatpush1.msra.mxu1 %v250_v35  ;;  %v8616_v26 = vpop.f32.mrf.mxu1  ;;  %v224_v35 = vld [vmem:[#allocation5 + $0x350] sm:$0xff] }
 0x2aa   :  { %v8608_v15 = vpop.f32.mrf.mxu0  ;;  %6711 = vmatmul.mubr.f32.gmra.mxu0 %v8509_v4  ;;  %11986 = vst [vmem:[#allocation240_spill] sm:$0xff] %v8616_v26  ;;  %1118 = vmatmul.mubr.f32.gmra.mxu1 %v7317_v37  ;;  %v214_v26 = vld [vmem:[#allocation5 + $0x300] sm:$0xff] }
 0x2ab   :  { %11983 = vst [vmem:[#allocation237_spill] sm:$0xff] %v8608_v15  ;;  %6713 = vmatprep.mubr.f32.mxu0 %v8523_v23  ;;  %1613 = vmatprep.subr.mxu1 %v242_v38  ;;  %v11987_v15 = vmov 0.0   ;;  %v8622_v17 = vpop.f32.mrf.mxu1  ;;  %v223_v23 = vld [vmem:[#allocation5 + $0x348] sm:$0xff] }
 0x2ac   :  { %v8614_v32 = vpop.f32.mrf.mxu0  ;;  %1614 = vmatpush1.msra.mxu1 %v241_v19  ;;  %1123 = vmatprep.mubr.f32.mxu1 %v11987_v15  ;;  %11989 = vst [vmem:[#allocation242_spill] sm:$0xff] %v8622_v17  ;;  %v215_v19 = vld [vmem:[#allocation5 + $0x308] sm:$0xff] }
 0x2ad   :  { %11985 = vst [vmem:[#allocation239_spill] sm:$0xff] %v8614_v32  ;;  %1615 = vmatprep.subr.mxu1 %v233_v12  ;;  %v8627_v38 = vpop.f32.mrf.mxu1  ;;  %v7333_v17 = vld [vmem:[#allocation2 + $0x108] sm:$0xff] }
 0x2ae   :  { %v8619_v4 = vpop.f32.mrf.mxu0  ;;  %6714 = vmatmul.mubr.f32.gmra.mxu0 %v8537_v61  ;;  %1616 = vmatpush1.msra.mxu1 %v232_v0  ;;  %11991 = vst [vmem:[#allocation244_spill] sm:$0xff] %v8627_v38  ;;  %v206_v0 = vld [vmem:[#allocation5 + $0x2c0] sm:$0xff]  ;;  %v196_v38 = vld [vmem:[#allocation5 + $0x270] sm:$0xff] }
 0x2af   :  { %11988 = vst [vmem:[#allocation241_spill] sm:$0xff] %v8619_v4  ;;  %6716 = vmatprep.mubr.f32.mxu0 %v8551_v57  ;;  %1124 = vmatmul.mubr.f32.gmra.mxu1 %v7318_v24  ;;  %v8633_v12 = vpop.f32.mrf.mxu1  ;;  %v205_v57 = vld [vmem:[#allocation5 + $0x2b8] sm:$0xff] }
 0x2b0   :  { %v8625_v32 = vpop.f32.mrf.mxu0  ;;  %1617 = vmatprep.subr.mxu1 %v224_v35  ;;  %1129 = vmatprep.mubr.f32.mxu1 %v11987_v15  ;;  %11993 = vst [vmem:[#allocation246_spill] sm:$0xff] %v8633_v12  ;;  %v7319_v4 = vld [vmem:[#allocation2 + $0x1d8] sm:$0xff]  ;;  %v178_v12 = vld [vmem:[#allocation5 + $0x1e0] sm:$0xff] }
 0x2b1   :  { %11990 = vst [vmem:[#allocation243_spill] sm:$0xff] %v8625_v32  ;;  %1618 = vmatpush1.msra.mxu1 %v223_v23  ;;  %v8638_v35 = vpop.f32.mrf.mxu1  ;;  %v197_v23 = vld [vmem:[#allocation5 + $0x278] sm:$0xff] }
 0x2b2   :  { %v8630_v61 = vpop.f32.mrf.mxu0  ;;  %6717 = vmatmul.mubr.f32.gmra.mxu0 %v8565_v13  ;;  %1619 = vmatprep.subr.mxu1 %v215_v19  ;;  %11995 = vst [vmem:[#allocation248_spill] sm:$0xff] %v8638_v35 }
 0x2b3   :  { %11992 = vst [vmem:[#allocation245_spill] sm:$0xff] %v8630_v61  ;;  %6719 = vmatprep.mubr.f32.mxu0 %v8579_v43  ;;  %1620 = vmatpush1.msra.mxu1 %v214_v26  ;;  %v8644_v19 = vpop.f32.mrf.mxu1  ;;  %v188_v43 = vld [vmem:[#allocation5 + $0x230] sm:$0xff]  ;;  %v187_v26 = vld [vmem:[#allocation5 + $0x228] sm:$0xff] }
 0x2b4   :  { %v8636_v32 = vpop.f32.mrf.mxu0  ;;  %1130 = vmatmul.mubr.f32.gmra.mxu1 %v7319_v4  ;;  %1621 = vmatprep.subr.mxu1 %v206_v0  ;;  %11997 = vst [vmem:[#allocation250_spill] sm:$0xff] %v8644_v19  ;;  %v7320_v0 = vld [vmem:[#allocation2 + $0x1e0] sm:$0xff] }
 0x2b5   :  { %11994 = vst [vmem:[#allocation247_spill] sm:$0xff] %v8636_v32  ;;  %1622 = vmatpush1.msra.mxu1 %v205_v57  ;;  %1135 = vmatprep.mubr.f32.mxu1 %v11987_v15  ;;  %v8648_v61 = vpop.f32.mrf.mxu1  ;;  %v179_v57 = vld [vmem:[#allocation5 + $0x1e8] sm:$0xff]  ;;  %v7332_v19 = vld [vmem:[#allocation2 + $0x100] sm:$0xff] }
 0x2b6   :  { %v8641_v13 = vpop.f32.mrf.mxu0  ;;  %6720 = vmatmul.mubr.f32.gmra.mxu0 %v8593_v1  ;;  %1623 = vmatprep.subr.mxu1 %v197_v23  ;;  %11999 = vst [vmem:[#allocation252_spill] sm:$0xff] %v8648_v61  ;;  %v160_v61 = vld [vmem:[#allocation5 + $0x150] sm:$0xff] }
 0x2b7   :  { %11996 = vst [vmem:[#allocation249_spill] sm:$0xff] %v8641_v13  ;;  %6722 = vmatprep.mubr.f32.mxu0 %v7316_v16  ;;  %1624 = vmatpush1.msra.mxu1 %v196_v38  ;;  %v8653_v23 = vpop.f32.mrf.mxu1  ;;  %v170_v16 = vld [vmem:[#allocation5 + $0x1a0] sm:$0xff]  ;;  %v169_v38 = vld [vmem:[#allocation5 + $0x198] sm:$0xff] }
 0x2b8   :  { %v8646_v32 = vpop.f32.mrf.mxu0  ;;  %1136 = vmatmul.mubr.f32.gmra.mxu1 %v7320_v0  ;;  %1625 = vmatprep.subr.mxu1 %v188_v43  ;;  %12001 = vst [vmem:[#allocation254_spill] sm:$0xff] %v8653_v23  ;;  %v7321_v43 = vld [vmem:[#allocation2 + $0x1e8] sm:$0xff]  ;;  %v142_v23 = vld [vmem:[#allocation5 + $0xc0] sm:$0xff] }
 0x2b9   :  { %11998 = vst [vmem:[#allocation251_spill] sm:$0xff] %v8646_v32  ;;  %1626 = vmatpush1.msra.mxu1 %v187_v26  ;;  %1141 = vmatprep.mubr.f32.mxu1 %v11987_v15  ;;  %v8657_v13 = vpop.f32.mrf.mxu1  ;;  %v161_v26 = vld [vmem:[#allocation5 + $0x158] sm:$0xff] }
 0x2ba   :  { %v8651_v1 = vpop.f32.mrf.mxu0  ;;  %6723 = vmatmul.mubr.f32.gmra.mxu0 %v7317_v37  ;;  %1627 = vmatprep.subr.mxu1 %v179_v57  ;;  %12003 = vst [vmem:[#allocation256_spill] sm:$0xff] %v8657_v13 }
 0x2bb   :  { %12000 = vst [vmem:[#allocation253_spill] sm:$0xff] %v8651_v1  ;;  %6725 = vmatprep.mubr.f32.mxu0 %v7318_v24  ;;  %1628 = vmatpush1.msra.mxu1 %v178_v12  ;;  %v8662_v57 = vpop.f32.mrf.mxu1  ;;  %v152_v24 = vld [vmem:[#allocation5 + $0x110] sm:$0xff]  ;;  %v151_v12 = vld [vmem:[#allocation5 + $0x108] sm:$0xff] }
 0x2bc   :  { %v8655_v32 = vpop.f32.mrf.mxu0  ;;  %1142 = vmatmul.mubr.f32.gmra.mxu1 %v7321_v43  ;;  %1629 = vmatprep.subr.mxu1 %v170_v16  ;;  %12005 = vst [vmem:[#allocation258_spill] sm:$0xff] %v8662_v57  ;;  %v7322_v16 = vld [vmem:[#allocation2 + $0x1f0] sm:$0xff]  ;;  %v7331_v57 = vld [vmem:[#allocation2 + $0xf8] sm:$0xff] }
 0x2bd   :  { %12002 = vst [vmem:[#allocation255_spill] sm:$0xff] %v8655_v32  ;;  %1630 = vmatpush1.msra.mxu1 %v169_v38  ;;  %1147 = vmatprep.mubr.f32.mxu1 %v11987_v15  ;;  %v8666_v1 = vpop.f32.mrf.mxu1  ;;  %v143_v38 = vld [vmem:[#allocation5 + $0xc8] sm:$0xff] }
 0x2be   :  { %v8660_v37 = vpop.f32.mrf.mxu0  ;;  %6726 = vmatmul.mubr.f32.gmra.mxu0 %v7319_v4  ;;  %1631 = vmatprep.subr.mxu1 %v161_v26  ;;  %12007 = vst [vmem:[#allocation260_spill] sm:$0xff] %v8666_v1  ;;  %v124_v1 = vld [vmem:[#allocation5 + $0x30] sm:$0xff] }
 0x2bf   :  { %12004 = vst [vmem:[#allocation257_spill] sm:$0xff] %v8660_v37  ;;  %6728 = vmatprep.mubr.f32.mxu0 %v7320_v0  ;;  %1632 = vmatpush1.msra.mxu1 %v160_v61  ;;  %v8671_v26 = vpop.f32.mrf.mxu1  ;;  %v134_v0 = vld [vmem:[#allocation5 + $0x80] sm:$0xff]  ;;  %v133_v61 = vld [vmem:[#allocation5 + $0x78] sm:$0xff] }
 0x2c0   :  { %v8664_v32 = vpop.f32.mrf.mxu0  ;;  %1148 = vmatmul.mubr.f32.gmra.mxu1 %v7322_v16  ;;  %1633 = vmatprep.subr.mxu1 %v152_v24  ;;  %12009 = vst [vmem:[#allocation262_spill] sm:$0xff] %v8671_v26  ;;  %v7323_v24 = vld [vmem:[#allocation2 + $0x1f8] sm:$0xff] }
 0x2c1   :  { %12006 = vst [vmem:[#allocation259_spill] sm:$0xff] %v8664_v32  ;;  %1634 = vmatpush1.msra.mxu1 %v151_v12  ;;  %1153 = vmatprep.mubr.f32.mxu1 %v11987_v15  ;;  %v8675_v37 = vpop.f32.mrf.mxu1  ;;  %v125_v12 = vld [vmem:[#allocation5 + $0x38] sm:$0xff] }
 0x2c2   :  { %v8669_v4 = vpop.f32.mrf.mxu0  ;;  %6729 = vmatmul.mubr.f32.gmra.mxu0 %v7321_v43  ;;  %1635 = vmatprep.subr.mxu1 %v143_v38  ;;  %12011 = vst [vmem:[#allocation264_spill] sm:$0xff] %v8675_v37 }
 0x2c3   :  { %12008 = vst [vmem:[#allocation261_spill] sm:$0xff] %v8669_v4  ;;  %6731 = vmatprep.mubr.f32.mxu0 %v7322_v16  ;;  %1636 = vmatpush1.msra.mxu1 %v142_v23  ;;  %v8680_v38 = vpop.f32.mrf.mxu1 }
 0x2c4   :  { %v8673_v32 = vpop.f32.mrf.mxu0  ;;  %1154 = vmatmul.mubr.f32.gmra.mxu1 %v7323_v24  ;;  %1637 = vmatprep.subr.mxu1 %v134_v0  ;;  %12013 = vst [vmem:[#allocation266_spill] sm:$0xff] %v8680_v38  ;;  %v7330_v38 = vld [vmem:[#allocation2 + $0xf0] sm:$0xff] }
 0x2c5   :  { %12010 = vst [vmem:[#allocation263_spill] sm:$0xff] %v8673_v32  ;;  %1638 = vmatpush1.msra.mxu1 %v133_v61  ;;  %1673 = vmatprep.mubr.f32.mxu1 %v11987_v15  ;;  %v8685_v16 = vpop.f32.mrf.mxu1 }
 0x2c6   :  { %v8678_v43 = vpop.f32.mrf.mxu0  ;;  %6732 = vmatmul.mubr.f32.gmra.mxu0 %v7323_v24  ;;  %1639 = vmatprep.subr.mxu1 %v125_v12  ;;  %12015 = vst [vmem:[#allocation268_spill] sm:$0xff] %v8685_v16  ;;  %v7328_v16 = vld [vmem:[#allocation2 + $0xe0] sm:$0xff] }
 0x2c7   :  { %12012 = vst [vmem:[#allocation265_spill] sm:$0xff] %v8678_v43  ;;  %1640 = vmatpush1.msra.mxu1 %v124_v1  ;;  %5120 = vmatprep.mubr.f32.mxu0 %v11987_v15  ;;  %v8691_v61 = vpop.f32.mrf.mxu1 }
 0x2c8   :  { %v8683_v23 = vpop.f32.mrf.mxu0  ;;  %1674 = vmatmul.mubr.f32.vlgmr.msra.gmra.mxu1 %v8013_v20  ;;  %12017 = vst [vmem:[#allocation270_spill] sm:$0xff] %v8691_v61 }
 0x2c9   :  { %12014 = vst [vmem:[#allocation267_spill] sm:$0xff] %v8683_v23  ;;  %1679 = vmatprep.mubr.f32.mxu1 %v11987_v15  ;;  %v8695_v24 = vpop.f32.mrf.mxu1 }
 0x2ca   :  { %v8689_v0 = vpop.f32.mrf.mxu0  ;;  %12019 = vst [vmem:[#allocation272_spill] sm:$0xff] %v8695_v24  ;;  %v7329_v24 = vld [vmem:[#allocation2 + $0xe8] sm:$0xff] }
 0x2cb   :  { %12016 = vst [vmem:[#allocation269_spill] sm:$0xff] %v8689_v0  ;;  %v8701_v12 = vpop.f32.mrf.mxu1 }
 0x2cc   :  { %v8693_v32 = vpop.f32.mrf.mxu0  ;;  %1680 = vmatmul.mubr.f32.gmra.mxu1 %v8023_v34  ;;  %12021 = vst [vmem:[#allocation274_spill] sm:$0xff] %v8701_v12 }
 0x2cd   :  { %12018 = vst [vmem:[#allocation271_spill] sm:$0xff] %v8693_v32  ;;  %1685 = vmatprep.mubr.f32.mxu1 %v11987_v15  ;;  %v8705_v20 = vpop.f32.mrf.mxu1 }
 0x2ce   :  { %v8699_v1 = vpop.f32.mrf.mxu0  ;;  %12023 = vst [vmem:[#allocation276_spill] sm:$0xff] %v8705_v20  ;;  %v7326_v20 = vld [vmem:[#allocation2 + $0xd0] sm:$0xff] }
 0x2cf   :  { %12020 = vst [vmem:[#allocation273_spill] sm:$0xff] %v8699_v1  ;;  %v8711_v32 = vpop.f32.mrf.mxu1 }
 0x2d0   :  { %v8703_v4 = vpop.f32.mrf.mxu0  ;;  %1686 = vmatmul.mubr.f32.gmra.mxu1 %v8033_v14  ;;  %12025 = vst [vmem:[#allocation278_spill] sm:$0xff] %v8711_v32 }
 0x2d1   :  { %12022 = vst [vmem:[#allocation275_spill] sm:$0xff] %v8703_v4  ;;  %1691 = vmatprep.mubr.f32.mxu1 %v11987_v15  ;;  %v8715_v34 = vpop.f32.mrf.mxu1 }
 0x2d2   :  { %v8709_v0 = vpop.f32.mrf.mxu0  ;;  %12027 = vst [vmem:[#allocation280_spill] sm:$0xff] %v8715_v34  ;;  %v7327_v34 = vld [vmem:[#allocation2 + $0xd8] sm:$0xff] }
 0x2d3   :  { %12024 = vst [vmem:[#allocation277_spill] sm:$0xff] %v8709_v0  ;;  %v8721_v4 = vpop.f32.mrf.mxu1 }
 0x2d4   :  { %v8713_v23 = vpop.f32.mrf.mxu0  ;;  %1692 = vmatmul.mubr.f32.gmra.mxu1 %v8043_v21  ;;  %12029 = vst [vmem:[#allocation282_spill] sm:$0xff] %v8721_v4 }
 0x2d5   :  { %12026 = vst [vmem:[#allocation279_spill] sm:$0xff] %v8713_v23  ;;  %1697 = vmatprep.mubr.f32.mxu1 %v11987_v15  ;;  %v8725_v14 = vpop.f32.mrf.mxu1 }
 0x2d6   :  { %v8719_v1 = vpop.f32.mrf.mxu0  ;;  %12031 = vst [vmem:[#allocation284_spill] sm:$0xff] %v8725_v14 }
 0x2d7   :  { %12028 = vst [vmem:[#allocation281_spill] sm:$0xff] %v8719_v1  ;;  %v8731_v23 = vpop.f32.mrf.mxu1 }
 0x2d8   :  { %v8723_v43 = vpop.f32.mrf.mxu0  ;;  %1698 = vmatmul.mubr.f32.gmra.mxu1 %v8342_v33  ;;  %12033 = vst [vmem:[#allocation286_spill] sm:$0xff] %v8731_v23 }
 0x2d9   :  { %12030 = vst [vmem:[#allocation283_spill] sm:$0xff] %v8723_v43  ;;  %1703 = vmatprep.mubr.f32.mxu1 %v11987_v15  ;;  %v8735_v21 = vpop.f32.mrf.mxu1 }
 0x2da   :  { %v8729_v0 = vpop.f32.mrf.mxu0  ;;  %12035 = vst [vmem:[#allocation288_spill] sm:$0xff] %v8735_v21 }
 0x2db   :  { %12032 = vst [vmem:[#allocation285_spill] sm:$0xff] %v8729_v0  ;;  %v8741_v43 = vpop.f32.mrf.mxu1 }
 0x2dc   :  { %v8733_v32 = vpop.f32.mrf.mxu0  ;;  %1704 = vmatmul.mubr.f32.gmra.mxu1 %v8353_v5  ;;  %12037 = vst [vmem:[#allocation290_spill] sm:$0xff] %v8741_v43  ;;  %v7325_v43 = vld [vmem:[#allocation2 + $0xc8] sm:$0xff] }
 0x2dd   :  { %12034 = vst [vmem:[#allocation287_spill] sm:$0xff] %v8733_v32  ;;  %1709 = vmatprep.mubr.f32.mxu1 %v11987_v15  ;;  %v8745_v33 = vpop.f32.mrf.mxu1 }
 0x2de   :  { %v8739_v1 = vpop.f32.mrf.mxu0  ;;  %12039 = vst [vmem:[#allocation292_spill] sm:$0xff] %v8745_v33 }
 0x2df   :  { %12036 = vst [vmem:[#allocation289_spill] sm:$0xff] %v8739_v1  ;;  %v8751_v32 = vpop.f32.mrf.mxu1 }
 0x2e0   :  { %v8743_v14 = vpop.f32.mrf.mxu0  ;;  %1710 = vmatmul.mubr.f32.gmra.mxu1 %v8356_v30  ;;  %12041 = vst [vmem:[#allocation294_spill] sm:$0xff] %v8751_v32 }
 0x2e1   :  { %12038 = vst [vmem:[#allocation291_spill] sm:$0xff] %v8743_v14  ;;  %1715 = vmatprep.mubr.f32.mxu1 %v11987_v15  ;;  %v8755_v5 = vpop.f32.mrf.mxu1 }
 0x2e2   :  { %v8749_v0 = vpop.f32.mrf.mxu0  ;;  %12043 = vst [vmem:[#allocation296_spill] sm:$0xff] %v8755_v5 }
 0x2e3   :  { %12040 = vst [vmem:[#allocation293_spill] sm:$0xff] %v8749_v0  ;;  %v8761_v14 = vpop.f32.mrf.mxu1 }
 0x2e4   :  { %v8753_v23 = vpop.f32.mrf.mxu0  ;;  %1716 = vmatmul.mubr.f32.gmra.mxu1 %v8367_v29  ;;  %12045 = vst [vmem:[#allocation298_spill] sm:$0xff] %v8761_v14  ;;  %v7324_v14 = vld [vmem:[#allocation2 + $0xc0] sm:$0xff] }
 0x2e5   :  { %12042 = vst [vmem:[#allocation295_spill] sm:$0xff] %v8753_v23  ;;  %1721 = vmatprep.mubr.f32.mxu1 %v11987_v15  ;;  %v8765_v30 = vpop.f32.mrf.mxu1 }
 0x2e6   :  { %v8759_v1 = vpop.f32.mrf.mxu0  ;;  %12047 = vst [vmem:[#allocation300_spill] sm:$0xff] %v8765_v30 }
 0x2e7   :  { %12044 = vst [vmem:[#allocation297_spill] sm:$0xff] %v8759_v1  ;;  %v8771_v23 = vpop.f32.mrf.mxu1 }
 0x2e8   :  { %v8763_v33 = vpop.f32.mrf.mxu0  ;;  %1722 = vmatmul.mubr.f32.gmra.mxu1 %v8085_v36  ;;  %12049 = vst [vmem:[#allocation302_spill] sm:$0xff] %v8771_v23 }
 0x2e9   :  { %12046 = vst [vmem:[#allocation299_spill] sm:$0xff] %v8763_v33  ;;  %1727 = vmatprep.mubr.f32.mxu1 %v11987_v15  ;;  %v8775_v29 = vpop.f32.mrf.mxu1 }
 0x2ea   :  { %v8769_v0 = vpop.f32.mrf.mxu0  ;;  %12051 = vst [vmem:[#allocation304_spill] sm:$0xff] %v8775_v29 }
 0x2eb   :  { %12048 = vst [vmem:[#allocation301_spill] sm:$0xff] %v8769_v0  ;;  %v8781_v33 = vpop.f32.mrf.mxu1 }
 0x2ec   :  { %v8773_v32 = vpop.f32.mrf.mxu0  ;;  %1728 = vmatmul.mubr.f32.gmra.mxu1 %v8095_v58  ;;  %12053 = vst [vmem:[#allocation306_spill] sm:$0xff] %v8781_v33 }
 0x2ed   :  { %12050 = vst [vmem:[#allocation303_spill] sm:$0xff] %v8773_v32  ;;  %1733 = vmatprep.mubr.f32.mxu1 %v11987_v15  ;;  %v8785_v36 = vpop.f32.mrf.mxu1 }
 0x2ee   :  { %v8779_v1 = vpop.f32.mrf.mxu0  ;;  %12055 = vst [vmem:[#allocation308_spill] sm:$0xff] %v8785_v36 }
 0x2ef   :  { %12052 = vst [vmem:[#allocation305_spill] sm:$0xff] %v8779_v1  ;;  %v8791_v32 = vpop.f32.mrf.mxu1 }
 0x2f0   :  { %v8783_v30 = vpop.f32.mrf.mxu0  ;;  %1734 = vmatmul.mubr.f32.gmra.mxu1 %v8105_v44  ;;  %12057 = vst [vmem:[#allocation310_spill] sm:$0xff] %v8791_v32 }
 0x2f1   :  { %12054 = vst [vmem:[#allocation307_spill] sm:$0xff] %v8783_v30  ;;  %1739 = vmatprep.mubr.f32.mxu1 %v11987_v15  ;;  %v8795_v58 = vpop.f32.mrf.mxu1 }
 0x2f2   :  { %v8789_v0 = vpop.f32.mrf.mxu0  ;;  %12059 = vst [vmem:[#allocation312_spill] sm:$0xff] %v8795_v58 }
 0x2f3   :  { %12056 = vst [vmem:[#allocation309_spill] sm:$0xff] %v8789_v0  ;;  %v8801_v30 = vpop.f32.mrf.mxu1 }
 0x2f4   :  { %v8793_v23 = vpop.f32.mrf.mxu0  ;;  %1740 = vmatmul.mubr.f32.gmra.mxu1 %v8115_v45  ;;  %12061 = vst [vmem:[#allocation314_spill] sm:$0xff] %v8801_v30 }
 0x2f5   :  { %12058 = vst [vmem:[#allocation311_spill] sm:$0xff] %v8793_v23  ;;  %1745 = vmatprep.mubr.f32.mxu1 %v11987_v15  ;;  %v8805_v44 = vpop.f32.mrf.mxu1 }
 0x2f6   :  { %v8799_v1 = vpop.f32.mrf.mxu0  ;;  %12063 = vst [vmem:[#allocation316_spill] sm:$0xff] %v8805_v44 }
 0x2f7   :  { %12060 = vst [vmem:[#allocation313_spill] sm:$0xff] %v8799_v1  ;;  %v8811_v23 = vpop.f32.mrf.mxu1 }
 0x2f8   :  { %v8803_v36 = vpop.f32.mrf.mxu0  ;;  %1746 = vmatmul.mubr.f32.gmra.mxu1 %v8125_v46  ;;  %12065 = vst [vmem:[#allocation318_spill] sm:$0xff] %v8811_v23 }
 0x2f9   :  { %12062 = vst [vmem:[#allocation315_spill] sm:$0xff] %v8803_v36  ;;  %1751 = vmatprep.mubr.f32.mxu1 %v11987_v15  ;;  %v8815_v45 = vpop.f32.mrf.mxu1 }
 0x2fa   :  { %v8809_v0 = vpop.f32.mrf.mxu0  ;;  %12067 = vst [vmem:[#allocation320_spill] sm:$0xff] %v8815_v45 }
 0x2fb   :  { %12064 = vst [vmem:[#allocation317_spill] sm:$0xff] %v8809_v0  ;;  %v8821_v36 = vpop.f32.mrf.mxu1 }
 0x2fc   :  { %v8813_v32 = vpop.f32.mrf.mxu0  ;;  %1752 = vmatmul.mubr.f32.gmra.mxu1 %v8135_v47  ;;  %12069 = vst [vmem:[#allocation322_spill] sm:$0xff] %v8821_v36 }
 0x2fd   :  { %12066 = vst [vmem:[#allocation319_spill] sm:$0xff] %v8813_v32  ;;  %1757 = vmatprep.mubr.f32.mxu1 %v11987_v15  ;;  %v8825_v46 = vpop.f32.mrf.mxu1 }
 0x2fe   :  { %v8819_v1 = vpop.f32.mrf.mxu0  ;;  %12071 = vst [vmem:[#allocation324_spill] sm:$0xff] %v8825_v46 }
 0x2ff   :  { %12068 = vst [vmem:[#allocation321_spill] sm:$0xff] %v8819_v1  ;;  %v8831_v32 = vpop.f32.mrf.mxu1 }
 0x300   :  { %v8823_v44 = vpop.f32.mrf.mxu0  ;;  %1758 = vmatmul.mubr.f32.gmra.mxu1 %v8145_v49  ;;  %12073 = vst [vmem:[#allocation326_spill] sm:$0xff] %v8831_v32 }
 0x301   :  { %12070 = vst [vmem:[#allocation323_spill] sm:$0xff] %v8823_v44  ;;  %1763 = vmatprep.mubr.f32.mxu1 %v11987_v15  ;;  %v8835_v47 = vpop.f32.mrf.mxu1 }
 0x302   :  { %v8829_v0 = vpop.f32.mrf.mxu0  ;;  %12075 = vst [vmem:[#allocation328_spill] sm:$0xff] %v8835_v47 }
 0x303   :  { %12072 = vst [vmem:[#allocation325_spill] sm:$0xff] %v8829_v0  ;;  %v8841_v44 = vpop.f32.mrf.mxu1 }
 0x304   :  { %v8833_v23 = vpop.f32.mrf.mxu0  ;;  %1764 = vmatmul.mubr.f32.gmra.mxu1 %v8155_v50  ;;  %12077 = vst [vmem:[#allocation330_spill] sm:$0xff] %v8841_v44 }
 0x305   :  { %12074 = vst [vmem:[#allocation327_spill] sm:$0xff] %v8833_v23  ;;  %1769 = vmatprep.mubr.f32.mxu1 %v11987_v15  ;;  %v8845_v49 = vpop.f32.mrf.mxu1 }
 0x306   :  { %v8839_v1 = vpop.f32.mrf.mxu0  ;;  %12079 = vst [vmem:[#allocation332_spill] sm:$0xff] %v8845_v49 }
 0x307   :  { %12076 = vst [vmem:[#allocation329_spill] sm:$0xff] %v8839_v1  ;;  %v8851_v0 = vpop.f32.mrf.mxu1 }
 0x308   :  { %v8843_v46 = vpop.f32.mrf.mxu0  ;;  %1770 = vmatmul.mubr.f32.gmra.mxu1 %v8165_v51  ;;  %12080 = vst [vmem:[#allocation333_spill] sm:$0xff] %v8851_v0 }
 0x309   :  { %12078 = vst [vmem:[#allocation331_spill] sm:$0xff] %v8843_v46  ;;  %1775 = vmatprep.mubr.f32.mxu1 %v11987_v15  ;;  %v8857_v32 = vpop.f32.mrf.mxu1 }
 0x30a   :  { %v8849_v23 = vpop.f32.mrf.mxu0  ;;  %12081 = vst [vmem:[#allocation334_spill] sm:$0xff] %v8857_v32 }
 0x30b   :  { %v2447_v50 = vsel %vm2443_vm0, %v8849_v23, -inf  ;;  %v8863_v51 = vpop.f32.mrf.mxu1 }
 0x30c   :  { %2448 = vmax.xlane.f32.xlu0 %v2447_v50  ;;  %v8855_v1 = vpop.f32.mrf.mxu0  ;;  %1776 = vmatmul.mubr.f32.gmra.mxu1 %v8175_v52  ;;  %12082 = vst [vmem:[#allocation335_spill] sm:$0xff] %v8863_v51 }
 0x30d   :  { %1781 = vmatprep.mubr.f32.mxu1 %v11987_v15  ;;  %v2444_v49 = vsel %vm2443_vm0, %v8855_v1, -inf  ;;  %v8871_v44 = vpop.f32.mrf.mxu1 }
 0x30e   :  { %v8861_v46 = vpop.f32.mrf.mxu0  ;;  %12083 = vst [vmem:[#allocation336_spill] sm:$0xff] %v8871_v44 }
 0x30f   :  { %v2453_v0 = vsel %vm2443_vm0, %v8861_v46, -inf  ;;  %v8878_v51 = vpop.f32.mrf.mxu1 }
 0x310   :  { %2445 = vmax.xlane.f32.xlu0 %v2444_v49  ;;  %2454 = vmax.xlane.f32.xlu1 %v2453_v0  ;;  %v8869_v50 = vpop.f32.mrf.mxu0  ;;  %12084 = vst [vmem:[#allocation337_spill] sm:$0xff] %v8878_v51 }
 0x311   :  { %v2450_v52 = vsel %vm2443_vm0, %v8869_v50, -inf  ;;  %1782 = vmatmul.mubr.f32.gmra.mxu1 %v8185_v59  ;;  %v8883_v49 = vpop.f32.mrf.mxu1 }
 0x312   :  { %v8876_v32 = vpop.f32.mrf.mxu0  ;;  %1787 = vmatprep.mubr.f32.mxu1 %v11987_v15  ;;  %12085 = vst [vmem:[#allocation338_spill] sm:$0xff] %v8883_v49 }
 0x313   :  { %v2459_v44 = vsel %vm2443_vm0, %v8876_v32, -inf  ;;  %v8892_v36 = vpop.f32.mrf.mxu1 }
 0x314   :  { %2451 = vmax.xlane.f32.xlu1 %v2450_v52  ;;  %v8881_v47 = vpop.f32.mrf.mxu0  ;;  %12086 = vst [vmem:[#allocation339_spill] sm:$0xff] %v8892_v36 }
 0x315   :  { %v2456_v0 = vsel %vm2443_vm0, %v8881_v47, -inf  ;;  %1788 = vmatmul.mubr.f32.gmra.mxu1 %v8195_v39  ;;  %v8897_v51 = vpop.f32.mrf.mxu1 }
 0x316   :  { %2457 = vmax.xlane.f32.xlu0 %v2456_v0  ;;  %v8890_v59 = vpop.f32.mrf.mxu0  ;;  %1793 = vmatprep.mubr.f32.mxu1 %v11987_v15  ;;  %12087 = vst [vmem:[#allocation340_spill] sm:$0xff] %v8897_v51 }
 0x317   :  { %v2465_v45 = vsel %vm2443_vm0, %v8890_v59, -inf  ;;  %v8906_v0 = vpop.f32.mrf.mxu1 }
 0x318   :  { %2460 = vmax.xlane.f32.xlu1 %v2459_v44  ;;  %v8895_v52 = vpop.f32.mrf.mxu0  ;;  %12088 = vst [vmem:[#allocation341_spill] sm:$0xff] %v8906_v0 }
 0x319   :  { %v2462_v49 = vsel %vm2443_vm0, %v8895_v52, -inf  ;;  %1794 = vmatmul.mubr.f32.gmra.mxu1 %v8205_v40  ;;  %v8911_v36 = vpop.f32.mrf.mxu1 }
 0x31a   :  { %2463 = vmax.xlane.f32.xlu0 %v2462_v49  ;;  %v8904_v39 = vpop.f32.mrf.mxu0  ;;  %1799 = vmatprep.mubr.f32.mxu1 %v11987_v15  ;;  %12089 = vst [vmem:[#allocation342_spill] sm:$0xff] %v8911_v36 }
 0x31b   :  { %v2471_v30 = vsel %vm2443_vm0, %v8904_v39, -inf  ;;  %v8920_v49 = vpop.f32.mrf.mxu1 }
 0x31c   :  { %2466 = vmax.xlane.f32.xlu1 %v2465_v45  ;;  %v8909_v44 = vpop.f32.mrf.mxu0  ;;  %12090 = vst [vmem:[#allocation343_spill] sm:$0xff] %v8920_v49 }
 0x31d   :  { %v2468_v51 = vsel %vm2443_vm0, %v8909_v44, -inf  ;;  %1800 = vmatmul.mubr.f32.gmra.mxu1 %v8215_v8  ;;  %v8925_v0 = vpop.f32.mrf.mxu1 }
 0x31e   :  { %2469 = vmax.xlane.f32.xlu0 %v2468_v51  ;;  %v8918_v40 = vpop.f32.mrf.mxu0  ;;  %1805 = vmatprep.mubr.f32.mxu1 %v11987_v15  ;;  %12091 = vst [vmem:[#allocation344_spill] sm:$0xff] %v8925_v0 }
 0x31f   :  { %v2477_v58 = vsel %vm2443_vm0, %v8918_v40, -inf  ;;  %v8934_v51 = vpop.f32.mrf.mxu1 }
 0x320   :  { %2472 = vmax.xlane.f32.xlu1 %v2471_v30  ;;  %v8923_v45 = vpop.f32.mrf.mxu0  ;;  %12092 = vst [vmem:[#allocation345_spill] sm:$0xff] %v8934_v51 }
 0x321   :  { %v2474_v36 = vsel %vm2443_vm0, %v8923_v45, -inf  ;;  %1806 = vmatmul.mubr.f32.gmra.mxu1 %v8225_v27  ;;  %v8939_v49 = vpop.f32.mrf.mxu1 }
 0x322   :  { %2475 = vmax.xlane.f32.xlu0 %v2474_v36  ;;  %v8932_v8 = vpop.f32.mrf.mxu0  ;;  %1811 = vmatprep.mubr.f32.mxu1 %v11987_v15  ;;  %12093 = vst [vmem:[#allocation346_spill] sm:$0xff] %v8939_v49 }
 0x323   :  { %v2483_v33 = vsel %vm2443_vm0, %v8932_v8, -inf  ;;  %v8948_v36 = vpop.f32.mrf.mxu1 }
 0x324   :  { %2478 = vmax.xlane.f32.xlu1 %v2477_v58  ;;  %v8937_v30 = vpop.f32.mrf.mxu0  ;;  %12094 = vst [vmem:[#allocation347_spill] sm:$0xff] %v8948_v36 }
 0x325   :  { %v2480_v0 = vsel %vm2443_vm0, %v8937_v30, -inf  ;;  %1812 = vmatmul.mubr.f32.gmra.mxu1 %v8235_v25  ;;  %v8953_v51 = vpop.f32.mrf.mxu1 }
 0x326   :  { %2481 = vmax.xlane.f32.xlu0 %v2480_v0  ;;  %v8946_v27 = vpop.f32.mrf.mxu0  ;;  %1817 = vmatprep.mubr.f32.mxu1 %v11987_v15  ;;  %12095 = vst [vmem:[#allocation348_spill] sm:$0xff] %v8953_v51 }
 0x327   :  { %v2489_v29 = vsel %vm2443_vm0, %v8946_v27, -inf  ;;  %v8961_v0 = vpop.f32.mrf.mxu1 }
 0x328   :  { %2484 = vmax.xlane.f32.xlu1 %v2483_v33  ;;  %v8951_v58 = vpop.f32.mrf.mxu0  ;;  %12096 = vst [vmem:[#allocation349_spill] sm:$0xff] %v8961_v0 }
 0x329   :  { %v2486_v49 = vsel %vm2443_vm0, %v8951_v58, -inf  ;;  %1818 = vmatmul.mubr.f32.gmra.mxu1 %v7324_v14  ;;  %v8966_v36 = vpop.f32.mrf.mxu1 }
 0x32a   :  { %2487 = vmax.xlane.f32.xlu0 %v2486_v49  ;;  %v8959_v25 = vpop.f32.mrf.mxu0  ;;  %1823 = vmatprep.mubr.f32.mxu1 %v11987_v15  ;;  %12097 = vst [vmem:[#allocation350_spill] sm:$0xff] %v8966_v36 }
 0x32b   :  { %v2495_v5 = vsel %vm2443_vm0, %v8959_v25, -inf  ;;  %v8974_v49 = vpop.f32.mrf.mxu1 }
 0x32c   :  { %2490 = vmax.xlane.f32.xlu1 %v2489_v29  ;;  %v8964_v33 = vpop.f32.mrf.mxu0  ;;  %12098 = vst [vmem:[#allocation351_spill] sm:$0xff] %v8974_v49 }
 0x32d   :  { %v2492_v51 = vsel %vm2443_vm0, %v8964_v33, -inf  ;;  %1824 = vmatmul.mubr.f32.gmra.mxu1 %v7325_v43  ;;  %v8979_v0 = vpop.f32.mrf.mxu1 }
 0x32e   :  { %2493 = vmax.xlane.f32.xlu0 %v2492_v51  ;;  %v8972_v14 = vpop.f32.mrf.mxu0  ;;  %1829 = vmatprep.mubr.f32.mxu1 %v11987_v15  ;;  %12099 = vst [vmem:[#allocation352_spill] sm:$0xff] %v8979_v0 }
 0x32f   :  { %v2501_v21 = vsel %vm2443_vm0, %v8972_v14, -inf  ;;  %v8987_v51 = vpop.f32.mrf.mxu1 }
 0x330   :  { %2496 = vmax.xlane.f32.xlu1 %v2495_v5  ;;  %v8977_v29 = vpop.f32.mrf.mxu0  ;;  %12100 = vst [vmem:[#allocation353_spill] sm:$0xff] %v8987_v51 }
 0x331   :  { %v2498_v36 = vsel %vm2443_vm0, %v8977_v29, -inf  ;;  %1830 = vmatmul.mubr.f32.gmra.mxu1 %v7326_v20  ;;  %v8992_v49 = vpop.f32.mrf.mxu1 }
 0x332   :  { %2499 = vmax.xlane.f32.xlu0 %v2498_v36  ;;  %v8985_v43 = vpop.f32.mrf.mxu0  ;;  %1835 = vmatprep.mubr.f32.mxu1 %v11987_v15  ;;  %12101 = vst [vmem:[#allocation354_spill] sm:$0xff] %v8992_v49 }
 0x333   :  { %v2507_v4 = vsel %vm2443_vm0, %v8985_v43, -inf  ;;  %v9000_v36 = vpop.f32.mrf.mxu1 }
 0x334   :  { %2502 = vmax.xlane.f32.xlu1 %v2501_v21  ;;  %v8990_v5 = vpop.f32.mrf.mxu0  ;;  %12102 = vst [vmem:[#allocation355_spill] sm:$0xff] %v9000_v36 }
 0x335   :  { %v2504_v0 = vsel %vm2443_vm0, %v8990_v5, -inf  ;;  %1836 = vmatmul.mubr.f32.gmra.mxu1 %v7327_v34  ;;  %v9005_v51 = vpop.f32.mrf.mxu1 }
 0x336   :  { %2505 = vmax.xlane.f32.xlu0 %v2504_v0  ;;  %v8998_v20 = vpop.f32.mrf.mxu0  ;;  %1841 = vmatprep.mubr.f32.mxu1 %v11987_v15  ;;  %12103 = vst [vmem:[#allocation356_spill] sm:$0xff] %v9005_v51 }
 0x337   :  { %v2513_v61 = vsel %vm2443_vm0, %v8998_v20, -inf  ;;  %v9013_v0 = vpop.f32.mrf.mxu1 }
 0x338   :  { %2508 = vmax.xlane.f32.xlu1 %v2507_v4  ;;  %v9003_v21 = vpop.f32.mrf.mxu0  ;;  %12104 = vst [vmem:[#allocation357_spill] sm:$0xff] %v9013_v0 }
 0x339   :  { %v2510_v49 = vsel %vm2443_vm0, %v9003_v21, -inf  ;;  %1842 = vmatmul.mubr.f32.gmra.mxu1 %v7328_v16  ;;  %v9018_v36 = vpop.f32.mrf.mxu1 }
 0x33a   :  { %2511 = vmax.xlane.f32.xlu0 %v2510_v49  ;;  %v9011_v34 = vpop.f32.mrf.mxu0  ;;  %1847 = vmatprep.mubr.f32.mxu1 %v11987_v15  ;;  %12105 = vst [vmem:[#allocation358_spill] sm:$0xff] %v9018_v36 }
 0x33b   :  { %v2519_v12 = vsel %vm2443_vm0, %v9011_v34, -inf  ;;  %v9026_v49 = vpop.f32.mrf.mxu1 }
 0x33c   :  { %2514 = vmax.xlane.f32.xlu1 %v2513_v61  ;;  %v9016_v4 = vpop.f32.mrf.mxu0  ;;  %12106 = vst [vmem:[#allocation359_spill] sm:$0xff] %v9026_v49 }
 0x33d   :  { %v2516_v51 = vsel %vm2443_vm0, %v9016_v4, -inf  ;;  %1848 = vmatmul.mubr.f32.gmra.mxu1 %v7329_v24  ;;  %v9031_v0 = vpop.f32.mrf.mxu1 }
 0x33e   :  { %2517 = vmax.xlane.f32.xlu0 %v2516_v51  ;;  %v9024_v16 = vpop.f32.mrf.mxu0  ;;  %1853 = vmatprep.mubr.f32.mxu1 %v11987_v15  ;;  %12107 = vst [vmem:[#allocation360_spill] sm:$0xff] %v9031_v0 }
 0x33f   :  { %v2525_v26 = vsel %vm2443_vm0, %v9024_v16, -inf  ;;  %v9039_v51 = vpop.f32.mrf.mxu1 }
 0x340   :  { %2520 = vmax.xlane.f32.xlu1 %v2519_v12  ;;  %v9029_v61 = vpop.f32.mrf.mxu0  ;;  %12108 = vst [vmem:[#allocation361_spill] sm:$0xff] %v9039_v51 }
 0x341   :  { %v2522_v36 = vsel %vm2443_vm0, %v9029_v61, -inf  ;;  %1854 = vmatmul.mubr.f32.gmra.mxu1 %v7330_v38  ;;  %v9044_v49 = vpop.f32.mrf.mxu1 }
 0x342   :  { %2523 = vmax.xlane.f32.xlu0 %v2522_v36  ;;  %v9037_v24 = vpop.f32.mrf.mxu0  ;;  %1859 = vmatprep.mubr.f32.mxu1 %v11987_v15  ;;  %12109 = vst [vmem:[#allocation362_spill] sm:$0xff] %v9044_v49 }
 0x343   :  { %v2531_v37 = vsel %vm2443_vm0, %v9037_v24, -inf  ;;  %v9052_v36 = vpop.f32.mrf.mxu1 }
 0x344   :  { %2526 = vmax.xlane.f32.xlu1 %v2525_v26  ;;  %v9042_v12 = vpop.f32.mrf.mxu0  ;;  %12110 = vst [vmem:[#allocation363_spill] sm:$0xff] %v9052_v36 }
 0x345   :  { %v2528_v0 = vsel %vm2443_vm0, %v9042_v12, -inf  ;;  %1860 = vmatmul.mubr.f32.gmra.mxu1 %v7331_v57  ;;  %v9057_v51 = vpop.f32.mrf.mxu1 }
 0x346   :  { %2529 = vmax.xlane.f32.xlu0 %v2528_v0  ;;  %v9050_v38 = vpop.f32.mrf.mxu0  ;;  %1865 = vmatprep.mubr.f32.mxu1 %v11987_v15  ;;  %12111 = vst [vmem:[#allocation364_spill] sm:$0xff] %v9057_v51 }
 0x347   :  { %v2537_v13 = vsel %vm2443_vm0, %v9050_v38, -inf  ;;  %v9065_v0 = vpop.f32.mrf.mxu1 }
 0x348   :  { %2532 = vmax.xlane.f32.xlu1 %v2531_v37  ;;  %v9055_v26 = vpop.f32.mrf.mxu0  ;;  %12112 = vst [vmem:[#allocation365_spill] sm:$0xff] %v9065_v0 }
 0x349   :  { %v2534_v49 = vsel %vm2443_vm0, %v9055_v26, -inf  ;;  %1866 = vmatmul.mubr.f32.gmra.mxu1 %v7332_v19 }
 0x34a   :  { %2535 = vmax.xlane.f32.xlu0 %v2534_v49  ;;  %v9063_v57 = vpop.f32.mrf.mxu0  ;;  %1871 = vmatprep.mubr.f32.mxu1 %v11987_v15  ;;  %v9070_v36 = vpop.f32.mrf.mxu1 }
 0x34b   :  { %12113 = vst [vmem:[#allocation366_spill] sm:$0xff] %v9070_v36  ;;  %v2543_v35 = vsel %vm2443_vm0, %v9063_v57, -inf }
 0x34c   :  { %2538 = vmax.xlane.f32.xlu1 %v2537_v13  ;;  %v9068_v37 = vpop.f32.mrf.mxu0  ;;  %v9078_v49 = vpop.f32.mrf.mxu1 }
 0x34d   :  { %v2540_v51 = vsel %vm2443_vm0, %v9068_v37, -inf  ;;  %1872 = vmatmul.mubr.f32.gmra.mxu1 %v7333_v17  ;;  %12114 = vst [vmem:[#allocation367_spill] sm:$0xff] %v9078_v49 }
 0x34e   :  { %2541 = vmax.xlane.f32.xlu0 %v2540_v51  ;;  %v9076_v19 = vpop.f32.mrf.mxu0  ;;  %1877 = vmatprep.mubr.f32.mxu1 %v11987_v15  ;;  %v9083_v0 = vpop.f32.mrf.mxu1 }
 0x34f   :  { %12115 = vst [vmem:[#allocation368_spill] sm:$0xff] %v9083_v0  ;;  %v2549_v28 = vsel %vm2443_vm0, %v9076_v19, -inf }
 0x350   :  { %2544 = vmax.xlane.f32.xlu1 %v2543_v35  ;;  %v9081_v13 = vpop.f32.mrf.mxu0  ;;  %v9091_v51 = vpop.f32.mrf.mxu1 }
 0x351   :  { %v2546_v36 = vsel %vm2443_vm0, %v9081_v13, -inf  ;;  %1878 = vmatmul.mubr.f32.gmra.mxu1 %v7334_v6  ;;  %12116 = vst [vmem:[#allocation369_spill] sm:$0xff] %v9091_v51 }
 0x352   :  { %2547 = vmax.xlane.f32.xlu0 %v2546_v36  ;;  %v9089_v17 = vpop.f32.mrf.mxu0  ;;  %1883 = vmatprep.mubr.f32.mxu1 %v11987_v15  ;;  %v9096_v49 = vpop.f32.mrf.mxu1 }
 0x353   :  { %12117 = vst [vmem:[#allocation370_spill] sm:$0xff] %v9096_v49  ;;  %v2555_v18 = vsel %vm2443_vm0, %v9089_v17, -inf }
 0x354   :  { %2550 = vmax.xlane.f32.xlu1 %v2549_v28  ;;  %v9094_v35 = vpop.f32.mrf.mxu0  ;;  %v9104_v36 = vpop.f32.mrf.mxu1 }
 0x355   :  { %v2552_v0 = vsel %vm2443_vm0, %v9094_v35, -inf  ;;  %1884 = vmatmul.mubr.f32.gmra.mxu1 %v7335_v10  ;;  %12118 = vst [vmem:[#allocation371_spill] sm:$0xff] %v9104_v36 }
 0x356   :  { %2553 = vmax.xlane.f32.xlu0 %v2552_v0  ;;  %v9102_v6 = vpop.f32.mrf.mxu0  ;;  %1889 = vmatprep.mubr.f32.mxu1 %v11987_v15  ;;  %v9109_v51 = vpop.f32.mrf.mxu1 }
 0x357   :  { %12119 = vst [vmem:[#allocation372_spill] sm:$0xff] %v9109_v51  ;;  %v2561_v7 = vsel %vm2443_vm0, %v9102_v6, -inf }
 0x358   :  { %2556 = vmax.xlane.f32.xlu1 %v2555_v18  ;;  %v9107_v28 = vpop.f32.mrf.mxu0  ;;  %v9117_v0 = vpop.f32.mrf.mxu1 }
 0x359   :  { %v2558_v49 = vsel %vm2443_vm0, %v9107_v28, -inf  ;;  %1890 = vmatmul.mubr.f32.gmra.mxu1 %v7336_v53  ;;  %12120 = vst [vmem:[#allocation373_spill] sm:$0xff] %v9117_v0 }
 0x35a   :  { %2559 = vmax.xlane.f32.xlu0 %v2558_v49  ;;  %v9115_v10 = vpop.f32.mrf.mxu0  ;;  %1895 = vmatprep.mubr.f32.mxu1 %v11987_v15  ;;  %v9122_v36 = vpop.f32.mrf.mxu1 }
 0x35b   :  { %12121 = vst [vmem:[#allocation374_spill] sm:$0xff] %v9122_v36  ;;  %v2567_v42 = vsel %vm2443_vm0, %v9115_v10, -inf }
 0x35c   :  { %2562 = vmax.xlane.f32.xlu1 %v2561_v7  ;;  %v9120_v18 = vpop.f32.mrf.mxu0  ;;  %v9130_v49 = vpop.f32.mrf.mxu1 }
 0x35d   :  { %v2564_v51 = vsel %vm2443_vm0, %v9120_v18, -inf  ;;  %1896 = vmatmul.mubr.f32.gmra.mxu1 %v7337_v56  ;;  %12122 = vst [vmem:[#allocation375_spill] sm:$0xff] %v9130_v49 }
 0x35e   :  { %2565 = vmax.xlane.f32.xlu0 %v2564_v51  ;;  %v9128_v53 = vpop.f32.mrf.mxu0  ;;  %1901 = vmatprep.mubr.f32.mxu1 %v11987_v15  ;;  %v9135_v0 = vpop.f32.mrf.mxu1 }
 0x35f   :  { %12123 = vst [vmem:[#allocation376_spill] sm:$0xff] %v9135_v0  ;;  %v2573_v3 = vsel %vm2443_vm0, %v9128_v53, -inf }
 0x360   :  { %2568 = vmax.xlane.f32.xlu1 %v2567_v42  ;;  %v9133_v7 = vpop.f32.mrf.mxu0  ;;  %v9143_v51 = vpop.f32.mrf.mxu1 }
 0x361   :  { %v2570_v36 = vsel %vm2443_vm0, %v9133_v7, -inf  ;;  %1902 = vmatmul.mubr.f32.gmra.mxu1 %v7338_v31  ;;  %12124 = vst [vmem:[#allocation377_spill] sm:$0xff] %v9143_v51 }
 0x362   :  { %2571 = vmax.xlane.f32.xlu0 %v2570_v36  ;;  %v9141_v56 = vpop.f32.mrf.mxu0  ;;  %1907 = vmatprep.mubr.f32.mxu1 %v11987_v15  ;;  %v9148_v49 = vpop.f32.mrf.mxu1 }
 0x363   :  { %12125 = vst [vmem:[#allocation378_spill] sm:$0xff] %v9148_v49  ;;  %v2579_v62 = vsel %vm2443_vm0, %v9141_v56, -inf }
 0x364   :  { %2574 = vmax.xlane.f32.xlu1 %v2573_v3  ;;  %v9146_v42 = vpop.f32.mrf.mxu0  ;;  %v9156_v36 = vpop.f32.mrf.mxu1 }
 0x365   :  { %v2576_v0 = vsel %vm2443_vm0, %v9146_v42, -inf  ;;  %1908 = vmatmul.mubr.f32.gmra.mxu1 %v7339_v11  ;;  %12126 = vst [vmem:[#allocation379_spill] sm:$0xff] %v9156_v36 }
 0x366   :  { %2577 = vmax.xlane.f32.xlu0 %v2576_v0  ;;  %v9154_v31 = vpop.f32.mrf.mxu0  ;;  %1913 = vmatprep.mubr.f32.mxu1 %v11987_v15  ;;  %v9161_v51 = vpop.f32.mrf.mxu1 }
 0x367   :  { %12127 = vst [vmem:[#allocation380_spill] sm:$0xff] %v9161_v51  ;;  %v2585_v9 = vsel %vm2443_vm0, %v9154_v31, -inf }
 0x368   :  { %2580 = vmax.xlane.f32.xlu1 %v2579_v62  ;;  %v9159_v3 = vpop.f32.mrf.mxu0  ;;  %v9169_v0 = vpop.f32.mrf.mxu1 }
 0x369   :  { %v2582_v49 = vsel %vm2443_vm0, %v9159_v3, -inf  ;;  %1914 = vmatmul.mubr.f32.gmra.mxu1 %v7340_v60  ;;  %12128 = vst [vmem:[#allocation381_spill] sm:$0xff] %v9169_v0 }
 0x36a   :  { %2583 = vmax.xlane.f32.xlu0 %v2582_v49  ;;  %v9167_v11 = vpop.f32.mrf.mxu0  ;;  %1919 = vmatprep.mubr.f32.mxu1 %v11987_v15  ;;  %v9174_v36 = vpop.f32.mrf.mxu1 }
 0x36b   :  { %12129 = vst [vmem:[#allocation382_spill] sm:$0xff] %v9174_v36  ;;  %v2591_v54 = vsel %vm2443_vm0, %v9167_v11, -inf }
 0x36c   :  { %2586 = vmax.xlane.f32.xlu1 %v2585_v9  ;;  %v9172_v62 = vpop.f32.mrf.mxu0  ;;  %v9182_v49 = vpop.f32.mrf.mxu1 }
 0x36d   :  { %v2588_v51 = vsel %vm2443_vm0, %v9172_v62, -inf  ;;  %1920 = vmatmul.mubr.f32.gmra.mxu1 %v7341_v22  ;;  %12131 = vst [vmem:[#allocation384_spill] sm:$0xff] %v9182_v49 }
 0x36e   :  { %2589 = vmax.xlane.f32.xlu0 %v2588_v51  ;;  %v9180_v60 = vpop.f32.mrf.mxu0  ;;  %1925 = vmatprep.mubr.f32.mxu1 %v11987_v15 }
 0x36f   :  { %12130 = vst [vmem:[#allocation383_spill] sm:$0xff] %v9180_v60  ;;  %v9187_v0 = vpop.f32.mrf.mxu1  ;;  %v2597_v41 = vsel %vm2443_vm0, %v9180_v60, -inf }
 0x370   :  { %2592 = vmax.xlane.f32.xlu1 %v2591_v54  ;;  %v9185_v9 = vpop.f32.mrf.mxu0  ;;  %12132 = vst [vmem:[#allocation385_spill] sm:$0xff] %v9187_v0 }
 0x371   :  { %v2594_v36 = vsel %vm2443_vm0, %v9185_v9, -inf  ;;  %1926 = vmatmul.mubr.f32.gmra.mxu1 %v7342_v55  ;;  %v9195_v51 = vpop.f32.mrf.mxu1 }
 0x372   :  { %2595 = vmax.xlane.f32.xlu0 %v2594_v36  ;;  %v9193_v22 = vpop.f32.mrf.mxu0  ;;  %12134 = vst [vmem:[#allocation387_spill] sm:$0xff] %v9195_v51  ;;  %1931 = vmatprep.mubr.f32.mxu1 %v11987_v15 }
 0x373   :  { %12133 = vst [vmem:[#allocation386_spill] sm:$0xff] %v9193_v22  ;;  %v2603_v2 = vsel %vm2443_vm0, %v9193_v22, -inf  ;;  %v7344_v22 = vld [vmem:[#allocation2 + $0x160] sm:$0xff] }
 0x374   :  { %2598 = vmax.xlane.f32.xlu1 %v2597_v41  ;;  %v9198_v54 = vpop.f32.mrf.mxu0  ;;  %v9200_v49 = vpop.f32.mrf.mxu1 }
 0x375   :  { %12135 = vst [vmem:[#allocation388_spill] sm:$0xff] %v9198_v54  ;;  %12136 = vst [vmem:[#allocation389_spill] sm:$0xff] %v9200_v49  ;;  %v2600_v0 = vsel %vm2443_vm0, %v9198_v54, -inf  ;;  %1932 = vmatmul.mubr.f32.gmra.mxu1 %v7343_v48  ;;  %v7352_v54 = vld [vmem:[#allocation2 + $0x1a0] sm:$0xff] }
 0x376   :  { %2601 = vmax.xlane.f32.xlu0 %v2600_v0  ;;  %v9206_v55 = vpop.f32.mrf.mxu0  ;;  %v9208_v36 = vpop.f32.mrf.mxu1  ;;  %1937 = vmatprep.mubr.f32.mxu1 %v11987_v15 }
 0x377   :  { %12137 = vst [vmem:[#allocation390_spill] sm:$0xff] %v9206_v55  ;;  %12138 = vst [vmem:[#allocation391_spill] sm:$0xff] %v9208_v36  ;;  %v2609_v63 = vsel %vm2443_vm0, %v9206_v55, -inf }
 0x378   :  { %2604 = vmax.xlane.f32.xlu1 %v2603_v2  ;;  %v9211_v41 = vpop.f32.mrf.mxu0  ;;  %v9213_v51 = vpop.f32.mrf.mxu1 }
 0x379   :  { %12139 = vst [vmem:[#allocation392_spill] sm:$0xff] %v9211_v41  ;;  %12140 = vst [vmem:[#allocation393_spill] sm:$0xff] %v9213_v51  ;;  %v2606_v49 = vsel %vm2443_vm0, %v9211_v41, -inf  ;;  %1938 = vmatmul.mubr.f32.gmra.mxu1 %v7344_v22  ;;  %v7345_v41 = vld [vmem:[#allocation2 + $0x168] sm:$0xff] }
 0x37a   :  { %2607 = vmax.xlane.f32.xlu0 %v2606_v49  ;;  %v9219_v48 = vpop.f32.mrf.mxu0  ;;  %v9221_v0 = vpop.f32.mrf.mxu1  ;;  %1943 = vmatprep.mubr.f32.mxu1 %v11987_v15 }
 0x37b   :  { %12141 = vst [vmem:[#allocation394_spill] sm:$0xff] %v9219_v48  ;;  %12142 = vst [vmem:[#allocation395_spill] sm:$0xff] %v9221_v0  ;;  %v2615_v55 = vsel %vm2443_vm0, %v9219_v48, -inf }
 0x37c   :  { %2610 = vmax.xlane.f32.xlu1 %v2609_v63  ;;  %v9224_v2 = vpop.f32.mrf.mxu0  ;;  %v9226_v36 = vpop.f32.mrf.mxu1 }
 0x37d   :  { %12143 = vst [vmem:[#allocation396_spill] sm:$0xff] %v9224_v2  ;;  %12144 = vst [vmem:[#allocation397_spill] sm:$0xff] %v9226_v36  ;;  %v2612_v51 = vsel %vm2443_vm0, %v9224_v2, -inf  ;;  %1944 = vmatmul.mubr.f32.gmra.mxu1 %v7345_v41  ;;  %v7346_v2 = vld [vmem:[#allocation2 + $0x170] sm:$0xff] }
 0x37e   :  { %2613 = vmax.xlane.f32.xlu0 %v2612_v51  ;;  %v9232_v49 = vpop.f32.mrf.mxu0  ;;  %v9234_v22 = vpop.f32.mrf.mxu1  ;;  %1949 = vmatprep.mubr.f32.mxu1 %v11987_v15 }
 0x37f   :  { %12145 = vst [vmem:[#allocation398_spill] sm:$0xff] %v9232_v49  ;;  %12146 = vst [vmem:[#allocation399_spill] sm:$0xff] %v9234_v22  ;;  %v2621_v48 = vsel %vm2443_vm0, %v9232_v49, -inf }
 0x380   :  { %2616 = vmax.xlane.f32.xlu1 %v2615_v55  ;;  %v9237_v63 = vpop.f32.mrf.mxu0  ;;  %v9239_v0 = vpop.f32.mrf.mxu1 }
 0x381   :  { %12147 = vst [vmem:[#allocation400_spill] sm:$0xff] %v9237_v63  ;;  %12148 = vst [vmem:[#allocation401_spill] sm:$0xff] %v9239_v0  ;;  %v2618_v36 = vsel %vm2443_vm0, %v9237_v63, -inf  ;;  %1950 = vmatmul.mubr.f32.gmra.mxu1 %v7346_v2  ;;  %v7347_v63 = vld [vmem:[#allocation2 + $0x178] sm:$0xff] }
 0x382   :  { %2619 = vmax.xlane.f32.xlu0 %v2618_v36  ;;  %v9245_v51 = vpop.f32.mrf.mxu0  ;;  %v9247_v41 = vpop.f32.mrf.mxu1  ;;  %1955 = vmatprep.mubr.f32.mxu1 %v11987_v15 }
 0x383   :  { %12149 = vst [vmem:[#allocation402_spill] sm:$0xff] %v9245_v51  ;;  %12150 = vst [vmem:[#allocation403_spill] sm:$0xff] %v9247_v41  ;;  %v2627_v49 = vsel %vm2443_vm0, %v9245_v51, -inf }
 0x384   :  { %2622 = vmax.xlane.f32.xlu1 %v2621_v48  ;;  %v9250_v55 = vpop.f32.mrf.mxu0  ;;  %v9252_v22 = vpop.f32.mrf.mxu1 }
 0x385   :  { %12151 = vst [vmem:[#allocation404_spill] sm:$0xff] %v9250_v55  ;;  %12152 = vst [vmem:[#allocation405_spill] sm:$0xff] %v9252_v22  ;;  %v2624_v0 = vsel %vm2443_vm0, %v9250_v55, -inf  ;;  %1956 = vmatmul.mubr.f32.gmra.mxu1 %v7347_v63  ;;  %v7348_v55 = vld [vmem:[#allocation2 + $0x180] sm:$0xff] }
 0x386   :  { %2625 = vmax.xlane.f32.xlu0 %v2624_v0  ;;  %v9258_v36 = vpop.f32.mrf.mxu0  ;;  %v9260_v2 = vpop.f32.mrf.mxu1  ;;  %1961 = vmatprep.mubr.f32.mxu1 %v11987_v15 }
 0x387   :  { %12153 = vst [vmem:[#allocation406_spill] sm:$0xff] %v9258_v36  ;;  %12154 = vst [vmem:[#allocation407_spill] sm:$0xff] %v9260_v2  ;;  %v2633_v51 = vsel %vm2443_vm0, %v9258_v36, -inf }
 0x388   :  { %2628 = vmax.xlane.f32.xlu1 %v2627_v49  ;;  %v9263_v48 = vpop.f32.mrf.mxu0  ;;  %v9265_v41 = vpop.f32.mrf.mxu1  ;;  %v7349_v49 = vld [vmem:[#allocation2 + $0x188] sm:$0xff] }
 0x389   :  { %12155 = vst [vmem:[#allocation408_spill] sm:$0xff] %v9263_v48  ;;  %12156 = vst [vmem:[#allocation409_spill] sm:$0xff] %v9265_v41  ;;  %v2630_v22 = vsel %vm2443_vm0, %v9263_v48, -inf  ;;  %1962 = vmatmul.mubr.f32.gmra.mxu1 %v7348_v55  ;;  %v7350_v48 = vld [vmem:[#allocation2 + $0x190] sm:$0xff] }
 0x38a   :  { %2631 = vmax.xlane.f32.xlu0 %v2630_v22  ;;  %v9271_v0 = vpop.f32.mrf.mxu1  ;;  %1967 = vmatprep.mubr.f32.mxu1 %v11987_v15 }
 0x38b   :  { %12157 = vst [vmem:[#allocation410_spill] sm:$0xff] %v9271_v0 }
 0x38c   :  { %2634 = vmax.xlane.f32.xlu1 %v2633_v51  ;;  %v9274_v63 = vpop.f32.mrf.mxu1  ;;  %v7351_v51 = vld [vmem:[#allocation2 + $0x198] sm:$0xff] }
 0x38d   :  { %12158 = vst [vmem:[#allocation411_spill] sm:$0xff] %v9274_v63  ;;  %1968 = vmatmul.mubr.f32.gmra.mxu1 %v7349_v49 }
 0x38e   :  { %v9276_v2 = vpop.f32.mrf.mxu1  ;;  %1973 = vmatprep.mubr.f32.mxu1 %v11987_v15 }
 0x38f   :  { %12159 = vst [vmem:[#allocation412_spill] sm:$0xff] %v9276_v2 }
 0x390   :  { %v9279_v41 = vpop.f32.mrf.mxu1 }
 0x391   :  { %12160 = vst [vmem:[#allocation413_spill] sm:$0xff] %v9279_v41  ;;  %1974 = vmatmul.mubr.f32.gmra.mxu1 %v7350_v48 }
 0x392   :  { %v9281_v36 = vpop.f32.mrf.mxu1  ;;  %1979 = vmatprep.mubr.f32.mxu1 %v11987_v15 }
 0x393   :  { %12161 = vst [vmem:[#allocation414_spill] sm:$0xff] %v9281_v36 }
 0x394   :  { %v9284_v22 = vpop.f32.mrf.mxu1 }
 0x395   :  { %12162 = vst [vmem:[#allocation415_spill] sm:$0xff] %v9284_v22  ;;  %v2449_v55 = vpop.xlane.xlu0 %2448  ;;  %1980 = vmatmul.mubr.f32.gmra.mxu1 %v7351_v51 }
 0x396   :  { %v2637_v0 = vsub.f32 %v8849_v23, %v2449_v55  ;;  %v9287_v49 = vpop.f32.mrf.mxu1  ;;  %1985 = vmatprep.mubr.f32.mxu1 %v11987_v15 }
 0x397   :  { %12163 = vst [vmem:[#allocation416_spill] sm:$0xff] %v9287_v49  ;;  %v7353_v49 = vld [vmem:[#allocation2 + $0x1a8] sm:$0xff] }
 0x398   :  { %v2702_v2 = vmul.f32 1.442695, %v2637_v0  ;;  %v9290_v63 = vpop.f32.mrf.mxu1 }
 0x399   :  { %12164 = vst [vmem:[#allocation417_spill] sm:$0xff] %v9290_v63  ;;  %v2446_v41 = vpop.xlane.xlu0 %2445  ;;  %v2455_v48 = vpop.xlane.xlu1 %2454  ;;  %1986 = vmatmul.mubr.f32.gmra.mxu1 %v7352_v54 }
 0x39a   :  { %7004 = vpow2.f32 %v2702_v2  ;;  %v2636_v36 = vsub.f32 %v8855_v1, %v2446_v41  ;;  %v2639_v22 = vsub.f32 %v8861_v46, %v2455_v48  ;;  %v9294_v60 = vpop.f32.mrf.mxu1  ;;  %1991 = vmatprep.mubr.f32.mxu1 %v11987_v15 }
 0x39b   :  { %12165 = vst [vmem:[#allocation418_spill] sm:$0xff] %v9294_v60 }
 0x39c   :  { %v2700_v23 = vmul.f32 1.442695, %v2636_v36  ;;  %v2706_v55 = vmul.f32 1.442695, %v2639_v22  ;;  %v9297_v51 = vpop.f32.mrf.mxu1  ;;  %v7354_v22 = vld [vmem:[#allocation2 + $0x1b0] sm:$0xff] }
 0x39d   :  { %12166 = vst [vmem:[#allocation419_spill] sm:$0xff] %v9297_v51  ;;  %v2452_v0 = vpop.xlane.xlu1 %2451  ;;  %1992 = vmatmul.mubr.f32.gmra.mxu1 %v7353_v49 }
 0x39e   :  { %7006 = vpow2.f32 %v2700_v23  ;;  %v2638_v63 = vsub.f32 %v8869_v50, %v2452_v0  ;;  %v9300_v54 = vpop.f32.mrf.mxu1  ;;  %1997 = vmatprep.mubr.f32.mxu1 %v11987_v15 }
 0x39f   :  { %12167 = vst [vmem:[#allocation420_spill] sm:$0xff] %v9300_v54  ;;  %7008 = vpow2.f32 %v2706_v55  ;;  %v2458_v1 = vpop.xlane.xlu0 %2457 }
 0x3a0   :  { %v2704_v46 = vmul.f32 1.442695, %v2638_v63  ;;  %v2640_v41 = vsub.f32 %v8881_v47, %v2458_v1  ;;  %v9304_v2 = vpop.f32.mrf.mxu1  ;;  %v7355_v1 = vld [vmem:[#allocation2 + $0x1b8] sm:$0xff] }
 0x3a1   :  { %12168 = vst [vmem:[#allocation421_spill] sm:$0xff] %v9304_v2  ;;  %v2461_v36 = vpop.xlane.xlu1 %2460  ;;  %1998 = vmatmul.mubr.f32.gmra.mxu1 %v7354_v22 }
 0x3a2   :  { %7010 = vpow2.f32 %v2704_v46  ;;  %v2708_v48 = vmul.f32 1.442695, %v2640_v41  ;;  %v2641_v49 = vsub.f32 %v8876_v32, %v2461_v36  ;;  %v9307_v23 = vpop.f32.mrf.mxu1  ;;  %2003 = vmatprep.mubr.f32.mxu1 %v11987_v15 }
 0x3a3   :  { %12169 = vst [vmem:[#allocation422_spill] sm:$0xff] %v9307_v23  ;;  %v2464_v50 = vpop.xlane.xlu0 %2463 }
 0x3a4   :  { %7012 = vpow2.f32 %v2708_v48  ;;  %v2710_v55 = vmul.f32 1.442695, %v2641_v49  ;;  %v2642_v63 = vsub.f32 %v8895_v52, %v2464_v50  ;;  %v9311_v0 = vpop.f32.mrf.mxu1 }
 0x3a5   :  { %12170 = vst [vmem:[#allocation423_spill] sm:$0xff] %v9311_v0  ;;  %v2467_v47 = vpop.xlane.xlu1 %2466  ;;  %2004 = vmatmul.mubr.f32.gmra.mxu1 %v7355_v1 }
 0x3a6   :  { %7014 = vpow2.f32 %v2710_v55  ;;  %v2712_v22 = vmul.f32 1.442695, %v2642_v63  ;;  %v2643_v46 = vsub.f32 %v8890_v59, %v2467_v47  ;;  %v9314_v41 = vpop.f32.mrf.mxu1  ;;  %2009 = vmatprep.mubr.f32.mxu1 %v11987_v15  ;;  %v7356_v63 = vld [vmem:[#allocation2 + $0x1c0] sm:$0xff] }
 0x3a7   :  { %12171 = vst [vmem:[#allocation424_spill] sm:$0xff] %v9314_v41  ;;  %v9317_v32 = vpop.eup %7004  ;;  %v2470_v36 = vpop.xlane.xlu0 %2469 }
 0x3a8   :  { %7016 = vpow2.f32 %v2712_v22  ;;  %v2714_v48 = vmul.f32 1.442695, %v2643_v46  ;;  %v2644_v52 = vsub.f32 %v8909_v44, %v2470_v36  ;;  %v2831_v49 = vsel %vm2443_vm0, %v9317_v32, 0.0  ;;  %v9322_v50 = vpop.f32.mrf.mxu1 }
 0x3a9   :  { %12172 = vst [vmem:[#allocation425_spill] sm:$0xff] %v9322_v50  ;;  %v2473_v55 = vpop.xlane.xlu1 %2472  ;;  %2832 = vadd.xlane.f32.xlu1 %v2831_v49  ;;  %2010 = vmatmul.mubr.f32.gmra.mxu1 %v7356_v63 }
 0x3aa   :  { %7018 = vpow2.f32 %v2714_v48  ;;  %v2716_v59 = vmul.f32 1.442695, %v2644_v52  ;;  %v2645_v47 = vsub.f32 %v8904_v39, %v2473_v55  ;;  %v9325_v1 = vpop.f32.mrf.mxu1  ;;  %2015 = vmatprep.mubr.f32.mxu1 %v11987_v15  ;;  %v7357_v55 = vld [vmem:[#allocation2 + $0x1c8] sm:$0xff] }
 0x3ab   :  { %12173 = vst [vmem:[#allocation426_spill] sm:$0xff] %v9325_v1  ;;  %v9328_v22 = vpop.eup %7006  ;;  %v2476_v44 = vpop.xlane.xlu0 %2475 }
 0x3ac   :  { %v9330_v46 = vpop.eup %7008  ;;  %7020 = vpow2.f32 %v2716_v59  ;;  %v2718_v36 = vmul.f32 1.442695, %v2645_v47  ;;  %v2646_v50 = vsub.f32 %v8923_v45, %v2476_v44  ;;  %v2828_v49 = vsel %vm2443_vm0, %v9328_v22, 0.0  ;;  %v9335_v48 = vpop.f32.mrf.mxu1 }
 0x3ad   :  { %12174 = vst [vmem:[#allocation427_spill] sm:$0xff] %v9335_v48  ;;  %v2479_v52 = vpop.xlane.xlu1 %2478  ;;  %v2837_v39 = vsel %vm2443_vm0, %v9330_v46, 0.0  ;;  %2829 = vadd.xlane.f32.xlu0 %v2828_v49  ;;  %2016 = vmatmul.mubr.f32.gmra.mxu1 %v7357_v55 }
 0x3ae   :  { %7022 = vpow2.f32 %v2718_v36  ;;  %v2720_v63 = vmul.f32 1.442695, %v2646_v50  ;;  %v2647_v1 = vsub.f32 %v8918_v40, %v2479_v52  ;;  %2838 = vadd.xlane.f32.xlu1 %v2837_v39  ;;  %v9340_v59 = vpop.f32.mrf.mxu1  ;;  %2021 = vmatprep.mubr.f32.mxu1 %v11987_v15  ;;  %v7358_v36 = vld [vmem:[#allocation2 + $0x1d0] sm:$0xff] }
 0x3af   :  { %12175 = vst [vmem:[#allocation428_spill] sm:$0xff] %v9340_v59  ;;  %v9343_v45 = vpop.eup %7010  ;;  %v2482_v47 = vpop.xlane.xlu0 %2481 }
 0x3b0   :  { %7024 = vpow2.f32 %v2720_v63  ;;  %v2722_v44 = vmul.f32 1.442695, %v2647_v1  ;;  %v2648_v48 = vsub.f32 %v8937_v30, %v2482_v47  ;;  %v2834_v49 = vsel %vm2443_vm0, %v9343_v45, 0.0  ;;  %v9348_v55 = vpop.f32.mrf.mxu1 }
 0x3b1   :  { %12176 = vst [vmem:[#allocation429_spill] sm:$0xff] %v9348_v55  ;;  %v9350_v50 = vpop.eup %7012  ;;  %v2485_v40 = vpop.xlane.xlu1 %2484  ;;  %2835 = vadd.xlane.f32.xlu0 %v2834_v49  ;;  %2022 = vmatmul.mubr.f32.gmra.mxu1 %v7358_v36  ;;  %v7359_v55 = vld [vmem:[#allocation2 + $0x1d8] sm:$0xff] }
 0x3b2   :  { %7026 = vpow2.f32 %v2722_v44  ;;  %v2724_v52 = vmul.f32 1.442695, %v2648_v48  ;;  %v2649_v39 = vsub.f32 %v8932_v8, %v2485_v40  ;;  %v9353_v59 = vpop.f32.mrf.mxu1  ;;  %2027 = vmatprep.mubr.f32.mxu1 %v11987_v15  ;;  %v2840_v63 = vsel %vm2443_vm0, %v9350_v50, 0.0 }
 0x3b3   :  { %12177 = vst [vmem:[#allocation430_spill] sm:$0xff] %v9353_v59  ;;  %v9356_v30 = vpop.eup %7014  ;;  %v2488_v1 = vpop.xlane.xlu0 %2487 }
 0x3b4   :  { %7028 = vpow2.f32 %v2724_v52  ;;  %v2726_v47 = vmul.f32 1.442695, %v2649_v39  ;;  %v2650_v49 = vsub.f32 %v8951_v58, %v2488_v1  ;;  %v2843_v44 = vsel %vm2443_vm0, %v9356_v30, 0.0  ;;  %v9363_v48 = vpop.f32.mrf.mxu1 }
 0x3b5   :  { %12178 = vst [vmem:[#allocation431_spill] sm:$0xff] %v9363_v48  ;;  %v9365_v8 = vpop.eup %7016  ;;  %v2491_v40 = vpop.xlane.xlu1 %2490  ;;  %2844 = vadd.xlane.f32.xlu1 %v2843_v44  ;;  %2841 = vadd.xlane.f32.xlu0 %v2840_v63 }
 0x3b6   :  { %7030 = vpow2.f32 %v2726_v47  ;;  %v2728_v36 = vmul.f32 1.442695, %v2650_v49  ;;  %v2651_v59 = vsub.f32 %v8946_v27, %v2491_v40  ;;  %2028 = vmatmul.mubr.f32.gmra.mxu1 %v7359_v55  ;;  %v9368_v52 = vpop.f32.mrf.mxu1  ;;  %v2846_v1 = vsel %vm2443_vm0, %v9365_v8, 0.0 }
 0x3b7   :  { %12179 = vst [vmem:[#allocation432_spill] sm:$0xff] %v9368_v52  ;;  %v9370_v39 = vpop.eup %7018  ;;  %v2494_v58 = vpop.xlane.xlu0 %2493  ;;  %2033 = vmatprep.mubr.f32.mxu1 %v11987_v15  ;;  %v7360_v52 = vld [vmem:[#allocation2 + $0x1e0] sm:$0xff] }
 0x3b8   :  { %7032 = vpow2.f32 %v2728_v36  ;;  %v2730_v48 = vmul.f32 1.442695, %v2651_v59  ;;  %v2652_v63 = vsub.f32 %v8964_v33, %v2494_v58  ;;  %v2849_v47 = vsel %vm2443_vm0, %v9370_v39, 0.0  ;;  %v9378_v27 = vpop.f32.mrf.mxu1 }
 0x3b9   :  { %12180 = vst [vmem:[#allocation433_spill] sm:$0xff] %v9378_v27  ;;  %v9380_v55 = vpop.eup %7020  ;;  %v2497_v49 = vpop.xlane.xlu1 %2496  ;;  %2850 = vadd.xlane.f32.xlu1 %v2849_v47  ;;  %2847 = vadd.xlane.f32.xlu0 %v2846_v1 }
 0x3ba   :  { %7034 = vpow2.f32 %v2730_v48  ;;  %v2732_v44 = vmul.f32 1.442695, %v2652_v63  ;;  %v2653_v40 = vsub.f32 %v8959_v25, %v2497_v49  ;;  %2034 = vmatmul.mubr.f32.gmra.mxu1 %v7360_v52  ;;  %v9383_v36 = vpop.f32.mrf.mxu1  ;;  %v2852_v58 = vsel %vm2443_vm0, %v9380_v55, 0.0 }
 0x3bb   :  { %12181 = vst [vmem:[#allocation434_spill] sm:$0xff] %v9383_v36  ;;  %v9385_v59 = vpop.eup %7022  ;;  %v2500_v33 = vpop.xlane.xlu0 %2499  ;;  %2039 = vmatprep.mubr.f32.mxu1 %v11987_v15  ;;  %v7361_v36 = vld [vmem:[#allocation2 + $0x1e8] sm:$0xff] }
 0x3bc   :  { %7036 = vpow2.f32 %v2732_v44  ;;  %v2734_v27 = vmul.f32 1.442695, %v2653_v40  ;;  %v2654_v1 = vsub.f32 %v8977_v29, %v2500_v33  ;;  %v2855_v48 = vsel %vm2443_vm0, %v9385_v59, 0.0  ;;  %v9393_v25 = vpop.f32.mrf.mxu1 }
 0x3bd   :  { %12182 = vst [vmem:[#allocation435_spill] sm:$0xff] %v9393_v25  ;;  %v9395_v52 = vpop.eup %7024  ;;  %v2503_v63 = vpop.xlane.xlu1 %2502  ;;  %2856 = vadd.xlane.f32.xlu1 %v2855_v48  ;;  %2853 = vadd.xlane.f32.xlu0 %v2852_v58 }
 0x3be   :  { %7038 = vpow2.f32 %v2734_v27  ;;  %v2736_v47 = vmul.f32 1.442695, %v2654_v1  ;;  %v2655_v49 = vsub.f32 %v8972_v14, %v2503_v63  ;;  %2040 = vmatmul.mubr.f32.gmra.mxu1 %v7361_v36  ;;  %v9398_v44 = vpop.f32.mrf.mxu1  ;;  %v2858_v33 = vsel %vm2443_vm0, %v9395_v52, 0.0 }
 0x3bf   :  { %12183 = vst [vmem:[#allocation436_spill] sm:$0xff] %v9398_v44  ;;  %v9400_v40 = vpop.eup %7026  ;;  %v2506_v29 = vpop.xlane.xlu0 %2505  ;;  %2045 = vmatprep.mubr.f32.mxu1 %v11987_v15  ;;  %v7362_v44 = vld [vmem:[#allocation2 + $0x1f0] sm:$0xff] }
 0x3c0   :  { %7040 = vpow2.f32 %v2736_v47  ;;  %v2738_v25 = vmul.f32 1.442695, %v2655_v49  ;;  %v2656_v58 = vsub.f32 %v8990_v5, %v2506_v29  ;;  %v2861_v27 = vsel %vm2443_vm0, %v9400_v40, 0.0  ;;  %v9408_v14 = vpop.f32.mrf.mxu1 }
 0x3c1   :  { %12184 = vst [vmem:[#allocation437_spill] sm:$0xff] %v9408_v14  ;;  %v9410_v36 = vpop.eup %7028  ;;  %v2509_v1 = vpop.xlane.xlu1 %2508  ;;  %2862 = vadd.xlane.f32.xlu1 %v2861_v27  ;;  %2859 = vadd.xlane.f32.xlu0 %v2858_v33  ;;  %v9420_v14 = vld [vmem:[#allocation7] sm:$0xff] }
 0x3c2   :  { %7042 = vpow2.f32 %v2738_v25  ;;  %v2740_v48 = vmul.f32 1.442695, %v2656_v58  ;;  %v2657_v63 = vsub.f32 %v8985_v43, %v2509_v1  ;;  %2046 = vmatmul.mubr.f32.gmra.mxu1 %v7362_v44  ;;  %v9413_v47 = vpop.f32.mrf.mxu1  ;;  %v2864_v29 = vsel %vm2443_vm0, %v9410_v36, 0.0 }
 0x3c3   :  { %12185 = vst [vmem:[#allocation438_spill] sm:$0xff] %v9413_v47  ;;  %v9415_v49 = vpop.eup %7030  ;;  %v2512_v5 = vpop.xlane.xlu0 %2511  ;;  %2051 = vmatprep.mubr.f32.mxu1 %v11987_v15  ;;  %v11648_v44 = vmov 1   ;;  %v11650_v58 = vmov 0  }
 0x3c4   :  { %7044 = vpow2.f32 %v2740_v48  ;;  %v2742_v33 = vmul.f32 1.442695, %v2657_v63  ;;  %v2658_v25 = vsub.f32 %v9003_v21, %v2512_v5  ;;  %v2867_v43 = vsel %vm2443_vm0, %v9415_v49, 0.0  ;;  %6750 = vset.pattern.permute.xlu0 %v11648_v44  ;;  %6749 = vset.pattern.permute.xlu1 %v11650_v58  ;;  %v9427_v27 = vpop.f32.mrf.mxu1  ;;  %v7363_v5 = vld [vmem:[#allocation2 + $0x1f8] sm:$0xff] }
 0x3c5   :  { %12186 = vst [vmem:[#allocation439_spill] sm:$0xff] %v9427_v27  ;;  %v9429_v1 = vpop.eup %7032  ;;  %v2515_v47 = vpop.xlane.xlu1 %2514  ;;  %2868 = vadd.xlane.f32.xlu1 %v2867_v43  ;;  %2865 = vadd.xlane.f32.xlu0 %v2864_v29  ;;  %v9433_v48 = vcombine.high %v9420_v14, %v9420_v14 }
 0x3c6   :  { %7046 = vpow2.f32 %v2742_v33  ;;  %v2744_v21 = vmul.f32 1.442695, %v2658_v25  ;;  %v2659_v63 = vsub.f32 %v8998_v20, %v2515_v47  ;;  %2052 = vmatmul.mubr.f32.gmra.mxu1 %v7363_v5  ;;  %v9436_v44 = vpop.f32.mrf.mxu1  ;;  %v2870_v43 = vsel %vm2443_vm0, %v9429_v1, 0.0 }
 0x3c7   :  { %12187 = vst [vmem:[#allocation440_spill] sm:$0xff] %v9436_v44  ;;  %v9438_v58 = vpop.eup %7034  ;;  %v2518_v27 = vpop.xlane.xlu0 %2517  ;;  %6446 = vmatprep.subr.msk.mxu1 %vm3415_vm1, %v9433_v48  ;;  %3484 = vmatprep.mubr.f32.mxu1 %v11987_v15 }
 0x3c8   :  { %7048 = vpow2.f32 %v2744_v21  ;;  %v2746_v29 = vmul.f32 1.442695, %v2659_v63  ;;  %v2660_v33 = vsub.f32 %v9016_v4, %v2518_v27  ;;  %v2873_v20 = vsel %vm2443_vm0, %v9438_v58, 0.0  ;;  %6447 = vmatpush1.msk.msra.mxu1 %vm3415_vm1, %v9420_v14  ;;  %v9450_v47 = vpop.f32.mrf.mxu1  ;;  %6486 = vmatprep.subr.msk.mxu0 %vm3415_vm1, %v9433_v48 }
 0x3c9   :  { %12188 = vst [vmem:[#allocation441_spill] sm:$0xff] %v9450_v47  ;;  %v9454_v25 = vpop.eup %7036  ;;  %v2521_v5 = vpop.xlane.xlu1 %2520  ;;  %2874 = vadd.xlane.f32.xlu1 %v2873_v20  ;;  %2871 = vadd.xlane.f32.xlu0 %v2870_v43 }
 0x3ca   :  { %7050 = vpow2.f32 %v2746_v29  ;;  %v2748_v21 = vmul.f32 1.442695, %v2660_v33  ;;  %v2661_v4 = vsub.f32 %v9011_v34, %v2521_v5  ;;  %v9457_v27 = vpop.f32.mrf.mxu1  ;;  %6456 = vmatprep.subr.msk.mxu1 %vm3415_vm1, %v9433_v48  ;;  %6487 = vmatpush1.msk.msra.mxu0 %vm3415_vm1, %v9420_v14  ;;  %v2876_v44 = vsel %vm2443_vm0, %v9454_v25, 0.0 }
 0x3cb   :  { %12189 = vst [vmem:[#allocation442_spill] sm:$0xff] %v9457_v27  ;;  %v9463_v63 = vpop.eup %7038  ;;  %v2524_v47 = vpop.xlane.xlu0 %2523  ;;  %6506 = vmatprep.subr.msk.mxu0 %vm3415_vm1, %v9433_v48 }
 0x3cc   :  { %7052 = vpow2.f32 %v2748_v21  ;;  %v2750_v43 = vmul.f32 1.442695, %v2661_v4  ;;  %v2662_v34 = vsub.f32 %v9029_v61, %v2524_v47  ;;  %v2879_v29 = vsel %vm2443_vm0, %v9463_v63, 0.0  ;;  %v9472_v33 = vpop.f32.mrf.mxu1 }
 0x3cd   :  { %12190 = vst [vmem:[#allocation443_spill] sm:$0xff] %v9472_v33  ;;  %v9474_v20 = vpop.eup %7040  ;;  %v2527_v5 = vpop.xlane.xlu1 %2526  ;;  %2880 = vadd.xlane.f32.xlu1 %v2879_v29  ;;  %2877 = vadd.xlane.f32.xlu0 %v2876_v44 }
 0x3ce   :  { %7054 = vpow2.f32 %v2750_v43  ;;  %v2752_v27 = vmul.f32 1.442695, %v2662_v34  ;;  %v2663_v23 = vsub.f32 %v9024_v16, %v2527_v5  ;;  %v9477_v2 = vpop.f32.mrf.mxu1  ;;  %v2882_v61 = vsel %vm2443_vm0, %v9474_v20, 0.0 }
 0x3cf   :  { %12191 = vst [vmem:[#allocation444_spill] sm:$0xff] %v9477_v2  ;;  %v9479_v21 = vpop.eup %7042  ;;  %v2530_v4 = vpop.xlane.xlu0 %2529 }
 0x3d0   :  { %7056 = vpow2.f32 %v2752_v27  ;;  %v2754_v47 = vmul.f32 1.442695, %v2663_v23  ;;  %v2664_v33 = vsub.f32 %v9042_v12, %v2530_v4  ;;  %v2885_v29 = vsel %vm2443_vm0, %v9479_v21, 0.0 }
 0x3d1   :  { %v9486_v44 = vpop.eup %7044  ;;  %v2533_v43 = vpop.xlane.xlu1 %2532  ;;  %2886 = vadd.xlane.f32.xlu1 %v2885_v29  ;;  %2883 = vadd.xlane.f32.xlu0 %v2882_v61 }
 0x3d2   :  { %v9488_v16 = vpop.f32.mrf.mxu1  ;;  %7058 = vpow2.f32 %v2754_v47  ;;  %v2756_v34 = vmul.f32 1.442695, %v2664_v33  ;;  %v2665_v5 = vsub.f32 %v9037_v24, %v2533_v43  ;;  %v2888_v12 = vsel %vm2443_vm0, %v9486_v44, 0.0 }
 0x3d3   :  { %12192 = vst [vmem:[#allocation445_spill] sm:$0xff] %v9488_v16  ;;  %v9491_v2 = vpop.eup %7046  ;;  %v2536_v27 = vpop.xlane.xlu0 %2535 }
 0x3d4   :  { %v9495_v23 = vpop.f32.mrf.mxu1  ;;  %7060 = vpow2.f32 %v2756_v34  ;;  %v2758_v4 = vmul.f32 1.442695, %v2665_v5  ;;  %v2666_v41 = vsub.f32 %v9055_v26, %v2536_v27  ;;  %v2891_v61 = vsel %vm2443_vm0, %v9491_v2, 0.0 }
 0x3d5   :  { %12193 = vst [vmem:[#allocation446_spill] sm:$0xff] %v9495_v23  ;;  %v9500_v29 = vpop.eup %7048  ;;  %v2539_v33 = vpop.xlane.xlu1 %2538  ;;  %2892 = vadd.xlane.f32.xlu1 %v2891_v61  ;;  %2889 = vadd.xlane.f32.xlu0 %v2888_v12 }
 0x3d6   :  { %v9502_v24 = vpop.f32.mrf.mxu1  ;;  %7062 = vpow2.f32 %v2758_v4  ;;  %v2760_v47 = vmul.f32 1.442695, %v2666_v41  ;;  %v2667_v43 = vsub.f32 %v9050_v38, %v2539_v33  ;;  %v2894_v26 = vsel %vm2443_vm0, %v9500_v29, 0.0 }
 0x3d7   :  { %12194 = vst [vmem:[#allocation447_spill] sm:$0xff] %v9502_v24  ;;  %v9505_v16 = vpop.eup %7050  ;;  %v2542_v34 = vpop.xlane.xlu0 %2541 }
 0x3d8   :  { %v9509_v5 = vpop.f32.mrf.mxu1  ;;  %7064 = vpow2.f32 %v2760_v47  ;;  %v2762_v27 = vmul.f32 1.442695, %v2667_v43  ;;  %v2668_v23 = vsub.f32 %v9068_v37, %v2542_v34  ;;  %v2897_v12 = vsel %vm2443_vm0, %v9505_v16, 0.0 }
 0x3d9   :  { %12195 = vst [vmem:[#allocation448_spill] sm:$0xff] %v9509_v5  ;;  %v9514_v61 = vpop.eup %7052  ;;  %v2545_v41 = vpop.xlane.xlu1 %2544  ;;  %2898 = vadd.xlane.f32.xlu1 %v2897_v12  ;;  %2895 = vadd.xlane.f32.xlu0 %v2894_v26 }
 0x3da   :  { %v9516_v38 = vpop.f32.mrf.mxu1  ;;  %7066 = vpow2.f32 %v2762_v27  ;;  %v2764_v4 = vmul.f32 1.442695, %v2668_v23  ;;  %v2669_v33 = vsub.f32 %v9063_v57, %v2545_v41  ;;  %v2900_v37 = vsel %vm2443_vm0, %v9514_v61, 0.0 }
 0x3db   :  { %12196 = vst [vmem:[#allocation449_spill] sm:$0xff] %v9516_v38  ;;  %v9519_v24 = vpop.eup %7054  ;;  %v2548_v47 = vpop.xlane.xlu0 %2547 }
 0x3dc   :  { %v9523_v43 = vpop.f32.mrf.mxu1  ;;  %7068 = vpow2.f32 %v2764_v4  ;;  %v2766_v34 = vmul.f32 1.442695, %v2669_v33  ;;  %v2670_v5 = vsub.f32 %v9081_v13, %v2548_v47  ;;  %v2903_v26 = vsel %vm2443_vm0, %v9519_v24, 0.0 }
 0x3dd   :  { %12197 = vst [vmem:[#allocation450_spill] sm:$0xff] %v9523_v43  ;;  %v9528_v12 = vpop.eup %7056  ;;  %v2551_v23 = vpop.xlane.xlu1 %2550  ;;  %2904 = vadd.xlane.f32.xlu1 %v2903_v26  ;;  %2901 = vadd.xlane.f32.xlu0 %v2900_v37 }
 0x3de   :  { %v9530_v57 = vpop.f32.mrf.mxu1  ;;  %7070 = vpow2.f32 %v2766_v34  ;;  %v2768_v27 = vmul.f32 1.442695, %v2670_v5  ;;  %v2671_v41 = vsub.f32 %v9076_v19, %v2551_v23  ;;  %v2906_v13 = vsel %vm2443_vm0, %v9528_v12, 0.0 }
 0x3df   :  { %12198 = vst [vmem:[#allocation451_spill] sm:$0xff] %v9530_v57  ;;  %v9533_v38 = vpop.eup %7058  ;;  %v2554_v4 = vpop.xlane.xlu0 %2553 }
 0x3e0   :  { %v9537_v33 = vpop.f32.mrf.mxu1  ;;  %7072 = vpow2.f32 %v2768_v27  ;;  %v2770_v47 = vmul.f32 1.442695, %v2671_v41  ;;  %v2672_v43 = vsub.f32 %v9094_v35, %v2554_v4  ;;  %v2909_v37 = vsel %vm2443_vm0, %v9533_v38, 0.0 }
 0x3e1   :  { %12199 = vst [vmem:[#allocation452_spill] sm:$0xff] %v9537_v33  ;;  %v9542_v26 = vpop.eup %7060  ;;  %v2557_v5 = vpop.xlane.xlu1 %2556  ;;  %2910 = vadd.xlane.f32.xlu1 %v2909_v37  ;;  %2907 = vadd.xlane.f32.xlu0 %v2906_v13 }
 0x3e2   :  { %12200 = vst [vmem:[#allocation453_spill] sm:$0xff] %v9542_v26  ;;  %v9544_v19 = vpop.f32.mrf.mxu1  ;;  %7074 = vpow2.f32 %v2770_v47  ;;  %v2772_v34 = vmul.f32 1.442695, %v2672_v43  ;;  %v2673_v23 = vsub.f32 %v9089_v17, %v2557_v5  ;;  %v2912_v35 = vsel %vm2443_vm0, %v9542_v26, 0.0 }
 0x3e3   :  { %12201 = vst [vmem:[#allocation454_spill] sm:$0xff] %v9544_v19  ;;  %v9547_v57 = vpop.eup %7062  ;;  %v2560_v27 = vpop.xlane.xlu0 %2559 }
 0x3e4   :  { %12202 = vst [vmem:[#allocation455_spill] sm:$0xff] %v9547_v57  ;;  %v9551_v41 = vpop.f32.mrf.mxu1  ;;  %7076 = vpow2.f32 %v2772_v34  ;;  %v2774_v4 = vmul.f32 1.442695, %v2673_v23  ;;  %v2674_v33 = vsub.f32 %v9107_v28, %v2560_v27  ;;  %v2915_v13 = vsel %vm2443_vm0, %v9547_v57, 0.0 }
 0x3e5   :  { %12203 = vst [vmem:[#allocation456_spill] sm:$0xff] %v9551_v41  ;;  %v9556_v37 = vpop.eup %7064  ;;  %v2563_v43 = vpop.xlane.xlu1 %2562  ;;  %2916 = vadd.xlane.f32.xlu1 %v2915_v13  ;;  %2913 = vadd.xlane.f32.xlu0 %v2912_v35 }
 0x3e6   :  { %12204 = vst [vmem:[#allocation457_spill] sm:$0xff] %v9556_v37  ;;  %v9558_v17 = vpop.f32.mrf.mxu1  ;;  %7078 = vpow2.f32 %v2774_v4  ;;  %v2776_v47 = vmul.f32 1.442695, %v2674_v33  ;;  %v2675_v5 = vsub.f32 %v9102_v6, %v2563_v43  ;;  %v2918_v28 = vsel %vm2443_vm0, %v9556_v37, 0.0 }
 0x3e7   :  { %12205 = vst [vmem:[#allocation458_spill] sm:$0xff] %v9558_v17  ;;  %v9561_v19 = vpop.eup %7066  ;;  %v2566_v34 = vpop.xlane.xlu0 %2565 }
 0x3e8   :  { %12206 = vst [vmem:[#allocation459_spill] sm:$0xff] %v9561_v19  ;;  %v9565_v23 = vpop.f32.mrf.mxu1  ;;  %7080 = vpow2.f32 %v2776_v47  ;;  %v2778_v27 = vmul.f32 1.442695, %v2675_v5  ;;  %v2676_v41 = vsub.f32 %v9120_v18, %v2566_v34  ;;  %v2921_v35 = vsel %vm2443_vm0, %v9561_v19, 0.0 }
 0x3e9   :  { %12207 = vst [vmem:[#allocation460_spill] sm:$0xff] %v9565_v23  ;;  %v9570_v13 = vpop.eup %7068  ;;  %v2569_v33 = vpop.xlane.xlu1 %2568  ;;  %2922 = vadd.xlane.f32.xlu1 %v2921_v35  ;;  %2919 = vadd.xlane.f32.xlu0 %v2918_v28  ;;  %v11672_v19 = vmov 3  }
 0x3ea   :  { %v9572_v6 = vpop.f32.mrf.mxu1  ;;  %7082 = vpow2.f32 %v2778_v27  ;;  %v2780_v4 = vmul.f32 1.442695, %v2676_v41  ;;  %v2677_v43 = vsub.f32 %v9115_v10, %v2569_v33  ;;  %v2924_v18 = vsel %vm2443_vm0, %v9570_v13, 0.0 }
 0x3eb   :  { %12208 = vst [vmem:[#allocation461_spill] sm:$0xff] %v9572_v6  ;;  %v9575_v17 = vpop.eup %7070  ;;  %v2572_v47 = vpop.xlane.xlu0 %2571 }
 0x3ec   :  { %v9579_v5 = vpop.f32.mrf.mxu1  ;;  %7084 = vpow2.f32 %v2780_v4  ;;  %v2782_v34 = vmul.f32 1.442695, %v2677_v43  ;;  %v2678_v23 = vsub.f32 %v9133_v7, %v2572_v47  ;;  %v2927_v28 = vsel %vm2443_vm0, %v9575_v17, 0.0 }
 0x3ed   :  { %12209 = vst [vmem:[#allocation462_spill] sm:$0xff] %v9579_v5  ;;  %v9584_v35 = vpop.eup %7072  ;;  %v2575_v41 = vpop.xlane.xlu1 %2574  ;;  %2928 = vadd.xlane.f32.xlu1 %v2927_v28  ;;  %2925 = vadd.xlane.f32.xlu0 %v2924_v18 }
 0x3ee   :  { %v9586_v10 = vpop.f32.mrf.mxu1  ;;  %7086 = vpow2.f32 %v2782_v34  ;;  %v2784_v27 = vmul.f32 1.442695, %v2678_v23  ;;  %v2679_v33 = vsub.f32 %v9128_v53, %v2575_v41  ;;  %v2930_v7 = vsel %vm2443_vm0, %v9584_v35, 0.0 }
 0x3ef   :  { %12210 = vst [vmem:[#allocation463_spill] sm:$0xff] %v9586_v10  ;;  %v9589_v6 = vpop.eup %7074  ;;  %v2578_v4 = vpop.xlane.xlu0 %2577 }
 0x3f0   :  { %v9593_v43 = vpop.f32.mrf.mxu1  ;;  %7088 = vpow2.f32 %v2784_v27  ;;  %v2786_v47 = vmul.f32 1.442695, %v2679_v33  ;;  %v2680_v5 = vsub.f32 %v9146_v42, %v2578_v4  ;;  %v2933_v18 = vsel %vm2443_vm0, %v9589_v6, 0.0 }
 0x3f1   :  { %12211 = vst [vmem:[#allocation464_spill] sm:$0xff] %v9593_v43  ;;  %v9598_v28 = vpop.eup %7076  ;;  %v2581_v23 = vpop.xlane.xlu1 %2580  ;;  %2934 = vadd.xlane.f32.xlu1 %v2933_v18  ;;  %2931 = vadd.xlane.f32.xlu0 %v2930_v7 }
 0x3f2   :  { %v9600_v53 = vpop.f32.mrf.mxu1  ;;  %7090 = vpow2.f32 %v2786_v47  ;;  %v2788_v34 = vmul.f32 1.442695, %v2680_v5  ;;  %v2681_v41 = vsub.f32 %v9141_v56, %v2581_v23  ;;  %v2936_v42 = vsel %vm2443_vm0, %v9598_v28, 0.0 }
 0x3f3   :  { %12212 = vst [vmem:[#allocation465_spill] sm:$0xff] %v9600_v53  ;;  %v9603_v10 = vpop.eup %7078  ;;  %v2584_v27 = vpop.xlane.xlu0 %2583 }
 0x3f4   :  { %v9607_v33 = vpop.f32.mrf.mxu1  ;;  %7092 = vpow2.f32 %v2788_v34  ;;  %v2790_v4 = vmul.f32 1.442695, %v2681_v41  ;;  %v2682_v43 = vsub.f32 %v9159_v3, %v2584_v27  ;;  %v2939_v7 = vsel %vm2443_vm0, %v9603_v10, 0.0 }
 0x3f5   :  { %12213 = vst [vmem:[#allocation466_spill] sm:$0xff] %v9607_v33  ;;  %v9612_v18 = vpop.eup %7080  ;;  %v2587_v5 = vpop.xlane.xlu1 %2586  ;;  %2940 = vadd.xlane.f32.xlu1 %v2939_v7  ;;  %2937 = vadd.xlane.f32.xlu0 %v2936_v42 }
 0x3f6   :  { %v9614_v56 = vpop.f32.mrf.mxu1  ;;  %7094 = vpow2.f32 %v2790_v4  ;;  %v2792_v47 = vmul.f32 1.442695, %v2682_v43  ;;  %v2683_v23 = vsub.f32 %v9154_v31, %v2587_v5  ;;  %v2942_v3 = vsel %vm2443_vm0, %v9612_v18, 0.0 }
 0x3f7   :  { %12214 = vst [vmem:[#allocation467_spill] sm:$0xff] %v9614_v56  ;;  %v9617_v53 = vpop.eup %7082  ;;  %v2590_v34 = vpop.xlane.xlu0 %2589 }
 0x3f8   :  { %v9621_v41 = vpop.f32.mrf.mxu1  ;;  %7096 = vpow2.f32 %v2792_v47  ;;  %v2794_v27 = vmul.f32 1.442695, %v2683_v23  ;;  %v2684_v33 = vsub.f32 %v9172_v62, %v2590_v34  ;;  %v2945_v42 = vsel %vm2443_vm0, %v9617_v53, 0.0 }
 0x3f9   :  { %12215 = vst [vmem:[#allocation468_spill] sm:$0xff] %v9621_v41  ;;  %v9626_v7 = vpop.eup %7084  ;;  %v2593_v43 = vpop.xlane.xlu1 %2592  ;;  %2946 = vadd.xlane.f32.xlu1 %v2945_v42  ;;  %2943 = vadd.xlane.f32.xlu0 %v2942_v3 }
 0x3fa   :  { %12216 = vst [vmem:[#allocation469_spill] sm:$0xff] %v9626_v7  ;;  %v9628_v31 = vpop.f32.mrf.mxu1  ;;  %7098 = vpow2.f32 %v2794_v27  ;;  %v2796_v4 = vmul.f32 1.442695, %v2684_v33  ;;  %v2685_v5 = vsub.f32 %v9167_v11, %v2593_v43  ;;  %v2948_v62 = vsel %vm2443_vm0, %v9626_v7, 0.0  ;;  %v12222_v43 = vld [vmem:[#allocation383_spill] sm:$0xff] }
 0x3fb   :  { %12217 = vst [vmem:[#allocation470_spill] sm:$0xff] %v9628_v31  ;;  %v9631_v56 = vpop.eup %7086  ;;  %v2596_v47 = vpop.xlane.xlu0 %2595 }
 0x3fc   :  { %12218 = vst [vmem:[#allocation471_spill] sm:$0xff] %v9631_v56  ;;  %v9635_v23 = vpop.f32.mrf.mxu1  ;;  %7100 = vpow2.f32 %v2796_v4  ;;  %v2798_v34 = vmul.f32 1.442695, %v2685_v5  ;;  %v2686_v41 = vsub.f32 %v9185_v9, %v2596_v47  ;;  %v2951_v3 = vsel %vm2443_vm0, %v9631_v56, 0.0 }
 0x3fd   :  { %12219 = vst [vmem:[#allocation472_spill] sm:$0xff] %v9635_v23  ;;  %v9640_v42 = vpop.eup %7088  ;;  %v2599_v33 = vpop.xlane.xlu1 %2598  ;;  %2952 = vadd.xlane.f32.xlu1 %v2951_v3  ;;  %2949 = vadd.xlane.f32.xlu0 %v2948_v62  ;;  %v12225_v23 = vld [vmem:[#allocation388_spill] sm:$0xff] }
 0x3fe   :  { %12220 = vst [vmem:[#allocation473_spill] sm:$0xff] %v9640_v42  ;;  %v9642_v11 = vpop.f32.mrf.mxu1  ;;  %7102 = vpow2.f32 %v2798_v34  ;;  %v2800_v27 = vmul.f32 1.442695, %v2686_v41  ;;  %v2687_v31 = vsub.f32 %v12222_v43, %v2599_v33  ;;  %v2954_v9 = vsel %vm2443_vm0, %v9640_v42, 0.0  ;;  %v12228_v43 = vld [vmem:[#allocation386_spill] sm:$0xff] }
 0x3ff   :  { %12221 = vst [vmem:[#allocation474_spill] sm:$0xff] %v9642_v11  ;;  %v9645_v0 = vpop.eup %7090  ;;  %v2602_v4 = vpop.xlane.xlu0 %2601 }
 0x400   :  { %12223 = vst [vmem:[#allocation383_spill] sm:$0xff] %v9645_v0  ;;  %v9649_v5 = vpop.f32.mrf.mxu1  ;;  %7104 = vpow2.f32 %v2800_v27  ;;  %v2802_v47 = vmul.f32 1.442695, %v2687_v31  ;;  %v2688_v54 = vsub.f32 %v12225_v23, %v2602_v4  ;;  %v2957_v62 = vsel %vm2443_vm0, %v9645_v0, 0.0 }
 0x401   :  { %12224 = vst [vmem:[#allocation475_spill] sm:$0xff] %v9649_v5  ;;  %v9654_v3 = vpop.eup %7092  ;;  %v2605_v41 = vpop.xlane.xlu1 %2604  ;;  %2958 = vadd.xlane.f32.xlu1 %v2957_v62  ;;  %2955 = vadd.xlane.f32.xlu0 %v2954_v9  ;;  %v12231_v5 = vld [vmem:[#allocation392_spill] sm:$0xff] }
 0x402   :  { %12226 = vst [vmem:[#allocation388_spill] sm:$0xff] %v9654_v3  ;;  %v9656_v34 = vpop.f32.mrf.mxu1  ;;  %7106 = vpow2.f32 %v2802_v47  ;;  %v2804_v33 = vmul.f32 1.442695, %v2688_v54  ;;  %v2689_v11 = vsub.f32 %v12228_v43, %v2605_v41  ;;  %v2960_v31 = vsel %vm2443_vm0, %v9654_v3, 0.0  ;;  %v12234_v43 = vld [vmem:[#allocation390_spill] sm:$0xff] }
 0x403   :  { %12227 = vst [vmem:[#allocation476_spill] sm:$0xff] %v9656_v34  ;;  %v9659_v51 = vpop.eup %7094  ;;  %v2608_v27 = vpop.xlane.xlu0 %2607 }
 0x404   :  { %12229 = vst [vmem:[#allocation386_spill] sm:$0xff] %v9659_v51  ;;  %v9663_v23 = vpop.f32.mrf.mxu1  ;;  %7108 = vpow2.f32 %v2804_v33  ;;  %v2806_v4 = vmul.f32 1.442695, %v2689_v11  ;;  %v2690_v60 = vsub.f32 %v12231_v5, %v2608_v27  ;;  %v2963_v9 = vsel %vm2443_vm0, %v9659_v51, 0.0 }
 0x405   :  { %12230 = vst [vmem:[#allocation477_spill] sm:$0xff] %v9663_v23  ;;  %v9668_v62 = vpop.eup %7096  ;;  %v2611_v54 = vpop.xlane.xlu1 %2610  ;;  %2964 = vadd.xlane.f32.xlu1 %v2963_v9  ;;  %2961 = vadd.xlane.f32.xlu0 %v2960_v31  ;;  %v12237_v23 = vld [vmem:[#allocation396_spill] sm:$0xff] }
 0x406   :  { %12232 = vst [vmem:[#allocation392_spill] sm:$0xff] %v9668_v62  ;;  %v9670_v47 = vpop.f32.mrf.mxu1  ;;  %7110 = vpow2.f32 %v2806_v4  ;;  %v2808_v41 = vmul.f32 1.442695, %v2690_v60  ;;  %v2691_v34 = vsub.f32 %v12234_v43, %v2611_v54  ;;  %v2966_v11 = vsel %vm2443_vm0, %v9668_v62, 0.0  ;;  %v12239_v43 = vld [vmem:[#allocation394_spill] sm:$0xff] }
 0x407   :  { %12233 = vst [vmem:[#allocation478_spill] sm:$0xff] %v9670_v47  ;;  %v9673_v3 = vpop.eup %7098  ;;  %v2614_v33 = vpop.xlane.xlu0 %2613 }
 0x408   :  { %12235 = vst [vmem:[#allocation390_spill] sm:$0xff] %v9673_v3  ;;  %v9677_v5 = vpop.f32.mrf.mxu1  ;;  %7112 = vpow2.f32 %v2808_v41  ;;  %v2810_v27 = vmul.f32 1.442695, %v2691_v34  ;;  %v2692_v51 = vsub.f32 %v12237_v23, %v2614_v33  ;;  %v2969_v31 = vsel %vm2443_vm0, %v9673_v3, 0.0  ;;  %v12240_v33 = vld [vmem:[#allocation400_spill] sm:$0xff] }
 0x409   :  { %12236 = vst [vmem:[#allocation479_spill] sm:$0xff] %v9677_v5  ;;  %v9682_v9 = vpop.eup %7100  ;;  %v2617_v60 = vpop.xlane.xlu1 %2616  ;;  %2970 = vadd.xlane.f32.xlu1 %v2969_v31  ;;  %2967 = vadd.xlane.f32.xlu0 %v2966_v11 }
 0x40a   :  { %v9684_v4 = vpop.f32.mrf.mxu1  ;;  %7114 = vpow2.f32 %v2810_v27  ;;  %v2812_v54 = vmul.f32 1.442695, %v2692_v51  ;;  %v2693_v47 = vsub.f32 %v12239_v43, %v2617_v60  ;;  %v2972_v34 = vsel %vm2443_vm0, %v9682_v9, 0.0  ;;  %v12242_v60 = vld [vmem:[#allocation398_spill] sm:$0xff] }
 0x40b   :  { %12238 = vst [vmem:[#allocation396_spill] sm:$0xff] %v9684_v4  ;;  %v9687_v62 = vpop.eup %7102  ;;  %v2620_v41 = vpop.xlane.xlu0 %2619 }
 0x40c   :  { %7116 = vpow2.f32 %v2812_v54  ;;  %v2814_v23 = vmul.f32 1.442695, %v2693_v47  ;;  %v2694_v5 = vsub.f32 %v12240_v33, %v2620_v41  ;;  %v2975_v31 = vsel %vm2443_vm0, %v9687_v62, 0.0  ;;  %v9694_v11 = vpop.f32.mrf.mxu1  ;;  %v12243_v33 = vld [vmem:[#allocation404_spill] sm:$0xff] }
 0x40d   :  { %12241 = vst [vmem:[#allocation394_spill] sm:$0xff] %v9694_v11  ;;  %v9696_v4 = vpop.eup %7104  ;;  %v2623_v51 = vpop.xlane.xlu1 %2622  ;;  %2976 = vadd.xlane.f32.xlu1 %v2975_v31  ;;  %2973 = vadd.xlane.f32.xlu0 %v2972_v34  ;;  %v12246_v31 = vld [vmem:[#allocation402_spill] sm:$0xff] }
 0x40e   :  { %7118 = vpow2.f32 %v2814_v23  ;;  %v2816_v27 = vmul.f32 1.442695, %v2694_v5  ;;  %v2695_v43 = vsub.f32 %v12242_v60, %v2623_v51  ;;  %v2978_v47 = vsel %vm2443_vm0, %v9696_v4, 0.0  ;;  %v9706_v42 = vpop.f32.mrf.mxu1 }
 0x40f   :  { %v9699_v3 = vpop.eup %7106  ;;  %v2626_v54 = vpop.xlane.xlu0 %2625  ;;  %12244 = vst [vmem:[#allocation400_spill] sm:$0xff] %v9706_v42 }
 0x410   :  { %7120 = vpow2.f32 %v2816_v27  ;;  %v2818_v41 = vmul.f32 1.442695, %v2695_v43  ;;  %v2696_v0 = vsub.f32 %v12243_v33, %v2626_v54  ;;  %v2981_v11 = vsel %vm2443_vm0, %v9699_v3, 0.0  ;;  %v12248_v33 = vld [vmem:[#allocation408_spill] sm:$0xff]  ;;  %v9718_v7 = vpop.f32.mrf.mxu1 }
 0x411   :  { %v9708_v34 = vpop.eup %7108  ;;  %v2629_v5 = vpop.xlane.xlu1 %2628  ;;  %2982 = vadd.xlane.f32.xlu1 %v2981_v11  ;;  %2979 = vadd.xlane.f32.xlu0 %v2978_v47  ;;  %12249 = vst [vmem:[#allocation402_spill] sm:$0xff] %v9718_v7 }
 0x412   :  { %12245 = vst [vmem:[#allocation398_spill] sm:$0xff] %v9708_v34  ;;  %7122 = vpow2.f32 %v2818_v41  ;;  %v2820_v23 = vmul.f32 1.442695, %v2696_v0  ;;  %v2697_v51 = vsub.f32 %v12246_v31, %v2629_v5  ;;  %v2984_v43 = vsel %vm2443_vm0, %v9708_v34, 0.0  ;;  %v12251_v41 = vld [vmem:[#allocation406_spill] sm:$0xff] }
 0x413   :  { %v9711_v60 = vpop.eup %7110  ;;  %v2632_v27 = vpop.xlane.xlu0 %2631 }
 0x414   :  { %12247 = vst [vmem:[#allocation404_spill] sm:$0xff] %v9711_v60  ;;  %7124 = vpow2.f32 %v2820_v23  ;;  %v2822_v54 = vmul.f32 1.442695, %v2697_v51  ;;  %v2698_v56 = vsub.f32 %v12248_v33, %v2632_v27  ;;  %v2987_v42 = vsel %vm2443_vm0, %v9711_v60, 0.0  ;;  %v9729_v33 = vpop.f32.mrf.mxu1 }
 0x415   :  { %v9720_v11 = vpop.eup %7112  ;;  %2988 = vadd.xlane.f32.xlu1 %v2987_v42  ;;  %v2635_v0 = vpop.xlane.xlu1 %2634  ;;  %2985 = vadd.xlane.f32.xlu0 %v2984_v43  ;;  %12253 = vst [vmem:[#allocation480_spill] sm:$0xff] %v9729_v33 }
 0x416   :  { %12250 = vst [vmem:[#allocation408_spill] sm:$0xff] %v9720_v11  ;;  %7126 = vpow2.f32 %v2822_v54  ;;  %v2824_v47 = vmul.f32 1.442695, %v2698_v56  ;;  %v2699_v5 = vsub.f32 %v12251_v41, %v2635_v0  ;;  %v2990_v27 = vsel %vm2443_vm0, %v9720_v11, 0.0  ;;  %v9739_v54 = vpop.f32.mrf.mxu1 }
 0x417   :  { %v9723_v31 = vpop.eup %7114  ;;  %12256 = vst [vmem:[#allocation483_spill] sm:$0xff] %v9739_v54 }
 0x418   :  { %12252 = vst [vmem:[#allocation406_spill] sm:$0xff] %v9723_v31  ;;  %7128 = vpow2.f32 %v2824_v47  ;;  %v2826_v23 = vmul.f32 1.442695, %v2699_v5  ;;  %v2993_v51 = vsel %vm2443_vm0, %v9723_v31, 0.0  ;;  %v11670_v31 = vmov 2  }
 0x419   :  { %v9731_v7 = vpop.eup %7116  ;;  %2994 = vadd.xlane.f32.xlu1 %v2993_v51  ;;  %2991 = vadd.xlane.f32.xlu0 %v2990_v27 }
 0x41a   :  { %12254 = vst [vmem:[#allocation481_spill] sm:$0xff] %v9731_v7  ;;  %7130 = vpow2.f32 %v2826_v23  ;;  %v2996_v43 = vsel %vm2443_vm0, %v9731_v7, 0.0  ;;  %v9749_v23 = vpop.f32.mrf.mxu1 }
 0x41b   :  { %v9733_v56 = vpop.eup %7118  ;;  %12259 = vst [vmem:[#allocation486_spill] sm:$0xff] %v9749_v23 }
 0x41c   :  { %12255 = vst [vmem:[#allocation482_spill] sm:$0xff] %v9733_v56  ;;  %v2999_v42 = vsel %vm2443_vm0, %v9733_v56, 0.0  ;;  %v9759_v54 = vpop.f32.mrf.mxu1 }
 0x41d   :  { %v9741_v0 = vpop.eup %7120  ;;  %3000 = vadd.xlane.f32.xlu1 %v2999_v42  ;;  %2997 = vadd.xlane.f32.xlu0 %v2996_v43  ;;  %12262 = vst [vmem:[#allocation489_spill] sm:$0xff] %v9759_v54 }
 0x41e   :  { %12257 = vst [vmem:[#allocation484_spill] sm:$0xff] %v9741_v0  ;;  %v3002_v5 = vsel %vm2443_vm0, %v9741_v0, 0.0  ;;  %v9769_v23 = vpop.f32.mrf.mxu1 }
 0x41f   :  { %v9743_v47 = vpop.eup %7122  ;;  %12265 = vst [vmem:[#allocation492_spill] sm:$0xff] %v9769_v23 }
 0x420   :  { %12258 = vst [vmem:[#allocation485_spill] sm:$0xff] %v9743_v47  ;;  %v3005_v41 = vsel %vm2443_vm0, %v9743_v47, 0.0 }
 0x421   :  { %v9751_v51 = vpop.eup %7124  ;;  %3006 = vadd.xlane.f32.xlu1 %v3005_v41  ;;  %3003 = vadd.xlane.f32.xlu0 %v3002_v5 }
 0x422   :  { %12260 = vst [vmem:[#allocation487_spill] sm:$0xff] %v9751_v51  ;;  %v3008_v43 = vsel %vm2443_vm0, %v9751_v51, 0.0 }
 0x423   :  { %v9753_v27 = vpop.eup %7126 }
 0x424   :  { %12261 = vst [vmem:[#allocation488_spill] sm:$0xff] %v9753_v27  ;;  %v3011_v42 = vsel %vm2443_vm0, %v9753_v27, 0.0  ;;  %v9771_v27 = vpop.f32.mrf.mxu1 }
 0x425   :  { %v9761_v33 = vpop.eup %7128  ;;  %3012 = vadd.xlane.f32.xlu1 %v3011_v42  ;;  %3009 = vadd.xlane.f32.xlu0 %v3008_v43  ;;  %12266 = vst [vmem:[#allocation493_spill] sm:$0xff] %v9771_v27 }
 0x426   :  { %12263 = vst [vmem:[#allocation490_spill] sm:$0xff] %v9761_v33  ;;  %v3014_v5 = vsel %vm2443_vm0, %v9761_v33, 0.0  ;;  %v9773_v51 = vpop.f32.mrf.mxu1 }
 0x427   :  { %v9763_v47 = vpop.eup %7130  ;;  %12267 = vst [vmem:[#allocation494_spill] sm:$0xff] %v9773_v51 }
 0x428   :  { %12264 = vst [vmem:[#allocation491_spill] sm:$0xff] %v9763_v47  ;;  %v3017_v41 = vsel %vm2443_vm0, %v9763_v47, 0.0  ;;  %v9775_v42 = vpop.f32.mrf.mxu1 }
 0x429   :  { %3018 = vadd.xlane.f32.xlu1 %v3017_v41  ;;  %3015 = vadd.xlane.f32.xlu0 %v3014_v5  ;;  %12268 = vst [vmem:[#allocation495_spill] sm:$0xff] %v9775_v42 }
 0x42a   :  { %v9777_v0 = vpop.f32.mrf.mxu1 }
 0x42b   :  { %12269 = vst [vmem:[#allocation496_spill] sm:$0xff] %v9777_v0 }
 0x42c   :  { %v9779_v7 = vpop.f32.mrf.mxu1 }
 0x42d   :  { %12270 = vst [vmem:[#allocation497_spill] sm:$0xff] %v9779_v7 }
 0x42e   :  { %v9781_v33 = vpop.f32.mrf.mxu1 }
 0x42f   :  { %12271 = vst [vmem:[#allocation498_spill] sm:$0xff] %v9781_v33 }
 0x430   :  { %v9784_v42 = vpop.f32.mrf.mxu1 }
 0x431   :  { %12272 = vst [vmem:[#allocation499_spill] sm:$0xff] %v9784_v42 }
 0x432   :  { %v2833_v54 = vpop.xlane.xlu1 %2832 }
 0x433   :  { %7132 = vrcp.f32 %v2833_v54 }
 0x436   :  { %v2830_v43 = vpop.xlane.xlu0 %2829 }
 0x437   :  { %7134 = vrcp.f32 %v2830_v43  ;;  %v2839_v47 = vpop.xlane.xlu1 %2838 }
 0x43a   :  { %v2836_v56 = vpop.xlane.xlu0 %2835 }
 0x43b   :  { %7136 = vrcp.f32 %v2836_v56 }
 0x43c   :  { %7138 = vrcp.f32 %v2839_v47 }
 0x43e   :  { %v2845_v23 = vpop.xlane.xlu1 %2844  ;;  %v2842_v41 = vpop.xlane.xlu0 %2841 }
 0x43f   :  { %7140 = vrcp.f32 %v2842_v41 }
 0x440   :  { %v7133_v5 = vpop.eup %7132  ;;  %7142 = vrcp.f32 %v2845_v23  ;;  %v12276_v23 = vmov 0  }
 0x441   :  { %v3085_v27 = vmul.f32 %v7133_v5, %v9317_v32  ;;  %v9790_v32 = vpop.f32.mrf.mxu1  ;;  %v12274_v5 = vmov 1  }
 0x442   :  { %v2851_v54 = vpop.xlane.xlu1 %2850  ;;  %v2848_v51 = vpop.xlane.xlu0 %2847  ;;  %12273 = vst [vmem:[#allocation500_spill] sm:$0xff] %v9790_v32 }
 0x443   :  { %3156 = vperm.xlu1 %6749, %v3085_v27   ;;  %3210 = vperm.xlu0 %6750, %v3085_v27   ;;  %7144 = vrcp.f32 %v2848_v51  ;;  %v12279_v51 = vmov 2  }
 0x444   :  { %v7135_v43 = vpop.eup %7134  ;;  %7146 = vrcp.f32 %v2851_v54 }
 0x445   :  { %v3084_v0 = vmul.f32 %v7135_v43, %v9328_v22  ;;  %v9801_v43 = vpop.f32.mrf.mxu1 }
 0x446   :  { %v2857_v7 = vpop.xlane.xlu1 %2856  ;;  %v2854_v56 = vpop.xlane.xlu0 %2853  ;;  %12275 = vst [vmem:[#allocation501_spill] sm:$0xff] %v9801_v43  ;;  %v12278_v43 = vmov 3  }
 0x447   :  { %6751 = vset.pattern.permute.xlu1 %v11670_v31  ;;  %6752 = vset.pattern.permute.xlu0 %v11672_v19  ;;  %7148 = vrcp.f32 %v2854_v56 }
 0x448   :  { %6448 = vmatmul.mubr.msk.f32.vlgmr.msra.gmra.mxu1 %vm2443_vm0, %v3084_v0  ;;  %3274 = vperm.xlu1 %6751, %v3085_v27   ;;  %v7137_v41 = vpop.eup %7136  ;;  %7150 = vrcp.f32 %v2857_v7 }
 0x449   :  { %3338 = vperm.xlu0 %6752, %v3085_v27   ;;  %3490 = vmatprep.mubr.f32.mxu1 %v11987_v15  ;;  %v9810_v32 = vmul.f32 %v7137_v41, %v9343_v45  ;;  %v7139_v42 = vpop.eup %7138 }
 0x44a   :  { %v9793_v47 = vpop.xlane.xlu1 %2862  ;;  %v2860_v22 = vpop.xlane.xlu0 %2859  ;;  %6457 = vmatpush1.msk.msra.mxu1 %vm3415_vm1, %v9420_v14  ;;  %v3087_v45 = vmul.f32 %v7139_v42, %v9330_v46 }
 0x44b   :  { %6466 = vmatprep.subr.msk.mxu1 %vm3415_vm1, %v9433_v48  ;;  %7152 = vrcp.f32 %v2860_v22 }
 0x44c   :  { %6449 = vmatmul.mubr.msk.f32.gmra.mxu1 %vm2443_vm0, %v3085_v27  ;;  %6754 = vset.pattern.permute.xlu1 %v12274_v5  ;;  %v9814_v27 = vpop.f32.mrf.mxu1  ;;  %v7141_v41 = vpop.eup %7140  ;;  %7154 = vrcp.f32 %v9793_v47 }
 0x44d   :  { %6753 = vset.pattern.permute.xlu0 %v12276_v23  ;;  %3206 = vperm.xlu1 %6754, %v3084_v0   ;;  %12277 = vst [vmem:[#allocation502_spill] sm:$0xff] %v9814_v27  ;;  %v7143_v27 = vpop.eup %7142  ;;  %v9834_v57 = vmul.f32 %v7141_v41, %v9350_v50 }
 0x44e   :  { %3151 = vperm.xlu0 %6753, %v3084_v0   ;;  %v9804_v31 = vpop.xlane.xlu1 %2868  ;;  %3496 = vmatprep.mubr.f32.mxu1 %v11987_v15  ;;  %v9807_v19 = vpop.xlane.xlu0 %2865 }
 0x44f   :  { %v9825_v37 = vpop.f32.mrf.mxu1  ;;  %7156 = vrcp.f32 %v9807_v19 }
 0x450   :  { %6450 = vmatmul.mubr.msk.f32.gmra.mxu1 %vm2443_vm0, %v9810_v32  ;;  %12280 = vst [vmem:[#allocation503_spill] sm:$0xff] %v9825_v37  ;;  %v7145_v37 = vpop.eup %7144  ;;  %7158 = vrcp.f32 %v9804_v31 }
 0x451   :  { %6756 = vset.pattern.permute.xlu1 %v12278_v43  ;;  %3502 = vmatprep.mubr.f32.mxu1 %v11987_v15  ;;  %v9838_v46 = vpop.f32.mrf.mxu1  ;;  %v7147_v41 = vpop.eup %7146 }
 0x452   :  { %6755 = vset.pattern.permute.xlu0 %v12279_v51  ;;  %v9819_v33 = vpop.xlane.xlu1 %2874  ;;  %3334 = vperm.xlu1 %6756, %v3084_v0   ;;  %v9821_v11 = vpop.xlane.xlu0 %2871  ;;  %12281 = vst [vmem:[#allocation504_spill] sm:$0xff] %v9838_v46 }
 0x453   :  { %3270 = vperm.xlu0 %6755, %v3084_v0   ;;  %v9841_v0 = vmul.f32 %v7143_v27, %v9356_v30  ;;  %v9852_v50 = vpop.f32.mrf.mxu1  ;;  %v9860_v27 = vmul.f32 %v7145_v37, %v9365_v8  ;;  %v9876_v37 = vmul.f32 %v7147_v41, %v9370_v39  ;;  %7160 = vrcp.f32 %v9821_v11 }
 0x454   :  { %6451 = vmatmul.mubr.msk.f32.gmra.mxu1 %vm2443_vm0, %v3087_v45  ;;  %12282 = vst [vmem:[#allocation505_spill] sm:$0xff] %v9852_v50  ;;  %v7149_v50 = vpop.eup %7148  ;;  %7162 = vrcp.f32 %v9819_v33 }
 0x455   :  { %3508 = vmatprep.mubr.f32.mxu1 %v11987_v15  ;;  %v9866_v46 = vpop.f32.mrf.mxu1  ;;  %v9886_v47 = vmul.f32 %v7149_v50, %v9380_v55  ;;  %v7151_v41 = vpop.eup %7150 }
 0x456   :  { %v9828_v54 = vpop.xlane.xlu1 %2880  ;;  %6757 = vset.pattern.permute.xlu1 %v12276_v23  ;;  %v9831_v60 = vpop.xlane.xlu0 %2877  ;;  %12283 = vst [vmem:[#allocation506_spill] sm:$0xff] %v9866_v46  ;;  %v9908_v50 = vmul.f32 %v7151_v41, %v9385_v59 }
 0x457   :  { %3282 = vperm.xlu0 %6755, %v3087_v45   ;;  %3166 = vperm.xlu1 %6757, %v3087_v45   ;;  %v9881_v46 = vpop.f32.mrf.mxu1  ;;  %7164 = vrcp.f32 %v9831_v60 }
 0x458   :  { %6452 = vmatmul.mubr.msk.f32.gmra.mxu1 %vm2443_vm0, %v9834_v57  ;;  %12284 = vst [vmem:[#allocation507_spill] sm:$0xff] %v9881_v46  ;;  %v7153_v34 = vpop.eup %7152 }
 0x459   :  { %3514 = vmatprep.mubr.f32.mxu1 %v11987_v15  ;;  %v9897_v46 = vpop.f32.mrf.mxu1  ;;  %v9928_v41 = vmul.f32 %v7153_v34, %v9395_v52 }
 0x45a   :  { %v9844_v42 = vpop.xlane.xlu1 %2886  ;;  %v9846_v56 = vpop.xlane.xlu0 %2883  ;;  %12285 = vst [vmem:[#allocation508_spill] sm:$0xff] %v9897_v46 }
 0x45b   :  { %3290 = vperm.xlu0 %6755, %v9841_v0   ;;  %6758 = vset.pattern.permute.xlu1 %v12274_v5  ;;  %v9918_v31 = vpop.f32.mrf.mxu1  ;;  %12287 = vst [vmem:[#allocation510_spill] sm:$0xff] %v9928_v41  ;;  %v7155_v46 = vpop.eup %7154 }
 0x45c   :  { %6453 = vmatmul.mubr.msk.f32.gmra.mxu1 %vm2443_vm0, %v9841_v0  ;;  %3218 = vperm.xlu1 %6758, %v3087_v45   ;;  %12286 = vst [vmem:[#allocation509_spill] sm:$0xff] %v9918_v31  ;;  %v9944_v34 = vmul.f32 %v7155_v46, %v9400_v40  ;;  %v7157_v26 = vpop.eup %7156 }
 0x45d   :  { %3520 = vmatprep.mubr.f32.mxu1 %v11987_v15  ;;  %v9934_v31 = vpop.f32.mrf.mxu1  ;;  %v9957_v46 = vmul.f32 %v7157_v26, %v9410_v36 }
 0x45e   :  { %v9855_v30 = vpop.xlane.xlu1 %2892  ;;  %v9857_v7 = vpop.xlane.xlu0 %2889  ;;  %12288 = vst [vmem:[#allocation511_spill] sm:$0xff] %v9934_v31 }
 0x45f   :  { %6768 = vset.pattern.permute.xlu0 %v12274_v5  ;;  %v9950_v31 = vpop.f32.mrf.mxu1 }
 0x460   :  { %3222 = vperm.xlu0 %6768, %v9834_v57   ;;  %6454 = vmatmul.mubr.msk.f32.gmra.mxu1 %vm2443_vm0, %v9860_v27  ;;  %12289 = vst [vmem:[#allocation512_spill] sm:$0xff] %v9950_v31 }
 0x461   :  { %6759 = vset.pattern.permute.xlu1 %v12278_v43  ;;  %3526 = vmatprep.mubr.f32.mxu1 %v11987_v15  ;;  %v9962_v31 = vpop.f32.mrf.mxu1 }
 0x462   :  { %3346 = vperm.xlu1 %6759, %v3087_v45   ;;  %v9871_v22 = vpop.xlane.xlu1 %2898  ;;  %v9873_v8 = vpop.xlane.xlu0 %2895  ;;  %12290 = vst [vmem:[#allocation513_spill] sm:$0xff] %v9962_v31 }
 0x464   :  { %6770 = vset.pattern.permute.xlu0 %v12278_v43  ;;  %6455 = vmatmul.mubr.msk.f32.gmra.mxu1 %vm2443_vm0, %v9876_v37 }
 0x465   :  { %3350 = vperm.xlu0 %6770, %v9834_v57   ;;  %3893 = vmatprep.mubr.f32.mxu1 %v11987_v15 }
 0x466   :  { %6760 = vset.pattern.permute.xlu1 %v12276_v23  ;;  %v9890_v39 = vpop.xlane.xlu1 %2904  ;;  %v9892_v45 = vpop.xlane.xlu0 %2901 }
 0x467   :  { %3161 = vperm.xlu1 %6760, %v9810_v32  }
 0x468   :  { %6458 = vmatmul.mubr.msk.f32.vlgmr.msra.gmra.mxu1 %vm2443_vm0, %v9886_v47 }
 0x469   :  { %6773 = vset.pattern.permute.xlu0 %v12279_v51  ;;  %3899 = vmatprep.mubr.f32.mxu1 %v11987_v15 }
 0x46a   :  { %3298 = vperm.xlu0 %6773, %v9876_v37   ;;  %v9903_v55 = vpop.xlane.xlu1 %2910  ;;  %v9905_v19 = vpop.xlane.xlu0 %2907  ;;  %6467 = vmatpush1.msk.msra.mxu1 %vm3415_vm1, %v9420_v14 }
 0x46b   :  { %6761 = vset.pattern.permute.xlu1 %v12274_v5  ;;  %6476 = vmatprep.subr.msk.mxu1 %vm3415_vm1, %v9433_v48 }
 0x46c   :  { %3214 = vperm.xlu1 %6761, %v9810_v32   ;;  %6459 = vmatmul.mubr.msk.f32.gmra.mxu1 %vm2443_vm0, %v9908_v50 }
 0x46d   :  { %3905 = vmatprep.mubr.f32.mxu1 %v11987_v15 }
 0x46e   :  { %6776 = vset.pattern.permute.xlu0 %v12274_v5  ;;  %v9923_v59 = vpop.xlane.xlu1 %2916  ;;  %v9925_v14 = vpop.xlane.xlu0 %2913 }
 0x46f   :  { %3230 = vperm.xlu0 %6776, %v9860_v27  }
 0x470   :  { %6762 = vset.pattern.permute.xlu1 %v12279_v51  ;;  %6460 = vmatmul.mubr.msk.f32.gmra.mxu1 %vm2443_vm0, %v9928_v41  ;;  %v7159_v41 = vpop.eup %7158 }
 0x471   :  { %3278 = vperm.xlu1 %6762, %v9810_v32   ;;  %3911 = vmatprep.mubr.f32.mxu1 %v11987_v15  ;;  %v9969_v26 = vmul.f32 %v7159_v41, %v9415_v49 }
 0x472   :  { %v9939_v11 = vpop.xlane.xlu1 %2922  ;;  %v9941_v52 = vpop.xlane.xlu0 %2919 }
 0x473   :  { %6778 = vset.pattern.permute.xlu0 %v12278_v43 }
 0x474   :  { %3358 = vperm.xlu0 %6778, %v9860_v27   ;;  %6461 = vmatmul.mubr.msk.f32.gmra.mxu1 %vm2443_vm0, %v9944_v34 }
 0x475   :  { %6763 = vset.pattern.permute.xlu1 %v12278_v43  ;;  %3917 = vmatprep.mubr.f32.mxu1 %v11987_v15 }
 0x476   :  { %3342 = vperm.xlu1 %6763, %v9810_v32   ;;  %v2929_v40 = vpop.xlane.xlu1 %2928  ;;  %v2926_v33 = vpop.xlane.xlu0 %2925 }
 0x477   :  { %7166 = vrcp.f32 %v2926_v33  ;;  %v7161_v32 = vpop.eup %7160  ;;  %v9974_v33 = vpop.f32.mrf.mxu1 }
 0x478   :  { %6780 = vset.pattern.permute.xlu0 %v12274_v5  ;;  %6462 = vmatmul.mubr.msk.f32.gmra.mxu1 %vm2443_vm0, %v9957_v46  ;;  %7168 = vrcp.f32 %v9828_v54  ;;  %12291 = vst [vmem:[#allocation514_spill] sm:$0xff] %v9974_v33  ;;  %v9981_v41 = vmul.f32 %v7161_v32, %v9429_v1 }
 0x479   :  { %3626 = vperm.xlu0 %6780, %v9908_v50   ;;  %3923 = vmatprep.mubr.f32.mxu1 %v11987_v15  ;;  %7170 = vrcp.f32 %v2929_v40  ;;  %v7163_v40 = vpop.eup %7162  ;;  %v9987_v33 = vpop.f32.mrf.mxu1 }
 0x47a   :  { %6764 = vset.pattern.permute.xlu1 %v12276_v23  ;;  %v2935_v60 = vpop.xlane.xlu1 %2934  ;;  %v2932_v36 = vpop.xlane.xlu0 %2931  ;;  %7172 = vrcp.f32 %v9846_v56  ;;  %12292 = vst [vmem:[#allocation515_spill] sm:$0xff] %v9981_v41  ;;  %12293 = vst [vmem:[#allocation516_spill] sm:$0xff] %v9987_v33 }
 0x47b   :  { %3176 = vperm.xlu1 %6764, %v9841_v0   ;;  %7174 = vrcp.f32 %v2932_v36  ;;  %v9995_v36 = vmul.f32 %v7163_v40, %v9438_v58  ;;  %v7165_v32 = vpop.eup %7164  ;;  %v10001_v31 = vpop.f32.mrf.mxu1 }
 0x47c   :  { %6463 = vmatmul.mubr.msk.f32.gmra.mxu1 %vm2443_vm0, %v9969_v26  ;;  %7176 = vrcp.f32 %v9844_v42  ;;  %12294 = vst [vmem:[#allocation517_spill] sm:$0xff] %v10001_v31  ;;  %v10006_v33 = vmul.f32 %v7165_v32, %v9454_v25 }
 0x47d   :  { %6782 = vset.pattern.permute.xlu0 %v12278_v43  ;;  %3929 = vmatprep.mubr.f32.mxu1 %v11987_v15  ;;  %7178 = vrcp.f32 %v2935_v60  ;;  %v10020_v25 = vpop.f32.mrf.mxu1 }
 0x47e   :  { %3754 = vperm.xlu0 %6782, %v9908_v50   ;;  %v2941_v54 = vpop.xlane.xlu1 %2940  ;;  %v2938_v49 = vpop.xlane.xlu0 %2937  ;;  %7180 = vrcp.f32 %v9857_v7  ;;  %12295 = vst [vmem:[#allocation518_spill] sm:$0xff] %v10020_v25 }
 0x47f   :  { %6765 = vset.pattern.permute.xlu1 %v12274_v5  ;;  %7182 = vrcp.f32 %v2938_v49 }
 0x480   :  { %3226 = vperm.xlu1 %6765, %v9841_v0   ;;  %6464 = vmatmul.mubr.msk.f32.gmra.mxu1 %vm2443_vm0, %v9981_v41  ;;  %7184 = vrcp.f32 %v9855_v30 }
 0x481   :  { %3935 = vmatprep.mubr.f32.mxu1 %v11987_v15  ;;  %7186 = vrcp.f32 %v2941_v54 }
 0x482   :  { %6783 = vset.pattern.permute.xlu0 %v12276_v23  ;;  %v9992_v56 = vpop.xlane.xlu1 %2946  ;;  %v2944_v1 = vpop.xlane.xlu0 %2943  ;;  %7188 = vrcp.f32 %v9873_v8 }
 0x483   :  { %3567 = vperm.xlu0 %6783, %v9886_v47   ;;  %7190 = vrcp.f32 %v2944_v1 }
 0x484   :  { %6766 = vset.pattern.permute.xlu1 %v12278_v43  ;;  %6465 = vmatmul.mubr.msk.f32.gmra.mxu1 %vm2443_vm0, %v9995_v36  ;;  %v7167_v42 = vpop.eup %7166  ;;  %7192 = vrcp.f32 %v9871_v22 }
 0x485   :  { %3354 = vperm.xlu1 %6766, %v9841_v0   ;;  %4302 = vmatprep.mubr.f32.mxu1 %v11987_v15  ;;  %v10010_v58 = vmul.f32 %v7167_v42, %v9570_v13  ;;  %v7169_v41 = vpop.eup %7168  ;;  %v10039_v42 = vld [vmem:[#allocation7] sm:$0xff]  ;;  %7194 = vrcp.f32 %v9992_v56 }
 0x486   :  { %v10012_v60 = vpop.xlane.xlu1 %2952  ;;  %v10014_v40 = vpop.xlane.xlu0 %2949  ;;  %v10033_v7 = vmul.f32 %v7169_v41, %v9463_v63  ;;  %7196 = vrcp.f32 %v9892_v45 }
 0x487   :  { %6785 = vset.pattern.permute.xlu0 %v12279_v51  ;;  %v7171_v31 = vpop.eup %7170  ;;  %6488 = vmatmul.mubr.msk.f32.vlgmr.msra.gmra.mxu0 %vm2443_vm0, %v10010_v58  ;;  %v10046_v63 = vpop.f32.mrf.mxu1 }
 0x488   :  { %3686 = vperm.xlu0 %6785, %v9886_v47   ;;  %6468 = vmatmul.mubr.msk.f32.vlgmr.msra.gmra.mxu1 %vm2443_vm0, %v10006_v33  ;;  %v7173_v49 = vpop.eup %7172  ;;  %v10037_v32 = vmul.f32 %v7171_v31, %v9575_v17  ;;  %12296 = vst [vmem:[#allocation519_spill] sm:$0xff] %v10046_v63 }
 0x489   :  { %6767 = vset.pattern.permute.xlu1 %v12276_v23  ;;  %4308 = vmatprep.mubr.f32.mxu1 %v11987_v15  ;;  %v7175_v30 = vpop.eup %7174  ;;  %v10059_v54 = vmul.f32 %v7173_v49, %v9474_v20  ;;  %v10070_v25 = vpop.f32.mrf.mxu1 }
 0x48a   :  { %3171 = vperm.xlu1 %6767, %v9834_v57   ;;  %v10027_v13 = vpop.xlane.xlu1 %2958  ;;  %v10030_v0 = vpop.xlane.xlu0 %2955  ;;  %5126 = vmatprep.mubr.f32.mxu0 %v11987_v15  ;;  %v10064_v63 = vmul.f32 %v7175_v30, %v9584_v35  ;;  %12298 = vst [vmem:[#allocation521_spill] sm:$0xff] %v10070_v25 }
 0x48b   :  { %6477 = vmatpush1.msk.msra.mxu1 %vm3415_vm1, %v10039_v42  ;;  %6489 = vmatmul.mubr.msk.f32.gmra.mxu0 %vm2443_vm0, %v10037_v32  ;;  %v7177_v41 = vpop.eup %7176  ;;  %v10094_v30 = vpop.f32.mrf.mxu1 }
 0x48c   :  { %6787 = vset.pattern.permute.xlu0 %v12276_v23  ;;  %6469 = vmatmul.mubr.msk.f32.gmra.mxu1 %vm2443_vm0, %v10033_v7  ;;  %12297 = vst [vmem:[#allocation520_spill] sm:$0xff] %v10064_v63  ;;  %v7179_v8 = vpop.eup %7178  ;;  %v10083_v35 = vmul.f32 %v7177_v41, %v9479_v21  ;;  %12299 = vst [vmem:[#allocation522_spill] sm:$0xff] %v10094_v30 }
 0x48d   :  { %3582 = vperm.xlu0 %6787, %v9944_v34   ;;  %4314 = vmatprep.mubr.f32.mxu1 %v11987_v15  ;;  %v7181_v1 = vpop.eup %7180  ;;  %v10089_v22 = vmul.f32 %v7179_v8, %v9589_v6  ;;  %v10114_v45 = vpop.f32.mrf.mxu1 }
 0x48e   :  { %6769 = vset.pattern.permute.xlu1 %v12279_v51  ;;  %v10053_v17 = vpop.xlane.xlu1 %2964  ;;  %v10056_v31 = vpop.xlane.xlu0 %2961  ;;  %5132 = vmatprep.mubr.f32.mxu0 %v11987_v15  ;;  %v10103_v56 = vmul.f32 %v7181_v1, %v9486_v44  ;;  %12301 = vst [vmem:[#allocation524_spill] sm:$0xff] %v10114_v45 }
 0x48f   :  { %3286 = vperm.xlu1 %6769, %v9834_v57   ;;  %6507 = vmatpush1.msk.msra.mxu0 %vm3415_vm1, %v10039_v42  ;;  %v7183_v49 = vpop.eup %7182 }
 0x490   :  { %6470 = vmatmul.mubr.msk.f32.gmra.mxu1 %vm2443_vm0, %v10059_v54  ;;  %6490 = vmatmul.mubr.msk.f32.gmra.mxu0 %vm2443_vm0, %v10064_v63  ;;  %v7185_v41 = vpop.eup %7184  ;;  %v10107_v8 = vmul.f32 %v7183_v49, %v9598_v28 }
 0x491   :  { %6789 = vset.pattern.permute.xlu0 %v12279_v51  ;;  %4320 = vmatprep.mubr.f32.mxu1 %v11987_v15  ;;  %v7187_v30 = vpop.eup %7186  ;;  %v10123_v28 = vmul.f32 %v7185_v41, %v9491_v2 }
 0x492   :  { %3698 = vperm.xlu0 %6789, %v9944_v34   ;;  %v10077_v20 = vpop.xlane.xlu1 %2970  ;;  %v10080_v57 = vpop.xlane.xlu0 %2967  ;;  %5138 = vmatprep.mubr.f32.mxu0 %v11987_v15  ;;  %12300 = vst [vmem:[#allocation523_spill] sm:$0xff] %v10107_v8  ;;  %v10127_v49 = vmul.f32 %v7187_v30, %v9603_v10 }
 0x493   :  { %6771 = vset.pattern.permute.xlu1 %v12276_v23  ;;  %6496 = vmatprep.subr.msk.mxu1 %vm3415_vm1, %v9433_v48  ;;  %v7189_v1 = vpop.eup %7188 }
 0x494   :  { %3186 = vperm.xlu1 %6771, %v9876_v37   ;;  %6471 = vmatmul.mubr.msk.f32.gmra.mxu1 %vm2443_vm0, %v10083_v35  ;;  %v10141_v10 = vmul.f32 %v7189_v1, %v9500_v29 }
 0x495   :  { %6491 = vmatmul.mubr.msk.f32.gmra.mxu0 %vm2443_vm0, %v10089_v22  ;;  %4326 = vmatprep.mubr.f32.mxu1 %v11987_v15 }
 0x496   :  { %6795 = vset.pattern.permute.xlu0 %v12276_v23  ;;  %v2977_v21 = vpop.xlane.xlu1 %2976  ;;  %5144 = vmatprep.mubr.f32.mxu0 %v11987_v15  ;;  %v2974_v6 = vpop.xlane.xlu0 %2973 }
 0x497   :  { %3592 = vperm.xlu0 %6795, %v9969_v26   ;;  %7198 = vrcp.f32 %v2974_v6  ;;  %v7191_v6 = vpop.eup %7190 }
 0x498   :  { %6772 = vset.pattern.permute.xlu1 %v12274_v5  ;;  %6472 = vmatmul.mubr.msk.f32.gmra.mxu1 %vm2443_vm0, %v10103_v56  ;;  %7200 = vrcp.f32 %v9890_v39  ;;  %v10132_v39 = vpop.f32.mrf.mxu1  ;;  %v7193_v30 = vpop.eup %7192 }
 0x499   :  { %6492 = vmatmul.mubr.msk.f32.gmra.mxu0 %vm2443_vm0, %v10107_v8  ;;  %3234 = vperm.xlu1 %6772, %v9876_v37   ;;  %7202 = vrcp.f32 %v2977_v21  ;;  %12302 = vst [vmem:[#allocation525_spill] sm:$0xff] %v10132_v39  ;;  %v10145_v21 = vmul.f32 %v7191_v6, %v9612_v18  ;;  %v7195_v41 = vpop.eup %7194  ;;  %v10161_v18 = vmul.f32 %v7193_v30, %v9505_v16  ;;  %v12338_v39 = vld [vmem:[#allocation510_spill] sm:$0xff] }
 0x49a   :  { %v2983_v44 = vpop.xlane.xlu1 %2982  ;;  %4332 = vmatprep.mubr.f32.mxu1 %v11987_v15  ;;  %5150 = vmatprep.mubr.f32.mxu0 %v11987_v15  ;;  %v2980_v45 = vpop.xlane.xlu0 %2979  ;;  %7204 = vrcp.f32 %v9905_v19 }
 0x49b   :  { %6797 = vset.pattern.permute.xlu0 %v12279_v51  ;;  %7206 = vrcp.f32 %v2980_v45  ;;  %12303 = vst [vmem:[#allocation526_spill] sm:$0xff] %v10145_v21  ;;  %v7197_v19 = vpop.eup %7196  ;;  %v10166_v45 = vmul.f32 %v7195_v41, %v9617_v53 }
 0x49c   :  { %3706 = vperm.xlu0 %6797, %v9969_v26   ;;  %6473 = vmatmul.mubr.msk.f32.gmra.mxu1 %vm2443_vm0, %v10123_v28  ;;  %7208 = vrcp.f32 %v9903_v55  ;;  %v10176_v16 = vmul.f32 %v7197_v19, %v9514_v61 }
 0x49d   :  { %6493 = vmatmul.mubr.msk.f32.gmra.mxu0 %vm2443_vm0, %v10127_v49  ;;  %6774 = vset.pattern.permute.xlu1 %v12278_v43  ;;  %7210 = vrcp.f32 %v2983_v44  ;;  %12305 = vst [vmem:[#allocation528_spill] sm:$0xff] %v10166_v45 }
 0x49e   :  { %3362 = vperm.xlu1 %6774, %v9876_v37   ;;  %v2989_v2 = vpop.xlane.xlu1 %2988  ;;  %4338 = vmatprep.mubr.f32.mxu1 %v11987_v15  ;;  %v10150_v37 = vpop.f32.mrf.mxu1  ;;  %7212 = vrcp.f32 %v9925_v14 }
 0x49f   :  { %5156 = vmatprep.mubr.f32.mxu0 %v11987_v15  ;;  %12304 = vst [vmem:[#allocation527_spill] sm:$0xff] %v10150_v37  ;;  %v2986_v1 = vpop.xlane.xlu0 %2985 }
 0x4a0   :  { %6800 = vset.pattern.permute.xlu0 %v12274_v5  ;;  %6474 = vmatmul.mubr.msk.f32.gmra.mxu1 %vm2443_vm0, %v10141_v10  ;;  %v10170_v55 = vpop.f32.mrf.mxu1  ;;  %7214 = vrcp.f32 %v2986_v1 }
 0x4a1   :  { %6494 = vmatmul.mubr.msk.f32.gmra.mxu0 %vm2443_vm0, %v10145_v21  ;;  %3638 = vperm.xlu0 %6800, %v9957_v46   ;;  %12306 = vst [vmem:[#allocation529_spill] sm:$0xff] %v10170_v55  ;;  %7216 = vrcp.f32 %v9923_v59  ;;  %v12388_v21 = vld [vmem:[#allocation149_spill] sm:$0xff] }
 0x4a2   :  { %6775 = vset.pattern.permute.xlu1 %v12276_v23  ;;  %v10157_v29 = vpop.xlane.xlu1 %2994  ;;  %4344 = vmatprep.mubr.f32.mxu1 %v11987_v15  ;;  %v10191_v61 = vpop.f32.mrf.mxu1  ;;  %7218 = vrcp.f32 %v2989_v2 }
 0x4a3   :  { %3181 = vperm.xlu1 %6775, %v9860_v27   ;;  %5162 = vmatprep.mubr.f32.mxu0 %v11987_v15  ;;  %12308 = vst [vmem:[#allocation531_spill] sm:$0xff] %v10191_v61  ;;  %v2992_v1 = vpop.xlane.xlu0 %2991  ;;  %7220 = vrcp.f32 %v9941_v52 }
 0x4a4   :  { %6475 = vmatmul.mubr.msk.f32.gmra.mxu1 %vm2443_vm0, %v10161_v18  ;;  %v7199_v6 = vpop.eup %7198  ;;  %v10211_v59 = vpop.f32.mrf.mxu1  ;;  %7222 = vrcp.f32 %v2992_v1 }
 0x4a5   :  { %6495 = vmatmul.mubr.msk.f32.gmra.mxu0 %vm2443_vm0, %v10166_v45  ;;  %6802 = vset.pattern.permute.xlu0 %v12278_v43  ;;  %v10180_v53 = vmul.f32 %v7199_v6, %v9682_v9  ;;  %v7201_v44 = vpop.eup %7200  ;;  %12310 = vst [vmem:[#allocation533_spill] sm:$0xff] %v10211_v59  ;;  %7224 = vrcp.f32 %v9939_v11 }
 0x4a6   :  { %3766 = vperm.xlu0 %6802, %v9957_v46   ;;  %4711 = vmatprep.mubr.f32.mxu1 %v11987_v15  ;;  %v7203_v30 = vpop.eup %7202  ;;  %v10186_v41 = vpop.xlane.xlu1 %3000  ;;  %v10200_v9 = vmul.f32 %v7201_v44, %v9519_v24  ;;  %7226 = vrcp.f32 %v10157_v29 }
 0x4a7   :  { %12307 = vst [vmem:[#allocation530_spill] sm:$0xff] %v10180_v53  ;;  %6777 = vset.pattern.permute.xlu1 %v12279_v51  ;;  %5938 = vmatprep.mubr.f32.mxu0 %v11987_v15  ;;  %v10204_v14 = vmul.f32 %v7203_v30, %v9687_v62  ;;  %v10233_v44 = vpop.f32.mrf.mxu1  ;;  %7228 = vrcp.f32 %v10014_v40 }
 0x4a8   :  { %3294 = vperm.xlu1 %6777, %v9860_v27   ;;  %6478 = vmatmul.mubr.msk.f32.vlgmr.msra.gmra.mxu1 %vm2443_vm0, %v10176_v16  ;;  %v7205_v27 = vpop.eup %7204  ;;  %12313 = vst [vmem:[#allocation536_spill] sm:$0xff] %v10233_v44  ;;  %7230 = vrcp.f32 %v10012_v60  ;;  %v2998_v44 = vpop.xlane.xlu0 %2997 }
 0x4a9   :  { %6508 = vmatmul.mubr.msk.f32.vlgmr.msra.gmra.mxu0 %vm2443_vm0, %v10180_v53  ;;  %4717 = vmatprep.mubr.f32.mxu1 %v11987_v15  ;;  %12309 = vst [vmem:[#allocation532_spill] sm:$0xff] %v10204_v14  ;;  %v7207_v19 = vpop.eup %7206  ;;  %v10222_v62 = vmul.f32 %v7205_v27, %v9528_v12  ;;  %7232 = vrcp.f32 %v10030_v0 }
 0x4aa   :  { %6803 = vset.pattern.permute.xlu0 %v12276_v23  ;;  %5944 = vmatprep.mubr.f32.mxu0 %v11987_v15  ;;  %v10217_v24 = vpop.xlane.xlu1 %3006  ;;  %v7209_v2 = vpop.eup %7208  ;;  %v10226_v6 = vmul.f32 %v7207_v19, %v9696_v4  ;;  %v12318_v19 = vld [vmem:[#allocation398_spill] sm:$0xff]  ;;  %7234 = vrcp.f32 %v10027_v13 }
 0x4ab   :  { %3602 = vperm.xlu0 %6803, %v9995_v36   ;;  %6497 = vmatpush1.msk.msra.mxu1 %vm3415_vm1, %v10039_v42  ;;  %12311 = vst [vmem:[#allocation534_spill] sm:$0xff] %v10222_v62  ;;  %v7211_v52 = vpop.eup %7210  ;;  %7236 = vrcp.f32 %v10056_v31 }
 0x4ac   :  { %6779 = vset.pattern.permute.xlu1 %v12276_v23  ;;  %6479 = vmatmul.mubr.msk.f32.gmra.mxu1 %vm2443_vm0, %v10200_v9  ;;  %12312 = vst [vmem:[#allocation535_spill] sm:$0xff] %v10226_v6  ;;  %v7213_v12 = vpop.eup %7212  ;;  %v10247_v4 = vmul.f32 %v7211_v52, %v9699_v3  ;;  %v12317_v3 = vld [vmem:[#allocation453_spill] sm:$0xff]  ;;  %7238 = vrcp.f32 %v10053_v17 }
 0x4ad   :  { %6509 = vmatmul.mubr.msk.f32.gmra.mxu0 %vm2443_vm0, %v10204_v14  ;;  %3572 = vperm.xlu1 %6779, %v9908_v50   ;;  %v7215_v30 = vpop.eup %7214  ;;  %v10263_v11 = vmul.f32 %v7213_v12, %v12317_v3  ;;  %v12321_v12 = vld [vmem:[#allocation455_spill] sm:$0xff]  ;;  %7240 = vrcp.f32 %v10080_v57  ;;  %v12377_v14 = vld [vmem:[#allocation208_spill] sm:$0xff] }
 0x4ae   :  { %4723 = vmatprep.mubr.f32.mxu1 %v11987_v15  ;;  %5950 = vmatprep.mubr.f32.mxu0 %v11987_v15  ;;  %12314 = vst [vmem:[#allocation537_spill] sm:$0xff] %v10247_v4  ;;  %v10249_v27 = vpop.xlane.xlu1 %3012  ;;  %v7217_v29 = vpop.eup %7216  ;;  %v10268_v1 = vmul.f32 %v7215_v30, %v12318_v19  ;;  %v12322_v19 = vld [vmem:[#allocation404_spill] sm:$0xff]  ;;  %7242 = vrcp.f32 %v10077_v20 }
 0x4af   :  { %6805 = vset.pattern.permute.xlu0 %v12279_v51  ;;  %6516 = vmatprep.subr.msk.mxu1 %vm3415_vm1, %v9433_v48  ;;  %v10242_v48 = vmul.f32 %v7209_v2, %v9533_v38  ;;  %v12316_v38 = vld [vmem:[#allocation515_spill] sm:$0xff]  ;;  %v7219_v2 = vpop.eup %7218  ;;  %v10283_v30 = vmul.f32 %v7217_v29, %v12321_v12  ;;  %7244 = vrcp.f32 %v2998_v44  ;;  %v12346_v20 = vld [vmem:[#allocation388_spill] sm:$0xff] }
 0x4b0   :  { %3714 = vperm.xlu0 %6805, %v9995_v36   ;;  %6480 = vmatmul.mubr.msk.f32.gmra.mxu1 %vm2443_vm0, %v10222_v62  ;;  %12319 = vst [vmem:[#allocation515_spill] sm:$0xff] %v10268_v1  ;;  %v7221_v3 = vpop.eup %7220  ;;  %7246 = vrcp.f32 %v10186_v41 }
 0x4b1   :  { %6510 = vmatmul.mubr.msk.f32.gmra.mxu0 %vm2443_vm0, %v10226_v6  ;;  %6781 = vset.pattern.permute.xlu1 %v12279_v51  ;;  %v7223_v59 = vpop.eup %7222 }
 0x4b2   :  { %3690 = vperm.xlu1 %6781, %v9908_v50   ;;  %4729 = vmatprep.mubr.f32.mxu1 %v11987_v15  ;;  %v10254_v50 = vpop.f32.mrf.mxu1  ;;  %v10278_v52 = vpop.xlane.xlu1 %3018 }
 0x4b3   :  { %5956 = vmatprep.mubr.f32.mxu0 %v11987_v15  ;;  %12315 = vst [vmem:[#allocation538_spill] sm:$0xff] %v10254_v50  ;;  %v7225_v12 = vpop.eup %7224 }
 0x4b4   :  { %6808 = vset.pattern.permute.xlu0 %v12274_v5  ;;  %6481 = vmatmul.mubr.msk.f32.gmra.mxu1 %vm2443_vm0, %v10242_v48  ;;  %v10272_v40 = vpop.f32.mrf.mxu1  ;;  %v7227_v61 = vpop.eup %7226 }
 0x4b5   :  { %6511 = vmatmul.mubr.msk.f32.gmra.mxu0 %vm2443_vm0, %v10247_v4  ;;  %3646 = vperm.xlu0 %6808, %v12316_v38   ;;  %12320 = vst [vmem:[#allocation453_spill] sm:$0xff] %v10272_v40  ;;  %v10288_v40 = vmul.f32 %v7219_v2, %v12322_v19  ;;  %v12325_v2 = vld [vmem:[#allocation457_spill] sm:$0xff]  ;;  %v12326_v19 = vld [vmem:[#allocation408_spill] sm:$0xff] }
 0x4b6   :  { %6784 = vset.pattern.permute.xlu1 %v12274_v5  ;;  %4735 = vmatprep.mubr.f32.mxu1 %v11987_v15  ;;  %v10293_v60 = vpop.f32.mrf.mxu1  ;;  %v12373_v4 = vld [vmem:[#allocation488_spill] sm:$0xff] }
 0x4b7   :  { %3622 = vperm.xlu1 %6784, %v9886_v47   ;;  %5962 = vmatprep.mubr.f32.mxu0 %v11987_v15  ;;  %12323 = vst [vmem:[#allocation398_spill] sm:$0xff] %v10288_v40  ;;  %12324 = vst [vmem:[#allocation455_spill] sm:$0xff] %v10293_v60  ;;  %v10308_v60 = vmul.f32 %v7223_v59, %v12326_v19  ;;  %v12329_v59 = vld [vmem:[#allocation459_spill] sm:$0xff] }
 0x4b8   :  { %6482 = vmatmul.mubr.msk.f32.gmra.mxu1 %vm2443_vm0, %v10263_v11  ;;  %v10313_v0 = vpop.f32.mrf.mxu1 }
 0x4b9   :  { %6512 = vmatmul.mubr.msk.f32.gmra.mxu0 %vm2443_vm0, %v10268_v1  ;;  %6810 = vset.pattern.permute.xlu0 %v12278_v43  ;;  %12327 = vst [vmem:[#allocation404_spill] sm:$0xff] %v10308_v60  ;;  %12328 = vst [vmem:[#allocation457_spill] sm:$0xff] %v10313_v0  ;;  %v12330_v0 = vld [vmem:[#allocation406_spill] sm:$0xff] }
 0x4ba   :  { %3774 = vperm.xlu0 %6810, %v12316_v38   ;;  %4741 = vmatprep.mubr.f32.mxu1 %v11987_v15  ;;  %v10328_v50 = vmul.f32 %v7227_v61, %v12330_v0  ;;  %v10333_v13 = vpop.f32.mrf.mxu1 }
 0x4bb   :  { %6786 = vset.pattern.permute.xlu1 %v12278_v43  ;;  %5968 = vmatprep.mubr.f32.mxu0 %v11987_v15  ;;  %12332 = vst [vmem:[#allocation459_spill] sm:$0xff] %v10333_v13 }
 0x4bc   :  { %3750 = vperm.xlu1 %6786, %v9886_v47   ;;  %6483 = vmatmul.mubr.msk.f32.gmra.mxu1 %vm2443_vm0, %v10283_v30  ;;  %v10304_v47 = vmul.f32 %v7221_v3, %v12325_v2  ;;  %v10322_v3 = vmul.f32 %v7225_v12, %v12329_v59  ;;  %v7229_v2 = vpop.eup %7228  ;;  %12331 = vst [vmem:[#allocation408_spill] sm:$0xff] %v10328_v50  ;;  %v12333_v12 = vld [vmem:[#allocation469_spill] sm:$0xff]  ;;  %v10349_v13 = vpop.f32.mrf.mxu1 }
 0x4bd   :  { %6513 = vmatmul.mubr.msk.f32.gmra.mxu0 %vm2443_vm0, %v10288_v40  ;;  %4747 = vmatprep.mubr.f32.mxu1 %v11987_v15  ;;  %v10339_v59 = vmul.f32 %v7229_v2, %v12333_v12  ;;  %v7231_v61 = vpop.eup %7230  ;;  %12335 = vst [vmem:[#allocation469_spill] sm:$0xff] %v10349_v13  ;;  %v3004_v12 = vpop.xlane.xlu0 %3003 }
 0x4be   :  { %6812 = vset.pattern.permute.xlu0 %v12274_v5  ;;  %v10300_v29 = vpop.permute.xlu1 %3156  ;;  %5974 = vmatprep.mubr.f32.mxu0 %v11987_v15  ;;  %v7233_v2 = vpop.eup %7232  ;;  %7248 = vrcp.f32 %v3004_v12 }
 0x4bf   :  { %4035 = vperm.xlu0 %6812, %v10033_v7   ;;  %12334 = vst [vmem:[#allocation406_spill] sm:$0xff] %v10339_v59  ;;  %v10363_v13 = vpop.f32.mrf.mxu1  ;;  %7250 = vrcp.f32 %v10217_v24  ;;  %v12358_v24 = vld [vmem:[#allocation481_spill] sm:$0xff] }
 0x4c0   :  { %6788 = vset.pattern.permute.xlu1 %v12274_v5  ;;  %6484 = vmatmul.mubr.msk.f32.gmra.mxu1 %vm2443_vm0, %v10304_v47  ;;  %12339 = vst [vmem:[#allocation510_spill] sm:$0xff] %v10363_v13 }
 0x4c1   :  { %6514 = vmatmul.mubr.msk.f32.gmra.mxu0 %vm2443_vm0, %v10308_v60  ;;  %3634 = vperm.xlu1 %6788, %v9944_v34   ;;  %v10378_v13 = vpop.f32.mrf.mxu1  ;;  %v3010_v55 = vpop.xlane.xlu0 %3009 }
 0x4c2   :  { %4753 = vmatprep.mubr.f32.mxu1 %v11987_v15  ;;  %5980 = vmatprep.mubr.f32.mxu0 %v11987_v15  ;;  %12342 = vst [vmem:[#allocation539_spill] sm:$0xff] %v10378_v13  ;;  %7252 = vrcp.f32 %v3010_v55  ;;  %v12361_v55 = vld [vmem:[#allocation482_spill] sm:$0xff] }
 0x4c3   :  { %6814 = vset.pattern.permute.xlu0 %v12278_v43  ;;  %v10325_v19 = vpop.permute.xlu1 %3274  ;;  %v10392_v13 = vpop.f32.mrf.mxu1  ;;  %7254 = vrcp.f32 %v10249_v27  ;;  %v12364_v27 = vld [vmem:[#allocation484_spill] sm:$0xff] }
 0x4c4   :  { %4163 = vperm.xlu0 %6814, %v10033_v7   ;;  %6485 = vmatmul.mubr.msk.f32.gmra.mxu1 %vm2443_vm0, %v10322_v3  ;;  %12345 = vst [vmem:[#allocation540_spill] sm:$0xff] %v10392_v13 }
 0x4c5   :  { %6515 = vmatmul.mubr.msk.f32.gmra.mxu0 %vm2443_vm0, %v10328_v50  ;;  %6790 = vset.pattern.permute.xlu1 %v12278_v43  ;;  %v10405_v13 = vpop.f32.mrf.mxu1 }
 0x4c6   :  { %3762 = vperm.xlu1 %6790, %v9944_v34   ;;  %5529 = vmatprep.mubr.f32.mxu1 %v11987_v15  ;;  %v12336_v34 = vld [vmem:[#allocation471_spill] sm:$0xff]  ;;  %12348 = vst [vmem:[#allocation541_spill] sm:$0xff] %v10405_v13 }
 0x4c7   :  { %v10356_v31 = vmul.f32 %v7231_v61, %v12336_v34  ;;  %v7235_v34 = vpop.eup %7234  ;;  %v10419_v13 = vpop.f32.mrf.mxu1 }
 0x4c8   :  { %6815 = vset.pattern.permute.xlu0 %v12276_v23  ;;  %6498 = vmatmul.mubr.msk.f32.vlgmr.msra.gmra.mxu1 %vm2443_vm0, %v10339_v59  ;;  %v10347_v0 = vpop.permute.xlu1 %3206  ;;  %v7237_v37 = vpop.eup %7236  ;;  %12351 = vst [vmem:[#allocation542_spill] sm:$0xff] %v10419_v13  ;;  %v12385_v59 = vld [vmem:[#allocation152_spill] sm:$0xff] }
 0x4c9   :  { %3976 = vperm.xlu0 %6815, %v10006_v33   ;;  %5535 = vmatprep.mubr.f32.mxu1 %v11987_v15  ;;  %12337 = vst [vmem:[#allocation471_spill] sm:$0xff] %v10356_v31  ;;  %v10397_v25 = vmul.f32 %v7237_v37, %v12346_v20  ;;  %v12349_v37 = vld [vmem:[#allocation386_spill] sm:$0xff] }
 0x4ca   :  { %6791 = vset.pattern.permute.xlu1 %v12276_v23  ;;  %6517 = vmatpush1.msk.msra.mxu1 %vm3415_vm1, %v10039_v42  ;;  %v12340_v42 = vld [vmem:[#allocation473_spill] sm:$0xff] }
 0x4cb   :  { %3577 = vperm.xlu1 %6791, %v12338_v39   ;;  %v10372_v61 = vmul.f32 %v7233_v2, %v12340_v42  ;;  %v12343_v2 = vld [vmem:[#allocation383_spill] sm:$0xff]  ;;  %12347 = vst [vmem:[#allocation388_spill] sm:$0xff] %v10397_v25 }
 0x4cc   :  { %6499 = vmatmul.mubr.msk.f32.gmra.mxu1 %vm2443_vm0, %v10356_v31  ;;  %v10386_v42 = vmul.f32 %v7235_v34, %v12343_v2  ;;  %v7239_v34 = vpop.eup %7238  ;;  %v3016_v2 = vpop.xlane.xlu0 %3015  ;;  %v12387_v31 = vld [vmem:[#allocation13_spill] sm:$0xff] }
 0x4cd   :  { %6817 = vset.pattern.permute.xlu0 %v12279_v51  ;;  %v10366_v17 = vpop.permute.xlu1 %3334  ;;  %5541 = vmatprep.mubr.f32.mxu1 %v11987_v15  ;;  %12341 = vst [vmem:[#allocation473_spill] sm:$0xff] %v10372_v61  ;;  %v10412_v44 = vmul.f32 %v7239_v34, %v12349_v37  ;;  %v7241_v20 = vpop.eup %7240  ;;  %7256 = vrcp.f32 %v3016_v2 }
 0x4ce   :  { %4095 = vperm.xlu0 %6817, %v10006_v33   ;;  %12344 = vst [vmem:[#allocation383_spill] sm:$0xff] %v10386_v42  ;;  %v7243_v34 = vpop.eup %7242  ;;  %v10432_v37 = vpop.f32.mrf.mxu1  ;;  %7258 = vrcp.f32 %v10278_v52 }
 0x4cf   :  { %6792 = vset.pattern.permute.xlu1 %v12274_v5  ;;  %12350 = vst [vmem:[#allocation386_spill] sm:$0xff] %v10412_v44  ;;  %12354 = vst [vmem:[#allocation543_spill] sm:$0xff] %v10432_v37  ;;  %v7245_v50 = vpop.eup %7244 }
 0x4d0   :  { %3630 = vperm.xlu1 %6792, %v12338_v39   ;;  %6500 = vmatmul.mubr.msk.f32.gmra.mxu1 %vm2443_vm0, %v10372_v61  ;;  %v10414_v61 = vpop.permute.xlu0 %3210  ;;  %v10449_v37 = vpop.f32.mrf.mxu1  ;;  %v10453_v1 = vmul.f32 %v7245_v50, %v12358_v24 }
 0x4d1   :  { %5547 = vmatprep.mubr.f32.mxu1 %v11987_v15  ;;  %12357 = vst [vmem:[#allocation544_spill] sm:$0xff] %v10449_v37 }
 0x4d2   :  { %6819 = vset.pattern.permute.xlu0 %v12276_v23  ;;  %v10383_v57 = vpop.permute.xlu1 %3166  ;;  %12359 = vst [vmem:[#allocation481_spill] sm:$0xff] %v10453_v1 }
 0x4d3   :  { %3991 = vperm.xlu0 %6819, %v10083_v35  }
 0x4d4   :  { %6793 = vset.pattern.permute.xlu1 %v12279_v51  ;;  %6501 = vmatmul.mubr.msk.f32.gmra.mxu1 %vm2443_vm0, %v10386_v42  ;;  %v10434_v13 = vpop.permute.xlu0 %3338 }
 0x4d5   :  { %3694 = vperm.xlu1 %6793, %v12338_v39   ;;  %5553 = vmatprep.mubr.f32.mxu1 %v11987_v15 }
 0x4d7   :  { %6821 = vset.pattern.permute.xlu0 %v12279_v51  ;;  %v10400_v6 = vpop.permute.xlu1 %3218 }
 0x4d8   :  { %4107 = vperm.xlu0 %6821, %v10083_v35   ;;  %6502 = vmatmul.mubr.msk.f32.gmra.mxu1 %vm2443_vm0, %v10397_v25  ;;  %v12380_v25 = vld [vmem:[#allocation204_spill] sm:$0xff] }
 0x4d9   :  { %6794 = vset.pattern.permute.xlu1 %v12278_v43  ;;  %5559 = vmatprep.mubr.f32.mxu1 %v11987_v15 }
 0x4da   :  { %3758 = vperm.xlu1 %6794, %v12338_v39   ;;  %v12352_v39 = vld [vmem:[#allocation392_spill] sm:$0xff] }
 0x4db   :  { %v10427_v41 = vmul.f32 %v7241_v20, %v12352_v39  ;;  %v12355_v20 = vld [vmem:[#allocation390_spill] sm:$0xff] }
 0x4dc   :  { %6827 = vset.pattern.permute.xlu0 %v12276_v23  ;;  %6503 = vmatmul.mubr.msk.f32.gmra.mxu1 %vm2443_vm0, %v10412_v44  ;;  %v10443_v39 = vmul.f32 %v7243_v34, %v12355_v20  ;;  %v7247_v34 = vpop.eup %7246  ;;  %v10456_v20 = vpop.permute.xlu0 %3151  ;;  %v3237_v44 = vmul.f32 %v10347_v0, %v12380_v25 }
 0x4dd   :  { %v10421_v60 = vpop.permute.xlu1 %3346  ;;  %4001 = vperm.xlu0 %6827, %v10123_v28   ;;  %5565 = vmatprep.mubr.f32.mxu1 %v11987_v15  ;;  %12353 = vst [vmem:[#allocation392_spill] sm:$0xff] %v10427_v41  ;;  %v10470_v50 = vmul.f32 %v7247_v34, %v12361_v55  ;;  %v7249_v24 = vpop.eup %7248 }
 0x4de   :  { %6796 = vset.pattern.permute.xlu1 %v12274_v5  ;;  %12356 = vst [vmem:[#allocation390_spill] sm:$0xff] %v10443_v39  ;;  %v10486_v34 = vmul.f32 %v7249_v24, %v12364_v27  ;;  %v7251_v55 = vpop.eup %7250 }
 0x4df   :  { %3642 = vperm.xlu1 %6796, %v9969_v26   ;;  %12362 = vst [vmem:[#allocation482_spill] sm:$0xff] %v10470_v50  ;;  %v7253_v24 = vpop.eup %7252 }
 0x4e0   :  { %6504 = vmatmul.mubr.msk.f32.gmra.mxu1 %vm2443_vm0, %v10427_v41  ;;  %12365 = vst [vmem:[#allocation484_spill] sm:$0xff] %v10486_v34  ;;  %v3239_v41 = vmul.f32 %v10414_v61, %v12377_v14  ;;  %v12382_v14 = vld [vmem:[#allocation151_spill] sm:$0xff] }
 0x4e1   :  { %6829 = vset.pattern.permute.xlu0 %v12279_v51  ;;  %5571 = vmatprep.mubr.f32.mxu1 %v11987_v15 }
 0x4e2   :  { %v10439_v12 = vpop.permute.xlu1 %3161  ;;  %4115 = vperm.xlu0 %6829, %v10123_v28  }
 0x4e3   :  { %6798 = vset.pattern.permute.xlu1 %v12278_v43 }
 0x4e4   :  { %3770 = vperm.xlu1 %6798, %v9969_v26   ;;  %6505 = vmatmul.mubr.msk.f32.gmra.mxu1 %vm2443_vm0, %v10443_v39  ;;  %v10464_v26 = vpop.f32.mrf.mxu1 }
 0x4e5   :  { %6347 = vmatprep.mubr.f32.mxu1 %v11987_v15  ;;  %12360 = vst [vmem:[#allocation545_spill] sm:$0xff] %v10464_v26 }
 0x4e6   :  { %6832 = vset.pattern.permute.xlu0 %v12274_v5  ;;  %v10478_v26 = vpop.f32.mrf.mxu1 }
 0x4e7   :  { %v10458_v40 = vpop.permute.xlu1 %3214  ;;  %4047 = vperm.xlu0 %6832, %v10103_v56   ;;  %12363 = vst [vmem:[#allocation546_spill] sm:$0xff] %v10478_v26 }
 0x4e8   :  { %6799 = vset.pattern.permute.xlu1 %v12276_v23  ;;  %6518 = vmatmul.mubr.msk.f32.vlgmr.msra.gmra.mxu1 %vm2443_vm0, %v10453_v1  ;;  %v10480_v1 = vpop.permute.xlu0 %3270 }
 0x4e9   :  { %3587 = vperm.xlu1 %6799, %v9957_v46   ;;  %6353 = vmatprep.mubr.f32.mxu1 %v11987_v15  ;;  %v3301_v62 = vmul.f32 %v10480_v1, %v12388_v21 }
 0x4eb   :  { %6834 = vset.pattern.permute.xlu0 %v12278_v43 }
 0x4ec   :  { %v10473_v37 = vpop.permute.xlu1 %3278  ;;  %4175 = vperm.xlu0 %6834, %v10103_v56   ;;  %6519 = vmatmul.mubr.msk.f32.gmra.mxu1 %vm2443_vm0, %v10470_v50  ;;  %v10491_v50 = vpop.f32.mrf.mxu1 }
 0x4ed   :  { %6801 = vset.pattern.permute.xlu1 %v12279_v51  ;;  %6359 = vmatprep.mubr.f32.mxu1 %v11987_v15  ;;  %12366 = vst [vmem:[#allocation547_spill] sm:$0xff] %v10491_v50  ;;  %v10502_v27 = vpop.permute.xlu0 %3282 }
 0x4ee   :  { %3702 = vperm.xlu1 %6801, %v9957_v46   ;;  %v12367_v46 = vld [vmem:[#allocation485_spill] sm:$0xff]  ;;  %v10507_v50 = vpop.f32.mrf.mxu1 }
 0x4ef   :  { %v10500_v2 = vmul.f32 %v7251_v55, %v12367_v46  ;;  %12369 = vst [vmem:[#allocation548_spill] sm:$0xff] %v10507_v50  ;;  %v12370_v55 = vld [vmem:[#allocation487_spill] sm:$0xff] }
 0x4f0   :  { %6835 = vset.pattern.permute.xlu0 %v12276_v23  ;;  %6520 = vmatmul.mubr.msk.f32.gmra.mxu1 %vm2443_vm0, %v10486_v34  ;;  %v10515_v46 = vmul.f32 %v7253_v24, %v12370_v55  ;;  %v7255_v34 = vpop.eup %7254  ;;  %v10521_v50 = vpop.f32.mrf.mxu1 }
 0x4f1   :  { %v10493_v26 = vpop.permute.xlu1 %3342  ;;  %4011 = vperm.xlu0 %6835, %v10161_v18   ;;  %6365 = vmatprep.mubr.f32.mxu1 %v11987_v15  ;;  %12368 = vst [vmem:[#allocation485_spill] sm:$0xff] %v10500_v2  ;;  %12372 = vst [vmem:[#allocation549_spill] sm:$0xff] %v10521_v50  ;;  %v10528_v53 = vmul.f32 %v7255_v34, %v12373_v4  ;;  %v7257_v24 = vpop.eup %7256  ;;  %v12379_v34 = vld [vmem:[#allocation210_spill] sm:$0xff] }
 0x4f2   :  { %6804 = vset.pattern.permute.xlu1 %v12274_v5  ;;  %12371 = vst [vmem:[#allocation487_spill] sm:$0xff] %v10515_v46  ;;  %v10542_v4 = vpop.f32.mrf.mxu1  ;;  %v3240_v39 = vmul.f32 %v10414_v61, %v12379_v34  ;;  %v3304_v61 = vmul.f32 %v10325_v19, %v12385_v59  ;;  %v12386_v34 = vld [vmem:[#allocation206_spill] sm:$0xff] }
 0x4f3   :  { %3650 = vperm.xlu1 %6804, %v9995_v36   ;;  %12374 = vst [vmem:[#allocation488_spill] sm:$0xff] %v10528_v53  ;;  %v3238_v25 = vmul.f32 %v10347_v0, %v12386_v34 }
 0x4f4   :  { %6521 = vmatmul.mubr.msk.f32.gmra.mxu1 %vm2443_vm0, %v10500_v2  ;;  %v10523_v2 = vpop.permute.xlu0 %3290 }
 0x4f5   :  { %6837 = vset.pattern.permute.xlu0 %v12279_v51  ;;  %6371 = vmatprep.mubr.f32.mxu1 %v11987_v15 }
 0x4f6   :  { %v10511_v52 = vpop.permute.xlu1 %3176  ;;  %4123 = vperm.xlu0 %6837, %v10161_v18  }
 0x4f7   :  { %6806 = vset.pattern.permute.xlu1 %v12278_v43 }
 0x4f8   :  { %3778 = vperm.xlu1 %6806, %v9995_v36   ;;  %6522 = vmatmul.mubr.msk.f32.gmra.mxu1 %vm2443_vm0, %v10515_v46  ;;  %v12375_v36 = vld [vmem:[#allocation14_spill] sm:$0xff]  ;;  %v12376_v46 = vld [vmem:[#allocation15_spill] sm:$0xff]  ;;  %v3223_v45 = vpop.permute.xlu0 %3222 }
 0x4f9   :  { %6377 = vmatprep.mubr.f32.mxu1 %v11987_v15  ;;  %v3191_v63 = vmul.f32 %v10300_v29, %v12375_v36  ;;  %v3192_v50 = vmul.f32 %v10300_v29, %v12376_v46  ;;  %12378 = vst [vmem:[#allocation14_spill] sm:$0xff] %v10542_v4  ;;  %v12381_v36 = vld [vmem:[#allocation12_spill] sm:$0xff]  ;;  %v3303_v29 = vmul.f32 %v10325_v19, %v12382_v14  ;;  %v12383_v46 = vld [vmem:[#allocation490_spill] sm:$0xff]  ;;  %v7259_v4 = vpop.eup %7258  ;;  %v10571_v19 = vpop.f32.mrf.mxu1 }
 0x4fa   :  { %6840 = vset.pattern.permute.xlu0 %v12274_v5  ;;  %v3189_v42 = vmul.f32 %v10456_v20, %v12381_v36  ;;  %v3190_v36 = vmul.f32 %v10456_v20, %v12387_v31  ;;  %12389 = vst [vmem:[#allocation208_spill] sm:$0xff] %v10571_v19 }
 0x4fb   :  { %v10530_v55 = vpop.permute.xlu1 %3226  ;;  %4055 = vperm.xlu0 %6840, %v10141_v10   ;;  %v3255_v14 = vadd.f32 %v3239_v41, %v3191_v63  ;;  %v3256_v59 = vadd.f32 %v3240_v39, %v3192_v50  ;;  %v12391_v63 = vld [vmem:[#allocation491_spill] sm:$0xff] }
 0x4fc   :  { %6807 = vset.pattern.permute.xlu1 %v12276_v23  ;;  %6523 = vmatmul.mubr.msk.f32.gmra.mxu1 %vm2443_vm0, %v10528_v53  ;;  %v10555_v53 = vmul.f32 %v7257_v24, %v12383_v46  ;;  %v3253_v0 = vadd.f32 %v3237_v44, %v3189_v42  ;;  %v12390_v24 = vld [vmem:[#allocation150_spill] sm:$0xff]  ;;  %v10579_v21 = vmul.f32 %v7259_v4, %v12391_v63  ;;  %v12395_v42 = vld [vmem:[#allocation409_spill] sm:$0xff]  ;;  %v10592_v50 = vpop.permute.xlu0 %3350 }
 0x4fd   :  { %3597 = vperm.xlu1 %6807, %v12316_v38   ;;  %6383 = vmatprep.mubr.f32.mxu1 %v11987_v15  ;;  %v3302_v31 = vmul.f32 %v10480_v1, %v12390_v24  ;;  %v3319_v41 = vadd.f32 %v3303_v29, %v3255_v14  ;;  %v3254_v20 = vadd.f32 %v3238_v25, %v3190_v36  ;;  %v10586_v1 = vpop.f32.mrf.mxu1  ;;  %v12397_v25 = vld [vmem:[#allocation410_spill] sm:$0xff]  ;;  %v12398_v14 = vld [vmem:[#allocation212_spill] sm:$0xff]  ;;  %v12399_v24 = vld [vmem:[#allocation155_spill] sm:$0xff] }
 0x4fe   :  { %12384 = vst [vmem:[#allocation15_spill] sm:$0xff] %v10555_v53  ;;  %v3317_v46 = vadd.f32 %v3301_v62, %v3253_v0  ;;  %v3320_v34 = vadd.f32 %v3304_v61, %v3256_v59  ;;  %12393 = vst [vmem:[#allocation210_spill] sm:$0xff] %v10586_v1  ;;  %v3365_v44 = vmul.f32 %v10366_v17, %v12395_v42  ;;  %v12406_v1 = vld [vmem:[#allocation17_spill] sm:$0xff] }
 0x4ff   :  { %6842 = vset.pattern.permute.xlu0 %v12278_v43  ;;  %v3318_v4 = vadd.f32 %v3302_v31, %v3254_v20  ;;  %v3366_v36 = vmul.f32 %v10366_v17, %v12397_v25  ;;  %v3307_v63 = vmul.f32 %v10502_v27, %v12399_v24  ;;  %v12400_v31 = vld [vmem:[#allocation18_spill] sm:$0xff] }
 0x500   :  { %v10566_v8 = vpop.permute.xlu1 %3354  ;;  %4183 = vperm.xlu0 %6842, %v10141_v10   ;;  %6524 = vmatmul.mubr.msk.f32.gmra.mxu1 %vm2443_vm0, %v10555_v53  ;;  %v12392_v53 = vld [vmem:[#allocation411_spill] sm:$0xff]  ;;  %v3381_v59 = vadd.f32 %v3365_v44, %v3317_v46  ;;  %v3195_v20 = vmul.f32 %v10383_v57, %v12400_v31 }
 0x501   :  { %6809 = vset.pattern.permute.xlu1 %v12279_v51  ;;  %6389 = vmatprep.mubr.f32.mxu1 %v11987_v15  ;;  %v3367_v39 = vmul.f32 %v10434_v13, %v12392_v53  ;;  %v12394_v15 = vld [vmem:[#allocation412_spill] sm:$0xff]  ;;  %v12405_v44 = vld [vmem:[#allocation19_spill] sm:$0xff] }
 0x502   :  { %3710 = vperm.xlu1 %6809, %v12316_v38   ;;  %v3368_v38 = vmul.f32 %v10434_v13, %v12394_v15  ;;  %v12396_v53 = vld [vmem:[#allocation216_spill] sm:$0xff]  ;;  %v3241_v13 = vmul.f32 %v10458_v40, %v12398_v14  ;;  %v12401_v15 = vld [vmem:[#allocation218_spill] sm:$0xff]  ;;  %v12404_v14 = vld [vmem:[#allocation153_spill] sm:$0xff]  ;;  %v3196_v24 = vmul.f32 %v10383_v57, %v12405_v44 }
 0x503   :  { %v3243_v29 = vmul.f32 %v10400_v6, %v12396_v53  ;;  %v3383_v61 = vadd.f32 %v3367_v39, %v3319_v41  ;;  %v3244_v42 = vmul.f32 %v10400_v6, %v12401_v15  ;;  %v12402_v41 = vld [vmem:[#allocation214_spill] sm:$0xff]  ;;  %v12403_v53 = vld [vmem:[#allocation16_spill] sm:$0xff]  ;;  %v3305_v46 = vmul.f32 %v10473_v37, %v12404_v14 }
 0x504   :  { %6844 = vset.pattern.permute.xlu0 %v12274_v5  ;;  %6525 = vmatmul.mubr.msk.f32.gmra.mxu1 %vm2443_vm0, %v10579_v21  ;;  %v3384_v0 = vadd.f32 %v3368_v38, %v3320_v34  ;;  %v3242_v39 = vmul.f32 %v10458_v40, %v12402_v41  ;;  %v3193_v25 = vmul.f32 %v10439_v12, %v12403_v53  ;;  %v12407_v15 = vld [vmem:[#allocation154_spill] sm:$0xff]  ;;  %v12408_v53 = vld [vmem:[#allocation156_spill] sm:$0xff] }
 0x505   :  { %v3172_v62 = vpop.permute.xlu1 %3171  ;;  %4444 = vperm.xlu0 %6844, %v10200_v9   ;;  %v3382_v38 = vadd.f32 %v3366_v36, %v3318_v4  ;;  %v3259_v31 = vadd.f32 %v3243_v29, %v3195_v20  ;;  %v3194_v6 = vmul.f32 %v10439_v12, %v12406_v1  ;;  %v3306_v40 = vmul.f32 %v10473_v37, %v12407_v15  ;;  %v12409_v36 = vld [vmem:[#allocation413_spill] sm:$0xff]  ;;  %v12410_v1 = vld [vmem:[#allocation220_spill] sm:$0xff]  ;;  %v12411_v20 = vld [vmem:[#allocation222_spill] sm:$0xff] }
 0x506   :  { %6811 = vset.pattern.permute.xlu1 %v12276_v23  ;;  %v3257_v4 = vadd.f32 %v3241_v13, %v3193_v25  ;;  %v3369_v57 = vmul.f32 %v10493_v26, %v12409_v36  ;;  %v3260_v12 = vadd.f32 %v3244_v42, %v3196_v24  ;;  %v3245_v37 = vmul.f32 %v3223_v45, %v12410_v1  ;;  %v12413_v13 = vld [vmem:[#allocation20_spill] sm:$0xff] }
 0x507   :  { %3981 = vperm.xlu1 %6811, %v10033_v7   ;;  %v3246_v14 = vmul.f32 %v3223_v45, %v12411_v20  ;;  %v3258_v44 = vadd.f32 %v3242_v39, %v3194_v6  ;;  %v3197_v25 = vmul.f32 %v3172_v62, %v12413_v13  ;;  %v12415_v42 = vld [vmem:[#allocation224_spill] sm:$0xff]  ;;  %v3323_v39 = vadd.f32 %v3307_v63, %v3259_v31  ;;  %v12417_v20 = vld [vmem:[#allocation157_spill] sm:$0xff] }
 0x508   :  { %v3486_v17 = vpop.f32.mrf.mxu1  ;;  %v3247_v24 = vmul.f32 %v10530_v55, %v12415_v42 }
 0x509   :  { %v3533_v34 = vsub.f32 %v3381_v59, %v3486_v17  ;;  %6846 = vset.pattern.permute.xlu0 %v12278_v43  ;;  %v3308_v59 = vmul.f32 %v10502_v27, %v12408_v53  ;;  %v10625_v17 = vpop.permute.xlu0 %3298  ;;  %v12412_v27 = vld [vmem:[#allocation414_spill] sm:$0xff]  ;;  %v3322_v45 = vadd.f32 %v3306_v40, %v3258_v44 }
 0x50a   :  { %v3488_v41 = vpop.f32.mrf.mxu1  ;;  %v3287_v19 = vpop.permute.xlu1 %3286  ;;  %4572 = vperm.xlu0 %6846, %v10200_v9   ;;  %v3370_v53 = vmul.f32 %v10493_v26, %v12412_v27  ;;  %v12421_v44 = vld [vmem:[#allocation158_spill] sm:$0xff] }
 0x50b   :  { %3549 = vst [vmem:[#allocation8] sm:$0xff] %v3533_v34  ;;  %v3534_v29 = vsub.f32 %v3382_v38, %v3488_v41  ;;  %6813 = vset.pattern.permute.xlu1 %v12279_v51  ;;  %v3321_v34 = vadd.f32 %v3305_v46, %v3257_v4  ;;  %v12414_v38 = vld [vmem:[#allocation415_spill] sm:$0xff]  ;;  %v3309_v26 = vmul.f32 %v3287_v19, %v12417_v20  ;;  %v12418_v46 = vld [vmem:[#allocation416_spill] sm:$0xff] }
 0x50c   :  { %v3492_v15 = vpop.f32.mrf.mxu1  ;;  %4099 = vperm.xlu1 %6813, %v10033_v7   ;;  %v3371_v41 = vmul.f32 %v10421_v60, %v12414_v38  ;;  %v12416_v7 = vld [vmem:[#allocation21_spill] sm:$0xff]  ;;  %v3372_v4 = vmul.f32 %v10421_v60, %v12418_v46  ;;  %v12420_v38 = vld [vmem:[#allocation226_spill] sm:$0xff]  ;;  %v3386_v60 = vadd.f32 %v3370_v53, %v3322_v45 }
 0x50d   :  { %3550 = vst [vmem:[#allocation8 + $0x8] sm:$0xff] %v3534_v29  ;;  %v3535_v36 = vsub.f32 %v3383_v61, %v3492_v15  ;;  %v3198_v6 = vmul.f32 %v3172_v62, %v12416_v7  ;;  %v3385_v61 = vadd.f32 %v3369_v57, %v3321_v34  ;;  %v12419_v15 = vld [vmem:[#allocation22_spill] sm:$0xff]  ;;  %v3248_v40 = vmul.f32 %v10530_v55, %v12420_v38  ;;  %v10651_v31 = vpop.permute.xlu0 %3230  ;;  %v12422_v34 = vld [vmem:[#allocation24_spill] sm:$0xff]  ;;  %v12424_v53 = vld [vmem:[#allocation417_spill] sm:$0xff] }
 0x50e   :  { %v3494_v1 = vpop.f32.mrf.mxu1  ;;  %6847 = vset.pattern.permute.xlu0 %v12276_v23  ;;  %v3199_v13 = vmul.f32 %v10511_v52, %v12419_v15  ;;  %v3324_v62 = vadd.f32 %v3308_v59, %v3260_v12  ;;  %v3200_v42 = vmul.f32 %v10511_v52, %v12422_v34  ;;  %v3387_v59 = vadd.f32 %v3371_v41, %v3323_v39  ;;  %v12426_v39 = vld [vmem:[#allocation418_spill] sm:$0xff]  ;;  %v12427_v38 = vld [vmem:[#allocation419_spill] sm:$0xff] }
 0x50f   :  { %3551 = vst [vmem:[#allocation8 + $0x10] sm:$0xff] %v3535_v36  ;;  %v3536_v27 = vsub.f32 %v3384_v0, %v3494_v1  ;;  %v3187_v29 = vpop.permute.xlu1 %3186  ;;  %4385 = vperm.xlu0 %6847, %v10176_v16   ;;  %v3261_v0 = vadd.f32 %v3245_v37, %v3197_v25  ;;  %v3310_v36 = vmul.f32 %v3287_v19, %v12421_v44  ;;  %v12423_v37 = vld [vmem:[#allocation159_spill] sm:$0xff]  ;;  %v12429_v44 = vld [vmem:[#allocation420_spill] sm:$0xff] }
 0x510   :  { %v3498_v63 = vpop.f32.mrf.mxu1  ;;  %6816 = vset.pattern.permute.xlu1 %v12274_v5  ;;  %v3263_v1 = vadd.f32 %v3247_v24, %v3199_v13  ;;  %v3262_v55 = vadd.f32 %v3246_v14, %v3198_v6  ;;  %v3311_v19 = vmul.f32 %v10523_v2, %v12423_v37  ;;  %v3264_v25 = vadd.f32 %v3248_v40, %v3200_v42  ;;  %v12425_v6 = vld [vmem:[#allocation160_spill] sm:$0xff] }
 0x511   :  { %3552 = vst [vmem:[#allocation8 + $0x18] sm:$0xff] %v3536_v27  ;;  %v3537_v57 = vsub.f32 %v3385_v61, %v3498_v63  ;;  %4031 = vperm.xlu1 %6816, %v10006_v33   ;;  %v3325_v12 = vadd.f32 %v3309_v26, %v3261_v0  ;;  %v3373_v52 = vmul.f32 %v10592_v50, %v12424_v53  ;;  %v10669_v13 = vpop.permute.xlu0 %3358  ;;  %v12428_v63 = vld [vmem:[#allocation232_spill] sm:$0xff] }
 0x512   :  { %v3500_v7 = vpop.f32.mrf.mxu1  ;;  %v3388_v14 = vadd.f32 %v3372_v4, %v3324_v62  ;;  %v3326_v45 = vadd.f32 %v3310_v36, %v3262_v55  ;;  %v3312_v41 = vmul.f32 %v10523_v2, %v12425_v6  ;;  %v3374_v26 = vmul.f32 %v10592_v50, %v12426_v39 }
 0x513   :  { %3553 = vst [vmem:[#allocation8 + $0x20] sm:$0xff] %v3537_v57  ;;  %v3538_v20 = vsub.f32 %v3386_v60, %v3500_v7  ;;  %6849 = vset.pattern.permute.xlu0 %v12279_v51  ;;  %v3327_v15 = vadd.f32 %v3311_v19, %v3263_v1  ;;  %v3375_v40 = vmul.f32 %v10566_v8, %v12427_v38  ;;  %v12430_v57 = vld [vmem:[#allocation28_spill] sm:$0xff]  ;;  %v12431_v60 = vld [vmem:[#allocation234_spill] sm:$0xff] }
 0x514   :  { %v3504_v27 = vpop.f32.mrf.mxu1  ;;  %v3235_v61 = vpop.permute.xlu1 %3234  ;;  %4504 = vperm.xlu0 %6849, %v10176_v16   ;;  %v3389_v62 = vadd.f32 %v3373_v52, %v3325_v12  ;;  %v3376_v2 = vmul.f32 %v10566_v8, %v12429_v44  ;;  %v3328_v50 = vadd.f32 %v3312_v41, %v3264_v25  ;;  %v3390_v7 = vadd.f32 %v3374_v26, %v3326_v45  ;;  %v12433_v25 = vld [vmem:[#allocation162_spill] sm:$0xff]  ;;  %v12435_v41 = vld [vmem:[#allocation423_spill] sm:$0xff] }
 0x515   :  { %3554 = vst [vmem:[#allocation8 + $0x28] sm:$0xff] %v3538_v20  ;;  %v3539_v24 = vsub.f32 %v3387_v59, %v3504_v27  ;;  %6818 = vset.pattern.permute.xlu1 %v12278_v43  ;;  %v3251_v0 = vmul.f32 %v3235_v61, %v12428_v63  ;;  %v3252_v34 = vmul.f32 %v3235_v61, %v12431_v60  ;;  %v12432_v20 = vld [vmem:[#allocation30_spill] sm:$0xff]  ;;  %v3627_v61 = vpop.permute.xlu0 %3626 }
 0x516   :  { %v3506_v46 = vpop.f32.mrf.mxu1  ;;  %4159 = vperm.xlu1 %6818, %v10006_v33   ;;  %v3203_v33 = vmul.f32 %v3187_v29, %v12430_v57  ;;  %v3204_v59 = vmul.f32 %v3187_v29, %v12432_v20  ;;  %v3391_v37 = vadd.f32 %v3375_v40, %v3327_v15  ;;  %v3315_v27 = vmul.f32 %v10625_v17, %v12433_v25  ;;  %v12434_v29 = vld [vmem:[#allocation26_spill] sm:$0xff]  ;;  %v12436_v15 = vld [vmem:[#allocation25_spill] sm:$0xff]  ;;  %v12437_v40 = vld [vmem:[#allocation27_spill] sm:$0xff] }
 0x517   :  { %3555 = vst [vmem:[#allocation8 + $0x30] sm:$0xff] %v3539_v24  ;;  %v3540_v4 = vsub.f32 %v3388_v14, %v3506_v46  ;;  %v3392_v24 = vadd.f32 %v3376_v2, %v3328_v50  ;;  %v3316_v6 = vmul.f32 %v10625_v17, %v12434_v29  ;;  %v12439_v2 = vld [vmem:[#allocation228_spill] sm:$0xff] }
 0x518   :  { %v3510_v36 = vpop.f32.mrf.mxu1  ;;  %6851 = vset.pattern.permute.xlu0 %v12276_v23  ;;  %v3267_v8 = vadd.f32 %v3251_v0, %v3203_v33  ;;  %v3268_v53 = vadd.f32 %v3252_v34, %v3204_v59  ;;  %v3249_v17 = vmul.f32 %v10651_v31, %v12439_v2 }
 0x519   :  { %3556 = vst [vmem:[#allocation8 + $0x38] sm:$0xff] %v3540_v4  ;;  %v3541_v42 = vsub.f32 %v3389_v62, %v3510_v36  ;;  %v3363_v1 = vpop.permute.xlu1 %3362  ;;  %4400 = vperm.xlu0 %6851, %v10242_v48   ;;  %v12438_v4 = vld [vmem:[#allocation424_spill] sm:$0xff]  ;;  %v12440_v36 = vld [vmem:[#allocation230_spill] sm:$0xff]  ;;  %v3755_v34 = vpop.permute.xlu0 %3754 }
 0x51a   :  { %v3512_v55 = vpop.f32.mrf.mxu1  ;;  %6820 = vset.pattern.permute.xlu1 %v12274_v5  ;;  %v3379_v39 = vmul.f32 %v3363_v1, %v12435_v41  ;;  %v3331_v46 = vadd.f32 %v3315_v27, %v3267_v8  ;;  %v3380_v62 = vmul.f32 %v3363_v1, %v12438_v4  ;;  %v3332_v44 = vadd.f32 %v3316_v6, %v3268_v53 }
 0x51b   :  { %3557 = vst [vmem:[#allocation8 + $0x40] sm:$0xff] %v3541_v42  ;;  %v3542_v12 = vsub.f32 %v3390_v7, %v3512_v55  ;;  %4043 = vperm.xlu1 %6820, %v10083_v35   ;;  %v3250_v50 = vmul.f32 %v10651_v31, %v12440_v36  ;;  %v12441_v7 = vld [vmem:[#allocation161_spill] sm:$0xff]  ;;  %v12442_v55 = vld [vmem:[#allocation23_spill] sm:$0xff]  ;;  %v12449_v36 = vld [vmem:[#allocation164_spill] sm:$0xff] }
 0x51c   :  { %v3516_v19 = vpop.f32.mrf.mxu1  ;;  %v3395_v60 = vadd.f32 %v3379_v39, %v3331_v46  ;;  %v3396_v31 = vadd.f32 %v3380_v62, %v3332_v44  ;;  %v12448_v62 = vld [vmem:[#allocation242_spill] sm:$0xff] }
 0x51d   :  { %3558 = vst [vmem:[#allocation8 + $0x48] sm:$0xff] %v3542_v12  ;;  %v3543_v52 = vsub.f32 %v3391_v37, %v3516_v19  ;;  %6853 = vset.pattern.permute.xlu0 %v12279_v51  ;;  %v12443_v12 = vld [vmem:[#allocation421_spill] sm:$0xff]  ;;  %v12444_v19 = vld [vmem:[#allocation422_spill] sm:$0xff]  ;;  %v3568_v41 = vpop.permute.xlu0 %3567  ;;  %v3656_v44 = vmul.f32 %v3627_v61, %v12448_v62 }
 0x51e   :  { %v3518_v14 = vpop.f32.mrf.mxu1  ;;  %v3182_v45 = vpop.permute.xlu1 %3181  ;;  %4516 = vperm.xlu0 %6853, %v10242_v48   ;;  %v3377_v37 = vmul.f32 %v10669_v13, %v12443_v12  ;;  %v3378_v25 = vmul.f32 %v10669_v13, %v12444_v19  ;;  %v12453_v12 = vld [vmem:[#allocation31_spill] sm:$0xff]  ;;  %v12454_v19 = vld [vmem:[#allocation33_spill] sm:$0xff] }
 0x51f   :  { %3559 = vst [vmem:[#allocation8 + $0x50] sm:$0xff] %v3543_v52  ;;  %v3544_v26 = vsub.f32 %v3392_v24, %v3518_v14  ;;  %6822 = vset.pattern.permute.xlu1 %v12278_v43  ;;  %v3201_v38 = vmul.f32 %v3182_v45, %v12436_v15  ;;  %v3202_v63 = vmul.f32 %v3182_v45, %v12437_v40  ;;  %v12446_v15 = vld [vmem:[#allocation36_spill] sm:$0xff]  ;;  %v12459_v62 = vld [vmem:[#allocation425_spill] sm:$0xff] }
 0x520   :  { %v3522_v0 = vpop.f32.mrf.mxu1  ;;  %4171 = vperm.xlu1 %6822, %v10083_v35  }
 0x521   :  { %3560 = vst [vmem:[#allocation8 + $0x58] sm:$0xff] %v3544_v26  ;;  %v3265_v42 = vadd.f32 %v3249_v17, %v3201_v38  ;;  %v3266_v35 = vadd.f32 %v3250_v50, %v3202_v63  ;;  %v12445_v26 = vld [vmem:[#allocation34_spill] sm:$0xff]  ;;  %v12447_v63 = vld [vmem:[#allocation240_spill] sm:$0xff] }
 0x522   :  { %v3524_v57 = vpop.f32.mrf.mxu1  ;;  %6859 = vset.pattern.permute.xlu0 %v12276_v23  ;;  %v3655_v4 = vmul.f32 %v3627_v61, %v12447_v63 }
 0x523   :  { %v3295_v33 = vpop.permute.xlu1 %3294  ;;  %4410 = vperm.xlu0 %6859, %v10283_v30  }
 0x524   :  { %v3313_v1 = vmul.f32 %v3295_v33, %v12441_v7  ;;  %v3314_v20 = vmul.f32 %v3295_v33, %v12442_v55  ;;  %v3528_v59 = vpop.f32.mrf.mxu1  ;;  %6823 = vset.pattern.permute.xlu1 %v12276_v23 }
 0x525   :  { %v3547_v8 = vsub.f32 %v3395_v60, %v3528_v59  ;;  %3986 = vperm.xlu1 %6823, %v10059_v54  }
 0x526   :  { %v3329_v27 = vadd.f32 %v3313_v1, %v3265_v42  ;;  %v3330_v53 = vadd.f32 %v3314_v20, %v3266_v35  ;;  %v3530_v52 = vpop.f32.mrf.mxu1  ;;  %v12451_v42 = vld [vmem:[#allocation427_spill] sm:$0xff]  ;;  %v12452_v35 = vld [vmem:[#allocation428_spill] sm:$0xff]  ;;  %v3687_v1 = vpop.permute.xlu0 %3686 }
 0x527   :  { %3563 = vst [vmem:[#allocation8 + $0x70] sm:$0xff] %v3547_v8  ;;  %v3548_v24 = vsub.f32 %v3396_v31, %v3530_v52  ;;  %6861 = vset.pattern.permute.xlu0 %v12279_v51  ;;  %v3783_v61 = vmul.f32 %v3755_v34, %v12451_v42  ;;  %v3784_v7 = vmul.f32 %v3755_v34, %v12452_v35  ;;  %v12461_v42 = vld [vmem:[#allocation40_spill] sm:$0xff]  ;;  %v12462_v35 = vld [vmem:[#allocation42_spill] sm:$0xff] }
 0x528   :  { %v3393_v14 = vadd.f32 %v3377_v37, %v3329_v27  ;;  %v3394_v45 = vadd.f32 %v3378_v25, %v3330_v53  ;;  %v3573_v29 = vpop.permute.xlu1 %3572  ;;  %v10710_v6 = vpop.f32.mrf.mxu1  ;;  %4524 = vperm.xlu0 %6861, %v10283_v30   ;;  %v3605_v37 = vmul.f32 %v3568_v41, %v12453_v12  ;;  %v3606_v25 = vmul.f32 %v3568_v41, %v12454_v19  ;;  %v12455_v53 = vld [vmem:[#allocation236_spill] sm:$0xff] }
 0x529   :  { %3564 = vst [vmem:[#allocation8 + $0x78] sm:$0xff] %v3548_v24  ;;  %6824 = vset.pattern.permute.xlu1 %v12274_v5  ;;  %v3607_v46 = vmul.f32 %v3573_v29, %v12445_v26  ;;  %v3608_v38 = vmul.f32 %v3573_v29, %v12446_v15  ;;  %v12456_v24 = vld [vmem:[#allocation238_spill] sm:$0xff]  ;;  %v12457_v29 = vld [vmem:[#allocation163_spill] sm:$0xff] }
 0x52a   :  { %v3545_v39 = vsub.f32 %v3393_v14, %v3522_v0  ;;  %v3546_v13 = vsub.f32 %v3394_v45, %v3524_v57  ;;  %4039 = vperm.xlu1 %6824, %v10059_v54   ;;  %v10717_v40 = vpop.f32.mrf.mxu1  ;;  %v12450_v57 = vld [vmem:[#allocation32_spill] sm:$0xff] }
 0x52b   :  { %v3671_v0 = vadd.f32 %v3655_v4, %v3607_v46  ;;  %v3672_v17 = vadd.f32 %v3656_v44, %v3608_v38  ;;  %v3583_v38 = vpop.permute.xlu0 %3582 }
 0x52c   :  { %3561 = vst [vmem:[#allocation8 + $0x60] sm:$0xff] %v3545_v39  ;;  %3562 = vst [vmem:[#allocation8 + $0x68] sm:$0xff] %v3546_v13  ;;  %6864 = vset.pattern.permute.xlu0 %v12274_v5  ;;  %v3901_v60 = vpop.f32.mrf.mxu1  ;;  %v3717_v39 = vmul.f32 %v3687_v1, %v12457_v29  ;;  %v12458_v13 = vld [vmem:[#allocation29_spill] sm:$0xff] }
 0x52d   :  { %v3691_v2 = vpop.permute.xlu1 %3690  ;;  %4456 = vperm.xlu0 %6864, %v10263_v11   ;;  %v3718_v26 = vmul.f32 %v3687_v1, %v12458_v13 }
 0x52e   :  { %v3719_v50 = vmul.f32 %v3691_v2, %v12449_v36  ;;  %v3720_v33 = vmul.f32 %v3691_v2, %v12450_v57  ;;  %6825 = vset.pattern.permute.xlu1 %v12279_v51  ;;  %v3903_v27 = vpop.f32.mrf.mxu1  ;;  %v12460_v2 = vld [vmem:[#allocation426_spill] sm:$0xff] }
 0x52f   :  { %4103 = vperm.xlu1 %6825, %v10059_v54  }
 0x530   :  { %v3735_v55 = vadd.f32 %v3719_v50, %v3671_v0  ;;  %v3736_v20 = vadd.f32 %v3720_v33, %v3672_v17  ;;  %v10744_v0 = vpop.f32.mrf.mxu1  ;;  %v3699_v50 = vpop.permute.xlu0 %3698 }
 0x531   :  { %6866 = vset.pattern.permute.xlu0 %v12278_v43 }
 0x532   :  { %v3799_v59 = vadd.f32 %v3783_v61, %v3735_v55  ;;  %v3800_v8 = vadd.f32 %v3784_v7, %v3736_v20  ;;  %v3623_v31 = vpop.permute.xlu1 %3622  ;;  %4584 = vperm.xlu0 %6866, %v10263_v11   ;;  %v3611_v61 = vmul.f32 %v3583_v38, %v12461_v42  ;;  %v3612_v7 = vmul.f32 %v3583_v38, %v12462_v35  ;;  %v10753_v1 = vpop.f32.mrf.mxu1  ;;  %v12463_v55 = vld [vmem:[#allocation248_spill] sm:$0xff] }
 0x533   :  { %v3653_v52 = vmul.f32 %v3623_v31, %v12455_v53  ;;  %v3654_v14 = vmul.f32 %v3623_v31, %v12456_v24  ;;  %6826 = vset.pattern.permute.xlu1 %v12278_v43  ;;  %v12466_v31 = vld [vmem:[#allocation38_spill] sm:$0xff]  ;;  %v12467_v24 = vld [vmem:[#allocation431_spill] sm:$0xff] }
 0x534   :  { %v3944_v34 = vsub.f32 %v3799_v59, %v3901_v60  ;;  %v3945_v45 = vsub.f32 %v3800_v8, %v3903_v27  ;;  %4167 = vperm.xlu1 %6826, %v10059_v54   ;;  %v12464_v59 = vld [vmem:[#allocation250_spill] sm:$0xff]  ;;  %v3724_v12 = vmul.f32 %v3699_v50, %v12466_v31 }
 0x535   :  { %v3669_v46 = vadd.f32 %v3653_v52, %v3605_v37  ;;  %v3670_v15 = vadd.f32 %v3654_v14, %v3606_v25  ;;  %v3913_v25 = vpop.f32.mrf.mxu1 }
 0x536   :  { %3960 = vst [vmem:[#allocation8 + $0x90] sm:$0xff] %v3944_v34  ;;  %3961 = vst [vmem:[#allocation8 + $0x98] sm:$0xff] %v3945_v45  ;;  %6867 = vset.pattern.permute.xlu0 %v12276_v23  ;;  %v12468_v34 = vld [vmem:[#allocation432_spill] sm:$0xff] }
 0x537   :  { %v3751_v41 = vpop.permute.xlu1 %3750  ;;  %v3733_v63 = vadd.f32 %v3717_v39, %v3669_v46  ;;  %v3734_v4 = vadd.f32 %v3718_v26, %v3670_v15  ;;  %4420 = vperm.xlu0 %6867, %v10322_v3   ;;  %v3915_v39 = vpop.f32.mrf.mxu1 }
 0x538   :  { %v3781_v44 = vmul.f32 %v3751_v41, %v12459_v62  ;;  %v3782_v54 = vmul.f32 %v3751_v41, %v12460_v2  ;;  %6828 = vset.pattern.permute.xlu1 %v12274_v5  ;;  %v3593_v15 = vpop.permute.xlu0 %3592  ;;  %v12470_v62 = vld [vmem:[#allocation246_spill] sm:$0xff] }
 0x539   :  { %4051 = vperm.xlu1 %6828, %v10123_v28   ;;  %v10790_v31 = vpop.f32.mrf.mxu1 }
 0x53a   :  { %v3797_v17 = vadd.f32 %v3781_v44, %v3733_v63  ;;  %v3798_v36 = vadd.f32 %v3782_v54, %v3734_v4  ;;  %v12469_v63 = vld [vmem:[#allocation244_spill] sm:$0xff] }
 0x53b   :  { %6869 = vset.pattern.permute.xlu0 %v12279_v51 }
 0x53c   :  { %v3942_v57 = vsub.f32 %v3797_v17, %v10710_v6  ;;  %v3943_v33 = vsub.f32 %v3798_v36, %v10717_v40  ;;  %v3635_v60 = vpop.permute.xlu1 %3634  ;;  %4532 = vperm.xlu0 %6869, %v10322_v3   ;;  %v12465_v6 = vld [vmem:[#allocation166_spill] sm:$0xff]  ;;  %v3707_v41 = vpop.permute.xlu0 %3706  ;;  %v12472_v17 = vld [vmem:[#allocation39_spill] sm:$0xff] }
 0x53d   :  { %v3659_v20 = vmul.f32 %v3635_v60, %v12463_v55  ;;  %v3660_v8 = vmul.f32 %v3635_v60, %v12464_v59  ;;  %6830 = vset.pattern.permute.xlu1 %v12278_v43  ;;  %v3723_v40 = vmul.f32 %v3699_v50, %v12465_v6  ;;  %v12473_v50 = vld [vmem:[#allocation165_spill] sm:$0xff]  ;;  %v12476_v6 = vld [vmem:[#allocation430_spill] sm:$0xff] }
 0x53e   :  { %3958 = vst [vmem:[#allocation8 + $0x80] sm:$0xff] %v3942_v57  ;;  %3959 = vst [vmem:[#allocation8 + $0x88] sm:$0xff] %v3943_v33  ;;  %4179 = vperm.xlu1 %6830, %v10123_v28   ;;  %v12474_v33 = vld [vmem:[#allocation35_spill] sm:$0xff]  ;;  %v12475_v59 = vld [vmem:[#allocation429_spill] sm:$0xff] }
 0x53f   :  { %v3675_v37 = vadd.f32 %v3659_v20, %v3611_v61  ;;  %v3676_v19 = vadd.f32 %v3660_v8, %v3612_v7 }
 0x540   :  { %6872 = vset.pattern.permute.xlu0 %v12274_v5  ;;  %v3639_v42 = vpop.permute.xlu0 %3638 }
 0x541   :  { %v3763_v27 = vpop.permute.xlu1 %3762  ;;  %v3739_v53 = vadd.f32 %v3723_v40, %v3675_v37  ;;  %v3740_v52 = vadd.f32 %v3724_v12, %v3676_v19  ;;  %4464 = vperm.xlu0 %6872, %v10304_v47  }
 0x542   :  { %v3787_v14 = vmul.f32 %v3763_v27, %v12467_v24  ;;  %v3788_v45 = vmul.f32 %v3763_v27, %v12468_v34  ;;  %6831 = vset.pattern.permute.xlu1 %v12276_v23  ;;  %v12478_v24 = vld [vmem:[#allocation48_spill] sm:$0xff]  ;;  %v10799_v34 = vpop.f32.mrf.mxu1 }
 0x543   :  { %3996 = vperm.xlu1 %6831, %v10103_v56  }
 0x544   :  { %v3803_v28 = vadd.f32 %v3787_v14, %v3739_v53  ;;  %v3804_v29 = vadd.f32 %v3788_v45, %v3740_v52  ;;  %v3767_v37 = vpop.permute.xlu0 %3766  ;;  %v12477_v53 = vld [vmem:[#allocation46_spill] sm:$0xff]  ;;  %v3616_v14 = vmul.f32 %v3593_v15, %v12478_v24  ;;  %v12479_v45 = vld [vmem:[#allocation256_spill] sm:$0xff] }
 0x545   :  { %6874 = vset.pattern.permute.xlu0 %v12278_v43  ;;  %v3615_v52 = vmul.f32 %v3593_v15, %v12477_v53  ;;  %v3925_v15 = vpop.f32.mrf.mxu1 }
 0x546   :  { %v3948_v13 = vsub.f32 %v3803_v28, %v3913_v25  ;;  %v3949_v26 = vsub.f32 %v3804_v29, %v3915_v39  ;;  %v3578_v46 = vpop.permute.xlu1 %3577  ;;  %4592 = vperm.xlu0 %6874, %v10304_v47   ;;  %v12480_v29 = vld [vmem:[#allocation258_spill] sm:$0xff] }
 0x547   :  { %6833 = vset.pattern.permute.xlu1 %v12279_v51  ;;  %v3610_v36 = vmul.f32 %v3578_v46, %v12472_v17 }
 0x548   :  { %3964 = vst [vmem:[#allocation8 + $0xb0] sm:$0xff] %v3948_v13  ;;  %3965 = vst [vmem:[#allocation8 + $0xb8] sm:$0xff] %v3949_v26  ;;  %4111 = vperm.xlu1 %6833, %v10103_v56   ;;  %v12471_v56 = vld [vmem:[#allocation37_spill] sm:$0xff]  ;;  %v12482_v13 = vld [vmem:[#allocation44_spill] sm:$0xff] }
 0x549   :  { %v3609_v54 = vmul.f32 %v3578_v46, %v12471_v56  ;;  %v3728_v26 = vmul.f32 %v3707_v41, %v12482_v13  ;;  %v12493_v13 = vld [vmem:[#allocation51_spill] sm:$0xff] }
 0x54a   :  { %6876 = vset.pattern.permute.xlu0 %v12274_v5 }
 0x54b   :  { %v3631_v38 = vpop.permute.xlu1 %3630  ;;  %4853 = vperm.xlu0 %6876, %v10037_v32  }
 0x54c   :  { %6836 = vset.pattern.permute.xlu1 %v12274_v5  ;;  %v3657_v4 = vmul.f32 %v3631_v38, %v12469_v63  ;;  %v3658_v44 = vmul.f32 %v3631_v38, %v12470_v62 }
 0x54d   :  { %4059 = vperm.xlu1 %6836, %v10161_v18  }
 0x54e   :  { %v3673_v61 = vadd.f32 %v3657_v4, %v3609_v54  ;;  %v3674_v35 = vadd.f32 %v3658_v44, %v3610_v36  ;;  %v3603_v44 = vpop.permute.xlu0 %3602  ;;  %v12484_v54 = vld [vmem:[#allocation436_spill] sm:$0xff]  ;;  %v3927_v36 = vpop.f32.mrf.mxu1 }
 0x54f   :  { %6878 = vset.pattern.permute.xlu0 %v12278_v43 }
 0x550   :  { %v3695_v2 = vpop.permute.xlu1 %3694  ;;  %4981 = vperm.xlu0 %6878, %v10037_v32  }
 0x551   :  { %6838 = vset.pattern.permute.xlu1 %v12278_v43  ;;  %v3721_v57 = vmul.f32 %v3695_v2, %v12473_v50  ;;  %v3722_v60 = vmul.f32 %v3695_v2, %v12474_v33  ;;  %v12483_v2 = vld [vmem:[#allocation435_spill] sm:$0xff] }
 0x552   :  { %4187 = vperm.xlu1 %6838, %v10161_v18  }
 0x553   :  { %v3737_v55 = vadd.f32 %v3721_v57, %v3673_v61  ;;  %v3738_v20 = vadd.f32 %v3722_v60, %v3674_v35  ;;  %v3715_v60 = vpop.permute.xlu0 %3714  ;;  %v12485_v61 = vld [vmem:[#allocation43_spill] sm:$0xff] }
 0x554   :  { %6879 = vset.pattern.permute.xlu0 %v12276_v23 }
 0x555   :  { %v3759_v7 = vpop.permute.xlu1 %3758  ;;  %4794 = vperm.xlu0 %6879, %v10010_v58  }
 0x556   :  { %v3785_v8 = vmul.f32 %v3759_v7, %v12475_v59  ;;  %v3786_v40 = vmul.f32 %v3759_v7, %v12476_v6  ;;  %6839 = vset.pattern.permute.xlu1 %v12276_v23  ;;  %v12486_v7 = vld [vmem:[#allocation45_spill] sm:$0xff] }
 0x557   :  { %4006 = vperm.xlu1 %6839, %v10141_v10  }
 0x558   :  { %v3801_v18 = vadd.f32 %v3785_v8, %v3737_v55  ;;  %v3802_v12 = vadd.f32 %v3786_v40, %v3738_v20  ;;  %v12487_v20 = vld [vmem:[#allocation252_spill] sm:$0xff]  ;;  %v12488_v8 = vld [vmem:[#allocation254_spill] sm:$0xff] }
 0x559   :  { %6881 = vset.pattern.permute.xlu0 %v12279_v51  ;;  %v3661_v59 = vmul.f32 %v3639_v42, %v12487_v20  ;;  %v3662_v6 = vmul.f32 %v3639_v42, %v12488_v8  ;;  %v12492_v42 = vld [vmem:[#allocation434_spill] sm:$0xff] }
 0x55a   :  { %v3946_v19 = vsub.f32 %v3801_v18, %v10744_v0  ;;  %v3947_v25 = vsub.f32 %v3802_v12, %v10753_v1  ;;  %v3643_v27 = vpop.permute.xlu1 %3642  ;;  %4913 = vperm.xlu0 %6881, %v10010_v58   ;;  %v12481_v0 = vld [vmem:[#allocation168_spill] sm:$0xff] }
 0x55b   :  { %v3663_v28 = vmul.f32 %v3643_v27, %v12479_v45  ;;  %v3664_v39 = vmul.f32 %v3643_v27, %v12480_v29  ;;  %6841 = vset.pattern.permute.xlu1 %v12279_v51  ;;  %v3727_v1 = vmul.f32 %v3707_v41, %v12481_v0  ;;  %v12490_v27 = vld [vmem:[#allocation41_spill] sm:$0xff]  ;;  %v3647_v45 = vpop.permute.xlu0 %3646 }
 0x55c   :  { %3962 = vst [vmem:[#allocation8 + $0xa0] sm:$0xff] %v3946_v19  ;;  %3963 = vst [vmem:[#allocation8 + $0xa8] sm:$0xff] %v3947_v25  ;;  %4119 = vperm.xlu1 %6841, %v10141_v10   ;;  %v12489_v19 = vld [vmem:[#allocation167_spill] sm:$0xff] }
 0x55d   :  { %v3679_v46 = vadd.f32 %v3663_v28, %v3615_v52  ;;  %v3680_v38 = vadd.f32 %v3664_v39, %v3616_v14  ;;  %v10826_v52 = vpop.f32.mrf.mxu1  ;;  %v3790_v14 = vmul.f32 %v3767_v37, %v12492_v42 }
 0x55e   :  { %6883 = vset.pattern.permute.xlu0 %v12276_v23 }
 0x55f   :  { %v3771_v63 = vpop.permute.xlu1 %3770  ;;  %v3743_v4 = vadd.f32 %v3727_v1, %v3679_v46  ;;  %v3744_v62 = vadd.f32 %v3728_v26, %v3680_v38  ;;  %4809 = vperm.xlu0 %6883, %v10089_v22   ;;  %v3619_v26 = vmul.f32 %v3603_v44, %v12493_v13  ;;  %v12494_v46 = vld [vmem:[#allocation52_spill] sm:$0xff] }
 0x560   :  { %v3791_v56 = vmul.f32 %v3771_v63, %v12483_v2  ;;  %v3792_v17 = vmul.f32 %v3771_v63, %v12484_v54  ;;  %6843 = vset.pattern.permute.xlu1 %v12276_v23  ;;  %v3620_v38 = vmul.f32 %v3603_v44, %v12494_v46  ;;  %v12495_v63 = vld [vmem:[#allocation264_spill] sm:$0xff]  ;;  %v12497_v54 = vld [vmem:[#allocation170_spill] sm:$0xff] }
 0x561   :  { %4390 = vperm.xlu1 %6843, %v10200_v9  }
 0x562   :  { %v3807_v10 = vadd.f32 %v3791_v56, %v3743_v4  ;;  %v3808_v41 = vadd.f32 %v3792_v17, %v3744_v62  ;;  %v12496_v62 = vld [vmem:[#allocation266_spill] sm:$0xff]  ;;  %v3731_v17 = vmul.f32 %v3715_v60, %v12497_v54 }
 0x563   :  { %6885 = vset.pattern.permute.xlu0 %v12279_v51 }
 0x564   :  { %v3952_v50 = vsub.f32 %v3807_v10, %v3925_v15  ;;  %v3953_v57 = vsub.f32 %v3808_v41, %v3927_v36  ;;  %v3588_v33 = vpop.permute.xlu1 %3587  ;;  %4925 = vperm.xlu0 %6885, %v10089_v22   ;;  %v10835_v15 = vpop.f32.mrf.mxu1  ;;  %v12498_v10 = vld [vmem:[#allocation171_spill] sm:$0xff] }
 0x565   :  { %6845 = vset.pattern.permute.xlu1 %v12279_v51  ;;  %v3613_v35 = vmul.f32 %v3588_v33, %v12485_v61  ;;  %v3614_v55 = vmul.f32 %v3588_v33, %v12486_v7  ;;  %v3732_v41 = vmul.f32 %v3715_v60, %v12498_v10 }
 0x566   :  { %3968 = vst [vmem:[#allocation8 + $0xd0] sm:$0xff] %v3952_v50  ;;  %3969 = vst [vmem:[#allocation8 + $0xd8] sm:$0xff] %v3953_v57  ;;  %4508 = vperm.xlu1 %6845, %v10200_v9   ;;  %v12491_v9 = vld [vmem:[#allocation433_spill] sm:$0xff]  ;;  %v3775_v50 = vpop.permute.xlu0 %3774  ;;  %v3937_v57 = vpop.f32.mrf.mxu1 }
 0x567   :  { %v3677_v18 = vadd.f32 %v3661_v59, %v3613_v35  ;;  %v3678_v12 = vadd.f32 %v3662_v6, %v3614_v55  ;;  %v3789_v24 = vmul.f32 %v3767_v37, %v12491_v9 }
 0x568   :  { %6891 = vset.pattern.permute.xlu0 %v12276_v23  ;;  %v3939_v59 = vpop.f32.mrf.mxu1 }
 0x569   :  { %v3703_v40 = vpop.permute.xlu1 %3702  ;;  %4819 = vperm.xlu0 %6891, %v10127_v49  }
 0x56a   :  { %v3725_v25 = vmul.f32 %v3703_v40, %v12489_v19  ;;  %v3726_v53 = vmul.f32 %v3703_v40, %v12490_v27  ;;  %6848 = vset.pattern.permute.xlu1 %v12274_v5  ;;  %v4036_v8 = vpop.permute.xlu0 %4035 }
 0x56b   :  { %4440 = vperm.xlu1 %6848, %v10176_v16  }
 0x56c   :  { %v3741_v28 = vadd.f32 %v3725_v25, %v3677_v18  ;;  %v3742_v29 = vadd.f32 %v3726_v53, %v3678_v12  ;;  %v12502_v12 = vld [vmem:[#allocation49_spill] sm:$0xff]  ;;  %v12503_v25 = vld [vmem:[#allocation50_spill] sm:$0xff]  ;;  %v12504_v53 = vld [vmem:[#allocation260_spill] sm:$0xff] }
 0x56d   :  { %6893 = vset.pattern.permute.xlu0 %v12279_v51  ;;  %v3665_v9 = vmul.f32 %v3647_v45, %v12504_v53 }
 0x56e   :  { %v3805_v39 = vadd.f32 %v3789_v24, %v3741_v28  ;;  %v3806_v0 = vadd.f32 %v3790_v14, %v3742_v29  ;;  %v3651_v1 = vpop.permute.xlu1 %3650  ;;  %4933 = vperm.xlu0 %6893, %v10127_v49   ;;  %v12505_v24 = vld [vmem:[#allocation262_spill] sm:$0xff]  ;;  %v12506_v28 = vld [vmem:[#allocation528_spill] sm:$0xff]  ;;  %v4164_v29 = vpop.permute.xlu0 %4163 }
 0x56f   :  { %v3667_v4 = vmul.f32 %v3651_v1, %v12495_v63  ;;  %v3668_v37 = vmul.f32 %v3651_v1, %v12496_v62  ;;  %6850 = vset.pattern.permute.xlu1 %v12278_v43  ;;  %v3666_v42 = vmul.f32 %v3647_v45, %v12505_v24  ;;  %v12507_v1 = vld [vmem:[#allocation169_spill] sm:$0xff] }
 0x570   :  { %v3950_v2 = vsub.f32 %v3805_v39, %v10790_v31  ;;  %v3951_v56 = vsub.f32 %v3806_v0, %v10799_v34  ;;  %4568 = vperm.xlu1 %6850, %v10176_v16   ;;  %v12499_v31 = vld [vmem:[#allocation523_spill] sm:$0xff]  ;;  %v12501_v16 = vld [vmem:[#allocation440_spill] sm:$0xff] }
 0x571   :  { %v3683_v36 = vadd.f32 %v3667_v4, %v3619_v26  ;;  %v3684_v44 = vadd.f32 %v3668_v37, %v3620_v38  ;;  %v12500_v34 = vld [vmem:[#allocation439_spill] sm:$0xff]  ;;  %v12509_v38 = vld [vmem:[#allocation534_spill] sm:$0xff] }
 0x572   :  { %3966 = vst [vmem:[#allocation8 + $0xc0] sm:$0xff] %v3950_v2  ;;  %3967 = vst [vmem:[#allocation8 + $0xc8] sm:$0xff] %v3951_v56  ;;  %6896 = vset.pattern.permute.xlu0 %v12274_v5  ;;  %v12508_v26 = vld [vmem:[#allocation47_spill] sm:$0xff]  ;;  %v12511_v4 = vld [vmem:[#allocation438_spill] sm:$0xff]  ;;  %v10867_v2 = vpop.f32.mrf.mxu1  ;;  %v3977_v10 = vpop.permute.xlu0 %3976 }
 0x573   :  { %v3779_v33 = vpop.permute.xlu1 %3778  ;;  %v3747_v61 = vadd.f32 %v3731_v17, %v3683_v36  ;;  %v3748_v35 = vadd.f32 %v3732_v41, %v3684_v44  ;;  %4865 = vperm.xlu0 %6896, %v12499_v31   ;;  %v3794_v45 = vmul.f32 %v3775_v50, %v12511_v4  ;;  %v12512_v44 = vld [vmem:[#allocation55_spill] sm:$0xff] }
 0x574   :  { %v3795_v7 = vmul.f32 %v3779_v33, %v12500_v34  ;;  %v3796_v55 = vmul.f32 %v3779_v33, %v12501_v16  ;;  %6852 = vset.pattern.permute.xlu1 %v12274_v5 }
 0x575   :  { %4452 = vperm.xlu1 %6852, %v10242_v48  }
 0x576   :  { %v3811_v60 = vadd.f32 %v3795_v7, %v3747_v61  ;;  %v3812_v20 = vadd.f32 %v3796_v55, %v3748_v35  ;;  %v10877_v61 = vpop.f32.mrf.mxu1  ;;  %v12514_v35 = vld [vmem:[#allocation272_spill] sm:$0xff]  ;;  %v12515_v7 = vld [vmem:[#allocation274_spill] sm:$0xff] }
 0x577   :  { %6898 = vset.pattern.permute.xlu0 %v12278_v43  ;;  %v4064_v34 = vmul.f32 %v4036_v8, %v12514_v35  ;;  %v4065_v16 = vmul.f32 %v4036_v8, %v12515_v7 }
 0x578   :  { %v3956_v6 = vsub.f32 %v3811_v60, %v3937_v57  ;;  %v3957_v40 = vsub.f32 %v3812_v20, %v3939_v59  ;;  %v3598_v18 = vpop.permute.xlu1 %3597  ;;  %4993 = vperm.xlu0 %6898, %v12499_v31   ;;  %v12513_v57 = vld [vmem:[#allocation56_spill] sm:$0xff]  ;;  %v12517_v20 = vld [vmem:[#allocation174_spill] sm:$0xff] }
 0x579   :  { %6854 = vset.pattern.permute.xlu1 %v12278_v43  ;;  %v3617_v19 = vmul.f32 %v3598_v18, %v12502_v12  ;;  %v3618_v27 = vmul.f32 %v3598_v18, %v12503_v25  ;;  %v4310_v18 = vpop.f32.mrf.mxu1  ;;  %v12519_v12 = vld [vmem:[#allocation443_spill] sm:$0xff] }
 0x57a   :  { %3972 = vst [vmem:[#allocation8 + $0xf0] sm:$0xff] %v3956_v6  ;;  %3973 = vst [vmem:[#allocation8 + $0xf8] sm:$0xff] %v3957_v40  ;;  %4580 = vperm.xlu1 %6854, %v10242_v48   ;;  %v12510_v48 = vld [vmem:[#allocation437_spill] sm:$0xff]  ;;  %v12518_v6 = vld [vmem:[#allocation175_spill] sm:$0xff]  ;;  %v4192_v8 = vmul.f32 %v4164_v29, %v12519_v12 }
 0x57b   :  { %v3681_v39 = vadd.f32 %v3665_v9, %v3617_v19  ;;  %v3682_v0 = vadd.f32 %v3666_v42, %v3618_v27  ;;  %v3793_v63 = vmul.f32 %v3775_v50, %v12510_v48  ;;  %v12520_v19 = vld [vmem:[#allocation444_spill] sm:$0xff]  ;;  %v4096_v27 = vpop.permute.xlu0 %4095 }
 0x57c   :  { %6899 = vset.pattern.permute.xlu0 %v12276_v23  ;;  %v4193_v25 = vmul.f32 %v4164_v29, %v12520_v19  ;;  %v12532_v19 = vld [vmem:[#allocation280_spill] sm:$0xff] }
 0x57d   :  { %v3711_v14 = vpop.permute.xlu1 %3710  ;;  %4829 = vperm.xlu0 %6899, %v12506_v28  }
 0x57e   :  { %v3729_v13 = vmul.f32 %v3711_v14, %v12507_v1  ;;  %v3730_v46 = vmul.f32 %v3711_v14, %v12508_v26  ;;  %6855 = vset.pattern.permute.xlu1 %v12276_v23  ;;  %v12522_v1 = vld [vmem:[#allocation54_spill] sm:$0xff]  ;;  %v4312_v26 = vpop.f32.mrf.mxu1 }
 0x57f   :  { %4395 = vperm.xlu1 %6855, %v12509_v38  }
 0x580   :  { %v3745_v62 = vadd.f32 %v3729_v13, %v3681_v39  ;;  %v3746_v37 = vadd.f32 %v3730_v46, %v3682_v0  ;;  %v12521_v39 = vld [vmem:[#allocation53_spill] sm:$0xff]  ;;  %v4015_v13 = vmul.f32 %v3977_v10, %v12522_v1  ;;  %v12523_v46 = vld [vmem:[#allocation268_spill] sm:$0xff]  ;;  %v10904_v7 = vpop.f32.mrf.mxu1 }
 0x581   :  { %6901 = vset.pattern.permute.xlu0 %v12279_v51  ;;  %v4014_v0 = vmul.f32 %v3977_v10, %v12521_v39 }
 0x582   :  { %v3809_v56 = vadd.f32 %v3793_v63, %v3745_v62  ;;  %v3810_v54 = vadd.f32 %v3794_v45, %v3746_v37  ;;  %v3982_v17 = vpop.permute.xlu1 %3981  ;;  %4941 = vperm.xlu0 %6901, %v12506_v28   ;;  %v12524_v63 = vld [vmem:[#allocation270_spill] sm:$0xff]  ;;  %v12525_v62 = vld [vmem:[#allocation172_spill] sm:$0xff] }
 0x583   :  { %6856 = vset.pattern.permute.xlu1 %v12274_v5  ;;  %v4016_v50 = vmul.f32 %v3982_v17, %v12512_v44  ;;  %v4017_v33 = vmul.f32 %v3982_v17, %v12513_v57  ;;  %v4126_v37 = vmul.f32 %v4096_v27, %v12525_v62  ;;  %v12527_v57 = vld [vmem:[#allocation471_spill] sm:$0xff] }
 0x584   :  { %v3954_v41 = vsub.f32 %v3809_v56, %v10826_v52  ;;  %v3955_v36 = vsub.f32 %v3810_v54, %v10835_v15  ;;  %4448 = vperm.xlu1 %6856, %v12509_v38   ;;  %v12516_v52 = vld [vmem:[#allocation526_spill] sm:$0xff]  ;;  %v12526_v56 = vld [vmem:[#allocation173_spill] sm:$0xff] }
 0x585   :  { %v4080_v15 = vadd.f32 %v4064_v34, %v4016_v50  ;;  %v4081_v60 = vadd.f32 %v4065_v16, %v4017_v33  ;;  %v4127_v54 = vmul.f32 %v4096_v27, %v12526_v56  ;;  %v12528_v33 = vld [vmem:[#allocation441_spill] sm:$0xff]  ;;  %v12529_v34 = vld [vmem:[#allocation442_spill] sm:$0xff] }
 0x586   :  { %3970 = vst [vmem:[#allocation8 + $0xe0] sm:$0xff] %v3954_v41  ;;  %3971 = vst [vmem:[#allocation8 + $0xe8] sm:$0xff] %v3955_v36  ;;  %6904 = vset.pattern.permute.xlu0 %v12274_v5  ;;  %v3992_v36 = vpop.permute.xlu0 %3991  ;;  %v12533_v27 = vld [vmem:[#allocation282_spill] sm:$0xff] }
 0x587   :  { %v4100_v55 = vpop.permute.xlu1 %4099  ;;  %4873 = vperm.xlu0 %6904, %v12516_v52  }
 0x588   :  { %v4128_v59 = vmul.f32 %v4100_v55, %v12517_v20  ;;  %v4129_v40 = vmul.f32 %v4100_v55, %v12518_v6  ;;  %6857 = vset.pattern.permute.xlu1 %v12279_v51  ;;  %v12530_v6 = vld [vmem:[#allocation59_spill] sm:$0xff] }
 0x589   :  { %4512 = vperm.xlu1 %6857, %v12509_v38  }
 0x58a   :  { %v4144_v53 = vadd.f32 %v4128_v59, %v4080_v15  ;;  %v4145_v9 = vadd.f32 %v4129_v40, %v4081_v60  ;;  %v4108_v15 = vpop.permute.xlu0 %4107  ;;  %v4020_v40 = vmul.f32 %v3992_v36, %v12530_v6 }
 0x58b   :  { %6906 = vset.pattern.permute.xlu0 %v12278_v43 }
 0x58c   :  { %v4208_v24 = vadd.f32 %v4192_v8, %v4144_v53  ;;  %v4209_v42 = vadd.f32 %v4193_v25, %v4145_v9  ;;  %v4032_v14 = vpop.permute.xlu1 %4031  ;;  %5001 = vperm.xlu0 %6906, %v12516_v52   ;;  %v10913_v8 = vpop.f32.mrf.mxu1  ;;  %v12535_v9 = vld [vmem:[#allocation179_spill] sm:$0xff] }
 0x58d   :  { %v4062_v48 = vmul.f32 %v4032_v14, %v12523_v46  ;;  %v4063_v4 = vmul.f32 %v4032_v14, %v12524_v63  ;;  %6858 = vset.pattern.permute.xlu1 %v12278_v43  ;;  %v12537_v46 = vld [vmem:[#allocation447_spill] sm:$0xff]  ;;  %v12538_v63 = vld [vmem:[#allocation448_spill] sm:$0xff] }
 0x58e   :  { %v4353_v29 = vsub.f32 %v4208_v24, %v4310_v18  ;;  %v4354_v45 = vsub.f32 %v4209_v42, %v4312_v26  ;;  %4576 = vperm.xlu1 %6858, %v12509_v38   ;;  %v12531_v18 = vld [vmem:[#allocation60_spill] sm:$0xff]  ;;  %v4133_v24 = vmul.f32 %v4108_v15, %v12535_v9  ;;  %v4322_v39 = vpop.f32.mrf.mxu1  ;;  %v12536_v26 = vld [vmem:[#allocation406_spill] sm:$0xff] }
 0x58f   :  { %v4078_v17 = vadd.f32 %v4062_v48, %v4014_v0  ;;  %v4079_v41 = vadd.f32 %v4063_v4, %v4015_v13  ;;  %v4021_v12 = vmul.f32 %v3992_v36, %v12531_v18 }
 0x590   :  { %4369 = vst [vmem:[#allocation8 + $0x110] sm:$0xff] %v4353_v29  ;;  %4370 = vst [vmem:[#allocation8 + $0x118] sm:$0xff] %v4354_v45  ;;  %6908 = vset.pattern.permute.xlu0 %v12274_v5  ;;  %v4324_v45 = vpop.f32.mrf.mxu1 }
 0x591   :  { %v4160_v10 = vpop.permute.xlu1 %4159  ;;  %v4142_v44 = vadd.f32 %v4126_v37, %v4078_v17  ;;  %v4143_v50 = vadd.f32 %v4127_v54, %v4079_v41  ;;  %5262 = vperm.xlu0 %6908, %v12527_v57   ;;  %v4002_v54 = vpop.permute.xlu0 %4001  ;;  %v12539_v41 = vld [vmem:[#allocation383_spill] sm:$0xff] }
 0x592   :  { %v4190_v35 = vmul.f32 %v4160_v10, %v12528_v33  ;;  %v4191_v38 = vmul.f32 %v4160_v10, %v12529_v34  ;;  %6860 = vset.pattern.permute.xlu1 %v12274_v5  ;;  %v12540_v10 = vld [vmem:[#allocation276_spill] sm:$0xff]  ;;  %v10950_v9 = vpop.f32.mrf.mxu1 }
 0x593   :  { %4460 = vperm.xlu1 %6860, %v10283_v30  }
 0x594   :  { %v4206_v16 = vadd.f32 %v4190_v35, %v4142_v44  ;;  %v4207_v55 = vadd.f32 %v4191_v38, %v4143_v50  ;;  %v12541_v50 = vld [vmem:[#allocation278_spill] sm:$0xff] }
 0x595   :  { %6910 = vset.pattern.permute.xlu0 %v12278_v43  ;;  %v4116_v36 = vpop.permute.xlu0 %4115  ;;  %v12543_v38 = vld [vmem:[#allocation58_spill] sm:$0xff] }
 0x596   :  { %v4351_v60 = vsub.f32 %v4206_v16, %v10867_v2  ;;  %v4352_v20 = vsub.f32 %v4207_v55, %v10877_v61  ;;  %v4044_v59 = vpop.permute.xlu1 %4043  ;;  %5390 = vperm.xlu0 %6910, %v12527_v57   ;;  %v12534_v2 = vld [vmem:[#allocation178_spill] sm:$0xff]  ;;  %v12544_v55 = vld [vmem:[#allocation176_spill] sm:$0xff] }
 0x597   :  { %v4068_v25 = vmul.f32 %v4044_v59, %v12532_v19  ;;  %v4069_v53 = vmul.f32 %v4044_v59, %v12533_v27  ;;  %6862 = vset.pattern.permute.xlu1 %v12278_v43  ;;  %v4132_v61 = vmul.f32 %v4108_v15, %v12534_v2  ;;  %v12547_v27 = vld [vmem:[#allocation445_spill] sm:$0xff]  ;;  %v12548_v2 = vld [vmem:[#allocation446_spill] sm:$0xff] }
 0x598   :  { %4367 = vst [vmem:[#allocation8 + $0x100] sm:$0xff] %v4351_v60  ;;  %4368 = vst [vmem:[#allocation8 + $0x108] sm:$0xff] %v4352_v20  ;;  %4588 = vperm.xlu1 %6862, %v10283_v30   ;;  %v12545_v60 = vld [vmem:[#allocation177_spill] sm:$0xff] }
 0x599   :  { %v4084_v42 = vadd.f32 %v4068_v25, %v4020_v40  ;;  %v4085_v14 = vadd.f32 %v4069_v53, %v4021_v12  ;;  %v4048_v59 = vpop.permute.xlu0 %4047  ;;  %v12546_v12 = vld [vmem:[#allocation386_spill] sm:$0xff] }
 0x59a   :  { %6911 = vset.pattern.permute.xlu0 %v12276_v23 }
 0x59b   :  { %v4172_v0 = vpop.permute.xlu1 %4171  ;;  %v4148_v1 = vadd.f32 %v4132_v61, %v4084_v42  ;;  %v4149_v13 = vadd.f32 %v4133_v24, %v4085_v14  ;;  %5203 = vperm.xlu0 %6911, %v12536_v26  }
 0x59c   :  { %v4196_v48 = vmul.f32 %v4172_v0, %v12537_v46  ;;  %v4197_v4 = vmul.f32 %v4172_v0, %v12538_v63  ;;  %6863 = vset.pattern.permute.xlu1 %v12276_v23  ;;  %v12550_v46 = vld [vmem:[#allocation64_spill] sm:$0xff]  ;;  %v10959_v63 = vpop.f32.mrf.mxu1 }
 0x59d   :  { %4405 = vperm.xlu1 %6863, %v10263_v11   ;;  %v4176_v42 = vpop.permute.xlu0 %4175 }
 0x59e   :  { %v4212_v30 = vadd.f32 %v4196_v48, %v4148_v1  ;;  %v4213_v29 = vadd.f32 %v4197_v4, %v4149_v13  ;;  %v12549_v1 = vld [vmem:[#allocation63_spill] sm:$0xff]  ;;  %v4025_v48 = vmul.f32 %v4002_v54, %v12550_v46  ;;  %v12551_v4 = vld [vmem:[#allocation288_spill] sm:$0xff] }
 0x59f   :  { %6913 = vset.pattern.permute.xlu0 %v12279_v51  ;;  %v4024_v13 = vmul.f32 %v4002_v54, %v12549_v1  ;;  %v4334_v54 = vpop.f32.mrf.mxu1 }
 0x5a0   :  { %v4357_v62 = vsub.f32 %v4212_v30, %v4322_v39  ;;  %v4358_v37 = vsub.f32 %v4213_v29, %v4324_v45  ;;  %v3987_v56 = vpop.permute.xlu1 %3986  ;;  %5322 = vperm.xlu0 %6913, %v12536_v26   ;;  %v12552_v29 = vld [vmem:[#allocation290_spill] sm:$0xff] }
 0x5a1   :  { %6865 = vset.pattern.permute.xlu1 %v12279_v51  ;;  %v4019_v16 = vmul.f32 %v3987_v56, %v12543_v38  ;;  %v12557_v38 = vld [vmem:[#allocation452_spill] sm:$0xff] }
 0x5a2   :  { %4373 = vst [vmem:[#allocation8 + $0x130] sm:$0xff] %v4357_v62  ;;  %4374 = vst [vmem:[#allocation8 + $0x138] sm:$0xff] %v4358_v37  ;;  %4520 = vperm.xlu1 %6865, %v10263_v11   ;;  %v12542_v11 = vld [vmem:[#allocation57_spill] sm:$0xff]  ;;  %v12554_v62 = vld [vmem:[#allocation183_spill] sm:$0xff] }
 0x5a3   :  { %v4018_v34 = vmul.f32 %v3987_v56, %v12542_v11  ;;  %v4137_v37 = vmul.f32 %v4116_v36, %v12554_v62  ;;  %v12556_v11 = vld [vmem:[#allocation451_spill] sm:$0xff] }
 0x5a4   :  { %6915 = vset.pattern.permute.xlu0 %v12276_v23 }
 0x5a5   :  { %v4040_v17 = vpop.permute.xlu1 %4039  ;;  %5218 = vperm.xlu0 %6915, %v12539_v41  }
 0x5a6   :  { %6868 = vset.pattern.permute.xlu1 %v12274_v5  ;;  %v4066_v44 = vmul.f32 %v4040_v17, %v12540_v10  ;;  %v4067_v33 = vmul.f32 %v4040_v17, %v12541_v50 }
 0x5a7   :  { %4468 = vperm.xlu1 %6868, %v10322_v3  }
 0x5a8   :  { %v4082_v6 = vadd.f32 %v4066_v44, %v4018_v34  ;;  %v4083_v40 = vadd.f32 %v4067_v33, %v4019_v16  ;;  %v12555_v33 = vld [vmem:[#allocation388_spill] sm:$0xff] }
 0x5a9   :  { %6917 = vset.pattern.permute.xlu0 %v12279_v51 }
 0x5aa   :  { %v4104_v35 = vpop.permute.xlu1 %4103  ;;  %5334 = vperm.xlu0 %6917, %v12539_v41  }
 0x5ab   :  { %6870 = vset.pattern.permute.xlu1 %v12278_v43  ;;  %v4130_v15 = vmul.f32 %v4104_v35, %v12544_v55  ;;  %v4131_v20 = vmul.f32 %v4104_v35, %v12545_v60  ;;  %v4012_v35 = vpop.permute.xlu0 %4011  ;;  %v4336_v55 = vpop.f32.mrf.mxu1 }
 0x5ac   :  { %4596 = vperm.xlu1 %6870, %v10322_v3  }
 0x5ad   :  { %v4146_v19 = vadd.f32 %v4130_v15, %v4082_v6  ;;  %v4147_v25 = vadd.f32 %v4131_v20, %v4083_v40  ;;  %v12558_v40 = vld [vmem:[#allocation61_spill] sm:$0xff] }
 0x5ae   :  { %6923 = vset.pattern.permute.xlu0 %v12276_v23 }
 0x5af   :  { %v4168_v18 = vpop.permute.xlu1 %4167  ;;  %5228 = vperm.xlu0 %6923, %v12546_v12   ;;  %v4124_v6 = vpop.permute.xlu0 %4123 }
 0x5b0   :  { %v4194_v53 = vmul.f32 %v4168_v18, %v12547_v27  ;;  %v4195_v61 = vmul.f32 %v4168_v18, %v12548_v2  ;;  %6871 = vset.pattern.permute.xlu1 %v12276_v23  ;;  %v12560_v27 = vld [vmem:[#allocation284_spill] sm:$0xff]  ;;  %v12561_v2 = vld [vmem:[#allocation286_spill] sm:$0xff] }
 0x5b1   :  { %4415 = vperm.xlu1 %6871, %v10304_v47  }
 0x5b2   :  { %v4210_v3 = vadd.f32 %v4194_v53, %v4146_v19  ;;  %v4211_v24 = vadd.f32 %v4195_v61, %v4147_v25  ;;  %v12559_v19 = vld [vmem:[#allocation62_spill] sm:$0xff]  ;;  %v4070_v53 = vmul.f32 %v4048_v59, %v12560_v27  ;;  %v4071_v61 = vmul.f32 %v4048_v59, %v12561_v2 }
 0x5b3   :  { %6925 = vset.pattern.permute.xlu0 %v12279_v51  ;;  %v12566_v59 = vld [vmem:[#allocation450_spill] sm:$0xff] }
 0x5b4   :  { %v4355_v14 = vsub.f32 %v4210_v3, %v10904_v7  ;;  %v4356_v39 = vsub.f32 %v4211_v24, %v10913_v8  ;;  %v4052_v0 = vpop.permute.xlu1 %4051  ;;  %5342 = vperm.xlu0 %6925, %v12546_v12   ;;  %v12553_v7 = vld [vmem:[#allocation182_spill] sm:$0xff] }
 0x5b5   :  { %v4072_v30 = vmul.f32 %v4052_v0, %v12551_v4  ;;  %v4073_v45 = vmul.f32 %v4052_v0, %v12552_v29  ;;  %6873 = vset.pattern.permute.xlu1 %v12279_v51  ;;  %v4136_v8 = vmul.f32 %v4116_v36, %v12553_v7  ;;  %v12562_v24 = vld [vmem:[#allocation390_spill] sm:$0xff]  ;;  %v12563_v0 = vld [vmem:[#allocation180_spill] sm:$0xff]  ;;  %v4056_v29 = vpop.permute.xlu0 %4055 }
 0x5b6   :  { %4371 = vst [vmem:[#allocation8 + $0x120] sm:$0xff] %v4355_v14  ;;  %4372 = vst [vmem:[#allocation8 + $0x128] sm:$0xff] %v4356_v39  ;;  %4528 = vperm.xlu1 %6873, %v10304_v47  }
 0x5b7   :  { %v4088_v56 = vadd.f32 %v4072_v30, %v4024_v13  ;;  %v4089_v17 = vadd.f32 %v4073_v45, %v4025_v48  ;;  %v12564_v13 = vld [vmem:[#allocation181_spill] sm:$0xff]  ;;  %v10986_v48 = vpop.f32.mrf.mxu1  ;;  %v4199_v30 = vmul.f32 %v4176_v42, %v12566_v59 }
 0x5b8   :  { %6928 = vset.pattern.permute.xlu0 %v12274_v5 }
 0x5b9   :  { %v4180_v10 = vpop.permute.xlu1 %4179  ;;  %v4152_v44 = vadd.f32 %v4136_v8, %v4088_v56  ;;  %v4153_v50 = vadd.f32 %v4137_v37, %v4089_v17  ;;  %5274 = vperm.xlu0 %6928, %v12555_v33   ;;  %v10993_v56 = vpop.f32.mrf.mxu1  ;;  %v12567_v17 = vld [vmem:[#allocation67_spill] sm:$0xff] }
 0x5ba   :  { %v4200_v34 = vmul.f32 %v4180_v10, %v12556_v11  ;;  %v4201_v16 = vmul.f32 %v4180_v10, %v12557_v38  ;;  %6875 = vset.pattern.permute.xlu1 %v12276_v23  ;;  %v12568_v10 = vld [vmem:[#allocation68_spill] sm:$0xff] }
 0x5bb   :  { %4799 = vperm.xlu1 %6875, %v10037_v32  }
 0x5bc   :  { %v4216_v47 = vadd.f32 %v4200_v34, %v4152_v44  ;;  %v4217_v36 = vadd.f32 %v4201_v16, %v4153_v50  ;;  %v4029_v44 = vmul.f32 %v4012_v35, %v12568_v10  ;;  %v12569_v50 = vld [vmem:[#allocation296_spill] sm:$0xff]  ;;  %v12570_v34 = vld [vmem:[#allocation298_spill] sm:$0xff] }
 0x5bd   :  { %6930 = vset.pattern.permute.xlu0 %v12278_v43 }
 0x5be   :  { %v4361_v15 = vsub.f32 %v4216_v47, %v4334_v54  ;;  %v4362_v60 = vsub.f32 %v4217_v36, %v4336_v55  ;;  %v3997_v20 = vpop.permute.xlu1 %3996  ;;  %5402 = vperm.xlu0 %6930, %v12555_v33   ;;  %v4028_v54 = vmul.f32 %v4012_v35, %v12567_v17  ;;  %v12571_v47 = vld [vmem:[#allocation186_spill] sm:$0xff]  ;;  %v12572_v55 = vld [vmem:[#allocation187_spill] sm:$0xff]  ;;  %v4346_v35 = vpop.f32.mrf.mxu1 }
 0x5bf   :  { %6877 = vset.pattern.permute.xlu1 %v12279_v51  ;;  %v4022_v18 = vmul.f32 %v3997_v20, %v12558_v40  ;;  %v4023_v25 = vmul.f32 %v3997_v20, %v12559_v19  ;;  %v4140_v36 = vmul.f32 %v4124_v6, %v12571_v47  ;;  %v4184_v40 = vpop.permute.xlu0 %4183 }
 0x5c0   :  { %4377 = vst [vmem:[#allocation8 + $0x150] sm:$0xff] %v4361_v15  ;;  %4378 = vst [vmem:[#allocation8 + $0x158] sm:$0xff] %v4362_v60  ;;  %4917 = vperm.xlu1 %6877, %v10037_v32   ;;  %v12565_v32 = vld [vmem:[#allocation449_spill] sm:$0xff]  ;;  %v4141_v15 = vmul.f32 %v4124_v6, %v12572_v55 }
 0x5c1   :  { %v4086_v14 = vadd.f32 %v4070_v53, %v4022_v18  ;;  %v4087_v39 = vadd.f32 %v4071_v61, %v4023_v25  ;;  %v4198_v4 = vmul.f32 %v4176_v42, %v12565_v32  ;;  %v4348_v61 = vpop.f32.mrf.mxu1 }
 0x5c2   :  { %6931 = vset.pattern.permute.xlu0 %v12276_v23 }
 0x5c3   :  { %v4112_v3 = vpop.permute.xlu1 %4111  ;;  %5238 = vperm.xlu0 %6931, %v12562_v24   ;;  %v11027_v47 = vpop.f32.mrf.mxu1 }
 0x5c4   :  { %v4134_v1 = vmul.f32 %v4112_v3, %v12563_v0  ;;  %v4135_v46 = vmul.f32 %v4112_v3, %v12564_v13  ;;  %6880 = vset.pattern.permute.xlu1 %v12274_v5  ;;  %v4445_v3 = vpop.permute.xlu0 %4444 }
 0x5c5   :  { %4849 = vperm.xlu1 %6880, %v10010_v58  }
 0x5c6   :  { %v4150_v45 = vadd.f32 %v4134_v1, %v4086_v14  ;;  %v4151_v7 = vadd.f32 %v4135_v46, %v4087_v39  ;;  %v12576_v1 = vld [vmem:[#allocation65_spill] sm:$0xff]  ;;  %v12577_v46 = vld [vmem:[#allocation66_spill] sm:$0xff] }
 0x5c7   :  { %6933 = vset.pattern.permute.xlu0 %v12279_v51 }
 0x5c8   :  { %v4214_v8 = vadd.f32 %v4198_v4, %v4150_v45  ;;  %v4215_v62 = vadd.f32 %v4199_v30, %v4151_v7  ;;  %v4060_v37 = vpop.permute.xlu1 %4059  ;;  %5350 = vperm.xlu0 %6933, %v12562_v24   ;;  %v12578_v4 = vld [vmem:[#allocation292_spill] sm:$0xff]  ;;  %v12579_v30 = vld [vmem:[#allocation294_spill] sm:$0xff] }
 0x5c9   :  { %v4076_v11 = vmul.f32 %v4060_v37, %v12569_v50  ;;  %v4077_v42 = vmul.f32 %v4060_v37, %v12570_v34  ;;  %6882 = vset.pattern.permute.xlu1 %v12278_v43  ;;  %v4074_v59 = vmul.f32 %v4056_v29, %v12578_v4  ;;  %v4075_v45 = vmul.f32 %v4056_v29, %v12579_v30 }
 0x5ca   :  { %v4359_v38 = vsub.f32 %v4214_v8, %v10950_v9  ;;  %v4360_v16 = vsub.f32 %v4215_v62, %v10959_v63  ;;  %4977 = vperm.xlu1 %6882, %v10010_v58   ;;  %v12573_v9 = vld [vmem:[#allocation392_spill] sm:$0xff]  ;;  %v12574_v63 = vld [vmem:[#allocation458_spill] sm:$0xff]  ;;  %v4573_v62 = vpop.permute.xlu0 %4572 }
 0x5cb   :  { %v4092_v60 = vadd.f32 %v4076_v11, %v4028_v54  ;;  %v4093_v20 = vadd.f32 %v4077_v42, %v4029_v44  ;;  %v12575_v58 = vld [vmem:[#allocation460_spill] sm:$0xff]  ;;  %v12582_v44 = vld [vmem:[#allocation185_spill] sm:$0xff] }
 0x5cc   :  { %4375 = vst [vmem:[#allocation8 + $0x140] sm:$0xff] %v4359_v38  ;;  %4376 = vst [vmem:[#allocation8 + $0x148] sm:$0xff] %v4360_v16  ;;  %6936 = vset.pattern.permute.xlu0 %v12274_v5  ;;  %v12580_v8 = vld [vmem:[#allocation532_spill] sm:$0xff] }
 0x5cd   :  { %v4188_v18 = vpop.permute.xlu1 %4187  ;;  %v4156_v19 = vadd.f32 %v4140_v36, %v4092_v60  ;;  %v4157_v25 = vadd.f32 %v4141_v15, %v4093_v20  ;;  %5282 = vperm.xlu0 %6936, %v12573_v9   ;;  %v12581_v54 = vld [vmem:[#allocation184_spill] sm:$0xff] }
 0x5ce   :  { %v4204_v27 = vmul.f32 %v4188_v18, %v12574_v63  ;;  %v4205_v53 = vmul.f32 %v4188_v18, %v12575_v58  ;;  %6884 = vset.pattern.permute.xlu1 %v12274_v5  ;;  %v12583_v11 = vld [vmem:[#allocation520_spill] sm:$0xff]  ;;  %v4386_v60 = vpop.permute.xlu0 %4385  ;;  %v12586_v18 = vld [vmem:[#allocation71_spill] sm:$0xff]  ;;  %v11037_v63 = vpop.f32.mrf.mxu1 }
 0x5cf   :  { %4861 = vperm.xlu1 %6884, %v10089_v22   ;;  %v12585_v42 = vld [vmem:[#allocation456_spill] sm:$0xff] }
 0x5d0   :  { %v4220_v6 = vadd.f32 %v4204_v27, %v4156_v19  ;;  %v4221_v2 = vadd.f32 %v4205_v53, %v4157_v25  ;;  %v4203_v29 = vmul.f32 %v4184_v40, %v12585_v42  ;;  %v12587_v19 = vld [vmem:[#allocation72_spill] sm:$0xff]  ;;  %v12589_v53 = vld [vmem:[#allocation306_spill] sm:$0xff] }
 0x5d1   :  { %6938 = vset.pattern.permute.xlu0 %v12278_v43  ;;  %v12588_v27 = vld [vmem:[#allocation304_spill] sm:$0xff] }
 0x5d2   :  { %v4365_v14 = vsub.f32 %v4220_v6, %v4346_v35  ;;  %v4366_v39 = vsub.f32 %v4221_v2, %v4348_v61  ;;  %v4007_v0 = vpop.permute.xlu1 %4006  ;;  %5410 = vperm.xlu0 %6938, %v12573_v9   ;;  %v4473_v58 = vmul.f32 %v4445_v3, %v12588_v27  ;;  %v4474_v6 = vmul.f32 %v4445_v3, %v12589_v53  ;;  %v12601_v27 = vld [vmem:[#allocation537_spill] sm:$0xff] }
 0x5d3   :  { %6886 = vset.pattern.permute.xlu1 %v12278_v43  ;;  %v4026_v13 = vmul.f32 %v4007_v0, %v12576_v1  ;;  %v4027_v32 = vmul.f32 %v4007_v0, %v12577_v46  ;;  %v12592_v0 = vld [vmem:[#allocation191_spill] sm:$0xff] }
 0x5d4   :  { %4381 = vst [vmem:[#allocation8 + $0x170] sm:$0xff] %v4365_v14  ;;  %4382 = vst [vmem:[#allocation8 + $0x178] sm:$0xff] %v4366_v39  ;;  %4989 = vperm.xlu1 %6886, %v10089_v22   ;;  %v12584_v22 = vld [vmem:[#allocation454_spill] sm:$0xff]  ;;  %v12593_v46 = vld [vmem:[#allocation463_spill] sm:$0xff] }
 0x5d5   :  { %v4090_v37 = vadd.f32 %v4074_v59, %v4026_v13  ;;  %v4091_v17 = vadd.f32 %v4075_v45, %v4027_v32  ;;  %v4202_v34 = vmul.f32 %v4184_v40, %v12584_v22  ;;  %v12591_v14 = vld [vmem:[#allocation190_spill] sm:$0xff]  ;;  %v4719_v13 = vpop.f32.mrf.mxu1  ;;  %v4601_v3 = vmul.f32 %v4573_v62, %v12593_v46  ;;  %v12594_v32 = vld [vmem:[#allocation464_spill] sm:$0xff]  ;;  %v4505_v59 = vpop.permute.xlu0 %4504  ;;  %v12604_v46 = vld [vmem:[#allocation75_spill] sm:$0xff] }
 0x5d6   :  { %6940 = vset.pattern.permute.xlu0 %v12274_v5  ;;  %v4602_v4 = vmul.f32 %v4573_v62, %v12594_v32  ;;  %v12605_v32 = vld [vmem:[#allocation76_spill] sm:$0xff] }
 0x5d7   :  { %v4120_v7 = vpop.permute.xlu1 %4119  ;;  %5671 = vperm.xlu0 %6940, %v12580_v8  }
 0x5d8   :  { %v4138_v10 = vmul.f32 %v4120_v7, %v12581_v54  ;;  %v4139_v50 = vmul.f32 %v4120_v7, %v12582_v44  ;;  %6887 = vset.pattern.permute.xlu1 %v12276_v23  ;;  %v4721_v54 = vpop.f32.mrf.mxu1 }
 0x5d9   :  { %4804 = vperm.xlu1 %6887, %v12583_v11  }
 0x5da   :  { %v4154_v38 = vadd.f32 %v4138_v10, %v4090_v37  ;;  %v4155_v16 = vadd.f32 %v4139_v50, %v4091_v17  ;;  %v12595_v10 = vld [vmem:[#allocation69_spill] sm:$0xff]  ;;  %v12596_v50 = vld [vmem:[#allocation70_spill] sm:$0xff] }
 0x5db   :  { %6942 = vset.pattern.permute.xlu0 %v12278_v43  ;;  %v4423_v44 = vmul.f32 %v4386_v60, %v12595_v10  ;;  %v4424_v22 = vmul.f32 %v4386_v60, %v12596_v50 }
 0x5dc   :  { %v4218_v36 = vadd.f32 %v4202_v34, %v4154_v38  ;;  %v4219_v55 = vadd.f32 %v4203_v29, %v4155_v16  ;;  %v4391_v15 = vpop.permute.xlu1 %4390  ;;  %5799 = vperm.xlu0 %6942, %v12580_v8   ;;  %v12597_v34 = vld [vmem:[#allocation300_spill] sm:$0xff]  ;;  %v12598_v29 = vld [vmem:[#allocation302_spill] sm:$0xff] }
 0x5dd   :  { %6888 = vset.pattern.permute.xlu1 %v12274_v5  ;;  %v4425_v40 = vmul.f32 %v4391_v15, %v12586_v18  ;;  %v4426_v25 = vmul.f32 %v4391_v15, %v12587_v19  ;;  %v12600_v15 = vld [vmem:[#allocation189_spill] sm:$0xff] }
 0x5de   :  { %v4363_v20 = vsub.f32 %v4218_v36, %v10986_v48  ;;  %v4364_v35 = vsub.f32 %v4219_v55, %v10993_v56  ;;  %4857 = vperm.xlu1 %6888, %v12583_v11   ;;  %v12590_v48 = vld [vmem:[#allocation530_spill] sm:$0xff]  ;;  %v12599_v36 = vld [vmem:[#allocation188_spill] sm:$0xff] }
 0x5df   :  { %v4489_v56 = vadd.f32 %v4473_v58, %v4425_v40  ;;  %v4490_v61 = vadd.f32 %v4474_v6, %v4426_v25  ;;  %v4535_v55 = vmul.f32 %v4505_v59, %v12599_v36  ;;  %v4401_v40 = vpop.permute.xlu0 %4400  ;;  %v12602_v58 = vld [vmem:[#allocation461_spill] sm:$0xff]  ;;  %v12603_v6 = vld [vmem:[#allocation462_spill] sm:$0xff] }
 0x5e0   :  { %4379 = vst [vmem:[#allocation8 + $0x160] sm:$0xff] %v4363_v20  ;;  %4380 = vst [vmem:[#allocation8 + $0x168] sm:$0xff] %v4364_v35  ;;  %6943 = vset.pattern.permute.xlu0 %v12276_v23  ;;  %v4536_v20 = vmul.f32 %v4505_v59, %v12600_v15  ;;  %v12606_v59 = vld [vmem:[#allocation312_spill] sm:$0xff] }
 0x5e1   :  { %v4509_v2 = vpop.permute.xlu1 %4508  ;;  %5612 = vperm.xlu0 %6943, %v12590_v48  }
 0x5e2   :  { %v4537_v39 = vmul.f32 %v4509_v2, %v12591_v14  ;;  %v4538_v1 = vmul.f32 %v4509_v2, %v12592_v0  ;;  %6889 = vset.pattern.permute.xlu1 %v12279_v51  ;;  %v11064_v2 = vpop.f32.mrf.mxu1 }
 0x5e3   :  { %4921 = vperm.xlu1 %6889, %v12583_v11   ;;  %v4517_v14 = vpop.permute.xlu0 %4516 }
 0x5e4   :  { %v4553_v30 = vadd.f32 %v4537_v39, %v4489_v56  ;;  %v4554_v45 = vadd.f32 %v4538_v1, %v4490_v61 }
 0x5e5   :  { %6945 = vset.pattern.permute.xlu0 %v12279_v51 }
 0x5e6   :  { %v4617_v7 = vadd.f32 %v4601_v3, %v4553_v30  ;;  %v4618_v37 = vadd.f32 %v4602_v4, %v4554_v45  ;;  %v4441_v17 = vpop.permute.xlu1 %4440  ;;  %5731 = vperm.xlu0 %6945, %v12590_v48   ;;  %v4429_v3 = vmul.f32 %v4401_v40, %v12604_v46  ;;  %v4430_v4 = vmul.f32 %v4401_v40, %v12605_v32  ;;  %v12607_v45 = vld [vmem:[#allocation314_spill] sm:$0xff] }
 0x5e7   :  { %v4471_v42 = vmul.f32 %v4441_v17, %v12597_v34  ;;  %v4472_v38 = vmul.f32 %v4441_v17, %v12598_v29  ;;  %6890 = vset.pattern.permute.xlu1 %v12278_v43  ;;  %v12611_v29 = vld [vmem:[#allocation467_spill] sm:$0xff] }
 0x5e8   :  { %v4762_v62 = vsub.f32 %v4617_v7, %v4719_v13  ;;  %v4763_v16 = vsub.f32 %v4618_v37, %v4721_v54  ;;  %4985 = vperm.xlu1 %6890, %v12583_v11   ;;  %v11071_v13 = vpop.f32.mrf.mxu1  ;;  %v12609_v37 = vld [vmem:[#allocation195_spill] sm:$0xff] }
 0x5e9   :  { %v4487_v35 = vadd.f32 %v4471_v42, %v4423_v44  ;;  %v4488_v18 = vadd.f32 %v4472_v38, %v4424_v22  ;;  %v4542_v17 = vmul.f32 %v4517_v14, %v12609_v37  ;;  %v12610_v42 = vld [vmem:[#allocation398_spill] sm:$0xff] }
 0x5ea   :  { %4778 = vst [vmem:[#allocation8 + $0x190] sm:$0xff] %v4762_v62  ;;  %4779 = vst [vmem:[#allocation8 + $0x198] sm:$0xff] %v4763_v16  ;;  %6947 = vset.pattern.permute.xlu0 %v12276_v23  ;;  %v4731_v44 = vpop.f32.mrf.mxu1  ;;  %v12612_v62 = vld [vmem:[#allocation468_spill] sm:$0xff]  ;;  %v12622_v37 = vld [vmem:[#allocation466_spill] sm:$0xff] }
 0x5eb   :  { %v4569_v60 = vpop.permute.xlu1 %4568  ;;  %v4551_v19 = vadd.f32 %v4535_v55, %v4487_v35  ;;  %v4552_v25 = vadd.f32 %v4536_v20, %v4488_v18  ;;  %5627 = vperm.xlu0 %6947, %v12601_v27   ;;  %v4411_v18 = vpop.permute.xlu0 %4410 }
 0x5ec   :  { %v4599_v53 = vmul.f32 %v4569_v60, %v12602_v58  ;;  %v4600_v11 = vmul.f32 %v4569_v60, %v12603_v6  ;;  %6892 = vset.pattern.permute.xlu1 %v12274_v5  ;;  %v4733_v55 = vpop.f32.mrf.mxu1  ;;  %v12613_v60 = vld [vmem:[#allocation515_spill] sm:$0xff] }
 0x5ed   :  { %4869 = vperm.xlu1 %6892, %v10127_v49  }
 0x5ee   :  { %v4615_v56 = vadd.f32 %v4599_v53, %v4551_v19  ;;  %v4616_v61 = vadd.f32 %v4600_v11, %v4552_v25  ;;  %v12614_v25 = vld [vmem:[#allocation308_spill] sm:$0xff]  ;;  %v12615_v53 = vld [vmem:[#allocation310_spill] sm:$0xff] }
 0x5ef   :  { %6949 = vset.pattern.permute.xlu0 %v12279_v51  ;;  %v4525_v19 = vpop.permute.xlu0 %4524 }
 0x5f0   :  { %v4760_v39 = vsub.f32 %v4615_v56, %v11027_v47  ;;  %v4761_v0 = vsub.f32 %v4616_v61, %v11037_v63  ;;  %v4453_v1 = vpop.permute.xlu1 %4452  ;;  %5743 = vperm.xlu0 %6949, %v12601_v27   ;;  %v12608_v47 = vld [vmem:[#allocation194_spill] sm:$0xff] }
 0x5f1   :  { %v4477_v30 = vmul.f32 %v4453_v1, %v12606_v59  ;;  %v4478_v7 = vmul.f32 %v4453_v1, %v12607_v45  ;;  %6894 = vset.pattern.permute.xlu1 %v12278_v43  ;;  %v4541_v63 = vmul.f32 %v4517_v14, %v12608_v47  ;;  %v12617_v61 = vld [vmem:[#allocation74_spill] sm:$0xff]  ;;  %v12619_v1 = vld [vmem:[#allocation193_spill] sm:$0xff] }
 0x5f2   :  { %4776 = vst [vmem:[#allocation8 + $0x180] sm:$0xff] %v4760_v39  ;;  %4777 = vst [vmem:[#allocation8 + $0x188] sm:$0xff] %v4761_v0  ;;  %4997 = vperm.xlu1 %6894, %v10127_v49   ;;  %v12618_v39 = vld [vmem:[#allocation192_spill] sm:$0xff]  ;;  %v12621_v47 = vld [vmem:[#allocation465_spill] sm:$0xff] }
 0x5f3   :  { %v4493_v54 = vadd.f32 %v4477_v30, %v4429_v3  ;;  %v4494_v10 = vadd.f32 %v4478_v7, %v4430_v4  ;;  %v4457_v3 = vpop.permute.xlu0 %4456  ;;  %v12620_v30 = vld [vmem:[#allocation408_spill] sm:$0xff] }
 0x5f4   :  { %6955 = vset.pattern.permute.xlu0 %v12276_v23 }
 0x5f5   :  { %v4581_v50 = vpop.permute.xlu1 %4580  ;;  %v4557_v22 = vadd.f32 %v4541_v63, %v4493_v54  ;;  %v4558_v34 = vadd.f32 %v4542_v17, %v4494_v10  ;;  %5637 = vperm.xlu0 %6955, %v12610_v42   ;;  %v11110_v54 = vpop.f32.mrf.mxu1 }
 0x5f6   :  { %v4605_v38 = vmul.f32 %v4581_v50, %v12611_v29  ;;  %v4606_v16 = vmul.f32 %v4581_v50, %v12612_v62  ;;  %6895 = vset.pattern.permute.xlu1 %v12276_v23 }
 0x5f7   :  { %4814 = vperm.xlu1 %6895, %v12499_v31   ;;  %v11117_v29 = vpop.f32.mrf.mxu1 }
 0x5f8   :  { %v4621_v49 = vadd.f32 %v4605_v38, %v4557_v22  ;;  %v4622_v36 = vadd.f32 %v4606_v16, %v4558_v34  ;;  %v12623_v38 = vld [vmem:[#allocation79_spill] sm:$0xff]  ;;  %v12624_v16 = vld [vmem:[#allocation80_spill] sm:$0xff] }
 0x5f9   :  { %6957 = vset.pattern.permute.xlu0 %v12279_v51  ;;  %v4433_v62 = vmul.f32 %v4411_v18, %v12623_v38 }
 0x5fa   :  { %v4766_v15 = vsub.f32 %v4621_v49, %v4731_v44  ;;  %v4767_v20 = vsub.f32 %v4622_v36, %v4733_v55  ;;  %v4396_v35 = vpop.permute.xlu1 %4395  ;;  %5751 = vperm.xlu0 %6957, %v12610_v42   ;;  %v4585_v44 = vpop.permute.xlu0 %4584  ;;  %v4434_v49 = vmul.f32 %v4411_v18, %v12624_v16  ;;  %v12625_v36 = vld [vmem:[#allocation320_spill] sm:$0xff] }
 0x5fb   :  { %6897 = vset.pattern.permute.xlu1 %v12279_v51  ;;  %v4428_v14 = vmul.f32 %v4396_v35, %v12617_v61  ;;  %v12630_v61 = vld [vmem:[#allocation474_spill] sm:$0xff] }
 0x5fc   :  { %4782 = vst [vmem:[#allocation8 + $0x1b0] sm:$0xff] %v4766_v15  ;;  %4783 = vst [vmem:[#allocation8 + $0x1b8] sm:$0xff] %v4767_v20  ;;  %4929 = vperm.xlu1 %6897, %v12499_v31   ;;  %v12616_v31 = vld [vmem:[#allocation73_spill] sm:$0xff]  ;;  %v12626_v15 = vld [vmem:[#allocation322_spill] sm:$0xff] }
 0x5fd   :  { %v4427_v56 = vmul.f32 %v4396_v35, %v12616_v31  ;;  %v12628_v35 = vld [vmem:[#allocation199_spill] sm:$0xff]  ;;  %v12629_v31 = vld [vmem:[#allocation404_spill] sm:$0xff] }
 0x5fe   :  { %6960 = vset.pattern.permute.xlu0 %v12274_v5 }
 0x5ff   :  { %v4449_v40 = vpop.permute.xlu1 %4448  ;;  %5683 = vperm.xlu0 %6960, %v12613_v60  }
 0x600   :  { %6900 = vset.pattern.permute.xlu1 %v12274_v5  ;;  %v4475_v58 = vmul.f32 %v4449_v40, %v12614_v25  ;;  %v4476_v6 = vmul.f32 %v4449_v40, %v12615_v53  ;;  %v4546_v40 = vmul.f32 %v4525_v19, %v12628_v35  ;;  %v4743_v53 = vpop.f32.mrf.mxu1 }
 0x601   :  { %4877 = vperm.xlu1 %6900, %v12506_v28  }
 0x602   :  { %v4491_v32 = vadd.f32 %v4475_v58, %v4427_v56  ;;  %v4492_v4 = vadd.f32 %v4476_v6, %v4428_v14  ;;  %v4421_v56 = vpop.permute.xlu0 %4420 }
 0x603   :  { %6962 = vset.pattern.permute.xlu0 %v12278_v43 }
 0x604   :  { %v4513_v11 = vpop.permute.xlu1 %4512  ;;  %5811 = vperm.xlu0 %6962, %v12613_v60  }
 0x605   :  { %6902 = vset.pattern.permute.xlu1 %v12278_v43  ;;  %v4539_v0 = vmul.f32 %v4513_v11, %v12618_v39  ;;  %v4540_v46 = vmul.f32 %v4513_v11, %v12619_v1  ;;  %v12631_v39 = vld [vmem:[#allocation475_spill] sm:$0xff]  ;;  %v4745_v1 = vpop.f32.mrf.mxu1 }
 0x606   :  { %5005 = vperm.xlu1 %6902, %v12506_v28  }
 0x607   :  { %v4555_v45 = vadd.f32 %v4539_v0, %v4491_v32  ;;  %v4556_v7 = vadd.f32 %v4540_v46, %v4492_v4 }
 0x608   :  { %6963 = vset.pattern.permute.xlu0 %v12276_v23 }
 0x609   :  { %v4577_v59 = vpop.permute.xlu1 %4576  ;;  %5647 = vperm.xlu0 %6963, %v12620_v30  }
 0x60a   :  { %v4603_v63 = vmul.f32 %v4577_v59, %v12621_v47  ;;  %v4604_v17 = vmul.f32 %v4577_v59, %v12622_v37  ;;  %6903 = vset.pattern.permute.xlu1 %v12276_v23  ;;  %v4533_v59 = vpop.permute.xlu0 %4532  ;;  %v12633_v47 = vld [vmem:[#allocation78_spill] sm:$0xff]  ;;  %v12634_v37 = vld [vmem:[#allocation316_spill] sm:$0xff] }
 0x60b   :  { %4824 = vperm.xlu1 %6903, %v12516_v52  }
 0x60c   :  { %v4619_v28 = vadd.f32 %v4603_v63, %v4555_v45  ;;  %v4620_v10 = vadd.f32 %v4604_v17, %v4556_v7  ;;  %v12632_v45 = vld [vmem:[#allocation77_spill] sm:$0xff]  ;;  %v4479_v17 = vmul.f32 %v4457_v3, %v12634_v37 }
 0x60d   :  { %6965 = vset.pattern.permute.xlu0 %v12279_v51 }
 0x60e   :  { %v4764_v50 = vsub.f32 %v4619_v28, %v11064_v2  ;;  %v4765_v22 = vsub.f32 %v4620_v10, %v11071_v13  ;;  %v4461_v34 = vpop.permute.xlu1 %4460  ;;  %5759 = vperm.xlu0 %6965, %v12620_v30   ;;  %v12627_v2 = vld [vmem:[#allocation198_spill] sm:$0xff] }
 0x60f   :  { %v4481_v55 = vmul.f32 %v4461_v34, %v12625_v36  ;;  %v4482_v20 = vmul.f32 %v4461_v34, %v12626_v15  ;;  %6905 = vset.pattern.permute.xlu1 %v12279_v51  ;;  %v4545_v13 = vmul.f32 %v4525_v19, %v12627_v2  ;;  %v12635_v28 = vld [vmem:[#allocation318_spill] sm:$0xff]  ;;  %v4465_v2 = vpop.permute.xlu0 %4464 }
 0x610   :  { %4780 = vst [vmem:[#allocation8 + $0x1a0] sm:$0xff] %v4764_v50  ;;  %4781 = vst [vmem:[#allocation8 + $0x1a8] sm:$0xff] %v4765_v22  ;;  %4937 = vperm.xlu1 %6905, %v12516_v52   ;;  %v4480_v10 = vmul.f32 %v4457_v3, %v12635_v28  ;;  %v12636_v22 = vld [vmem:[#allocation482_spill] sm:$0xff]  ;;  %v12640_v3 = vld [vmem:[#allocation472_spill] sm:$0xff] }
 0x611   :  { %v4497_v25 = vadd.f32 %v4481_v55, %v4433_v62  ;;  %v4498_v58 = vadd.f32 %v4482_v20, %v4434_v49  ;;  %v12637_v62 = vld [vmem:[#allocation196_spill] sm:$0xff]  ;;  %v12638_v49 = vld [vmem:[#allocation197_spill] sm:$0xff]  ;;  %v11146_v55 = vpop.f32.mrf.mxu1  ;;  %v4608_v20 = vmul.f32 %v4585_v44, %v12640_v3 }
 0x612   :  { %6968 = vset.pattern.permute.xlu0 %v12274_v5 }
 0x613   :  { %v4589_v18 = vpop.permute.xlu1 %4588  ;;  %v4561_v6 = vadd.f32 %v4545_v13, %v4497_v25  ;;  %v4562_v11 = vadd.f32 %v4546_v40, %v4498_v58  ;;  %5691 = vperm.xlu0 %6968, %v12629_v31  }
 0x614   :  { %v4609_v14 = vmul.f32 %v4589_v18, %v12630_v61  ;;  %v4610_v0 = vmul.f32 %v4589_v18, %v12631_v39  ;;  %6907 = vset.pattern.permute.xlu1 %v12276_v23  ;;  %v12641_v18 = vld [vmem:[#allocation83_spill] sm:$0xff] }
 0x615   :  { %5208 = vperm.xlu1 %6907, %v12527_v57  }
 0x616   :  { %v4625_v52 = vadd.f32 %v4609_v14, %v4561_v6  ;;  %v4626_v19 = vadd.f32 %v4610_v0, %v4562_v11  ;;  %v4437_v6 = vmul.f32 %v4421_v56, %v12641_v18  ;;  %v12642_v11 = vld [vmem:[#allocation84_spill] sm:$0xff]  ;;  %v12644_v0 = vld [vmem:[#allocation330_spill] sm:$0xff] }
 0x617   :  { %6970 = vset.pattern.permute.xlu0 %v12278_v43  ;;  %v4438_v61 = vmul.f32 %v4421_v56, %v12642_v11  ;;  %v12643_v14 = vld [vmem:[#allocation328_spill] sm:$0xff] }
 0x618   :  { %v4770_v46 = vsub.f32 %v4625_v52, %v4743_v53  ;;  %v4771_v32 = vsub.f32 %v4626_v19, %v4745_v1  ;;  %v4406_v4 = vpop.permute.xlu1 %4405  ;;  %5819 = vperm.xlu0 %6970, %v12629_v31   ;;  %v11153_v53 = vpop.f32.mrf.mxu1  ;;  %v12645_v1 = vld [vmem:[#allocation202_spill] sm:$0xff] }
 0x619   :  { %6909 = vset.pattern.permute.xlu1 %v12279_v51  ;;  %v4431_v7 = vmul.f32 %v4406_v4, %v12632_v45  ;;  %v4432_v63 = vmul.f32 %v4406_v4, %v12633_v47  ;;  %v4593_v47 = vpop.permute.xlu0 %4592 }
 0x61a   :  { %4786 = vst [vmem:[#allocation8 + $0x1d0] sm:$0xff] %v4770_v46  ;;  %4787 = vst [vmem:[#allocation8 + $0x1d8] sm:$0xff] %v4771_v32  ;;  %5326 = vperm.xlu1 %6909, %v12527_v57   ;;  %v12639_v57 = vld [vmem:[#allocation470_spill] sm:$0xff]  ;;  %v4549_v46 = vmul.f32 %v4533_v59, %v12645_v1  ;;  %v12646_v32 = vld [vmem:[#allocation203_spill] sm:$0xff]  ;;  %v4755_v56 = vpop.f32.mrf.mxu1 }
 0x61b   :  { %v4495_v34 = vadd.f32 %v4479_v17, %v4431_v7  ;;  %v4496_v38 = vadd.f32 %v4480_v10, %v4432_v63  ;;  %v4607_v15 = vmul.f32 %v4585_v44, %v12639_v57  ;;  %v4550_v4 = vmul.f32 %v4533_v59, %v12646_v32  ;;  %v11187_v32 = vpop.f32.mrf.mxu0 }
 0x61c   :  { %6972 = vset.pattern.permute.xlu0 %v12274_v5 }
 0x61d   :  { %v4521_v50 = vpop.permute.xlu1 %4520  ;;  %6080 = vperm.xlu0 %6972, %v12636_v22  }
 0x61e   :  { %v4543_v16 = vmul.f32 %v4521_v50, %v12637_v62  ;;  %v4544_v36 = vmul.f32 %v4521_v50, %v12638_v49  ;;  %6912 = vset.pattern.permute.xlu1 %v12274_v5 }
 0x61f   :  { %5258 = vperm.xlu1 %6912, %v12536_v26  }
 0x620   :  { %v4559_v13 = vadd.f32 %v4543_v16, %v4495_v34  ;;  %v4560_v35 = vadd.f32 %v4544_v36, %v4496_v38  ;;  %v4757_v34 = vpop.f32.mrf.mxu1  ;;  %v4854_v38 = vpop.permute.xlu0 %4853  ;;  %v12650_v36 = vld [vmem:[#allocation81_spill] sm:$0xff] }
 0x621   :  { %6974 = vset.pattern.permute.xlu0 %v12278_v43 }
 0x622   :  { %v4623_v40 = vadd.f32 %v4607_v15, %v4559_v13  ;;  %v4624_v25 = vadd.f32 %v4608_v20, %v4560_v35  ;;  %v4469_v58 = vpop.permute.xlu1 %4468  ;;  %6208 = vperm.xlu0 %6974, %v12636_v22   ;;  %v12651_v15 = vld [vmem:[#allocation82_spill] sm:$0xff]  ;;  %v12652_v20 = vld [vmem:[#allocation324_spill] sm:$0xff] }
 0x623   :  { %v4485_v39 = vmul.f32 %v4469_v58, %v12643_v14  ;;  %v4486_v44 = vmul.f32 %v4469_v58, %v12644_v0  ;;  %6914 = vset.pattern.permute.xlu1 %v12278_v43  ;;  %v4483_v13 = vmul.f32 %v4465_v2, %v12652_v20  ;;  %v12653_v35 = vld [vmem:[#allocation326_spill] sm:$0xff]  ;;  %v12654_v58 = vld [vmem:[#allocation485_spill] sm:$0xff]  ;;  %v12667_v20 = vld [vmem:[#allocation400_spill] sm:$0xff] }
 0x624   :  { %v4768_v52 = vsub.f32 %v4623_v40, %v11110_v54  ;;  %v4769_v19 = vsub.f32 %v4624_v25, %v11117_v29  ;;  %5386 = vperm.xlu1 %6914, %v12536_v26   ;;  %v12647_v54 = vld [vmem:[#allocation481_spill] sm:$0xff]  ;;  %v12648_v29 = vld [vmem:[#allocation478_spill] sm:$0xff]  ;;  %v12649_v26 = vld [vmem:[#allocation479_spill] sm:$0xff]  ;;  %v4484_v40 = vmul.f32 %v4465_v2, %v12653_v35  ;;  %v4982_v18 = vpop.permute.xlu0 %4981 }
 0x625   :  { %v4501_v45 = vadd.f32 %v4485_v39, %v4437_v6  ;;  %v4502_v7 = vadd.f32 %v4486_v44, %v4438_v61  ;;  %v12655_v61 = vld [vmem:[#allocation200_spill] sm:$0xff]  ;;  %v12656_v39 = vld [vmem:[#allocation201_spill] sm:$0xff] }
 0x626   :  { %4784 = vst [vmem:[#allocation8 + $0x1c0] sm:$0xff] %v4768_v52  ;;  %4785 = vst [vmem:[#allocation8 + $0x1c8] sm:$0xff] %v4769_v19  ;;  %6975 = vset.pattern.permute.xlu0 %v12276_v23  ;;  %v12657_v44 = vld [vmem:[#allocation473_spill] sm:$0xff] }
 0x627   :  { %v4597_v63 = vpop.permute.xlu1 %4596  ;;  %v4565_v37 = vadd.f32 %v4549_v46, %v4501_v45  ;;  %v4566_v17 = vadd.f32 %v4550_v4, %v4502_v7  ;;  %6021 = vperm.xlu0 %6975, %v12647_v54   ;;  %v12659_v19 = vld [vmem:[#allocation477_spill] sm:$0xff] }
 0x628   :  { %v4613_v28 = vmul.f32 %v4597_v63, %v12648_v29  ;;  %v4614_v10 = vmul.f32 %v4597_v63, %v12649_v26  ;;  %6916 = vset.pattern.permute.xlu1 %v12274_v5  ;;  %v4612_v2 = vmul.f32 %v4593_v47, %v12659_v19  ;;  %v12661_v29 = vld [vmem:[#allocation88_spill] sm:$0xff]  ;;  %v11197_v26 = vpop.f32.mrf.mxu0 }
 0x629   :  { %5270 = vperm.xlu1 %6916, %v12539_v41  }
 0x62a   :  { %v4629_v59 = vadd.f32 %v4613_v28, %v4565_v37  ;;  %v4630_v50 = vadd.f32 %v4614_v10, %v4566_v17  ;;  %v12660_v17 = vld [vmem:[#allocation87_spill] sm:$0xff]  ;;  %v12662_v10 = vld [vmem:[#allocation334_spill] sm:$0xff] }
 0x62b   :  { %6977 = vset.pattern.permute.xlu0 %v12279_v51 }
 0x62c   :  { %v4774_v62 = vsub.f32 %v4629_v59, %v4755_v56  ;;  %v4775_v16 = vsub.f32 %v4630_v50, %v4757_v34  ;;  %v4416_v49 = vpop.permute.xlu1 %4415  ;;  %6140 = vperm.xlu0 %6977, %v12647_v54   ;;  %v4795_v56 = vpop.permute.xlu0 %4794  ;;  %v4882_v59 = vmul.f32 %v4854_v38, %v12662_v10  ;;  %v12663_v50 = vld [vmem:[#allocation335_spill] sm:$0xff] }
 0x62d   :  { %6918 = vset.pattern.permute.xlu1 %v12278_v43  ;;  %v4435_v57 = vmul.f32 %v4416_v49, %v12650_v36  ;;  %v4436_v3 = vmul.f32 %v4416_v49, %v12651_v15  ;;  %v4883_v34 = vmul.f32 %v4854_v38, %v12663_v50  ;;  %v12665_v49 = vld [vmem:[#allocation209_spill] sm:$0xff]  ;;  %v5010_v38 = vmul.f32 %v4982_v18, %v12667_v20  ;;  %v12675_v50 = vld [vmem:[#allocation487_spill] sm:$0xff] }
 0x62e   :  { %4790 = vst [vmem:[#allocation8 + $0x1f0] sm:$0xff] %v4774_v62  ;;  %4791 = vst [vmem:[#allocation8 + $0x1f8] sm:$0xff] %v4775_v16  ;;  %5398 = vperm.xlu1 %6918, %v12539_v41   ;;  %v12658_v41 = vld [vmem:[#allocation476_spill] sm:$0xff] }
 0x62f   :  { %v4499_v6 = vadd.f32 %v4483_v13, %v4435_v57  ;;  %v4500_v11 = vadd.f32 %v4484_v40, %v4436_v3  ;;  %v4611_v52 = vmul.f32 %v4593_v47, %v12658_v41  ;;  %v12666_v57 = vld [vmem:[#allocation211_spill] sm:$0xff]  ;;  %v5128_v3 = vpop.f32.mrf.mxu0  ;;  %v12668_v13 = vld [vmem:[#allocation402_spill] sm:$0xff] }
 0x630   :  { %6979 = vset.pattern.permute.xlu0 %v12276_v23  ;;  %v5011_v35 = vmul.f32 %v4982_v18, %v12668_v13  ;;  %v4914_v40 = vpop.permute.xlu0 %4913  ;;  %v12678_v13 = vld [vmem:[#allocation91_spill] sm:$0xff] }
 0x631   :  { %v4529_v25 = vpop.permute.xlu1 %4528  ;;  %6036 = vperm.xlu0 %6979, %v12654_v58  }
 0x632   :  { %v4547_v14 = vmul.f32 %v4529_v25, %v12655_v61  ;;  %v4548_v0 = vmul.f32 %v4529_v25, %v12656_v39  ;;  %6919 = vset.pattern.permute.xlu1 %v12276_v23  ;;  %v5130_v39 = vpop.f32.mrf.mxu0 }
 0x633   :  { %5213 = vperm.xlu1 %6919, %v12657_v44  }
 0x634   :  { %v4563_v1 = vadd.f32 %v4547_v14, %v4499_v6  ;;  %v4564_v46 = vadd.f32 %v4548_v0, %v4500_v11  ;;  %v12669_v0 = vld [vmem:[#allocation85_spill] sm:$0xff] }
 0x635   :  { %6981 = vset.pattern.permute.xlu0 %v12279_v51  ;;  %v4832_v41 = vmul.f32 %v4795_v56, %v12669_v0 }
 0x636   :  { %v4627_v4 = vadd.f32 %v4611_v52, %v4563_v1  ;;  %v4628_v45 = vadd.f32 %v4612_v2, %v4564_v46  ;;  %v4800_v7 = vpop.permute.xlu1 %4799  ;;  %6152 = vperm.xlu0 %6981, %v12654_v58   ;;  %v12670_v52 = vld [vmem:[#allocation86_spill] sm:$0xff]  ;;  %v12671_v2 = vld [vmem:[#allocation332_spill] sm:$0xff]  ;;  %v12672_v46 = vld [vmem:[#allocation333_spill] sm:$0xff] }
 0x637   :  { %6920 = vset.pattern.permute.xlu1 %v12274_v5  ;;  %v4834_v47 = vmul.f32 %v4800_v7, %v12660_v17  ;;  %v4835_v28 = vmul.f32 %v4800_v7, %v12661_v29  ;;  %v4833_v19 = vmul.f32 %v4795_v56, %v12670_v52  ;;  %v12673_v7 = vld [vmem:[#allocation205_spill] sm:$0xff] }
 0x638   :  { %v4772_v63 = vsub.f32 %v4627_v4, %v11146_v55  ;;  %v4773_v37 = vsub.f32 %v4628_v45, %v11153_v53  ;;  %5266 = vperm.xlu1 %6920, %v12657_v44   ;;  %v12664_v55 = vld [vmem:[#allocation488_spill] sm:$0xff] }
 0x639   :  { %v4898_v53 = vadd.f32 %v4882_v59, %v4834_v47  ;;  %v4899_v16 = vadd.f32 %v4883_v34, %v4835_v28  ;;  %v4810_v28 = vpop.permute.xlu0 %4809  ;;  %v12676_v34 = vld [vmem:[#allocation396_spill] sm:$0xff] }
 0x63a   :  { %4788 = vst [vmem:[#allocation8 + $0x1e0] sm:$0xff] %v4772_v63  ;;  %4789 = vst [vmem:[#allocation8 + $0x1e8] sm:$0xff] %v4773_v37  ;;  %6987 = vset.pattern.permute.xlu0 %v12276_v23  ;;  %v4944_v63 = vmul.f32 %v4914_v40, %v12673_v7  ;;  %v12674_v37 = vld [vmem:[#allocation207_spill] sm:$0xff] }
 0x63b   :  { %v4918_v62 = vpop.permute.xlu1 %4917  ;;  %6046 = vperm.xlu0 %6987, %v12664_v55   ;;  %v4945_v17 = vmul.f32 %v4914_v40, %v12674_v37  ;;  %v12679_v40 = vld [vmem:[#allocation92_spill] sm:$0xff] }
 0x63c   :  { %v4946_v36 = vmul.f32 %v4918_v62, %v12665_v49  ;;  %v4947_v15 = vmul.f32 %v4918_v62, %v12666_v57  ;;  %6921 = vset.pattern.permute.xlu1 %v12279_v51 }
 0x63d   :  { %5330 = vperm.xlu1 %6921, %v12657_v44   ;;  %v4926_v57 = vpop.permute.xlu0 %4925 }
 0x63e   :  { %v4962_v25 = vadd.f32 %v4946_v36, %v4898_v53  ;;  %v4963_v6 = vadd.f32 %v4947_v15, %v4899_v16  ;;  %v12677_v53 = vld [vmem:[#allocation394_spill] sm:$0xff]  ;;  %v11224_v16 = vpop.f32.mrf.mxu0 }
 0x63f   :  { %6989 = vset.pattern.permute.xlu0 %v12279_v51 }
 0x640   :  { %v5026_v11 = vadd.f32 %v5010_v38, %v4962_v25  ;;  %v5027_v61 = vadd.f32 %v5011_v35, %v4963_v6  ;;  %v4850_v14 = vpop.permute.xlu1 %4849  ;;  %6160 = vperm.xlu0 %6989, %v12664_v55   ;;  %v11231_v38 = vpop.f32.mrf.mxu0  ;;  %v4838_v35 = vmul.f32 %v4810_v28, %v12678_v13  ;;  %v4839_v25 = vmul.f32 %v4810_v28, %v12679_v40  ;;  %v12680_v6 = vld [vmem:[#allocation338_spill] sm:$0xff]  ;;  %v12692_v13 = vld [vmem:[#allocation215_spill] sm:$0xff] }
 0x641   :  { %v4880_v1 = vmul.f32 %v4850_v14, %v12671_v2  ;;  %v4881_v4 = vmul.f32 %v4850_v14, %v12672_v46  ;;  %6922 = vset.pattern.permute.xlu1 %v12278_v43  ;;  %v4820_v28 = vpop.permute.xlu0 %4819 }
 0x642   :  { %v5171_v18 = vsub.f32 %v5026_v11, %v5128_v3  ;;  %v5172_v45 = vsub.f32 %v5027_v61, %v5130_v39  ;;  %5394 = vperm.xlu1 %6922, %v12657_v44   ;;  %v12681_v61 = vld [vmem:[#allocation339_spill] sm:$0xff] }
 0x643   :  { %v4896_v47 = vadd.f32 %v4880_v1, %v4832_v41  ;;  %v4897_v29 = vadd.f32 %v4881_v4, %v4833_v19  ;;  %v12683_v39 = vld [vmem:[#allocation219_spill] sm:$0xff]  ;;  %v5140_v19 = vpop.f32.mrf.mxu0  ;;  %v12684_v4 = vld [vmem:[#allocation486_spill] sm:$0xff] }
 0x644   :  { %5187 = vst [vmem:[#allocation8 + $0x210] sm:$0xff] %v5171_v18  ;;  %5188 = vst [vmem:[#allocation8 + $0x218] sm:$0xff] %v5172_v45  ;;  %6992 = vset.pattern.permute.xlu0 %v12274_v5  ;;  %v4951_v0 = vmul.f32 %v4926_v57, %v12683_v39  ;;  %v12685_v45 = vld [vmem:[#allocation489_spill] sm:$0xff]  ;;  %v12694_v39 = vld [vmem:[#allocation483_spill] sm:$0xff] }
 0x645   :  { %v4978_v56 = vpop.permute.xlu1 %4977  ;;  %v4960_v10 = vadd.f32 %v4944_v63, %v4896_v47  ;;  %v4961_v59 = vadd.f32 %v4945_v17, %v4897_v29  ;;  %6092 = vperm.xlu0 %6992, %v12675_v50   ;;  %v5142_v37 = vpop.f32.mrf.mxu0 }
 0x646   :  { %v5008_v62 = vmul.f32 %v4978_v56, %v12676_v34  ;;  %v5009_v44 = vmul.f32 %v4978_v56, %v12677_v53  ;;  %6924 = vset.pattern.permute.xlu1 %v12274_v5  ;;  %v12687_v34 = vld [vmem:[#allocation336_spill] sm:$0xff]  ;;  %v12688_v53 = vld [vmem:[#allocation337_spill] sm:$0xff] }
 0x647   :  { %5278 = vperm.xlu1 %6924, %v12546_v12  }
 0x648   :  { %v5024_v49 = vadd.f32 %v5008_v62, %v4960_v10  ;;  %v5025_v36 = vadd.f32 %v5009_v44, %v4961_v59  ;;  %v12686_v10 = vld [vmem:[#allocation15_spill] sm:$0xff]  ;;  %v4934_v59 = vpop.permute.xlu0 %4933 }
 0x649   :  { %6994 = vset.pattern.permute.xlu0 %v12278_v43 }
 0x64a   :  { %v5169_v15 = vsub.f32 %v5024_v49, %v11187_v32  ;;  %v5170_v3 = vsub.f32 %v5025_v36, %v11197_v26  ;;  %v4862_v20 = vpop.permute.xlu1 %4861  ;;  %6220 = vperm.xlu0 %6994, %v12675_v50   ;;  %v12682_v32 = vld [vmem:[#allocation217_spill] sm:$0xff] }
 0x64b   :  { %v4886_v11 = vmul.f32 %v4862_v20, %v12680_v6  ;;  %v4887_v14 = vmul.f32 %v4862_v20, %v12681_v61  ;;  %6926 = vset.pattern.permute.xlu1 %v12278_v43  ;;  %v4950_v26 = vmul.f32 %v4926_v57, %v12682_v32  ;;  %v12690_v57 = vld [vmem:[#allocation90_spill] sm:$0xff]  ;;  %v12693_v32 = vld [vmem:[#allocation480_spill] sm:$0xff] }
 0x64c   :  { %5185 = vst [vmem:[#allocation8 + $0x200] sm:$0xff] %v5169_v15  ;;  %5186 = vst [vmem:[#allocation8 + $0x208] sm:$0xff] %v5170_v3  ;;  %5406 = vperm.xlu1 %6926, %v12546_v12   ;;  %v12691_v3 = vld [vmem:[#allocation213_spill] sm:$0xff]  ;;  %v4866_v40 = vpop.permute.xlu0 %4865 }
 0x64d   :  { %v4902_v41 = vadd.f32 %v4886_v11, %v4838_v35  ;;  %v4903_v52 = vadd.f32 %v4887_v14, %v4839_v25 }
 0x64e   :  { %6995 = vset.pattern.permute.xlu0 %v12276_v23 }
 0x64f   :  { %v4990_v2 = vpop.permute.xlu1 %4989  ;;  %v4966_v1 = vadd.f32 %v4950_v26, %v4902_v41  ;;  %v4967_v46 = vadd.f32 %v4951_v0, %v4903_v52  ;;  %6056 = vperm.xlu0 %6995, %v10579_v21   ;;  %v11268_v41 = vpop.f32.mrf.mxu0 }
 0x650   :  { %v5014_v18 = vmul.f32 %v4990_v2, %v12684_v4  ;;  %v5015_v7 = vmul.f32 %v4990_v2, %v12685_v45  ;;  %6927 = vset.pattern.permute.xlu1 %v12276_v23  ;;  %v4994_v2 = vpop.permute.xlu0 %4993 }
 0x651   :  { %5223 = vperm.xlu1 %6927, %v12555_v33   ;;  %v11273_v4 = vpop.f32.mrf.mxu0 }
 0x652   :  { %v5030_v12 = vadd.f32 %v5014_v18, %v4966_v1  ;;  %v5031_v63 = vadd.f32 %v5015_v7, %v4967_v46  ;;  %v12695_v18 = vld [vmem:[#allocation95_spill] sm:$0xff]  ;;  %v12696_v7 = vld [vmem:[#allocation96_spill] sm:$0xff] }
 0x653   :  { %6997 = vset.pattern.permute.xlu0 %v12279_v51  ;;  %v4842_v45 = vmul.f32 %v4820_v28, %v12695_v18 }
 0x654   :  { %v5175_v17 = vsub.f32 %v5030_v12, %v5140_v19  ;;  %v5176_v47 = vsub.f32 %v5031_v63, %v5142_v37  ;;  %v4805_v29 = vpop.permute.xlu1 %4804  ;;  %6168 = vperm.xlu0 %6997, %v10579_v21   ;;  %v4843_v12 = vmul.f32 %v4820_v28, %v12696_v7  ;;  %v12697_v63 = vld [vmem:[#allocation342_spill] sm:$0xff] }
 0x655   :  { %6929 = vset.pattern.permute.xlu1 %v12279_v51  ;;  %v4837_v15 = vmul.f32 %v4805_v29, %v12690_v57 }
 0x656   :  { %5191 = vst [vmem:[#allocation8 + $0x230] sm:$0xff] %v5175_v17  ;;  %5192 = vst [vmem:[#allocation8 + $0x238] sm:$0xff] %v5176_v47  ;;  %5338 = vperm.xlu1 %6929, %v12555_v33   ;;  %v12689_v33 = vld [vmem:[#allocation89_spill] sm:$0xff]  ;;  %v12698_v17 = vld [vmem:[#allocation343_spill] sm:$0xff] }
 0x657   :  { %v4836_v36 = vmul.f32 %v4805_v29, %v12689_v33  ;;  %v4830_v33 = vpop.permute.xlu0 %4829 }
 0x658   :  { %6999 = vset.pattern.permute.xlu0 %v12274_v5 }
 0x659   :  { %v4858_v56 = vpop.permute.xlu1 %4857  ;;  %6100 = vperm.xlu0 %6999, %v12686_v10  }
 0x65a   :  { %6932 = vset.pattern.permute.xlu1 %v12274_v5  ;;  %v4884_v62 = vmul.f32 %v4858_v56, %v12687_v34  ;;  %v4885_v44 = vmul.f32 %v4858_v56, %v12688_v53  ;;  %v5152_v53 = vpop.f32.mrf.mxu0 }
 0x65b   :  { %5286 = vperm.xlu1 %6932, %v12562_v24  }
 0x65c   :  { %v4900_v25 = vadd.f32 %v4884_v62, %v4836_v36  ;;  %v4901_v6 = vadd.f32 %v4885_v44, %v4837_v15  ;;  %v12701_v36 = vld [vmem:[#allocation494_spill] sm:$0xff]  ;;  %v12702_v15 = vld [vmem:[#allocation495_spill] sm:$0xff] }
 0x65d   :  { %7001 = vset.pattern.permute.xlu0 %v12278_v43 }
 0x65e   :  { %v4922_v49 = vpop.permute.xlu1 %4921  ;;  %6228 = vperm.xlu0 %7001, %v12686_v10  }
 0x65f   :  { %6934 = vset.pattern.permute.xlu1 %v12278_v43  ;;  %v4948_v20 = vmul.f32 %v4922_v49, %v12691_v3  ;;  %v4949_v35 = vmul.f32 %v4922_v49, %v12692_v13  ;;  %v5154_v13 = vpop.f32.mrf.mxu0 }
 0x660   :  { %5414 = vperm.xlu1 %6934, %v12562_v24  }
 0x661   :  { %v4964_v61 = vadd.f32 %v4948_v20, %v4900_v25  ;;  %v4965_v14 = vadd.f32 %v4949_v35, %v4901_v6  ;;  %v4942_v6 = vpop.permute.xlu0 %4941 }
 0x663   :  { %v4986_v11 = vpop.permute.xlu1 %4985 }
 0x664   :  { %v5012_v26 = vmul.f32 %v4986_v11, %v12693_v32  ;;  %v5013_v0 = vmul.f32 %v4986_v11, %v12694_v39  ;;  %6935 = vset.pattern.permute.xlu1 %v12276_v23  ;;  %v12703_v11 = vld [vmem:[#allocation93_spill] sm:$0xff] }
 0x665   :  { %5233 = vperm.xlu1 %6935, %v12573_v9  }
 0x666   :  { %v5028_v52 = vadd.f32 %v5012_v26, %v4964_v61  ;;  %v5029_v19 = vadd.f32 %v5013_v0, %v4965_v14  ;;  %v12704_v14 = vld [vmem:[#allocation94_spill] sm:$0xff]  ;;  %v12705_v26 = vld [vmem:[#allocation340_spill] sm:$0xff]  ;;  %v12706_v0 = vld [vmem:[#allocation341_spill] sm:$0xff] }
 0x667   :  { %v4888_v39 = vmul.f32 %v4866_v40, %v12705_v26  ;;  %v12717_v26 = vld [vmem:[#allocation498_spill] sm:$0xff] }
 0x668   :  { %v5173_v24 = vsub.f32 %v5028_v52, %v11224_v16  ;;  %v5174_v1 = vsub.f32 %v5029_v19, %v11231_v38  ;;  %v4870_v46 = vpop.permute.xlu1 %4869  ;;  %v12699_v16 = vld [vmem:[#allocation225_spill] sm:$0xff]  ;;  %v12700_v38 = vld [vmem:[#allocation227_spill] sm:$0xff]  ;;  %v4889_v52 = vmul.f32 %v4866_v40, %v12706_v0 }
 0x669   :  { %v4890_v37 = vmul.f32 %v4870_v46, %v12697_v63  ;;  %v4891_v47 = vmul.f32 %v4870_v46, %v12698_v17  ;;  %6937 = vset.pattern.permute.xlu1 %v12279_v51  ;;  %v4954_v29 = vmul.f32 %v4934_v59, %v12699_v16  ;;  %v4955_v56 = vmul.f32 %v4934_v59, %v12700_v38  ;;  %v12707_v46 = vld [vmem:[#allocation221_spill] sm:$0xff]  ;;  %v12709_v63 = vld [vmem:[#allocation492_spill] sm:$0xff] }
 0x66a   :  { %5189 = vst [vmem:[#allocation8 + $0x220] sm:$0xff] %v5173_v24  ;;  %5190 = vst [vmem:[#allocation8 + $0x228] sm:$0xff] %v5174_v1  ;;  %5346 = vperm.xlu1 %6937, %v12573_v9  }
 0x66b   :  { %v4906_v34 = vadd.f32 %v4890_v37, %v4842_v45  ;;  %v4907_v62 = vadd.f32 %v4891_v47, %v4843_v12  ;;  %v12708_v45 = vld [vmem:[#allocation223_spill] sm:$0xff]  ;;  %v11296_v12 = vpop.f32.mrf.mxu0  ;;  %v5016_v37 = vmul.f32 %v4994_v2, %v12709_v63  ;;  %v4874_v47 = vpop.permute.xlu0 %4873  ;;  %v12721_v63 = vld [vmem:[#allocation344_spill] sm:$0xff] }
 0x66d   :  { %v4998_v44 = vpop.permute.xlu1 %4997  ;;  %v4970_v49 = vadd.f32 %v4954_v29, %v4906_v34  ;;  %v4971_v28 = vadd.f32 %v4955_v56, %v4907_v62  ;;  %v11301_v34 = vpop.f32.mrf.mxu0  ;;  %v12711_v62 = vld [vmem:[#allocation99_spill] sm:$0xff] }
 0x66e   :  { %v5018_v57 = vmul.f32 %v4998_v44, %v12701_v36  ;;  %v5019_v3 = vmul.f32 %v4998_v44, %v12702_v15  ;;  %6939 = vset.pattern.permute.xlu1 %v12276_v23  ;;  %v12712_v44 = vld [vmem:[#allocation100_spill] sm:$0xff] }
 0x66f   :  { %5617 = vperm.xlu1 %6939, %v12580_v8  }
 0x670   :  { %v5034_v9 = vadd.f32 %v5018_v57, %v4970_v49  ;;  %v5035_v20 = vadd.f32 %v5019_v3, %v4971_v28  ;;  %v4847_v49 = vmul.f32 %v4830_v33, %v12712_v44  ;;  %v12713_v28 = vld [vmem:[#allocation346_spill] sm:$0xff]  ;;  %v12714_v57 = vld [vmem:[#allocation347_spill] sm:$0xff] }
 0x672   :  { %v5179_v35 = vsub.f32 %v5034_v9, %v5152_v53  ;;  %v5180_v59 = vsub.f32 %v5035_v20, %v5154_v13  ;;  %v4815_v25 = vpop.permute.xlu1 %4814  ;;  %v4846_v53 = vmul.f32 %v4830_v33, %v12711_v62  ;;  %v12715_v9 = vld [vmem:[#allocation233_spill] sm:$0xff]  ;;  %v12716_v13 = vld [vmem:[#allocation235_spill] sm:$0xff]  ;;  %v5164_v33 = vpop.f32.mrf.mxu0 }
 0x673   :  { %6941 = vset.pattern.permute.xlu1 %v12279_v51  ;;  %v4840_v61 = vmul.f32 %v4815_v25, %v12703_v11  ;;  %v4841_v32 = vmul.f32 %v4815_v25, %v12704_v14  ;;  %v4958_v20 = vmul.f32 %v4942_v6, %v12715_v9  ;;  %v5002_v11 = vpop.permute.xlu0 %5001 }
 0x674   :  { %5195 = vst [vmem:[#allocation8 + $0x250] sm:$0xff] %v5179_v35  ;;  %5196 = vst [vmem:[#allocation8 + $0x258] sm:$0xff] %v5180_v59  ;;  %5735 = vperm.xlu1 %6941, %v12580_v8   ;;  %v12710_v8 = vld [vmem:[#allocation493_spill] sm:$0xff]  ;;  %v4959_v35 = vmul.f32 %v4942_v6, %v12716_v13  ;;  %v5166_v6 = vpop.f32.mrf.mxu0 }
 0x675   :  { %v4904_v24 = vadd.f32 %v4888_v39, %v4840_v61  ;;  %v4905_v1 = vadd.f32 %v4889_v52, %v4841_v32  ;;  %v5017_v17 = vmul.f32 %v4994_v2, %v12710_v8  ;;  %v12722_v8 = vld [vmem:[#allocation345_spill] sm:$0xff] }
 0x677   :  { %v4930_v19 = vpop.permute.xlu1 %4929  ;;  %v5263_v52 = vpop.permute.xlu0 %5262 }
 0x678   :  { %v4952_v18 = vmul.f32 %v4930_v19, %v12707_v46  ;;  %v4953_v7 = vmul.f32 %v4930_v19, %v12708_v45  ;;  %6944 = vset.pattern.permute.xlu1 %v12274_v5  ;;  %v12719_v46 = vld [vmem:[#allocation97_spill] sm:$0xff]  ;;  %v12720_v45 = vld [vmem:[#allocation98_spill] sm:$0xff] }
 0x679   :  { %5667 = vperm.xlu1 %6944, %v12590_v48  }
 0x67a   :  { %v4968_v16 = vadd.f32 %v4952_v18, %v4904_v24  ;;  %v4969_v40 = vadd.f32 %v4953_v7, %v4905_v1 }
 0x67c   :  { %v5032_v29 = vadd.f32 %v5016_v37, %v4968_v16  ;;  %v5033_v38 = vadd.f32 %v5017_v17, %v4969_v40  ;;  %v4878_v56 = vpop.permute.xlu1 %4877  ;;  %v4892_v37 = vmul.f32 %v4874_v47, %v12721_v63  ;;  %v4893_v17 = vmul.f32 %v4874_v47, %v12722_v8  ;;  %v5391_v40 = vpop.permute.xlu0 %5390 }
 0x67d   :  { %v4894_v36 = vmul.f32 %v4878_v56, %v12713_v28  ;;  %v4895_v15 = vmul.f32 %v4878_v56, %v12714_v57  ;;  %6946 = vset.pattern.permute.xlu1 %v12278_v43  ;;  %v12723_v56 = vld [vmem:[#allocation229_spill] sm:$0xff]  ;;  %v12726_v28 = vld [vmem:[#allocation496_spill] sm:$0xff] }
 0x67e   :  { %v5177_v2 = vsub.f32 %v5032_v29, %v11268_v41  ;;  %v5178_v3 = vsub.f32 %v5033_v38, %v11273_v4  ;;  %5795 = vperm.xlu1 %6946, %v12590_v48   ;;  %v12718_v41 = vld [vmem:[#allocation499_spill] sm:$0xff]  ;;  %v12727_v57 = vld [vmem:[#allocation497_spill] sm:$0xff] }
 0x67f   :  { %v4910_v59 = vadd.f32 %v4894_v36, %v4846_v53  ;;  %v4911_v25 = vadd.f32 %v4895_v15, %v4847_v49  ;;  %v12724_v53 = vld [vmem:[#allocation231_spill] sm:$0xff]  ;;  %v5020_v36 = vmul.f32 %v5002_v11, %v12726_v28  ;;  %v12739_v28 = vld [vmem:[#allocation349_spill] sm:$0xff] }
 0x680   :  { %5193 = vst [vmem:[#allocation8 + $0x240] sm:$0xff] %v5177_v2  ;;  %5194 = vst [vmem:[#allocation8 + $0x248] sm:$0xff] %v5178_v3  ;;  %v12725_v49 = vld [vmem:[#allocation535_spill] sm:$0xff]  ;;  %v11329_v3 = vpop.f32.mrf.mxu1  ;;  %v5204_v13 = vpop.permute.xlu0 %5203 }
 0x681   :  { %v5006_v61 = vpop.permute.xlu1 %5005  ;;  %v4974_v14 = vadd.f32 %v4958_v20, %v4910_v59  ;;  %v4975_v32 = vadd.f32 %v4959_v35, %v4911_v25  ;;  %v12728_v25 = vld [vmem:[#allocation103_spill] sm:$0xff] }
 0x682   :  { %v5022_v39 = vmul.f32 %v5006_v61, %v12717_v26  ;;  %v5023_v0 = vmul.f32 %v5006_v61, %v12718_v41  ;;  %6948 = vset.pattern.permute.xlu1 %v12274_v5  ;;  %v12729_v61 = vld [vmem:[#allocation104_spill] sm:$0xff] }
 0x683   :  { %5679 = vperm.xlu1 %6948, %v12601_v27  }
 0x684   :  { %v5038_v48 = vadd.f32 %v5022_v39, %v4974_v14  ;;  %v5039_v4 = vadd.f32 %v5023_v0, %v4975_v32  ;;  %v12730_v32 = vld [vmem:[#allocation350_spill] sm:$0xff]  ;;  %v12731_v39 = vld [vmem:[#allocation351_spill] sm:$0xff] }
 0x685   :  { %v5291_v26 = vmul.f32 %v5263_v52, %v12730_v32  ;;  %v5292_v41 = vmul.f32 %v5263_v52, %v12731_v39 }
 0x686   :  { %v5183_v19 = vsub.f32 %v5038_v48, %v5164_v33  ;;  %v5184_v24 = vsub.f32 %v5039_v4, %v5166_v6  ;;  %v4825_v1 = vpop.permute.xlu1 %4824  ;;  %v12732_v6 = vld [vmem:[#allocation241_spill] sm:$0xff] }
 0x687   :  { %6950 = vset.pattern.permute.xlu1 %v12278_v43  ;;  %v4844_v18 = vmul.f32 %v4825_v1, %v12719_v46  ;;  %v4845_v7 = vmul.f32 %v4825_v1, %v12720_v45  ;;  %v12734_v1 = vld [vmem:[#allocation502_spill] sm:$0xff] }
 0x688   :  { %5199 = vst [vmem:[#allocation8 + $0x270] sm:$0xff] %v5183_v19  ;;  %5200 = vst [vmem:[#allocation8 + $0x278] sm:$0xff] %v5184_v24  ;;  %5807 = vperm.xlu1 %6950, %v12601_v27   ;;  %v5021_v27 = vmul.f32 %v5002_v11, %v12727_v57  ;;  %v5533_v11 = vpop.f32.mrf.mxu1  ;;  %v12733_v19 = vld [vmem:[#allocation243_spill] sm:$0xff]  ;;  %v5419_v46 = vmul.f32 %v5391_v40, %v12734_v1  ;;  %v12746_v1 = vld [vmem:[#allocation354_spill] sm:$0xff] }
 0x689   :  { %v4908_v29 = vadd.f32 %v4892_v37, %v4844_v18  ;;  %v4909_v38 = vadd.f32 %v4893_v17, %v4845_v7  ;;  %v12735_v18 = vld [vmem:[#allocation503_spill] sm:$0xff]  ;;  %v5323_v7 = vpop.permute.xlu0 %5322 }
 0x68a   :  { %v5537_v24 = vpop.f32.mrf.mxu1  ;;  %v5420_v45 = vmul.f32 %v5391_v40, %v12735_v18  ;;  %v12740_v40 = vld [vmem:[#allocation237_spill] sm:$0xff]  ;;  %v12747_v18 = vld [vmem:[#allocation355_spill] sm:$0xff] }
 0x68b   :  { %v4938_v16 = vpop.permute.xlu1 %4937 }
 0x68c   :  { %v4956_v62 = vmul.f32 %v4938_v16, %v12723_v56  ;;  %v4957_v44 = vmul.f32 %v4938_v16, %v12724_v53  ;;  %6951 = vset.pattern.permute.xlu1 %v12276_v23  ;;  %v5539_v16 = vpop.f32.mrf.mxu1  ;;  %v12737_v56 = vld [vmem:[#allocation102_spill] sm:$0xff]  ;;  %v12738_v53 = vld [vmem:[#allocation348_spill] sm:$0xff] }
 0x68d   :  { %5622 = vperm.xlu1 %6951, %v12725_v49  }
 0x68e   :  { %v4972_v15 = vadd.f32 %v4956_v62, %v4908_v29  ;;  %v4973_v2 = vadd.f32 %v4957_v44, %v4909_v38  ;;  %v12736_v29 = vld [vmem:[#allocation101_spill] sm:$0xff]  ;;  %v5242_v62 = vmul.f32 %v5204_v13, %v12737_v56 }
 0x68f   :  { %v5241_v38 = vmul.f32 %v5204_v13, %v12736_v29 }
 0x690   :  { %v5036_v47 = vadd.f32 %v5020_v36, %v4972_v15  ;;  %v5037_v9 = vadd.f32 %v5021_v27, %v4973_v2  ;;  %v5209_v20 = vpop.permute.xlu1 %5208  ;;  %v5353_v15 = vmul.f32 %v5323_v7, %v12740_v40  ;;  %v12741_v2 = vld [vmem:[#allocation239_spill] sm:$0xff] }
 0x691   :  { %6952 = vset.pattern.permute.xlu1 %v12274_v5  ;;  %v5243_v33 = vmul.f32 %v5209_v20, %v12728_v25  ;;  %v5244_v14 = vmul.f32 %v5209_v20, %v12729_v61 }
 0x692   :  { %v5181_v35 = vsub.f32 %v5036_v47, %v11296_v12  ;;  %v5182_v59 = vsub.f32 %v5037_v9, %v11301_v34  ;;  %5675 = vperm.xlu1 %6952, %v12725_v49   ;;  %v5354_v47 = vmul.f32 %v5323_v7, %v12741_v2  ;;  %v12748_v7 = vld [vmem:[#allocation249_spill] sm:$0xff] }
 0x693   :  { %v5307_v48 = vadd.f32 %v5291_v26, %v5243_v33  ;;  %v5308_v4 = vadd.f32 %v5292_v41, %v5244_v14  ;;  %v12742_v33 = vld [vmem:[#allocation500_spill] sm:$0xff]  ;;  %v12743_v14 = vld [vmem:[#allocation501_spill] sm:$0xff]  ;;  %v11356_v26 = vpop.f32.mrf.mxu1 }
 0x694   :  { %5197 = vst [vmem:[#allocation8 + $0x260] sm:$0xff] %v5181_v35  ;;  %5198 = vst [vmem:[#allocation8 + $0x268] sm:$0xff] %v5182_v59  ;;  %v5219_v35 = vpop.permute.xlu0 %5218 }
 0x695   :  { %v5327_v0 = vpop.permute.xlu1 %5326 }
 0x696   :  { %v5355_v12 = vmul.f32 %v5327_v0, %v12732_v6  ;;  %v5356_v34 = vmul.f32 %v5327_v0, %v12733_v19  ;;  %6953 = vset.pattern.permute.xlu1 %v12279_v51  ;;  %v11360_v6 = vpop.f32.mrf.mxu1 }
 0x697   :  { %5739 = vperm.xlu1 %6953, %v12725_v49  }
 0x698   :  { %v5371_v52 = vadd.f32 %v5355_v12, %v5307_v48  ;;  %v5372_v63 = vadd.f32 %v5356_v34, %v5308_v4  ;;  %v5335_v41 = vpop.permute.xlu0 %5334  ;;  %v12744_v12 = vld [vmem:[#allocation107_spill] sm:$0xff]  ;;  %v12745_v34 = vld [vmem:[#allocation108_spill] sm:$0xff] }
 0x699   :  { %v5247_v19 = vmul.f32 %v5219_v35, %v12744_v12 }
 0x69a   :  { %v5435_v37 = vadd.f32 %v5419_v46, %v5371_v52  ;;  %v5436_v8 = vadd.f32 %v5420_v45, %v5372_v63  ;;  %v5259_v17 = vpop.permute.xlu1 %5258 }
 0x69b   :  { %v5289_v44 = vmul.f32 %v5259_v17, %v12738_v53  ;;  %v5290_v36 = vmul.f32 %v5259_v17, %v12739_v28  ;;  %6954 = vset.pattern.permute.xlu1 %v12278_v43 }
 0x69c   :  { %v5580_v57 = vsub.f32 %v5435_v37, %v5537_v24  ;;  %v5581_v27 = vsub.f32 %v5436_v8, %v5539_v16  ;;  %5803 = vperm.xlu1 %6954, %v12725_v49   ;;  %v5248_v24 = vmul.f32 %v5219_v35, %v12745_v34  ;;  %v5549_v8 = vpop.f32.mrf.mxu1  ;;  %v5229_v40 = vpop.permute.xlu0 %5228 }
 0x69d   :  { %v5305_v9 = vadd.f32 %v5289_v44, %v5241_v38  ;;  %v5306_v20 = vadd.f32 %v5290_v36, %v5242_v62  ;;  %v12750_v38 = vld [vmem:[#allocation506_spill] sm:$0xff]  ;;  %v12751_v62 = vld [vmem:[#allocation507_spill] sm:$0xff] }
 0x69e   :  { %5596 = vst [vmem:[#allocation8 + $0x290] sm:$0xff] %v5580_v57  ;;  %5597 = vst [vmem:[#allocation8 + $0x298] sm:$0xff] %v5581_v27  ;;  %v5551_v28 = vpop.f32.mrf.mxu1 }
 0x69f   :  { %v5387_v13 = vpop.permute.xlu1 %5386  ;;  %v5369_v59 = vadd.f32 %v5353_v15, %v5305_v9  ;;  %v5370_v25 = vadd.f32 %v5354_v47, %v5306_v20  ;;  %v12752_v47 = vld [vmem:[#allocation352_spill] sm:$0xff]  ;;  %v12753_v20 = vld [vmem:[#allocation353_spill] sm:$0xff] }
 0x6a0   :  { %v5417_v61 = vmul.f32 %v5387_v13, %v12742_v33  ;;  %v5418_v32 = vmul.f32 %v5387_v13, %v12743_v14  ;;  %6956 = vset.pattern.permute.xlu1 %v12274_v5  ;;  %v5343_v2 = vpop.permute.xlu0 %5342  ;;  %v12755_v33 = vld [vmem:[#allocation106_spill] sm:$0xff]  ;;  %v12756_v14 = vld [vmem:[#allocation245_spill] sm:$0xff] }
 0x6a1   :  { %5687 = vperm.xlu1 %6956, %v12610_v42  }
 0x6a2   :  { %v5433_v49 = vadd.f32 %v5417_v61, %v5369_v59  ;;  %v5434_v39 = vadd.f32 %v5418_v32, %v5370_v25  ;;  %v12754_v59 = vld [vmem:[#allocation105_spill] sm:$0xff] }
 0x6a4   :  { %v5578_v0 = vsub.f32 %v5433_v49, %v11329_v3  ;;  %v5579_v48 = vsub.f32 %v5434_v39, %v5533_v11  ;;  %v5271_v4 = vpop.permute.xlu1 %5270  ;;  %v5359_v3 = vmul.f32 %v5335_v41, %v12748_v7  ;;  %v12749_v11 = vld [vmem:[#allocation251_spill] sm:$0xff]  ;;  %v5275_v39 = vpop.permute.xlu0 %5274 }
 0x6a5   :  { %v5295_v46 = vmul.f32 %v5271_v4, %v12746_v1  ;;  %v5296_v45 = vmul.f32 %v5271_v4, %v12747_v18  ;;  %6958 = vset.pattern.permute.xlu1 %v12278_v43  ;;  %v5360_v52 = vmul.f32 %v5335_v41, %v12749_v11 }
 0x6a6   :  { %5594 = vst [vmem:[#allocation8 + $0x280] sm:$0xff] %v5578_v0  ;;  %5595 = vst [vmem:[#allocation8 + $0x288] sm:$0xff] %v5579_v48  ;;  %5815 = vperm.xlu1 %6958, %v12610_v42  }
 0x6a7   :  { %v5311_v63 = vadd.f32 %v5295_v46, %v5247_v19  ;;  %v5312_v37 = vadd.f32 %v5296_v45, %v5248_v24  ;;  %v12758_v19 = vld [vmem:[#allocation504_spill] sm:$0xff]  ;;  %v12759_v24 = vld [vmem:[#allocation505_spill] sm:$0xff]  ;;  %v11389_v46 = vpop.f32.mrf.mxu1 }
 0x6a8   :  { %v5403_v7 = vpop.permute.xlu0 %5402 }
 0x6a9   :  { %v5399_v17 = vpop.permute.xlu1 %5398  ;;  %v5375_v16 = vadd.f32 %v5359_v3, %v5311_v63  ;;  %v5376_v29 = vadd.f32 %v5360_v52, %v5312_v37  ;;  %v11394_v52 = vpop.f32.mrf.mxu1  ;;  %v12760_v63 = vld [vmem:[#allocation111_spill] sm:$0xff] }
 0x6aa   :  { %v5423_v56 = vmul.f32 %v5399_v17, %v12750_v38  ;;  %v5424_v53 = vmul.f32 %v5399_v17, %v12751_v62  ;;  %6959 = vset.pattern.permute.xlu1 %v12276_v23  ;;  %v5251_v37 = vmul.f32 %v5229_v40, %v12760_v63  ;;  %v12763_v38 = vld [vmem:[#allocation359_spill] sm:$0xff] }
 0x6ab   :  { %5632 = vperm.xlu1 %6959, %v12613_v60  }
 0x6ac   :  { %v5439_v44 = vadd.f32 %v5423_v56, %v5375_v16  ;;  %v5440_v42 = vadd.f32 %v5424_v53, %v5376_v29  ;;  %v12762_v16 = vld [vmem:[#allocation358_spill] sm:$0xff] }
 0x6ae   :  { %v5584_v36 = vsub.f32 %v5439_v44, %v5549_v8  ;;  %v5585_v57 = vsub.f32 %v5440_v42, %v5551_v28  ;;  %v5214_v27 = vpop.permute.xlu1 %5213  ;;  %v12761_v8 = vld [vmem:[#allocation112_spill] sm:$0xff]  ;;  %v5561_v28 = vpop.f32.mrf.mxu1 }
 0x6af   :  { %6961 = vset.pattern.permute.xlu1 %v12279_v51  ;;  %v5245_v25 = vmul.f32 %v5214_v27, %v12754_v59  ;;  %v5246_v61 = vmul.f32 %v5214_v27, %v12755_v33  ;;  %v5252_v17 = vmul.f32 %v5229_v40, %v12761_v8  ;;  %v5239_v40 = vpop.permute.xlu0 %5238 }
 0x6b0   :  { %5600 = vst [vmem:[#allocation8 + $0x2b0] sm:$0xff] %v5584_v36  ;;  %5601 = vst [vmem:[#allocation8 + $0x2b8] sm:$0xff] %v5585_v57  ;;  %5747 = vperm.xlu1 %6961, %v12613_v60   ;;  %v12757_v60 = vld [vmem:[#allocation247_spill] sm:$0xff] }
 0x6b3   :  { %v5267_v15 = vpop.permute.xlu1 %5266  ;;  %v5351_v33 = vpop.permute.xlu0 %5350 }
 0x6b4   :  { %6964 = vset.pattern.permute.xlu1 %v12274_v5  ;;  %v5293_v9 = vmul.f32 %v5267_v15, %v12752_v47  ;;  %v5294_v35 = vmul.f32 %v5267_v15, %v12753_v20  ;;  %v12766_v15 = vld [vmem:[#allocation511_spill] sm:$0xff] }
 0x6b5   :  { %5695 = vperm.xlu1 %6964, %v12620_v30  }
 0x6b6   :  { %v5309_v41 = vadd.f32 %v5293_v9, %v5245_v25  ;;  %v5310_v0 = vadd.f32 %v5294_v35, %v5246_v61  ;;  %v12767_v9 = vld [vmem:[#allocation512_spill] sm:$0xff]  ;;  %v12768_v61 = vld [vmem:[#allocation109_spill] sm:$0xff] }
 0x6b7   :  { %v5283_v63 = vpop.permute.xlu0 %5282 }
 0x6b8   :  { %v5331_v13 = vpop.permute.xlu1 %5330 }
 0x6b9   :  { %6966 = vset.pattern.permute.xlu1 %v12278_v43  ;;  %v5357_v32 = vmul.f32 %v5331_v13, %v12756_v14  ;;  %v5358_v49 = vmul.f32 %v5331_v13, %v12757_v60  ;;  %v5563_v13 = vpop.f32.mrf.mxu1 }
 0x6ba   :  { %5823 = vperm.xlu1 %6966, %v12620_v30  }
 0x6bb   :  { %v5373_v4 = vadd.f32 %v5357_v32, %v5309_v41  ;;  %v5374_v12 = vadd.f32 %v5358_v49, %v5310_v0  ;;  %v12769_v32 = vld [vmem:[#allocation110_spill] sm:$0xff]  ;;  %v12770_v49 = vld [vmem:[#allocation356_spill] sm:$0xff]  ;;  %v12771_v0 = vld [vmem:[#allocation357_spill] sm:$0xff] }
 0x6bc   :  { %v5297_v41 = vmul.f32 %v5275_v39, %v12770_v49  ;;  %v12784_v49 = vld [vmem:[#allocation113_spill] sm:$0xff] }
 0x6bd   :  { %v5395_v48 = vpop.permute.xlu1 %5394 }
 0x6be   :  { %v5421_v34 = vmul.f32 %v5395_v48, %v12758_v19  ;;  %v5422_v1 = vmul.f32 %v5395_v48, %v12759_v24  ;;  %6967 = vset.pattern.permute.xlu1 %v12276_v23  ;;  %v5298_v48 = vmul.f32 %v5275_v39, %v12771_v0  ;;  %v12785_v0 = vld [vmem:[#allocation114_spill] sm:$0xff] }
 0x6bf   :  { %5642 = vperm.xlu1 %6967, %v12629_v31  }
 0x6c0   :  { %v5437_v18 = vadd.f32 %v5421_v34, %v5373_v4  ;;  %v5438_v45 = vadd.f32 %v5422_v1, %v5374_v12  ;;  %v12772_v34 = vld [vmem:[#allocation253_spill] sm:$0xff]  ;;  %v12773_v1 = vld [vmem:[#allocation255_spill] sm:$0xff] }
 0x6c2   :  { %v5582_v30 = vsub.f32 %v5437_v18, %v11356_v26  ;;  %v5583_v3 = vsub.f32 %v5438_v45, %v11360_v6  ;;  %v5279_v11 = vpop.permute.xlu1 %5278  ;;  %v12764_v26 = vld [vmem:[#allocation257_spill] sm:$0xff]  ;;  %v12765_v6 = vld [vmem:[#allocation259_spill] sm:$0xff]  ;;  %v11417_v45 = vpop.f32.mrf.mxu1 }
 0x6c3   :  { %v5299_v29 = vmul.f32 %v5279_v11, %v12762_v16  ;;  %v5300_v56 = vmul.f32 %v5279_v11, %v12763_v38  ;;  %6969 = vset.pattern.permute.xlu1 %v12279_v51  ;;  %v5363_v62 = vmul.f32 %v5343_v2, %v12764_v26  ;;  %v5364_v53 = vmul.f32 %v5343_v2, %v12765_v6  ;;  %v12776_v38 = vld [vmem:[#allocation115_spill] sm:$0xff]  ;;  %v12777_v26 = vld [vmem:[#allocation116_spill] sm:$0xff]  ;;  %v12778_v6 = vld [vmem:[#allocation362_spill] sm:$0xff] }
 0x6c4   :  { %5598 = vst [vmem:[#allocation8 + $0x2a0] sm:$0xff] %v5582_v30  ;;  %5599 = vst [vmem:[#allocation8 + $0x2a8] sm:$0xff] %v5583_v3  ;;  %5755 = vperm.xlu1 %6969, %v12629_v31   ;;  %v12774_v30 = vld [vmem:[#allocation508_spill] sm:$0xff] }
 0x6c5   :  { %v5315_v44 = vadd.f32 %v5299_v29, %v5251_v37  ;;  %v5316_v42 = vadd.f32 %v5300_v56, %v5252_v17  ;;  %v5425_v3 = vmul.f32 %v5403_v7, %v12774_v30  ;;  %v11422_v29 = vpop.f32.mrf.mxu1  ;;  %v5255_v56 = vmul.f32 %v5239_v40, %v12776_v38 }
 0x6c7   :  { %v5407_v36 = vpop.permute.xlu1 %5406  ;;  %v5379_v57 = vadd.f32 %v5363_v62, %v5315_v44  ;;  %v5380_v27 = vadd.f32 %v5364_v53, %v5316_v42  ;;  %v5256_v62 = vmul.f32 %v5239_v40, %v12777_v26  ;;  %v12779_v44 = vld [vmem:[#allocation363_spill] sm:$0xff]  ;;  %v5573_v40 = vpop.f32.mrf.mxu1 }
 0x6c8   :  { %v5427_v47 = vmul.f32 %v5407_v36, %v12766_v15  ;;  %v5428_v20 = vmul.f32 %v5407_v36, %v12767_v9  ;;  %6971 = vset.pattern.permute.xlu1 %v12276_v23  ;;  %v12780_v36 = vld [vmem:[#allocation265_spill] sm:$0xff]  ;;  %v11450_v26 = vpop.f32.mrf.mxu0 }
 0x6c9   :  { %6026 = vperm.xlu1 %6971, %v12636_v22  }
 0x6ca   :  { %v5443_v31 = vadd.f32 %v5427_v47, %v5379_v57  ;;  %v5444_v35 = vadd.f32 %v5428_v20, %v5380_v27  ;;  %v5367_v57 = vmul.f32 %v5351_v33, %v12780_v36  ;;  %v12781_v27 = vld [vmem:[#allocation267_spill] sm:$0xff]  ;;  %v5411_v20 = vpop.permute.xlu0 %5410  ;;  %v12794_v36 = vld [vmem:[#allocation120_spill] sm:$0xff] }
 0x6cb   :  { %v5368_v15 = vmul.f32 %v5351_v33, %v12781_v27  ;;  %v5575_v33 = vpop.f32.mrf.mxu1  ;;  %v5942_v27 = vpop.f32.mrf.mxu0 }
 0x6cc   :  { %v5588_v59 = vsub.f32 %v5443_v31, %v5561_v28  ;;  %v5589_v2 = vsub.f32 %v5444_v35, %v5563_v13  ;;  %v5224_v25 = vpop.permute.xlu1 %5223 }
 0x6cd   :  { %6973 = vset.pattern.permute.xlu1 %v12279_v51  ;;  %v5249_v14 = vmul.f32 %v5224_v25, %v12768_v61  ;;  %v5250_v60 = vmul.f32 %v5224_v25, %v12769_v32 }
 0x6ce   :  { %5604 = vst [vmem:[#allocation8 + $0x2d0] sm:$0xff] %v5588_v59  ;;  %5605 = vst [vmem:[#allocation8 + $0x2d8] sm:$0xff] %v5589_v2  ;;  %6144 = vperm.xlu1 %6973, %v12636_v22   ;;  %v12775_v22 = vld [vmem:[#allocation509_spill] sm:$0xff]  ;;  %v12782_v59 = vld [vmem:[#allocation516_spill] sm:$0xff]  ;;  %v5672_v61 = vpop.permute.xlu0 %5671 }
 0x6cf   :  { %v5313_v12 = vadd.f32 %v5297_v41, %v5249_v14  ;;  %v5314_v19 = vadd.f32 %v5298_v48, %v5250_v60  ;;  %v5426_v11 = vmul.f32 %v5403_v7, %v12775_v22 }
 0x6d1   :  { %v5339_v4 = vpop.permute.xlu1 %5338 }
 0x6d2   :  { %v5361_v24 = vmul.f32 %v5339_v4, %v12772_v34  ;;  %v5362_v18 = vmul.f32 %v5339_v4, %v12773_v1  ;;  %6976 = vset.pattern.permute.xlu1 %v12274_v5  ;;  %v12786_v4 = vld [vmem:[#allocation360_spill] sm:$0xff]  ;;  %v5800_v1 = vpop.permute.xlu0 %5799 }
 0x6d3   :  { %6076 = vperm.xlu1 %6976, %v12647_v54  }
 0x6d4   :  { %v5377_v37 = vadd.f32 %v5361_v24, %v5313_v12  ;;  %v5378_v39 = vadd.f32 %v5362_v18, %v5314_v19  ;;  %v5301_v12 = vmul.f32 %v5283_v63, %v12786_v4  ;;  %v12787_v19 = vld [vmem:[#allocation361_spill] sm:$0xff]  ;;  %v12802_v4 = vld [vmem:[#allocation118_spill] sm:$0xff] }
 0x6d5   :  { %v5302_v34 = vmul.f32 %v5283_v63, %v12787_v19  ;;  %v12803_v19 = vld [vmem:[#allocation364_spill] sm:$0xff] }
 0x6d6   :  { %v5441_v8 = vadd.f32 %v5425_v3, %v5377_v37  ;;  %v5442_v17 = vadd.f32 %v5426_v11, %v5378_v39  ;;  %v5287_v16 = vpop.permute.xlu1 %5286  ;;  %v12788_v3 = vld [vmem:[#allocation261_spill] sm:$0xff]  ;;  %v12789_v11 = vld [vmem:[#allocation263_spill] sm:$0xff]  ;;  %v12790_v39 = vld [vmem:[#allocation484_spill] sm:$0xff] }
 0x6d7   :  { %v5303_v53 = vmul.f32 %v5287_v16, %v12778_v6  ;;  %v5304_v42 = vmul.f32 %v5287_v16, %v12779_v44  ;;  %6978 = vset.pattern.permute.xlu1 %v12278_v43  ;;  %v12792_v16 = vld [vmem:[#allocation514_spill] sm:$0xff] }
 0x6d8   :  { %v5586_v7 = vsub.f32 %v5441_v8, %v11389_v46  ;;  %v5587_v28 = vsub.f32 %v5442_v17, %v11394_v52  ;;  %6204 = vperm.xlu1 %6978, %v12647_v54   ;;  %v12783_v46 = vld [vmem:[#allocation517_spill] sm:$0xff] }
 0x6d9   :  { %v5319_v47 = vadd.f32 %v5303_v53, %v5255_v56  ;;  %v5320_v9 = vadd.f32 %v5304_v42, %v5256_v62  ;;  %v12791_v8 = vld [vmem:[#allocation513_spill] sm:$0xff]  ;;  %v5613_v53 = vpop.permute.xlu0 %5612 }
 0x6da   :  { %5602 = vst [vmem:[#allocation8 + $0x2c0] sm:$0xff] %v5586_v7  ;;  %5603 = vst [vmem:[#allocation8 + $0x2c8] sm:$0xff] %v5587_v28  ;;  %v5429_v17 = vmul.f32 %v5411_v20, %v12791_v8  ;;  %v12793_v7 = vld [vmem:[#allocation119_spill] sm:$0xff] }
 0x6db   :  { %v5415_v31 = vpop.permute.xlu1 %5414  ;;  %v5383_v35 = vadd.f32 %v5367_v57, %v5319_v47  ;;  %v5384_v13 = vadd.f32 %v5368_v15, %v5320_v9  ;;  %v12795_v15 = vld [vmem:[#allocation366_spill] sm:$0xff]  ;;  %v12796_v9 = vld [vmem:[#allocation367_spill] sm:$0xff] }
 0x6dc   :  { %v5431_v2 = vmul.f32 %v5415_v31, %v12782_v59  ;;  %v5432_v25 = vmul.f32 %v5415_v31, %v12783_v46  ;;  %6980 = vset.pattern.permute.xlu1 %v12274_v5  ;;  %v5700_v47 = vmul.f32 %v5672_v61, %v12795_v15  ;;  %v12798_v59 = vld [vmem:[#allocation275_spill] sm:$0xff]  ;;  %v12799_v46 = vld [vmem:[#allocation521_spill] sm:$0xff] }
 0x6dd   :  { %6088 = vperm.xlu1 %6980, %v12654_v58  }
 0x6de   :  { %v5447_v54 = vadd.f32 %v5431_v2, %v5383_v35  ;;  %v5448_v52 = vadd.f32 %v5432_v25, %v5384_v13  ;;  %v12797_v13 = vld [vmem:[#allocation273_spill] sm:$0xff]  ;;  %v5946_v2 = vpop.f32.mrf.mxu0  ;;  %v5828_v25 = vmul.f32 %v5800_v1, %v12799_v46 }
 0x6e0   :  { %v5592_v14 = vsub.f32 %v5447_v54, %v5573_v40  ;;  %v5593_v32 = vsub.f32 %v5448_v52, %v5575_v33  ;;  %v5234_v60 = vpop.permute.xlu1 %5233  ;;  %v12800_v54 = vld [vmem:[#allocation522_spill] sm:$0xff]  ;;  %v5732_v33 = vpop.permute.xlu0 %5731 }
 0x6e1   :  { %6982 = vset.pattern.permute.xlu1 %v12278_v43  ;;  %v5253_v41 = vmul.f32 %v5234_v60, %v12784_v49  ;;  %v5254_v48 = vmul.f32 %v5234_v60, %v12785_v0  ;;  %v5829_v52 = vmul.f32 %v5800_v1, %v12800_v54  ;;  %v12801_v0 = vld [vmem:[#allocation117_spill] sm:$0xff] }
 0x6e2   :  { %5608 = vst [vmem:[#allocation8 + $0x2f0] sm:$0xff] %v5592_v14  ;;  %5609 = vst [vmem:[#allocation8 + $0x2f8] sm:$0xff] %v5593_v32  ;;  %6216 = vperm.xlu1 %6982, %v12654_v58   ;;  %v5430_v58 = vmul.f32 %v5411_v20, %v12792_v16  ;;  %v5701_v20 = vmul.f32 %v5672_v61, %v12796_v9  ;;  %v12805_v1 = vld [vmem:[#allocation269_spill] sm:$0xff] }
 0x6e3   :  { %v5317_v18 = vadd.f32 %v5301_v12, %v5253_v41  ;;  %v5318_v30 = vadd.f32 %v5302_v34, %v5254_v48  ;;  %v5948_v41 = vpop.f32.mrf.mxu0  ;;  %v5650_v48 = vmul.f32 %v5613_v53, %v12801_v0  ;;  %v5651_v12 = vmul.f32 %v5613_v53, %v12802_v4 }
 0x6e4   :  { %v5628_v16 = vpop.permute.xlu0 %5627 }
 0x6e5   :  { %v5347_v24 = vpop.permute.xlu1 %5346 }
 0x6e6   :  { %v5365_v22 = vmul.f32 %v5347_v24, %v12788_v3  ;;  %v5366_v37 = vmul.f32 %v5347_v24, %v12789_v11  ;;  %6983 = vset.pattern.permute.xlu1 %v12276_v23  ;;  %v12804_v24 = vld [vmem:[#allocation365_spill] sm:$0xff]  ;;  %v12806_v11 = vld [vmem:[#allocation271_spill] sm:$0xff] }
 0x6e7   :  { %6031 = vperm.xlu1 %6983, %v12790_v39  }
 0x6e8   :  { %v5381_v38 = vadd.f32 %v5365_v22, %v5317_v18  ;;  %v5382_v56 = vadd.f32 %v5366_v37, %v5318_v30  ;;  %v5762_v22 = vmul.f32 %v5732_v33, %v12805_v1  ;;  %v5763_v37 = vmul.f32 %v5732_v33, %v12806_v11 }
 0x6ea   :  { %v5445_v63 = vadd.f32 %v5429_v17, %v5381_v38  ;;  %v5446_v62 = vadd.f32 %v5430_v58, %v5382_v56  ;;  %v5618_v6 = vpop.permute.xlu1 %5617 }
 0x6eb   :  { %6984 = vset.pattern.permute.xlu1 %v12274_v5  ;;  %v5652_v28 = vmul.f32 %v5618_v6, %v12793_v7  ;;  %v5653_v57 = vmul.f32 %v5618_v6, %v12794_v36  ;;  %v12808_v6 = vld [vmem:[#allocation519_spill] sm:$0xff]  ;;  %v5744_v7 = vpop.permute.xlu0 %5743 }
 0x6ec   :  { %v5590_v44 = vsub.f32 %v5445_v63, %v11417_v45  ;;  %v5591_v42 = vsub.f32 %v5446_v62, %v11422_v29  ;;  %6084 = vperm.xlu1 %6984, %v12790_v39   ;;  %v12807_v63 = vld [vmem:[#allocation518_spill] sm:$0xff] }
 0x6ed   :  { %v5716_v31 = vadd.f32 %v5700_v47, %v5652_v28  ;;  %v5717_v35 = vadd.f32 %v5701_v20, %v5653_v57  ;;  %v12809_v47 = vld [vmem:[#allocation123_spill] sm:$0xff]  ;;  %v12810_v20 = vld [vmem:[#allocation124_spill] sm:$0xff] }
 0x6ee   :  { %5606 = vst [vmem:[#allocation8 + $0x2e0] sm:$0xff] %v5590_v44  ;;  %5607 = vst [vmem:[#allocation8 + $0x2e8] sm:$0xff] %v5591_v42  ;;  %v11477_v44 = vpop.f32.mrf.mxu0  ;;  %v5656_v9 = vmul.f32 %v5628_v16, %v12809_v47 }
 0x6ef   :  { %v5736_v40 = vpop.permute.xlu1 %5735 }
 0x6f0   :  { %v5764_v45 = vmul.f32 %v5736_v40, %v12797_v13  ;;  %v5765_v29 = vmul.f32 %v5736_v40, %v12798_v59  ;;  %6985 = vset.pattern.permute.xlu1 %v12279_v51  ;;  %v11481_v15 = vpop.f32.mrf.mxu0  ;;  %v5657_v40 = vmul.f32 %v5628_v16, %v12810_v20  ;;  %v12812_v13 = vld [vmem:[#allocation371_spill] sm:$0xff]  ;;  %v12813_v59 = vld [vmem:[#allocation281_spill] sm:$0xff] }
 0x6f1   :  { %6148 = vperm.xlu1 %6985, %v12790_v39  }
 0x6f2   :  { %v5780_v61 = vadd.f32 %v5764_v45, %v5716_v31  ;;  %v5781_v14 = vadd.f32 %v5765_v29, %v5717_v35  ;;  %v12811_v31 = vld [vmem:[#allocation370_spill] sm:$0xff] }
 0x6f4   :  { %v5844_v32 = vadd.f32 %v5828_v25, %v5780_v61  ;;  %v5845_v60 = vadd.f32 %v5829_v52, %v5781_v14  ;;  %v5668_v49 = vpop.permute.xlu1 %5667  ;;  %v5958_v25 = vpop.f32.mrf.mxu0  ;;  %v12815_v61 = vld [vmem:[#allocation527_spill] sm:$0xff] }
 0x6f5   :  { %v5698_v34 = vmul.f32 %v5668_v49, %v12803_v19  ;;  %v5699_v18 = vmul.f32 %v5668_v49, %v12804_v24  ;;  %6986 = vset.pattern.permute.xlu1 %v12278_v43  ;;  %v12817_v24 = vld [vmem:[#allocation368_spill] sm:$0xff] }
 0x6f6   :  { %v5989_v30 = vsub.f32 %v5844_v32, %v5946_v2  ;;  %v5990_v3 = vsub.f32 %v5845_v60, %v5948_v41  ;;  %6212 = vperm.xlu1 %6986, %v12790_v39   ;;  %v12816_v32 = vld [vmem:[#allocation529_spill] sm:$0xff]  ;;  %v5960_v41 = vpop.f32.mrf.mxu0 }
 0x6f7   :  { %v5714_v8 = vadd.f32 %v5698_v34, %v5650_v48  ;;  %v5715_v17 = vadd.f32 %v5699_v18, %v5651_v12  ;;  %v5638_v12 = vpop.permute.xlu0 %5637 }
 0x6f8   :  { %6005 = vst [vmem:[#allocation8 + $0x310] sm:$0xff] %v5989_v30  ;;  %6006 = vst [vmem:[#allocation8 + $0x318] sm:$0xff] %v5990_v3  ;;  %v12818_v30 = vld [vmem:[#allocation369_spill] sm:$0xff] }
 0x6f9   :  { %v5796_v58 = vpop.permute.xlu1 %5795  ;;  %v5778_v38 = vadd.f32 %v5762_v22, %v5714_v8  ;;  %v5779_v56 = vadd.f32 %v5763_v37, %v5715_v17  ;;  %v12819_v22 = vld [vmem:[#allocation121_spill] sm:$0xff]  ;;  %v12820_v37 = vld [vmem:[#allocation122_spill] sm:$0xff] }
 0x6fa   :  { %v5826_v62 = vmul.f32 %v5796_v58, %v12807_v63  ;;  %v5827_v53 = vmul.f32 %v5796_v58, %v12808_v6  ;;  %6988 = vset.pattern.permute.xlu1 %v12274_v5  ;;  %v12821_v17 = vld [vmem:[#allocation277_spill] sm:$0xff] }
 0x6fb   :  { %6096 = vperm.xlu1 %6988, %v12664_v55   ;;  %v5752_v34 = vpop.permute.xlu0 %5751 }
 0x6fc   :  { %v5842_v39 = vadd.f32 %v5826_v62, %v5778_v38  ;;  %v5843_v42 = vadd.f32 %v5827_v53, %v5779_v56  ;;  %v12823_v53 = vld [vmem:[#allocation524_spill] sm:$0xff] }
 0x6fe   :  { %v5987_v28 = vsub.f32 %v5842_v39, %v11450_v26  ;;  %v5988_v36 = vsub.f32 %v5843_v42, %v5942_v27  ;;  %v5680_v57 = vpop.permute.xlu1 %5679  ;;  %v5768_v26 = vmul.f32 %v5744_v7, %v12813_v59  ;;  %v12814_v27 = vld [vmem:[#allocation283_spill] sm:$0xff]  ;;  %v12824_v42 = vld [vmem:[#allocation525_spill] sm:$0xff]  ;;  %v12827_v59 = vld [vmem:[#allocation374_spill] sm:$0xff] }
 0x6ff   :  { %v5704_v35 = vmul.f32 %v5680_v57, %v12811_v31  ;;  %v5705_v45 = vmul.f32 %v5680_v57, %v12812_v13  ;;  %6990 = vset.pattern.permute.xlu1 %v12278_v43  ;;  %v5769_v29 = vmul.f32 %v5744_v7, %v12814_v27  ;;  %v11510_v7 = vpop.f32.mrf.mxu0  ;;  %v12825_v31 = vld [vmem:[#allocation127_spill] sm:$0xff]  ;;  %v12826_v13 = vld [vmem:[#allocation128_spill] sm:$0xff] }
 0x700   :  { %6003 = vst [vmem:[#allocation8 + $0x300] sm:$0xff] %v5987_v28  ;;  %6004 = vst [vmem:[#allocation8 + $0x308] sm:$0xff] %v5988_v36  ;;  %6224 = vperm.xlu1 %6990, %v12664_v55  }
 0x701   :  { %v5720_v2 = vadd.f32 %v5704_v35, %v5656_v9  ;;  %v5721_v46 = vadd.f32 %v5705_v45, %v5657_v40  ;;  %v5966_v40 = vpop.f32.mrf.mxu0  ;;  %v5660_v35 = vmul.f32 %v5638_v12, %v12825_v31  ;;  %v5661_v45 = vmul.f32 %v5638_v12, %v12826_v13  ;;  %v12833_v12 = vld [vmem:[#allocation125_spill] sm:$0xff]  ;;  %v12843_v31 = vld [vmem:[#allocation378_spill] sm:$0xff]  ;;  %v12844_v13 = vld [vmem:[#allocation379_spill] sm:$0xff] }
 0x703   :  { %v5808_v54 = vpop.permute.xlu1 %5807  ;;  %v5784_v52 = vadd.f32 %v5768_v26, %v5720_v2  ;;  %v5785_v33 = vadd.f32 %v5769_v29, %v5721_v46  ;;  %v12830_v29 = vld [vmem:[#allocation291_spill] sm:$0xff] }
 0x704   :  { %v5832_v14 = vmul.f32 %v5808_v54, %v12815_v61  ;;  %v5833_v60 = vmul.f32 %v5808_v54, %v12816_v32  ;;  %6991 = vset.pattern.permute.xlu1 %v12276_v23 }
 0x705   :  { %6041 = vperm.xlu1 %6991, %v12675_v50  }
 0x706   :  { %v5848_v49 = vadd.f32 %v5832_v14, %v5784_v52  ;;  %v5849_v55 = vadd.f32 %v5833_v60, %v5785_v33  ;;  %v12831_v14 = vld [vmem:[#allocation536_spill] sm:$0xff]  ;;  %v12832_v60 = vld [vmem:[#allocation538_spill] sm:$0xff] }
 0x708   :  { %v5993_v0 = vsub.f32 %v5848_v49, %v5958_v25  ;;  %v5994_v48 = vsub.f32 %v5849_v55, %v5960_v41  ;;  %v5623_v4 = vpop.permute.xlu1 %5622  ;;  %v5970_v25 = vpop.f32.mrf.mxu0 }
 0x709   :  { %6993 = vset.pattern.permute.xlu1 %v12279_v51  ;;  %v5654_v11 = vmul.f32 %v5623_v4, %v12819_v22  ;;  %v5655_v8 = vmul.f32 %v5623_v4, %v12820_v37 }
 0x70a   :  { %6009 = vst [vmem:[#allocation8 + $0x330] sm:$0xff] %v5993_v0  ;;  %6010 = vst [vmem:[#allocation8 + $0x338] sm:$0xff] %v5994_v48  ;;  %6156 = vperm.xlu1 %6993, %v12675_v50   ;;  %v12822_v50 = vld [vmem:[#allocation279_spill] sm:$0xff]  ;;  %v5972_v41 = vpop.f32.mrf.mxu0 }
 0x70d   :  { %v5676_v19 = vpop.permute.xlu1 %5675 }
 0x70e   :  { %6996 = vset.pattern.permute.xlu1 %v12274_v5  ;;  %v5702_v18 = vmul.f32 %v5676_v19, %v12817_v24  ;;  %v5703_v3 = vmul.f32 %v5676_v19, %v12818_v30  ;;  %v5684_v5 = vpop.permute.xlu0 %5683 }
 0x70f   :  { %6104 = vperm.xlu1 %6996, %v10579_v21  }
 0x710   :  { %v5718_v38 = vadd.f32 %v5702_v18, %v5654_v11  ;;  %v5719_v56 = vadd.f32 %v5703_v3, %v5655_v8  ;;  %v12835_v18 = vld [vmem:[#allocation372_spill] sm:$0xff]  ;;  %v12836_v3 = vld [vmem:[#allocation373_spill] sm:$0xff] }
 0x711   :  { %v5706_v30 = vmul.f32 %v5684_v5, %v12835_v18  ;;  %v12837_v8 = vld [vmem:[#allocation285_spill] sm:$0xff] }
 0x712   :  { %v5740_v1 = vpop.permute.xlu1 %5739  ;;  %v5812_v57 = vpop.permute.xlu0 %5811 }
 0x713   :  { %6998 = vset.pattern.permute.xlu1 %v12276_v23  ;;  %v5766_v16 = vmul.f32 %v5740_v1, %v12821_v17  ;;  %v5767_v58 = vmul.f32 %v5740_v1, %v12822_v50  ;;  %v5707_v1 = vmul.f32 %v5684_v5, %v12836_v3 }
 0x714   :  { %6051 = vperm.xlu1 %6998, %v12686_v10  }
 0x715   :  { %v5782_v62 = vadd.f32 %v5766_v16, %v5718_v38  ;;  %v5783_v6 = vadd.f32 %v5767_v58, %v5719_v56  ;;  %v12838_v16 = vld [vmem:[#allocation287_spill] sm:$0xff]  ;;  %v11531_v58 = vpop.f32.mrf.mxu0 }
 0x716   :  { %v5648_v61 = vpop.permute.xlu0 %5647  ;;  %v12839_v38 = vld [vmem:[#allocation531_spill] sm:$0xff] }
 0x717   :  { %v5804_v63 = vpop.permute.xlu1 %5803  ;;  %v5834_v56 = vmul.f32 %v5812_v57, %v12839_v38  ;;  %v5978_v5 = vpop.f32.mrf.mxu0 }
 0x718   :  { %v5830_v39 = vmul.f32 %v5804_v63, %v12823_v53  ;;  %v5831_v23 = vmul.f32 %v5804_v63, %v12824_v42  ;;  %7000 = vset.pattern.permute.xlu1 %v12279_v51  ;;  %v12828_v51 = vld [vmem:[#allocation375_spill] sm:$0xff]  ;;  %v12840_v63 = vld [vmem:[#allocation533_spill] sm:$0xff] }
 0x719   :  { %6164 = vperm.xlu1 %7000, %v12686_v10   ;;  %v12829_v10 = vld [vmem:[#allocation289_spill] sm:$0xff] }
 0x71a   :  { %v5846_v28 = vadd.f32 %v5830_v39, %v5782_v62  ;;  %v5847_v36 = vadd.f32 %v5831_v23, %v5783_v6  ;;  %v5760_v4 = vpop.permute.xlu0 %5759  ;;  %v5835_v62 = vmul.f32 %v5812_v57, %v12840_v63  ;;  %v6349_v63 = vpop.f32.mrf.mxu1 }
 0x71c   :  { %v5991_v47 = vsub.f32 %v5846_v28, %v11477_v44  ;;  %v5992_v9 = vsub.f32 %v5847_v36, %v11481_v15  ;;  %v5688_v20 = vpop.permute.xlu1 %5687  ;;  %v5772_v44 = vmul.f32 %v5752_v34, %v12829_v10  ;;  %v5773_v15 = vmul.f32 %v5752_v34, %v12830_v29  ;;  %v12834_v34 = vld [vmem:[#allocation126_spill] sm:$0xff]  ;;  %v12841_v36 = vld [vmem:[#allocation131_spill] sm:$0xff] }
 0x71d   :  { %v5708_v26 = vmul.f32 %v5688_v20, %v12827_v59  ;;  %v5709_v27 = vmul.f32 %v5688_v20, %v12828_v51  ;;  %7002 = vset.pattern.permute.xlu1 %v12278_v43  ;;  %v12845_v51 = vld [vmem:[#allocation297_spill] sm:$0xff] }
 0x71e   :  { %6007 = vst [vmem:[#allocation8 + $0x320] sm:$0xff] %v5991_v47  ;;  %6008 = vst [vmem:[#allocation8 + $0x328] sm:$0xff] %v5992_v9  ;;  %6232 = vperm.xlu1 %7002, %v10579_v21   ;;  %v5692_v6 = vpop.permute.xlu0 %5691  ;;  %v5664_v47 = vmul.f32 %v5648_v61, %v12841_v36  ;;  %v12842_v9 = vld [vmem:[#allocation132_spill] sm:$0xff]  ;;  %v5776_v57 = vmul.f32 %v5760_v4, %v12845_v51 }
 0x71f   :  { %v5724_v2 = vadd.f32 %v5708_v26, %v5660_v35  ;;  %v5725_v46 = vadd.f32 %v5709_v27, %v5661_v45  ;;  %v5665_v20 = vmul.f32 %v5648_v61, %v12842_v9  ;;  %v12846_v27 = vld [vmem:[#allocation299_spill] sm:$0xff] }
 0x720   :  { %v5777_v10 = vmul.f32 %v5760_v4, %v12846_v27  ;;  %v12848_v61 = vld [vmem:[#allocation459_spill] sm:$0xff]  ;;  %v12851_v4 = vld [vmem:[#allocation376_spill] sm:$0xff] }
 0x721   :  { %v5816_v54 = vpop.permute.xlu1 %5815  ;;  %v5788_v52 = vadd.f32 %v5772_v44, %v5724_v2  ;;  %v5789_v33 = vadd.f32 %v5773_v15, %v5725_v46  ;;  %v5982_v2 = vpop.f32.mrf.mxu0 }
 0x722   :  { %v5836_v32 = vmul.f32 %v5816_v54, %v12831_v14  ;;  %v5837_v49 = vmul.f32 %v5816_v54, %v12832_v60  ;;  %v5820_v15 = vpop.permute.xlu0 %5819 }
 0x724   :  { %v5852_v43 = vadd.f32 %v5836_v32, %v5788_v52  ;;  %v5853_v55 = vadd.f32 %v5837_v49, %v5789_v33  ;;  %v12847_v52 = vld [vmem:[#allocation457_spill] sm:$0xff] }
 0x726   :  { %v5997_v0 = vsub.f32 %v5852_v43, %v5970_v25  ;;  %v5998_v21 = vsub.f32 %v5853_v55, %v5972_v41  ;;  %v5633_v48 = vpop.permute.xlu1 %5632  ;;  %v6081_v60 = vpop.permute.xlu0 %6080  ;;  %v12849_v41 = vld [vmem:[#allocation129_spill] sm:$0xff] }
 0x727   :  { %v5658_v19 = vmul.f32 %v5633_v48, %v12833_v12  ;;  %v5659_v24 = vmul.f32 %v5633_v48, %v12834_v34  ;;  %v5710_v12 = vmul.f32 %v5692_v6, %v12851_v4 }
 0x728   :  { %6013 = vst [vmem:[#allocation8 + $0x350] sm:$0xff] %v5997_v0  ;;  %6014 = vst [vmem:[#allocation8 + $0x358] sm:$0xff] %v5998_v21  ;;  %v12850_v21 = vld [vmem:[#allocation130_spill] sm:$0xff] }
 0x729   :  { %v5722_v11 = vadd.f32 %v5706_v30, %v5658_v19  ;;  %v5723_v37 = vadd.f32 %v5707_v1, %v5659_v24  ;;  %v12852_v19 = vld [vmem:[#allocation377_spill] sm:$0xff] }
 0x72a   :  { %v5711_v34 = vmul.f32 %v5692_v6, %v12852_v19  ;;  %v6209_v18 = vpop.permute.xlu0 %6208  ;;  %v12853_v1 = vld [vmem:[#allocation293_spill] sm:$0xff] }
 0x72b   :  { %v5748_v22 = vpop.permute.xlu1 %5747 }
 0x72c   :  { %v5770_v17 = vmul.f32 %v5748_v22, %v12837_v8  ;;  %v5771_v50 = vmul.f32 %v5748_v22, %v12838_v16  ;;  %v12855_v8 = vld [vmem:[#allocation453_spill] sm:$0xff]  ;;  %v12856_v16 = vld [vmem:[#allocation455_spill] sm:$0xff] }
 0x72e   :  { %v5786_v53 = vadd.f32 %v5770_v17, %v5722_v11  ;;  %v5787_v39 = vadd.f32 %v5771_v50, %v5723_v37  ;;  %v12854_v11 = vld [vmem:[#allocation295_spill] sm:$0xff]  ;;  %v5838_v17 = vmul.f32 %v5820_v15, %v12855_v8  ;;  %v5839_v50 = vmul.f32 %v5820_v15, %v12856_v16  ;;  %v12864_v15 = vld [vmem:[#allocation540_spill] sm:$0xff] }
 0x730   :  { %v5850_v42 = vadd.f32 %v5834_v56, %v5786_v53  ;;  %v5851_v23 = vadd.f32 %v5835_v62, %v5787_v39  ;;  %v5696_v28 = vpop.permute.xlu1 %5695 }
 0x731   :  { %v5712_v35 = vmul.f32 %v5696_v28, %v12843_v31  ;;  %v5713_v45 = vmul.f32 %v5696_v28, %v12844_v13  ;;  %v12857_v28 = vld [vmem:[#allocation135_spill] sm:$0xff]  ;;  %v12859_v31 = vld [vmem:[#allocation382_spill] sm:$0xff]  ;;  %v12860_v13 = vld [vmem:[#allocation384_spill] sm:$0xff] }
 0x732   :  { %v5995_v59 = vsub.f32 %v5850_v42, %v11510_v7  ;;  %v5996_v26 = vsub.f32 %v5851_v23, %v5966_v40  ;;  %v5984_v40 = vpop.f32.mrf.mxu0  ;;  %v6022_v42 = vpop.permute.xlu0 %6021 }
 0x733   :  { %v5728_v44 = vadd.f32 %v5712_v35, %v5664_v47  ;;  %v5729_v29 = vadd.f32 %v5713_v45, %v5665_v20  ;;  %v12858_v47 = vld [vmem:[#allocation136_spill] sm:$0xff]  ;;  %v6351_v20 = vpop.f32.mrf.mxu1  ;;  %v6109_v35 = vmul.f32 %v6081_v60, %v12859_v31  ;;  %v6110_v45 = vmul.f32 %v6081_v60, %v12860_v13 }
 0x734   :  { %6011 = vst [vmem:[#allocation8 + $0x340] sm:$0xff] %v5995_v59  ;;  %6012 = vst [vmem:[#allocation8 + $0x348] sm:$0xff] %v5996_v26 }
 0x735   :  { %v5824_v46 = vpop.permute.xlu1 %5823  ;;  %v5792_v25 = vadd.f32 %v5776_v57, %v5728_v44  ;;  %v5793_v54 = vadd.f32 %v5777_v10, %v5729_v29  ;;  %v12861_v57 = vld [vmem:[#allocation305_spill] sm:$0xff]  ;;  %v12862_v10 = vld [vmem:[#allocation307_spill] sm:$0xff] }
 0x736   :  { %v5840_v33 = vmul.f32 %v5824_v46, %v12847_v52  ;;  %v5841_v14 = vmul.f32 %v5824_v46, %v12848_v61  ;;  %v6141_v46 = vpop.permute.xlu0 %6140 }
 0x738   :  { %v5856_v32 = vadd.f32 %v5840_v33, %v5792_v25  ;;  %v5857_v7 = vadd.f32 %v5841_v14, %v5793_v54 }
 0x73a   :  { %v6001_v49 = vsub.f32 %v5856_v32, %v5982_v2  ;;  %v6002_v43 = vsub.f32 %v5857_v7, %v5984_v40  ;;  %v5643_v55 = vpop.permute.xlu1 %5642  ;;  %v6238_v2 = vmul.f32 %v6209_v18, %v12864_v15  ;;  %v12865_v32 = vld [vmem:[#allocation133_spill] sm:$0xff]  ;;  %v12866_v40 = vld [vmem:[#allocation134_spill] sm:$0xff] }
 0x73b   :  { %v5662_v0 = vmul.f32 %v5643_v55, %v12849_v41  ;;  %v5663_v48 = vmul.f32 %v5643_v55, %v12850_v21  ;;  %v6059_v7 = vmul.f32 %v6022_v42, %v12865_v32  ;;  %v6060_v60 = vmul.f32 %v6022_v42, %v12866_v40  ;;  %v12868_v55 = vld [vmem:[#allocation381_spill] sm:$0xff]  ;;  %v12873_v42 = vld [vmem:[#allocation139_spill] sm:$0xff] }
 0x73c   :  { %6017 = vst [vmem:[#allocation8 + $0x370] sm:$0xff] %v6001_v49  ;;  %6018 = vst [vmem:[#allocation8 + $0x378] sm:$0xff] %v6002_v43  ;;  %v12867_v49 = vld [vmem:[#allocation380_spill] sm:$0xff]  ;;  %v12882_v32 = vld [vmem:[#allocation387_spill] sm:$0xff] }
 0x73d   :  { %v5726_v30 = vadd.f32 %v5710_v12, %v5662_v0  ;;  %v5727_v3 = vadd.f32 %v5711_v34, %v5663_v48  ;;  %v12869_v48 = vld [vmem:[#allocation301_spill] sm:$0xff]  ;;  %v12870_v12 = vld [vmem:[#allocation303_spill] sm:$0xff] }
 0x73e   :  { %v6171_v4 = vmul.f32 %v6141_v46, %v12869_v48  ;;  %v6172_v19 = vmul.f32 %v6141_v46, %v12870_v12 }
 0x73f   :  { %v5756_v24 = vpop.permute.xlu1 %5755 }
 0x740   :  { %v5774_v22 = vmul.f32 %v5756_v24, %v12853_v1  ;;  %v5775_v37 = vmul.f32 %v5756_v24, %v12854_v11 }
 0x742   :  { %v5790_v38 = vadd.f32 %v5774_v22, %v5726_v30  ;;  %v5791_v56 = vadd.f32 %v5775_v37, %v5727_v3  ;;  %v12871_v22 = vld [vmem:[#allocation469_spill] sm:$0xff]  ;;  %v12872_v37 = vld [vmem:[#allocation510_spill] sm:$0xff] }
 0x744   :  { %v5854_v62 = vadd.f32 %v5838_v17, %v5790_v38  ;;  %v5855_v53 = vadd.f32 %v5839_v50, %v5791_v56  ;;  %v6027_v39 = vpop.permute.xlu1 %6026 }
 0x745   :  { %v6061_v36 = vmul.f32 %v6027_v39, %v12857_v28  ;;  %v6062_v9 = vmul.f32 %v6027_v39, %v12858_v47 }
 0x746   :  { %v5999_v6 = vsub.f32 %v5854_v62, %v11531_v58  ;;  %v6000_v23 = vsub.f32 %v5855_v53, %v5978_v5  ;;  %v6355_v58 = vpop.f32.mrf.mxu1  ;;  %v12863_v5 = vld [vmem:[#allocation539_spill] sm:$0xff] }
 0x747   :  { %v6125_v26 = vadd.f32 %v6109_v35, %v6061_v36  ;;  %v6126_v51 = vadd.f32 %v6110_v45, %v6062_v9  ;;  %v6237_v29 = vmul.f32 %v6209_v18, %v12863_v5  ;;  %v6037_v18 = vpop.permute.xlu0 %6036  ;;  %v12875_v36 = vld [vmem:[#allocation389_spill] sm:$0xff]  ;;  %v12876_v9 = vld [vmem:[#allocation391_spill] sm:$0xff] }
 0x748   :  { %6015 = vst [vmem:[#allocation8 + $0x360] sm:$0xff] %v5999_v6  ;;  %6016 = vst [vmem:[#allocation8 + $0x368] sm:$0xff] %v6000_v23  ;;  %v6357_v14 = vpop.f32.mrf.mxu1  ;;  %v6065_v6 = vmul.f32 %v6037_v18, %v12873_v42  ;;  %v12874_v23 = vld [vmem:[#allocation140_spill] sm:$0xff]  ;;  %v12877_v35 = vld [vmem:[#allocation313_spill] sm:$0xff] }
 0x749   :  { %v6145_v59 = vpop.permute.xlu1 %6144  ;;  %v6066_v28 = vmul.f32 %v6037_v18, %v12874_v23  ;;  %v12878_v45 = vld [vmem:[#allocation315_spill] sm:$0xff] }
 0x74a   :  { %v6173_v27 = vmul.f32 %v6145_v59, %v12861_v57  ;;  %v6174_v44 = vmul.f32 %v6145_v59, %v12862_v10  ;;  %v6361_v17 = vpop.f32.mrf.mxu1  ;;  %v12879_v10 = vld [vmem:[#allocation543_spill] sm:$0xff] }
 0x74b   :  { %v6153_v38 = vpop.permute.xlu0 %6152 }
 0x74c   :  { %v6189_v25 = vadd.f32 %v6173_v27, %v6125_v26  ;;  %v6190_v54 = vadd.f32 %v6174_v44, %v6126_v51  ;;  %v6363_v39 = vpop.f32.mrf.mxu1  ;;  %v6177_v13 = vmul.f32 %v6153_v38, %v12877_v35  ;;  %v6178_v59 = vmul.f32 %v6153_v38, %v12878_v45 }
 0x74e   :  { %v6253_v52 = vadd.f32 %v6237_v29, %v6189_v25  ;;  %v6254_v33 = vadd.f32 %v6238_v2, %v6190_v54  ;;  %v6077_v61 = vpop.permute.xlu1 %6076 }
 0x74f   :  { %v6107_v43 = vmul.f32 %v6077_v61, %v12867_v49  ;;  %v6108_v41 = vmul.f32 %v6077_v61, %v12868_v55  ;;  %v12881_v61 = vld [vmem:[#allocation385_spill] sm:$0xff] }
 0x750   :  { %v6398_v0 = vsub.f32 %v6253_v52, %v6355_v58  ;;  %v6399_v21 = vsub.f32 %v6254_v33, %v6357_v14  ;;  %v12880_v58 = vld [vmem:[#allocation544_spill] sm:$0xff]  ;;  %v6047_v33 = vpop.permute.xlu0 %6046 }
 0x751   :  { %v6123_v34 = vadd.f32 %v6107_v43, %v6059_v7  ;;  %v6124_v24 = vadd.f32 %v6108_v41, %v6060_v60  ;;  %v12883_v60 = vld [vmem:[#allocation137_spill] sm:$0xff]  ;;  %v12884_v43 = vld [vmem:[#allocation138_spill] sm:$0xff] }
 0x752   :  { %6414 = vst [vmem:[#allocation8 + $0x390] sm:$0xff] %v6398_v0  ;;  %6415 = vst [vmem:[#allocation8 + $0x398] sm:$0xff] %v6399_v21  ;;  %v12885_v41 = vld [vmem:[#allocation309_spill] sm:$0xff]  ;;  %v12886_v21 = vld [vmem:[#allocation311_spill] sm:$0xff] }
 0x753   :  { %v6205_v30 = vpop.permute.xlu1 %6204  ;;  %v6187_v3 = vadd.f32 %v6171_v4, %v6123_v34  ;;  %v6188_v1 = vadd.f32 %v6172_v19, %v6124_v24 }
 0x754   :  { %v6235_v11 = vmul.f32 %v6205_v30, %v12871_v22  ;;  %v6236_v8 = vmul.f32 %v6205_v30, %v12872_v37  ;;  %v6161_v4 = vpop.permute.xlu0 %6160  ;;  %v12887_v30 = vld [vmem:[#allocation541_spill] sm:$0xff] }
 0x756   :  { %v6251_v16 = vadd.f32 %v6235_v11, %v6187_v3  ;;  %v6252_v50 = vadd.f32 %v6236_v8, %v6188_v1  ;;  %v12888_v1 = vld [vmem:[#allocation542_spill] sm:$0xff] }
 0x758   :  { %v6396_v56 = vsub.f32 %v6251_v16, %v6349_v63  ;;  %v6397_v62 = vsub.f32 %v6252_v50, %v6351_v20  ;;  %v6089_v53 = vpop.permute.xlu1 %6088  ;;  %v6367_v63 = vpop.f32.mrf.mxu1 }
 0x759   :  { %v6113_v47 = vmul.f32 %v6089_v53, %v12875_v36  ;;  %v6114_v31 = vmul.f32 %v6089_v53, %v12876_v9  ;;  %v6093_v16 = vpop.permute.xlu0 %6092  ;;  %v12889_v53 = vld [vmem:[#allocation143_spill] sm:$0xff] }
 0x75a   :  { %6412 = vst [vmem:[#allocation8 + $0x380] sm:$0xff] %v6396_v56  ;;  %6413 = vst [vmem:[#allocation8 + $0x388] sm:$0xff] %v6397_v62  ;;  %v6369_v2 = vpop.f32.mrf.mxu1  ;;  %v6069_v42 = vmul.f32 %v6047_v33, %v12889_v53  ;;  %v12906_v53 = vld [vmem:[#allocation146_spill] sm:$0xff] }
 0x75b   :  { %v6129_v26 = vadd.f32 %v6113_v47, %v6065_v6  ;;  %v6130_v51 = vadd.f32 %v6114_v31, %v6066_v28  ;;  %v12890_v6 = vld [vmem:[#allocation144_spill] sm:$0xff]  ;;  %v12891_v28 = vld [vmem:[#allocation397_spill] sm:$0xff]  ;;  %v12892_v47 = vld [vmem:[#allocation399_spill] sm:$0xff] }
 0x75c   :  { %v6373_v11 = vpop.f32.mrf.mxu1  ;;  %v6070_v23 = vmul.f32 %v6047_v33, %v12890_v6  ;;  %v12893_v31 = vld [vmem:[#allocation321_spill] sm:$0xff]  ;;  %v12898_v33 = vld [vmem:[#allocation142_spill] sm:$0xff] }
 0x75d   :  { %v6217_v20 = vpop.permute.xlu1 %6216  ;;  %v6193_v57 = vadd.f32 %v6177_v13, %v6129_v26  ;;  %v6194_v27 = vadd.f32 %v6178_v59, %v6130_v51  ;;  %v6181_v35 = vmul.f32 %v6161_v4, %v12893_v31  ;;  %v12894_v13 = vld [vmem:[#allocation323_spill] sm:$0xff]  ;;  %v12907_v6 = vld [vmem:[#allocation405_spill] sm:$0xff] }
 0x75e   :  { %v6241_v44 = vmul.f32 %v6217_v20, %v12879_v10  ;;  %v6242_v5 = vmul.f32 %v6217_v20, %v12880_v58  ;;  %v6375_v62 = vpop.f32.mrf.mxu1  ;;  %v6182_v45 = vmul.f32 %v6161_v4, %v12894_v13  ;;  %v6221_v20 = vpop.permute.xlu0 %6220  ;;  %v12896_v10 = vld [vmem:[#allocation548_spill] sm:$0xff]  ;;  %v12910_v31 = vld [vmem:[#allocation403_spill] sm:$0xff] }
 0x75f   :  { %v12911_v13 = vld [vmem:[#allocation147_spill] sm:$0xff] }
 0x760   :  { %v6257_v29 = vadd.f32 %v6241_v44, %v6193_v57  ;;  %v6258_v15 = vadd.f32 %v6242_v5, %v6194_v27  ;;  %v12895_v57 = vld [vmem:[#allocation547_spill] sm:$0xff] }
 0x762   :  { %v6402_v46 = vsub.f32 %v6257_v29, %v6367_v63  ;;  %v6403_v25 = vsub.f32 %v6258_v15, %v6369_v2  ;;  %v6032_v54 = vpop.permute.xlu1 %6031 }
 0x763   :  { %v6063_v49 = vmul.f32 %v6032_v54, %v12883_v60  ;;  %v6064_v55 = vmul.f32 %v6032_v54, %v12884_v43  ;;  %v12897_v54 = vld [vmem:[#allocation141_spill] sm:$0xff] }
 0x764   :  { %6418 = vst [vmem:[#allocation8 + $0x3b0] sm:$0xff] %v6402_v46  ;;  %6419 = vst [vmem:[#allocation8 + $0x3b8] sm:$0xff] %v6403_v25  ;;  %v6057_v25 = vpop.permute.xlu0 %6056 }
 0x767   :  { %v6085_v52 = vpop.permute.xlu1 %6084 }
 0x768   :  { %v6111_v14 = vmul.f32 %v6085_v52, %v12881_v61  ;;  %v6112_v7 = vmul.f32 %v6085_v52, %v12882_v32 }
 0x76a   :  { %v6127_v12 = vadd.f32 %v6111_v14, %v6063_v49  ;;  %v6128_v19 = vadd.f32 %v6112_v7, %v6064_v55  ;;  %v12899_v14 = vld [vmem:[#allocation393_spill] sm:$0xff]  ;;  %v12900_v7 = vld [vmem:[#allocation395_spill] sm:$0xff] }
 0x76b   :  { %v6115_v32 = vmul.f32 %v6093_v16, %v12899_v14  ;;  %v12901_v55 = vld [vmem:[#allocation317_spill] sm:$0xff] }
 0x76c   :  { %v6149_v40 = vpop.permute.xlu1 %6148 }
 0x76d   :  { %v6175_v0 = vmul.f32 %v6149_v40, %v12885_v41  ;;  %v6176_v48 = vmul.f32 %v6149_v40, %v12886_v21  ;;  %v6116_v40 = vmul.f32 %v6093_v16, %v12900_v7 }
 0x76f   :  { %v6191_v24 = vadd.f32 %v6175_v0, %v6127_v12  ;;  %v6192_v18 = vadd.f32 %v6176_v48, %v6128_v19  ;;  %v12902_v0 = vld [vmem:[#allocation319_spill] sm:$0xff]  ;;  %v12903_v48 = vld [vmem:[#allocation545_spill] sm:$0xff]  ;;  %v12904_v12 = vld [vmem:[#allocation546_spill] sm:$0xff] }
 0x770   :  { %v6243_v4 = vmul.f32 %v6221_v20, %v12903_v48  ;;  %v6244_v19 = vmul.f32 %v6221_v20, %v12904_v12 }
 0x771   :  { %v6213_v34 = vpop.permute.xlu1 %6212 }
 0x772   :  { %v6239_v3 = vmul.f32 %v6213_v34, %v12887_v30  ;;  %v6240_v22 = vmul.f32 %v6213_v34, %v12888_v1  ;;  %v6169_v34 = vpop.permute.xlu0 %6168 }
 0x774   :  { %v6255_v37 = vadd.f32 %v6239_v3, %v6191_v24  ;;  %v6256_v8 = vadd.f32 %v6240_v22, %v6192_v18 }
 0x776   :  { %v6400_v50 = vsub.f32 %v6255_v37, %v6361_v17  ;;  %v6401_v38 = vsub.f32 %v6256_v8, %v6363_v39  ;;  %v6097_v56 = vpop.permute.xlu1 %6096  ;;  %v6379_v17 = vpop.f32.mrf.mxu1 }
 0x777   :  { %v6117_v36 = vmul.f32 %v6097_v56, %v12891_v28  ;;  %v6118_v9 = vmul.f32 %v6097_v56, %v12892_v47  ;;  %v6101_v8 = vpop.permute.xlu0 %6100  ;;  %v12908_v28 = vld [vmem:[#allocation407_spill] sm:$0xff]  ;;  %v12909_v47 = vld [vmem:[#allocation401_spill] sm:$0xff] }
 0x778   :  { %6416 = vst [vmem:[#allocation8 + $0x3a0] sm:$0xff] %v6400_v50  ;;  %6417 = vst [vmem:[#allocation8 + $0x3a8] sm:$0xff] %v6401_v38  ;;  %v6381_v29 = vpop.f32.mrf.mxu1  ;;  %v12905_v38 = vld [vmem:[#allocation145_spill] sm:$0xff] }
 0x779   :  { %v6133_v59 = vadd.f32 %v6117_v36, %v6069_v42  ;;  %v6134_v26 = vadd.f32 %v6118_v9, %v6070_v23  ;;  %v6119_v9 = vmul.f32 %v6101_v8, %v12909_v47 }
 0x77a   :  { %v6385_v50 = vpop.f32.mrf.mxu1 }
 0x77b   :  { %v6225_v39 = vpop.permute.xlu1 %6224  ;;  %v6197_v51 = vadd.f32 %v6181_v35, %v6133_v59  ;;  %v6198_v63 = vadd.f32 %v6182_v45, %v6134_v26  ;;  %v6120_v35 = vmul.f32 %v6101_v8, %v12910_v31  ;;  %v6229_v59 = vpop.permute.xlu0 %6228 }
 0x77c   :  { %v6245_v27 = vmul.f32 %v6225_v39, %v12895_v57  ;;  %v6246_v44 = vmul.f32 %v6225_v39, %v12896_v10  ;;  %v12914_v57 = vld [vmem:[#allocation327_spill] sm:$0xff] }
 0x77e   :  { %v6261_v58 = vadd.f32 %v6245_v27, %v6197_v51  ;;  %v6262_v5 = vadd.f32 %v6246_v44, %v6198_v63  ;;  %v12913_v63 = vld [vmem:[#allocation325_spill] sm:$0xff] }
 0x780   :  { %v6406_v15 = vsub.f32 %v6261_v58, %v6379_v17  ;;  %v6407_v2 = vsub.f32 %v6262_v5, %v6381_v29  ;;  %v6042_v46 = vpop.permute.xlu1 %6041  ;;  %v6387_v17 = vpop.f32.mrf.mxu1  ;;  %v12915_v58 = vld [vmem:[#allocation549_spill] sm:$0xff]  ;;  %v12916_v29 = vld [vmem:[#allocation14_spill] sm:$0xff] }
 0x781   :  { %v6067_v52 = vmul.f32 %v6042_v46, %v12897_v54  ;;  %v6068_v61 = vmul.f32 %v6042_v46, %v12898_v33  ;;  %v6247_v5 = vmul.f32 %v6229_v59, %v12915_v58  ;;  %v12917_v54 = vld [vmem:[#allocation329_spill] sm:$0xff] }
 0x782   :  { %6422 = vst [vmem:[#allocation8 + $0x3d0] sm:$0xff] %v6406_v15  ;;  %6423 = vst [vmem:[#allocation8 + $0x3d8] sm:$0xff] %v6407_v2  ;;  %v6248_v15 = vmul.f32 %v6229_v59, %v12916_v29 }
 0x783   :  { %v6131_v49 = vadd.f32 %v6115_v32, %v6067_v52  ;;  %v6132_v43 = vadd.f32 %v6116_v40, %v6068_v61  ;;  %v6185_v52 = vmul.f32 %v6169_v34, %v12917_v54  ;;  %v6391_v61 = vpop.f32.mrf.mxu1 }
 0x785   :  { %v6157_v60 = vpop.permute.xlu1 %6156  ;;  %v6393_v12 = vpop.f32.mrf.mxu1 }
 0x786   :  { %v6179_v41 = vmul.f32 %v6157_v60, %v12901_v55  ;;  %v6180_v21 = vmul.f32 %v6157_v60, %v12902_v0  ;;  %v12920_v55 = vld [vmem:[#allocation210_spill] sm:$0xff] }
 0x788   :  { %v6195_v24 = vadd.f32 %v6179_v41, %v6131_v49  ;;  %v6196_v18 = vadd.f32 %v6180_v21, %v6132_v43  ;;  %v12919_v49 = vld [vmem:[#allocation208_spill] sm:$0xff] }
 0x78a   :  { %v6259_v30 = vadd.f32 %v6243_v4, %v6195_v24  ;;  %v6260_v3 = vadd.f32 %v6244_v19, %v6196_v18  ;;  %v6105_v1 = vpop.permute.xlu1 %6104 }
 0x78b   :  { %v6121_v23 = vmul.f32 %v6105_v1, %v12907_v6  ;;  %v6122_v36 = vmul.f32 %v6105_v1, %v12908_v28 }
 0x78c   :  { %v6404_v22 = vsub.f32 %v6259_v30, %v6373_v11  ;;  %v6405_v37 = vsub.f32 %v6260_v3, %v6375_v62  ;;  %v6073_v11 = vmul.f32 %v6057_v25, %v12911_v13  ;;  %v12912_v62 = vld [vmem:[#allocation148_spill] sm:$0xff] }
 0x78d   :  { %v6074_v45 = vmul.f32 %v6057_v25, %v12912_v62  ;;  %v12918_v25 = vld [vmem:[#allocation331_spill] sm:$0xff] }
 0x78e   :  { %6420 = vst [vmem:[#allocation8 + $0x3c0] sm:$0xff] %v6404_v22  ;;  %6421 = vst [vmem:[#allocation8 + $0x3c8] sm:$0xff] %v6405_v37  ;;  %v6137_v10 = vadd.f32 %v6121_v23, %v6073_v11  ;;  %v6186_v33 = vmul.f32 %v6169_v34, %v12918_v25 }
 0x78f   :  { %v6052_v16 = vpop.permute.xlu1 %6051  ;;  %v6138_v44 = vadd.f32 %v6122_v36, %v6074_v45 }
 0x790   :  { %v6071_v56 = vmul.f32 %v6052_v16, %v12905_v38  ;;  %v6072_v42 = vmul.f32 %v6052_v16, %v12906_v53  ;;  %v6201_v40 = vadd.f32 %v6185_v52, %v6137_v10 }
 0x791   :  { %v6202_v60 = vadd.f32 %v6186_v33, %v6138_v44 }
 0x792   :  { %v6135_v39 = vadd.f32 %v6119_v9, %v6071_v56  ;;  %v6136_v51 = vadd.f32 %v6120_v35, %v6072_v42 }
 0x794   :  { %v6165_v26 = vpop.permute.xlu1 %6164 }
 0x795   :  { %v6183_v20 = vmul.f32 %v6165_v26, %v12913_v63  ;;  %v6184_v27 = vmul.f32 %v6165_v26, %v12914_v57 }
 0x797   :  { %v6199_v2 = vadd.f32 %v6183_v20, %v6135_v39  ;;  %v6200_v46 = vadd.f32 %v6184_v27, %v6136_v51 }
 0x799   :  { %v6263_v14 = vadd.f32 %v6247_v5, %v6199_v2  ;;  %v6264_v32 = vadd.f32 %v6248_v15, %v6200_v46  ;;  %v6233_v7 = vpop.permute.xlu1 %6232 }
 0x79a   :  { %v6249_v43 = vmul.f32 %v6233_v7, %v12919_v49  ;;  %v6250_v41 = vmul.f32 %v6233_v7, %v12920_v55 }
 0x79b   :  { %v6408_v0 = vsub.f32 %v6263_v14, %v6385_v50  ;;  %v6409_v21 = vsub.f32 %v6264_v32, %v6387_v17 }
 0x79c   :  { %v6265_v48 = vadd.f32 %v6249_v43, %v6201_v40  ;;  %v6266_v4 = vadd.f32 %v6250_v41, %v6202_v60 }
 0x79d   :  { %6424 = vst [vmem:[#allocation8 + $0x3e0] sm:$0xff] %v6408_v0  ;;  %6425 = vst [vmem:[#allocation8 + $0x3e8] sm:$0xff] %v6409_v21 }
 0x79e   :  { %v6410_v19 = vsub.f32 %v6265_v48, %v6391_v61  ;;  %v6411_v34 = vsub.f32 %v6266_v4, %v6393_v12 }
 0x7a0   :  { %6426 = vst [vmem:[#allocation8 + $0x3f0] sm:$0xff] %v6410_v19  ;;  %6427 = vst [vmem:[#allocation8 + $0x3f8] sm:$0xff] %v6411_v34 }
 0x7a1   :  { %7436 = shalt.err (!%p7433_p5)
}
 0x7a2   :  { %s7464_s4 = smov 256   ;;  %s7465_s5 = smov 16  }
 0x7a3   :  { %6439 = dma.vmem_to_hbm [thread:$0]  %s6434_s2, 16384, %s11623_s3, [#allocation4], %s7464_s4, %s7464_s4, %s7465_s5  }
 0x7a4   :  { %7449 = dma.done.wait [#allocation4], 16384  }
 0x7a5   :  { %7450 = vsyncadd [#allocation4], 4294950912 }
 0x7a6   :  { %6443 = vsyncpa [#allocation3], 1 }
 0x7a7   :  { %6444 = vsyncpa [#allocation6], 1 }
 0x7a8   :  { %6445 = vsyncpa [#allocation4], 1 }

</bundles_post_ra>
